<compile_context>
chip_gen: v7x
topology: tpu7x:2x2x1
jax: 0.10.0
libtpu: 0.0.40
codegen_flags: <defaults>
</compile_context>

<pallas_src>
import jax
import jax.numpy as jnp
from jax import lax
from jax.experimental import pallas as pl
from jax.experimental.pallas import tpu as pltpu

EPS = 1e-3       # BatchNorm eps in BasicConv2d
PAD = 3          # padding of the (1,7)/(7,1) convs
C_IN = 160       # Mixed_4a input channels
C_MID = 64       # branch intermediate channels
C_OUT = 96       # per-branch output channels

F_HEAD = 16      # zero front rows in the merged head buffer (>= PAD, mult. of 16)
TAIL = 16        # zero tail rows in the merged head buffer  (>= PAD)


def _round_up(x, m):
    return ((x + m - 1) // m) * m


# ----------------------------------------------------------------------------
# Fused Mixed_4a kernel (one batch element per grid step), flattened layout
# ----------------------------------------------------------------------------
def _make_mixed4a_kernel(H, W):
    Ho = H - 2
    HW = H * W
    HoW = Ho * W                    # full-width output rows (last 2 cols/row are junk)
    TOP = _round_up(PAD * W, 16)    # aligned top zero region of the H-padded buffer
    BOT = PAD * W
    bf16 = jnp.bfloat16

    def kernel(x_ref,                        # (1, HW, 160) bf16
               w_head_ref, b_head_ref,       # (160, 128) bf16 / (1, 128) f32
               w01_ref, b01_ref,             # (576,  96) bf16 / (1,  96) f32
               w11_ref, b11_ref,             # (448,  64) bf16 / (1,  64) f32
               w12_ref, b12_ref,             # (448,  64) bf16 / (1,  64) f32
               w13_ref, b13_ref,             # (576,  96) bf16 / (1,  96) f32
               o_ref,                        # (1, HoW, 192) bf16
               s_head,                       # (F_HEAD + HW + TAIL, 128) bf16
               s_pad2,                       # (TOP + HW + BOT, 64) bf16
               col):                         # (HW, 576) bf16, shared im2col buffer

        def mm_bias_relu(lhs, w_ref, b_ref):
            # single deep-K MXU matmul, f32 accumulation, f32 epilogue
            acc = jnp.dot(lhs, w_ref[...], preferred_element_type=jnp.float32)
            return jnp.maximum(acc + b_ref[0], 0.0)

        # --- zero only the padding borders (few rows), every step -----------
        s_head[0:F_HEAD, :] = jnp.zeros((F_HEAD, 2 * C_MID), bf16)
        s_head[F_HEAD + HW:F_HEAD + HW + TAIL, :] = jnp.zeros((TAIL, 2 * C_MID), bf16)
        s_pad2[0:TOP, :] = jnp.zeros((TOP, C_MID), bf16)
        s_pad2[TOP + HW:TOP + HW + BOT, :] = jnp.zeros((BOT, C_MID), bf16)

        # --- fused branch heads: one 1x1 conv, 160 -> 128 (= 64 | 64) -------
        head = mm_bias_relu(x_ref[0], w_head_ref, b_head_ref)      # (HW, 128) f32
        s_head[F_HEAD:F_HEAD + HW, :] = head.astype(bf16)          # lane-dense store

        # --- branch 0: 3x3 valid conv, 64 -> 96 ------------------------------
        for kh in range(3):
            for kw in range(3):
                idx = kh * 3 + kw
                off = F_HEAD + kh * W + kw
                col[0:HoW, idx * C_MID:(idx + 1) * C_MID] = \
                    s_head[off:off + HoW, 0:C_MID]
        y0 = mm_bias_relu(col[0:HoW, 0:9 * C_MID], w01_ref, b01_ref)   # (HoW, 96)
        o_ref[0, :, 0:C_OUT] = y0.astype(o_ref.dtype)                  # stream out

        # --- branch 1: 1x7 conv, pad 3 along W, 64 -> 64 ---------------------
        # Column index of every flattened row (exact float math; no int div/mod).
        # Taps whose read would wrap across a row boundary are zeroed -> this
        # IS the W zero-padding.
        r = lax.broadcasted_iota(jnp.int32, (HW, C_MID), 0).astype(jnp.float32)
        q = jnp.floor((r + 0.5) * (1.0 / W))
        wcol = r - q * W                                            # exact column idx
        for kw in range(7):
            off = F_HEAD - PAD + kw
            tap = s_head[off:off + HW, C_MID:2 * C_MID]
            if kw < PAD:
                tap = jnp.where(wcol >= (PAD - kw), tap, 0)
            elif kw > PAD:
                tap = jnp.where(wcol < (W + PAD - kw), tap, 0)
            col[0:HW, kw * C_MID:(kw + 1) * C_MID] = tap
        t = mm_bias_relu(col[0:HW, 0:7 * C_MID], w11_ref, b11_ref)     # (HW, 64)
        s_pad2[TOP:TOP + HW, :] = t.astype(bf16)

        # --- branch 1: 7x1 conv, pad 3 along H (zero border rows), 64 -> 64 --
        base = TOP - PAD * W
        for kh in range(7):
            off = base + kh * W
            col[0:HW, kh * C_MID:(kh + 1) * C_MID] = s_pad2[off:off + HW, :]
        t = mm_bias_relu(col[0:HW, 0:7 * C_MID], w12_ref, b12_ref)     # (HW, 64)
        s_head[F_HEAD:F_HEAD + HW, 0:C_MID] = t.astype(bf16)           # reuse buffer

        # --- branch 1: 3x3 valid conv, 64 -> 96 -------------------------------
        for kh in range(3):
            for kw in range(3):
                idx = kh * 3 + kw
                off = F_HEAD + kh * W + kw
                col[0:HoW, idx * C_MID:(idx + 1) * C_MID] = \
                    s_head[off:off + HoW, 0:C_MID]
        y1 = mm_bias_relu(col[0:HoW, 0:9 * C_MID], w13_ref, b13_ref)   # (HoW, 96)
        o_ref[0, :, C_OUT:2 * C_OUT] = y1.astype(o_ref.dtype)

    return kernel


# ----------------------------------------------------------------------------
# Parameter construction (deterministic, synthetic) + BN folding / weight prep
# ----------------------------------------------------------------------------
def init_basic_conv(key, cin, cout, kh, kw):
    k1, k2, k3, k4, k5 = jax.random.split(key, 5)
    return {
        "w": 0.1 * jax.random.normal(k1, (cout, cin, kh, kw), jnp.float32),  # OIHW
        "gamma": 1.0 + 0.1 * jax.random.normal(k2, (cout,), jnp.float32),
        "beta": 0.1 * jax.random.normal(k3, (cout,), jnp.float32),
        "mean": 0.1 * jax.random.normal(k4, (cout,), jnp.float32),
        "var": jax.random.uniform(k5, (cout,), jnp.float32, 0.5, 1.5),
    }


def init_mixed_4a(key):
    ks = jax.random.split(key, 6)
    return {
        "b0_0": init_basic_conv(ks[0], 160, 64, 1, 1),
        "b0_1": init_basic_conv(ks[1], 64, 96, 3, 3),
        "b1_0": init_basic_conv(ks[2], 160, 64, 1, 1),
        "b1_1": init_basic_conv(ks[3], 64, 64, 1, 7),
        "b1_2": init_basic_conv(ks[4], 64, 64, 7, 1),
        "b1_3": init_basic_conv(ks[5], 64, 96, 3, 3),
    }


def _fold_bn(p):
    scale = p["gamma"] / jnp.sqrt(p["var"] + EPS)
    bias = p["beta"] - p["mean"] * scale
    return scale, bias


def _prep_conv(p):
    """OIHW weight -> (KH*KW*Cin, Cout) bf16 with BN scale folded in, plus
    the folded (1, Cout) f32 bias."""
    scale, bias = _fold_bn(p)
    w_hwio = jnp.transpose(p["w"], (2, 3, 1, 0)) * scale        # scale per Cout
    kh, kw, cin, cout = w_hwio.shape
    w2d = w_hwio.reshape(kh * kw * cin, cout).astype(jnp.bfloat16)
    return w2d, bias.reshape(1, cout).astype(jnp.float32)


def prepare_mixed_4a(params):
    """One-time weight prep: BN fold, branch-head fusion, im2col weight layout."""
    w00, b00 = _prep_conv(params["b0_0"])       # (160, 64)
    w10, b10 = _prep_conv(params["b1_0"])       # (160, 64)
    prep = {
        "w_head": jnp.concatenate([w00, w10], axis=1),          # (160, 128)
        "b_head": jnp.concatenate([b00, b10], axis=1),          # (1, 128)
    }
    for name in ("b0_1", "b1_1", "b1_2", "b1_3"):
        w, b = _prep_conv(params[name])
        prep["w_" + name] = w
        prep["b_" + name] = b
    return prep


# ----------------------------------------------------------------------------
# Mixed_4a forward (single fused pallas_call)
# ----------------------------------------------------------------------------
@jax.jit
def mixed_4a_forward(x_nchw, prep):
    N, C, H, W = x_nchw.shape
    assert C == C_IN
    Ho, Wo = H - 2, W - 2
    HW, HoW = H * W, Ho * W
    TOP = _round_up(PAD * W, 16)

    # NCHW -> flattened (N, H*W, C) bf16 once at entry (public interface stays
    # NCHW like PyTorch); bf16 halves the HBM read of the activations.
    x = jnp.transpose(x_nchw, (0, 2, 3, 1)).astype(jnp.bfloat16).reshape(N, HW, C_IN)

    kernel = _make_mixed4a_kernel(H, W)
    const2 = lambda n: (0, 0)

    flops = 2 * N * (HW * C_IN * 2 * C_MID
                     + 2 * HoW * 9 * C_MID * C_OUT
                     + 2 * HW * 7 * C_MID * C_MID)
    bytes_accessed = (x.size * 2 + N * HoW * 2 * C_OUT * 2
                      + sum(int(v.size) * v.dtype.itemsize for v in prep.values()))

    out_flat = pl.pallas_call(
        kernel,
        out_shape=jax.ShapeDtypeStruct((N, HoW, 2 * C_OUT), jnp.bfloat16),
        grid=(N,),
        in_specs=[
            pl.BlockSpec((1, HW, C_IN), lambda n: (n, 0, 0)),
            pl.BlockSpec((C_IN, 2 * C_MID), const2),        # w_head
            pl.BlockSpec((1, 2 * C_MID), const2),           # b_head
            pl.BlockSpec((9 * C_MID, C_OUT), const2),       # w_b0_1
            pl.BlockSpec((1, C_OUT), const2),               # b_b0_1
            pl.BlockSpec((7 * C_MID, C_MID), const2),       # w_b1_1
            pl.BlockSpec((1, C_MID), const2),               # b_b1_1
            pl.BlockSpec((7 * C_MID, C_MID), const2),       # w_b1_2
            pl.BlockSpec((1, C_MID), const2),               # b_b1_2
            pl.BlockSpec((9 * C_MID, C_OUT), const2),       # w_b1_3
            pl.BlockSpec((1, C_OUT), const2),               # b_b1_3
        ],
        out_specs=pl.BlockSpec((1, HoW, 2 * C_OUT), lambda n: (n, 0, 0)),
        scratch_shapes=[
            pltpu.VMEM((F_HEAD + HW + TAIL, 2 * C_MID), jnp.bfloat16),  # s_head
            pltpu.VMEM((TOP + HW + PAD * W, C_MID), jnp.bfloat16),      # s_pad2
            pltpu.VMEM((HW, 9 * C_MID), jnp.bfloat16),                  # shared col
        ],
        compiler_params=pltpu.CompilerParams(
            dimension_semantics=("parallel",),
            vmem_limit_bytes=48 * 1024 * 1024),
        cost_estimate=pl.CostEstimate(flops=flops, transcendentals=0,
                                      bytes_accessed=bytes_accessed),
    )(x, prep["w_head"], prep["b_head"],
      prep["w_b0_1"], prep["b_b0_1"],
      prep["w_b1_1"], prep["b_b1_1"],
      prep["w_b1_2"], prep["b_b1_2"],
      prep["w_b1_3"], prep["b_b1_3"])

    # Drop the 2 junk columns per output row (valid 3x3 conv), back to NCHW,
    # upcast to f32 once at the module boundary.
    out = out_flat.reshape(N, Ho, W, 2 * C_OUT)[:, :, :Wo, :]
    return jnp.transpose(out, (0, 3, 1, 2)).astype(jnp.float32)


# ----------------------------------------------------------------------------
# Plain-JAX reference (mirrors the PyTorch module in eval mode, f32)
# ----------------------------------------------------------------------------
def ref_basic_conv(x_nchw, p, padding):
    y = jax.lax.conv_general_dilated(
        x_nchw, p["w"], window_strides=(1, 1),
        padding=((padding[0], padding[0]), (padding[1], padding[1])),
        dimension_numbers=("NCHW", "OIHW", "NCHW"))
    scale, bias = _fold_bn(p)
    y = y * scale[None, :, None, None] + bias[None, :, None, None]
    return jnp.maximum(y, 0.0)


def ref_mixed_4a(x_nchw, params):
    b0 = ref_basic_conv(x_nchw, params["b0_0"], (0, 0))
    b0 = ref_basic_conv(b0, params["b0_1"], (0, 0))
    b1 = ref_basic_conv(x_nchw, params["b1_0"], (0, 0))
    b1 = ref_basic_conv(b1, params["b1_1"], (0, 3))
    b1 = ref_basic_conv(b1, params["b1_2"], (3, 0))
    b1 = ref_basic_conv(b1, params["b1_3"], (0, 0))
    return jnp.concatenate([b0, b1], axis=1)


if __name__ == "__main__":
    key = jax.random.PRNGKey(0)
    kx, kp = jax.random.split(key)

    # 160 input channels are required by the branch-head 1x1 convs.
    x = jax.random.normal(kx, (2, 160, 16, 16), jnp.float32)
    params = init_mixed_4a(kp)
    prep = prepare_mixed_4a(params)

    out = jax.block_until_ready(mixed_4a_forward(x, prep))
    assert out.shape == (2, 192, 14, 14), out.shape

    ref = jax.block_until_ready(ref_mixed_4a(x, params))
    diff = jnp.abs(out - ref)
    rel_fro = float(jnp.linalg.norm(diff.ravel()) / jnp.linalg.norm(ref.ravel()))
    max_err = float(jnp.max(diff))
    ref_max = float(jnp.max(jnp.abs(ref)))
    # bf16 MXU inputs + bf16 intermediate/output storage with f32 accumulation:
    # expect well under 1% relative error against the f32 reference.
    assert rel_fro < 2e-2, ("relative Frobenius error too large", rel_fro)
    assert max_err < 5e-2 * ref_max, ("max abs error too large", max_err, ref_max)
    print("KERNEL_OK")
</pallas_src>

<mosaic_0001>
module attributes {stable_mosaic.version = 11 : i64} {
  func.func @kernel(%arg0: i32, %arg1: memref<1x256x160xbf16, #tpu.memory_space<vmem>>, %arg2: memref<160x128xbf16, #tpu.memory_space<vmem>>, %arg3: memref<1x128xf32, #tpu.memory_space<vmem>>, %arg4: memref<576x96xbf16, #tpu.memory_space<vmem>>, %arg5: memref<1x96xf32, #tpu.memory_space<vmem>>, %arg6: memref<448x64xbf16, #tpu.memory_space<vmem>>, %arg7: memref<1x64xf32, #tpu.memory_space<vmem>>, %arg8: memref<448x64xbf16, #tpu.memory_space<vmem>>, %arg9: memref<1x64xf32, #tpu.memory_space<vmem>>, %arg10: memref<576x96xbf16, #tpu.memory_space<vmem>>, %arg11: memref<1x96xf32, #tpu.memory_space<vmem>>, %arg12: memref<1x224x192xbf16, #tpu.memory_space<vmem>>, %arg13: memref<288x128xbf16, #tpu.memory_space<vmem>>, %arg14: memref<352x64xbf16, #tpu.memory_space<vmem>>, %arg15: memref<256x576xbf16, #tpu.memory_space<vmem>>) attributes {dimension_semantics = [#tpu.dimension_semantics<parallel>], iteration_bounds = array<i64: 2>, scalar_prefetch = 0 : i64, scratch_operands = 3 : i64, tpu.core_type = #tpu.core_type<tc>, window_params = [{transform_indices = @transform_0, window_bounds = array<i64: 1, 256, 160>}, {pipeline_mode = #tpu.pipeline_mode<synchronous>, transform_indices = @transform_1, window_bounds = array<i64: 160, 128>}, {pipeline_mode = #tpu.pipeline_mode<synchronous>, transform_indices = @transform_2, window_bounds = array<i64: 1, 128>}, {pipeline_mode = #tpu.pipeline_mode<synchronous>, transform_indices = @transform_3, window_bounds = array<i64: 576, 96>}, {pipeline_mode = #tpu.pipeline_mode<synchronous>, transform_indices = @transform_4, window_bounds = array<i64: 1, 96>}, {pipeline_mode = #tpu.pipeline_mode<synchronous>, transform_indices = @transform_5, window_bounds = array<i64: 448, 64>}, {pipeline_mode = #tpu.pipeline_mode<synchronous>, transform_indices = @transform_6, window_bounds = array<i64: 1, 64>}, {pipeline_mode = #tpu.pipeline_mode<synchronous>, transform_indices = @transform_7, window_bounds = array<i64: 448, 64>}, {pipeline_mode = #tpu.pipeline_mode<synchronous>, transform_indices = @transform_8, window_bounds = array<i64: 1, 64>}, {pipeline_mode = #tpu.pipeline_mode<synchronous>, transform_indices = @transform_9, window_bounds = array<i64: 576, 96>}, {pipeline_mode = #tpu.pipeline_mode<synchronous>, transform_indices = @transform_10, window_bounds = array<i64: 1, 96>}, {transform_indices = @transform_11, window_bounds = array<i64: 1, 224, 192>}]} {
    %cst = arith.constant 0.000000e+00 : bf16
    %0 = vector.broadcast %cst : bf16 to vector<16x128xbf16>
    %c0 = arith.constant 0 : index
    %c0_0 = arith.constant 0 : index
    %1 = vector.load %arg13[%c0, %c0_0] : memref<288x128xbf16, #tpu.memory_space<vmem>>, vector<16x128xbf16>
    tpu.vector_store %arg13[%c0, %c0_0], %0 {strides = array<i32>} : memref<288x128xbf16, #tpu.memory_space<vmem>>, vector<16x128xbf16>,
    %cst_1 = arith.constant 0.000000e+00 : bf16
    %2 = vector.broadcast %cst_1 : bf16 to vector<16x128xbf16>
    %c272 = arith.constant 272 : index
    %c0_2 = arith.constant 0 : index
    %3 = vector.load %arg13[%c272, %c0_2] : memref<288x128xbf16, #tpu.memory_space<vmem>>, vector<16x128xbf16>
    tpu.vector_store %arg13[%c272, %c0_2], %2 {strides = array<i32>} : memref<288x128xbf16, #tpu.memory_space<vmem>>, vector<16x128xbf16>,
    %cst_3 = arith.constant 0.000000e+00 : bf16
    %4 = vector.broadcast %cst_3 : bf16 to vector<48x64xbf16>
    %c0_4 = arith.constant 0 : index
    %c0_5 = arith.constant 0 : index
    %5 = vector.load %arg14[%c0_4, %c0_5] : memref<352x64xbf16, #tpu.memory_space<vmem>>, vector<48x64xbf16>
    tpu.vector_store %arg14[%c0_4, %c0_5], %4 {strides = array<i32>} : memref<352x64xbf16, #tpu.memory_space<vmem>>, vector<48x64xbf16>,
    %cst_6 = arith.constant 0.000000e+00 : bf16
    %6 = vector.broadcast %cst_6 : bf16 to vector<48x64xbf16>
    %c304 = arith.constant 304 : index
    %c0_7 = arith.constant 0 : index
    %7 = vector.load %arg14[%c304, %c0_7] : memref<352x64xbf16, #tpu.memory_space<vmem>>, vector<48x64xbf16>
    tpu.vector_store %arg14[%c304, %c0_7], %6 {strides = array<i32>} : memref<352x64xbf16, #tpu.memory_space<vmem>>, vector<48x64xbf16>,
    %c0_8 = arith.constant 0 : index
    %c0_9 = arith.constant 0 : index
    %c0_10 = arith.constant 0 : index
    %8 = vector.load %arg1[%c0_8, %c0_9, %c0_10] : memref<1x256x160xbf16, #tpu.memory_space<vmem>>, vector<1x256x160xbf16>
    %9 = vector.shape_cast %8 : vector<1x256x160xbf16> to vector<256x160xbf16>
    %c0_11 = arith.constant 0 : index
    %c0_12 = arith.constant 0 : index
    %10 = vector.load %arg2[%c0_11, %c0_12] : memref<160x128xbf16, #tpu.memory_space<vmem>>, vector<160x128xbf16>
    %cst_13 = arith.constant dense<0.000000e+00> : vector<256x128xf32>
    %11 = tpu.matmul %9, %10, %cst_13 {dimension_numbers = #tpu.dot_dimension_numbers<[1], [0], [0], [1], [0, 0, 1, 1], [], []>} : vector<256x160xbf16>, vector<160x128xbf16>, vector<256x128xf32> -> vector<256x128xf32>
    %c0_14 = arith.constant 0 : index
    %c0_15 = arith.constant 0 : index
    %12 = vector.load %arg3[%c0_14, %c0_15] : memref<1x128xf32, #tpu.memory_space<vmem>>, vector<1x128xf32>
    %13 = vector.shape_cast %12 : vector<1x128xf32> to vector<128xf32>
    %14 = vector.shape_cast %13 : vector<128xf32> to vector<1x128xf32>
    %15 = vector.broadcast %14 : vector<1x128xf32> to vector<256x128xf32>
    %16 = arith.addf %11, %15 : vector<256x128xf32>
    %cst_16 = arith.constant 0.000000e+00 : f32
    %17 = vector.broadcast %cst_16 : f32 to vector<256x128xf32>
    %18 = arith.maximumf %16, %17 : vector<256x128xf32>
    %19 = arith.truncf %18 : vector<256x128xf32> to vector<256x128xbf16>
    %c16 = arith.constant 16 : index
    %c0_17 = arith.constant 0 : index
    %20 = vector.load %arg13[%c16, %c0_17] : memref<288x128xbf16, #tpu.memory_space<vmem>>, vector<256x128xbf16>
    tpu.vector_store %arg13[%c16, %c0_17], %19 {strides = array<i32>} : memref<288x128xbf16, #tpu.memory_space<vmem>>, vector<256x128xbf16>,
    %c16_18 = arith.constant 16 : index
    %c0_19 = arith.constant 0 : index
    %21 = vector.load %arg13[%c16_18, %c0_19] : memref<288x128xbf16, #tpu.memory_space<vmem>>, vector<224x64xbf16>
    %c0_20 = arith.constant 0 : index
    %c0_21 = arith.constant 0 : index
    %22 = vector.load %arg15[%c0_20, %c0_21] : memref<256x576xbf16, #tpu.memory_space<vmem>>, vector<224x64xbf16>
    tpu.vector_store %arg15[%c0_20, %c0_21], %21 {strides = array<i32>} : memref<256x576xbf16, #tpu.memory_space<vmem>>, vector<224x64xbf16>,
    %c17 = arith.constant 17 : index
    %c0_22 = arith.constant 0 : index
    %23 = vector.load %arg13[%c17, %c0_22] : memref<288x128xbf16, #tpu.memory_space<vmem>>, vector<224x64xbf16>
    %c0_23 = arith.constant 0 : index
    %c64 = arith.constant 64 : index
    %24 = vector.load %arg15[%c0_23, %c64] : memref<256x576xbf16, #tpu.memory_space<vmem>>, vector<224x64xbf16>
    tpu.vector_store %arg15[%c0_23, %c64], %23 {strides = array<i32>} : memref<256x576xbf16, #tpu.memory_space<vmem>>, vector<224x64xbf16>,
    %c18 = arith.constant 18 : index
    %c0_24 = arith.constant 0 : index
    %25 = vector.load %arg13[%c18, %c0_24] : memref<288x128xbf16, #tpu.memory_space<vmem>>, vector<224x64xbf16>
    %c0_25 = arith.constant 0 : index
    %c128 = arith.constant 128 : index
    %26 = vector.load %arg15[%c0_25, %c128] : memref<256x576xbf16, #tpu.memory_space<vmem>>, vector<224x64xbf16>
    tpu.vector_store %arg15[%c0_25, %c128], %25 {strides = array<i32>} : memref<256x576xbf16, #tpu.memory_space<vmem>>, vector<224x64xbf16>,
    %c32 = arith.constant 32 : index
    %c0_26 = arith.constant 0 : index
    %27 = vector.load %arg13[%c32, %c0_26] : memref<288x128xbf16, #tpu.memory_space<vmem>>, vector<224x64xbf16>
    %c0_27 = arith.constant 0 : index
    %c192 = arith.constant 192 : index
    %28 = vector.load %arg15[%c0_27, %c192] : memref<256x576xbf16, #tpu.memory_space<vmem>>, vector<224x64xbf16>
    tpu.vector_store %arg15[%c0_27, %c192], %27 {strides = array<i32>} : memref<256x576xbf16, #tpu.memory_space<vmem>>, vector<224x64xbf16>,
    %c33 = arith.constant 33 : index
    %c0_28 = arith.constant 0 : index
    %29 = vector.load %arg13[%c33, %c0_28] : memref<288x128xbf16, #tpu.memory_space<vmem>>, vector<224x64xbf16>
    %c0_29 = arith.constant 0 : index
    %c256 = arith.constant 256 : index
    %30 = vector.load %arg15[%c0_29, %c256] : memref<256x576xbf16, #tpu.memory_space<vmem>>, vector<224x64xbf16>
    tpu.vector_store %arg15[%c0_29, %c256], %29 {strides = array<i32>} : memref<256x576xbf16, #tpu.memory_space<vmem>>, vector<224x64xbf16>,
    %c34 = arith.constant 34 : index
    %c0_30 = arith.constant 0 : index
    %31 = vector.load %arg13[%c34, %c0_30] : memref<288x128xbf16, #tpu.memory_space<vmem>>, vector<224x64xbf16>
    %c0_31 = arith.constant 0 : index
    %c320 = arith.constant 320 : index
    %32 = vector.load %arg15[%c0_31, %c320] : memref<256x576xbf16, #tpu.memory_space<vmem>>, vector<224x64xbf16>
    tpu.vector_store %arg15[%c0_31, %c320], %31 {strides = array<i32>} : memref<256x576xbf16, #tpu.memory_space<vmem>>, vector<224x64xbf16>,
    %c48 = arith.constant 48 : index
    %c0_32 = arith.constant 0 : index
    %33 = vector.load %arg13[%c48, %c0_32] : memref<288x128xbf16, #tpu.memory_space<vmem>>, vector<224x64xbf16>
    %c0_33 = arith.constant 0 : index
    %c384 = arith.constant 384 : index
    %34 = vector.load %arg15[%c0_33, %c384] : memref<256x576xbf16, #tpu.memory_space<vmem>>, vector<224x64xbf16>
    tpu.vector_store %arg15[%c0_33, %c384], %33 {strides = array<i32>} : memref<256x576xbf16, #tpu.memory_space<vmem>>, vector<224x64xbf16>,
    %c49 = arith.constant 49 : index
    %c0_34 = arith.constant 0 : index
    %35 = vector.load %arg13[%c49, %c0_34] : memref<288x128xbf16, #tpu.memory_space<vmem>>, vector<224x64xbf16>
    %c0_35 = arith.constant 0 : index
    %c448 = arith.constant 448 : index
    %36 = vector.load %arg15[%c0_35, %c448] : memref<256x576xbf16, #tpu.memory_space<vmem>>, vector<224x64xbf16>
    tpu.vector_store %arg15[%c0_35, %c448], %35 {strides = array<i32>} : memref<256x576xbf16, #tpu.memory_space<vmem>>, vector<224x64xbf16>,
    %c50 = arith.constant 50 : index
    %c0_36 = arith.constant 0 : index
    %37 = vector.load %arg13[%c50, %c0_36] : memref<288x128xbf16, #tpu.memory_space<vmem>>, vector<224x64xbf16>
    %c0_37 = arith.constant 0 : index
    %c512 = arith.constant 512 : index
    %38 = vector.load %arg15[%c0_37, %c512] : memref<256x576xbf16, #tpu.memory_space<vmem>>, vector<224x64xbf16>
    tpu.vector_store %arg15[%c0_37, %c512], %37 {strides = array<i32>} : memref<256x576xbf16, #tpu.memory_space<vmem>>, vector<224x64xbf16>,
    %c0_38 = arith.constant 0 : index
    %c0_39 = arith.constant 0 : index
    %39 = vector.load %arg15[%c0_38, %c0_39] : memref<256x576xbf16, #tpu.memory_space<vmem>>, vector<224x576xbf16>
    %c0_40 = arith.constant 0 : index
    %c0_41 = arith.constant 0 : index
    %40 = vector.load %arg4[%c0_40, %c0_41] : memref<576x96xbf16, #tpu.memory_space<vmem>>, vector<576x96xbf16>
    %cst_42 = arith.constant dense<0.000000e+00> : vector<224x96xf32>
    %41 = tpu.matmul %39, %40, %cst_42 {dimension_numbers = #tpu.dot_dimension_numbers<[1], [0], [0], [1], [0, 0, 1, 1], [], []>} : vector<224x576xbf16>, vector<576x96xbf16>, vector<224x96xf32> -> vector<224x96xf32>
    %c0_43 = arith.constant 0 : index
    %c0_44 = arith.constant 0 : index
    %42 = vector.load %arg5[%c0_43, %c0_44] : memref<1x96xf32, #tpu.memory_space<vmem>>, vector<1x96xf32>
    %43 = vector.shape_cast %42 : vector<1x96xf32> to vector<96xf32>
    %44 = vector.shape_cast %43 : vector<96xf32> to vector<1x96xf32>
    %45 = vector.broadcast %44 : vector<1x96xf32> to vector<224x96xf32>
    %46 = arith.addf %41, %45 : vector<224x96xf32>
    %cst_45 = arith.constant 0.000000e+00 : f32
    %47 = vector.broadcast %cst_45 : f32 to vector<224x96xf32>
    %48 = arith.maximumf %46, %47 : vector<224x96xf32>
    %49 = arith.truncf %48 : vector<224x96xf32> to vector<224x96xbf16>
    %c0_46 = arith.constant 0 : index
    %c0_47 = arith.constant 0 : index
    %c0_48 = arith.constant 0 : index
    %50 = vector.load %arg12[%c0_46, %c0_47, %c0_48] : memref<1x224x192xbf16, #tpu.memory_space<vmem>>, vector<1x224x96xbf16>
    %51 = vector.shape_cast %50 : vector<1x224x96xbf16> to vector<224x96xbf16>
    %52 = vector.shape_cast %49 : vector<224x96xbf16> to vector<1x224x96xbf16>
    tpu.vector_store %arg12[%c0_46, %c0_47, %c0_48], %52 {strides = array<i32>} : memref<1x224x192xbf16, #tpu.memory_space<vmem>>, vector<1x224x96xbf16>,
    %53 = tpu.iota {dimensions = array<i32: 0>} : vector<256x64xi32>
    %54 = arith.sitofp %53 : vector<256x64xi32> to vector<256x64xf32>
    %cst_49 = arith.constant 5.000000e-01 : f32
    %55 = vector.broadcast %cst_49 : f32 to vector<256x64xf32>
    %56 = arith.addf %54, %55 : vector<256x64xf32>
    %cst_50 = arith.constant 6.250000e-02 : f32
    %57 = vector.broadcast %cst_50 : f32 to vector<256x64xf32>
    %58 = arith.mulf %56, %57 : vector<256x64xf32>
    %59 = math.floor %58 : vector<256x64xf32>
    %cst_51 = arith.constant 1.600000e+01 : f32
    %60 = vector.broadcast %cst_51 : f32 to vector<256x64xf32>
    %61 = arith.mulf %59, %60 : vector<256x64xf32>
    %62 = arith.subf %54, %61 : vector<256x64xf32>
    %c13 = arith.constant 13 : index
    %c64_52 = arith.constant 64 : index
    %63 = vector.load %arg13[%c13, %c64_52] : memref<288x128xbf16, #tpu.memory_space<vmem>>, vector<256x64xbf16>
    %cst_53 = arith.constant 3.000000e+00 : f32
    %64 = vector.broadcast %cst_53 : f32 to vector<256x64xf32>
    %65 = arith.cmpf oge, %62, %64 : vector<256x64xf32>
    %c0_i32 = arith.constant 0 : i32
    %66 = arith.sitofp %c0_i32 : i32 to bf16
    %67 = vector.broadcast %66 : bf16 to vector<256x64xbf16>
    %68 = arith.select %65, %63, %67 : vector<256x64xi1>, vector<256x64xbf16>
    %c0_54 = arith.constant 0 : index
    %c0_55 = arith.constant 0 : index
    %69 = vector.load %arg15[%c0_54, %c0_55] : memref<256x576xbf16, #tpu.memory_space<vmem>>, vector<256x64xbf16>
    tpu.vector_store %arg15[%c0_54, %c0_55], %68 {strides = array<i32>} : memref<256x576xbf16, #tpu.memory_space<vmem>>, vector<256x64xbf16>,
    %c14 = arith.constant 14 : index
    %c64_56 = arith.constant 64 : index
    %70 = vector.load %arg13[%c14, %c64_56] : memref<288x128xbf16, #tpu.memory_space<vmem>>, vector<256x64xbf16>
    %cst_57 = arith.constant 2.000000e+00 : f32
    %71 = vector.broadcast %cst_57 : f32 to vector<256x64xf32>
    %72 = arith.cmpf oge, %62, %71 : vector<256x64xf32>
    %c0_i32_58 = arith.constant 0 : i32
    %73 = arith.sitofp %c0_i32_58 : i32 to bf16
    %74 = vector.broadcast %73 : bf16 to vector<256x64xbf16>
    %75 = arith.select %72, %70, %74 : vector<256x64xi1>, vector<256x64xbf16>
    %c0_59 = arith.constant 0 : index
    %c64_60 = arith.constant 64 : index
    %76 = vector.load %arg15[%c0_59, %c64_60] : memref<256x576xbf16, #tpu.memory_space<vmem>>, vector<256x64xbf16>
    tpu.vector_store %arg15[%c0_59, %c64_60], %75 {strides = array<i32>} : memref<256x576xbf16, #tpu.memory_space<vmem>>, vector<256x64xbf16>,
    %c15 = arith.constant 15 : index
    %c64_61 = arith.constant 64 : index
    %77 = vector.load %arg13[%c15, %c64_61] : memref<288x128xbf16, #tpu.memory_space<vmem>>, vector<256x64xbf16>
    %cst_62 = arith.constant 1.000000e+00 : f32
    %78 = vector.broadcast %cst_62 : f32 to vector<256x64xf32>
    %79 = arith.cmpf oge, %62, %78 : vector<256x64xf32>
    %c0_i32_63 = arith.constant 0 : i32
    %80 = arith.sitofp %c0_i32_63 : i32 to bf16
    %81 = vector.broadcast %80 : bf16 to vector<256x64xbf16>
    %82 = arith.select %79, %77, %81 : vector<256x64xi1>, vector<256x64xbf16>
    %c0_64 = arith.constant 0 : index
    %c128_65 = arith.constant 128 : index
    %83 = vector.load %arg15[%c0_64, %c128_65] : memref<256x576xbf16, #tpu.memory_space<vmem>>, vector<256x64xbf16>
    tpu.vector_store %arg15[%c0_64, %c128_65], %82 {strides = array<i32>} : memref<256x576xbf16, #tpu.memory_space<vmem>>, vector<256x64xbf16>,
    %c16_66 = arith.constant 16 : index
    %c64_67 = arith.constant 64 : index
    %84 = vector.load %arg13[%c16_66, %c64_67] : memref<288x128xbf16, #tpu.memory_space<vmem>>, vector<256x64xbf16>
    %c0_68 = arith.constant 0 : index
    %c192_69 = arith.constant 192 : index
    %85 = vector.load %arg15[%c0_68, %c192_69] : memref<256x576xbf16, #tpu.memory_space<vmem>>, vector<256x64xbf16>
    tpu.vector_store %arg15[%c0_68, %c192_69], %84 {strides = array<i32>} : memref<256x576xbf16, #tpu.memory_space<vmem>>, vector<256x64xbf16>,
    %c17_70 = arith.constant 17 : index
    %c64_71 = arith.constant 64 : index
    %86 = vector.load %arg13[%c17_70, %c64_71] : memref<288x128xbf16, #tpu.memory_space<vmem>>, vector<256x64xbf16>
    %cst_72 = arith.constant 1.500000e+01 : f32
    %87 = vector.broadcast %cst_72 : f32 to vector<256x64xf32>
    %88 = arith.cmpf olt, %62, %87 : vector<256x64xf32>
    %c0_i32_73 = arith.constant 0 : i32
    %89 = arith.sitofp %c0_i32_73 : i32 to bf16
    %90 = vector.broadcast %89 : bf16 to vector<256x64xbf16>
    %91 = arith.select %88, %86, %90 : vector<256x64xi1>, vector<256x64xbf16>
    %c0_74 = arith.constant 0 : index
    %c256_75 = arith.constant 256 : index
    %92 = vector.load %arg15[%c0_74, %c256_75] : memref<256x576xbf16, #tpu.memory_space<vmem>>, vector<256x64xbf16>
    tpu.vector_store %arg15[%c0_74, %c256_75], %91 {strides = array<i32>} : memref<256x576xbf16, #tpu.memory_space<vmem>>, vector<256x64xbf16>,
    %c18_76 = arith.constant 18 : index
    %c64_77 = arith.constant 64 : index
    %93 = vector.load %arg13[%c18_76, %c64_77] : memref<288x128xbf16, #tpu.memory_space<vmem>>, vector<256x64xbf16>
    %cst_78 = arith.constant 1.400000e+01 : f32
    %94 = vector.broadcast %cst_78 : f32 to vector<256x64xf32>
    %95 = arith.cmpf olt, %62, %94 : vector<256x64xf32>
    %c0_i32_79 = arith.constant 0 : i32
    %96 = arith.sitofp %c0_i32_79 : i32 to bf16
    %97 = vector.broadcast %96 : bf16 to vector<256x64xbf16>
    %98 = arith.select %95, %93, %97 : vector<256x64xi1>, vector<256x64xbf16>
    %c0_80 = arith.constant 0 : index
    %c320_81 = arith.constant 320 : index
    %99 = vector.load %arg15[%c0_80, %c320_81] : memref<256x576xbf16, #tpu.memory_space<vmem>>, vector<256x64xbf16>
    tpu.vector_store %arg15[%c0_80, %c320_81], %98 {strides = array<i32>} : memref<256x576xbf16, #tpu.memory_space<vmem>>, vector<256x64xbf16>,
    %c19 = arith.constant 19 : index
    %c64_82 = arith.constant 64 : index
    %100 = vector.load %arg13[%c19, %c64_82] : memref<288x128xbf16, #tpu.memory_space<vmem>>, vector<256x64xbf16>
    %cst_83 = arith.constant 1.300000e+01 : f32
    %101 = vector.broadcast %cst_83 : f32 to vector<256x64xf32>
    %102 = arith.cmpf olt, %62, %101 : vector<256x64xf32>
    %c0_i32_84 = arith.constant 0 : i32
    %103 = arith.sitofp %c0_i32_84 : i32 to bf16
    %104 = vector.broadcast %103 : bf16 to vector<256x64xbf16>
    %105 = arith.select %102, %100, %104 : vector<256x64xi1>, vector<256x64xbf16>
    %c0_85 = arith.constant 0 : index
    %c384_86 = arith.constant 384 : index
    %106 = vector.load %arg15[%c0_85, %c384_86] : memref<256x576xbf16, #tpu.memory_space<vmem>>, vector<256x64xbf16>
    tpu.vector_store %arg15[%c0_85, %c384_86], %105 {strides = array<i32>} : memref<256x576xbf16, #tpu.memory_space<vmem>>, vector<256x64xbf16>,
    %c0_87 = arith.constant 0 : index
    %c0_88 = arith.constant 0 : index
    %107 = vector.load %arg15[%c0_87, %c0_88] : memref<256x576xbf16, #tpu.memory_space<vmem>>, vector<256x448xbf16>
    %c0_89 = arith.constant 0 : index
    %c0_90 = arith.constant 0 : index
    %108 = vector.load %arg6[%c0_89, %c0_90] : memref<448x64xbf16, #tpu.memory_space<vmem>>, vector<448x64xbf16>
    %cst_91 = arith.constant dense<0.000000e+00> : vector<256x64xf32>
    %109 = tpu.matmul %107, %108, %cst_91 {dimension_numbers = #tpu.dot_dimension_numbers<[1], [0], [0], [1], [0, 0, 1, 1], [], []>} : vector<256x448xbf16>, vector<448x64xbf16>, vector<256x64xf32> -> vector<256x64xf32>
    %c0_92 = arith.constant 0 : index
    %c0_93 = arith.constant 0 : index
    %110 = vector.load %arg7[%c0_92, %c0_93] : memref<1x64xf32, #tpu.memory_space<vmem>>, vector<1x64xf32>
    %111 = vector.shape_cast %110 : vector<1x64xf32> to vector<64xf32>
    %112 = vector.shape_cast %111 : vector<64xf32> to vector<1x64xf32>
    %113 = vector.broadcast %112 : vector<1x64xf32> to vector<256x64xf32>
    %114 = arith.addf %109, %113 : vector<256x64xf32>
    %cst_94 = arith.constant 0.000000e+00 : f32
    %115 = vector.broadcast %cst_94 : f32 to vector<256x64xf32>
    %116 = arith.maximumf %114, %115 : vector<256x64xf32>
    %117 = arith.truncf %116 : vector<256x64xf32> to vector<256x64xbf16>
    %c48_95 = arith.constant 48 : index
    %c0_96 = arith.constant 0 : index
    %118 = vector.load %arg14[%c48_95, %c0_96] : memref<352x64xbf16, #tpu.memory_space<vmem>>, vector<256x64xbf16>
    tpu.vector_store %arg14[%c48_95, %c0_96], %117 {strides = array<i32>} : memref<352x64xbf16, #tpu.memory_space<vmem>>, vector<256x64xbf16>,
    %c0_97 = arith.constant 0 : index
    %c0_98 = arith.constant 0 : index
    %119 = vector.load %arg14[%c0_97, %c0_98] : memref<352x64xbf16, #tpu.memory_space<vmem>>, vector<256x64xbf16>
    %c0_99 = arith.constant 0 : index
    %c0_100 = arith.constant 0 : index
    %120 = vector.load %arg15[%c0_99, %c0_100] : memref<256x576xbf16, #tpu.memory_space<vmem>>, vector<256x64xbf16>
    tpu.vector_store %arg15[%c0_99, %c0_100], %119 {strides = array<i32>} : memref<256x576xbf16, #tpu.memory_space<vmem>>, vector<256x64xbf16>,
    %c16_101 = arith.constant 16 : index
    %c0_102 = arith.constant 0 : index
    %121 = vector.load %arg14[%c16_101, %c0_102] : memref<352x64xbf16, #tpu.memory_space<vmem>>, vector<256x64xbf16>
    %c0_103 = arith.constant 0 : index
    %c64_104 = arith.constant 64 : index
    %122 = vector.load %arg15[%c0_103, %c64_104] : memref<256x576xbf16, #tpu.memory_space<vmem>>, vector<256x64xbf16>
    tpu.vector_store %arg15[%c0_103, %c64_104], %121 {strides = array<i32>} : memref<256x576xbf16, #tpu.memory_space<vmem>>, vector<256x64xbf16>,
    %c32_105 = arith.constant 32 : index
    %c0_106 = arith.constant 0 : index
    %123 = vector.load %arg14[%c32_105, %c0_106] : memref<352x64xbf16, #tpu.memory_space<vmem>>, vector<256x64xbf16>
    %c0_107 = arith.constant 0 : index
    %c128_108 = arith.constant 128 : index
    %124 = vector.load %arg15[%c0_107, %c128_108] : memref<256x576xbf16, #tpu.memory_space<vmem>>, vector<256x64xbf16>
    tpu.vector_store %arg15[%c0_107, %c128_108], %123 {strides = array<i32>} : memref<256x576xbf16, #tpu.memory_space<vmem>>, vector<256x64xbf16>,
    %c48_109 = arith.constant 48 : index
    %c0_110 = arith.constant 0 : index
    %125 = vector.load %arg14[%c48_109, %c0_110] : memref<352x64xbf16, #tpu.memory_space<vmem>>, vector<256x64xbf16>
    %c0_111 = arith.constant 0 : index
    %c192_112 = arith.constant 192 : index
    %126 = vector.load %arg15[%c0_111, %c192_112] : memref<256x576xbf16, #tpu.memory_space<vmem>>, vector<256x64xbf16>
    tpu.vector_store %arg15[%c0_111, %c192_112], %125 {strides = array<i32>} : memref<256x576xbf16, #tpu.memory_space<vmem>>, vector<256x64xbf16>,
    %c64_113 = arith.constant 64 : index
    %c0_114 = arith.constant 0 : index
    %127 = vector.load %arg14[%c64_113, %c0_114] : memref<352x64xbf16, #tpu.memory_space<vmem>>, vector<256x64xbf16>
    %c0_115 = arith.constant 0 : index
    %c256_116 = arith.constant 256 : index
    %128 = vector.load %arg15[%c0_115, %c256_116] : memref<256x576xbf16, #tpu.memory_space<vmem>>, vector<256x64xbf16>
    tpu.vector_store %arg15[%c0_115, %c256_116], %127 {strides = array<i32>} : memref<256x576xbf16, #tpu.memory_space<vmem>>, vector<256x64xbf16>,
    %c80 = arith.constant 80 : index
    %c0_117 = arith.constant 0 : index
    %129 = vector.load %arg14[%c80, %c0_117] : memref<352x64xbf16, #tpu.memory_space<vmem>>, vector<256x64xbf16>
    %c0_118 = arith.constant 0 : index
    %c320_119 = arith.constant 320 : index
    %130 = vector.load %arg15[%c0_118, %c320_119] : memref<256x576xbf16, #tpu.memory_space<vmem>>, vector<256x64xbf16>
    tpu.vector_store %arg15[%c0_118, %c320_119], %129 {strides = array<i32>} : memref<256x576xbf16, #tpu.memory_space<vmem>>, vector<256x64xbf16>,
    %c96 = arith.constant 96 : index
    %c0_120 = arith.constant 0 : index
    %131 = vector.load %arg14[%c96, %c0_120] : memref<352x64xbf16, #tpu.memory_space<vmem>>, vector<256x64xbf16>
    %c0_121 = arith.constant 0 : index
    %c384_122 = arith.constant 384 : index
    %132 = vector.load %arg15[%c0_121, %c384_122] : memref<256x576xbf16, #tpu.memory_space<vmem>>, vector<256x64xbf16>
    tpu.vector_store %arg15[%c0_121, %c384_122], %131 {strides = array<i32>} : memref<256x576xbf16, #tpu.memory_space<vmem>>, vector<256x64xbf16>,
    %c0_123 = arith.constant 0 : index
    %c0_124 = arith.constant 0 : index
    %133 = vector.load %arg15[%c0_123, %c0_124] : memref<256x576xbf16, #tpu.memory_space<vmem>>, vector<256x448xbf16>
    %c0_125 = arith.constant 0 : index
    %c0_126 = arith.constant 0 : index
    %134 = vector.load %arg8[%c0_125, %c0_126] : memref<448x64xbf16, #tpu.memory_space<vmem>>, vector<448x64xbf16>
    %cst_127 = arith.constant dense<0.000000e+00> : vector<256x64xf32>
    %135 = tpu.matmul %133, %134, %cst_127 {dimension_numbers = #tpu.dot_dimension_numbers<[1], [0], [0], [1], [0, 0, 1, 1], [], []>} : vector<256x448xbf16>, vector<448x64xbf16>, vector<256x64xf32> -> vector<256x64xf32>
    %c0_128 = arith.constant 0 : index
    %c0_129 = arith.constant 0 : index
    %136 = vector.load %arg9[%c0_128, %c0_129] : memref<1x64xf32, #tpu.memory_space<vmem>>, vector<1x64xf32>
    %137 = vector.shape_cast %136 : vector<1x64xf32> to vector<64xf32>
    %138 = vector.shape_cast %137 : vector<64xf32> to vector<1x64xf32>
    %139 = vector.broadcast %138 : vector<1x64xf32> to vector<256x64xf32>
    %140 = arith.addf %135, %139 : vector<256x64xf32>
    %cst_130 = arith.constant 0.000000e+00 : f32
    %141 = vector.broadcast %cst_130 : f32 to vector<256x64xf32>
    %142 = arith.maximumf %140, %141 : vector<256x64xf32>
    %143 = arith.truncf %142 : vector<256x64xf32> to vector<256x64xbf16>
    %c16_131 = arith.constant 16 : index
    %c0_132 = arith.constant 0 : index
    %144 = vector.load %arg13[%c16_131, %c0_132] : memref<288x128xbf16, #tpu.memory_space<vmem>>, vector<256x64xbf16>
    tpu.vector_store %arg13[%c16_131, %c0_132], %143 {strides = array<i32>} : memref<288x128xbf16, #tpu.memory_space<vmem>>, vector<256x64xbf16>,
    %c16_133 = arith.constant 16 : index
    %c0_134 = arith.constant 0 : index
    %145 = vector.load %arg13[%c16_133, %c0_134] : memref<288x128xbf16, #tpu.memory_space<vmem>>, vector<224x64xbf16>
    %c0_135 = arith.constant 0 : index
    %c0_136 = arith.constant 0 : index
    %146 = vector.load %arg15[%c0_135, %c0_136] : memref<256x576xbf16, #tpu.memory_space<vmem>>, vector<224x64xbf16>
    tpu.vector_store %arg15[%c0_135, %c0_136], %145 {strides = array<i32>} : memref<256x576xbf16, #tpu.memory_space<vmem>>, vector<224x64xbf16>,
    %c17_137 = arith.constant 17 : index
    %c0_138 = arith.constant 0 : index
    %147 = vector.load %arg13[%c17_137, %c0_138] : memref<288x128xbf16, #tpu.memory_space<vmem>>, vector<224x64xbf16>
    %c0_139 = arith.constant 0 : index
    %c64_140 = arith.constant 64 : index
    %148 = vector.load %arg15[%c0_139, %c64_140] : memref<256x576xbf16, #tpu.memory_space<vmem>>, vector<224x64xbf16>
    tpu.vector_store %arg15[%c0_139, %c64_140], %147 {strides = array<i32>} : memref<256x576xbf16, #tpu.memory_space<vmem>>, vector<224x64xbf16>,
    %c18_141 = arith.constant 18 : index
    %c0_142 = arith.constant 0 : index
    %149 = vector.load %arg13[%c18_141, %c0_142] : memref<288x128xbf16, #tpu.memory_space<vmem>>, vector<224x64xbf16>
    %c0_143 = arith.constant 0 : index
    %c128_144 = arith.constant 128 : index
    %150 = vector.load %arg15[%c0_143, %c128_144] : memref<256x576xbf16, #tpu.memory_space<vmem>>, vector<224x64xbf16>
    tpu.vector_store %arg15[%c0_143, %c128_144], %149 {strides = array<i32>} : memref<256x576xbf16, #tpu.memory_space<vmem>>, vector<224x64xbf16>,
    %c32_145 = arith.constant 32 : index
    %c0_146 = arith.constant 0 : index
    %151 = vector.load %arg13[%c32_145, %c0_146] : memref<288x128xbf16, #tpu.memory_space<vmem>>, vector<224x64xbf16>
    %c0_147 = arith.constant 0 : index
    %c192_148 = arith.constant 192 : index
    %152 = vector.load %arg15[%c0_147, %c192_148] : memref<256x576xbf16, #tpu.memory_space<vmem>>, vector<224x64xbf16>
    tpu.vector_store %arg15[%c0_147, %c192_148], %151 {strides = array<i32>} : memref<256x576xbf16, #tpu.memory_space<vmem>>, vector<224x64xbf16>,
    %c33_149 = arith.constant 33 : index
    %c0_150 = arith.constant 0 : index
    %153 = vector.load %arg13[%c33_149, %c0_150] : memref<288x128xbf16, #tpu.memory_space<vmem>>, vector<224x64xbf16>
    %c0_151 = arith.constant 0 : index
    %c256_152 = arith.constant 256 : index
    %154 = vector.load %arg15[%c0_151, %c256_152] : memref<256x576xbf16, #tpu.memory_space<vmem>>, vector<224x64xbf16>
    tpu.vector_store %arg15[%c0_151, %c256_152], %153 {strides = array<i32>} : memref<256x576xbf16, #tpu.memory_space<vmem>>, vector<224x64xbf16>,
    %c34_153 = arith.constant 34 : index
    %c0_154 = arith.constant 0 : index
    %155 = vector.load %arg13[%c34_153, %c0_154] : memref<288x128xbf16, #tpu.memory_space<vmem>>, vector<224x64xbf16>
    %c0_155 = arith.constant 0 : index
    %c320_156 = arith.constant 320 : index
    %156 = vector.load %arg15[%c0_155, %c320_156] : memref<256x576xbf16, #tpu.memory_space<vmem>>, vector<224x64xbf16>
    tpu.vector_store %arg15[%c0_155, %c320_156], %155 {strides = array<i32>} : memref<256x576xbf16, #tpu.memory_space<vmem>>, vector<224x64xbf16>,
    %c48_157 = arith.constant 48 : index
    %c0_158 = arith.constant 0 : index
    %157 = vector.load %arg13[%c48_157, %c0_158] : memref<288x128xbf16, #tpu.memory_space<vmem>>, vector<224x64xbf16>
    %c0_159 = arith.constant 0 : index
    %c384_160 = arith.constant 384 : index
    %158 = vector.load %arg15[%c0_159, %c384_160] : memref<256x576xbf16, #tpu.memory_space<vmem>>, vector<224x64xbf16>
    tpu.vector_store %arg15[%c0_159, %c384_160], %157 {strides = array<i32>} : memref<256x576xbf16, #tpu.memory_space<vmem>>, vector<224x64xbf16>,
    %c49_161 = arith.constant 49 : index
    %c0_162 = arith.constant 0 : index
    %159 = vector.load %arg13[%c49_161, %c0_162] : memref<288x128xbf16, #tpu.memory_space<vmem>>, vector<224x64xbf16>
    %c0_163 = arith.constant 0 : index
    %c448_164 = arith.constant 448 : index
    %160 = vector.load %arg15[%c0_163, %c448_164] : memref<256x576xbf16, #tpu.memory_space<vmem>>, vector<224x64xbf16>
    tpu.vector_store %arg15[%c0_163, %c448_164], %159 {strides = array<i32>} : memref<256x576xbf16, #tpu.memory_space<vmem>>, vector<224x64xbf16>,
    %c50_165 = arith.constant 50 : index
    %c0_166 = arith.constant 0 : index
    %161 = vector.load %arg13[%c50_165, %c0_166] : memref<288x128xbf16, #tpu.memory_space<vmem>>, vector<224x64xbf16>
    %c0_167 = arith.constant 0 : index
    %c512_168 = arith.constant 512 : index
    %162 = vector.load %arg15[%c0_167, %c512_168] : memref<256x576xbf16, #tpu.memory_space<vmem>>, vector<224x64xbf16>
    tpu.vector_store %arg15[%c0_167, %c512_168], %161 {strides = array<i32>} : memref<256x576xbf16, #tpu.memory_space<vmem>>, vector<224x64xbf16>,
    %c0_169 = arith.constant 0 : index
    %c0_170 = arith.constant 0 : index
    %163 = vector.load %arg15[%c0_169, %c0_170] : memref<256x576xbf16, #tpu.memory_space<vmem>>, vector<224x576xbf16>
    %c0_171 = arith.constant 0 : index
    %c0_172 = arith.constant 0 : index
    %164 = vector.load %arg10[%c0_171, %c0_172] : memref<576x96xbf16, #tpu.memory_space<vmem>>, vector<576x96xbf16>
    %cst_173 = arith.constant dense<0.000000e+00> : vector<224x96xf32>
    %165 = tpu.matmul %163, %164, %cst_173 {dimension_numbers = #tpu.dot_dimension_numbers<[1], [0], [0], [1], [0, 0, 1, 1], [], []>} : vector<224x576xbf16>, vector<576x96xbf16>, vector<224x96xf32> -> vector<224x96xf32>
    %c0_174 = arith.constant 0 : index
    %c0_175 = arith.constant 0 : index
    %166 = vector.load %arg11[%c0_174, %c0_175] : memref<1x96xf32, #tpu.memory_space<vmem>>, vector<1x96xf32>
    %167 = vector.shape_cast %166 : vector<1x96xf32> to vector<96xf32>
    %168 = vector.shape_cast %167 : vector<96xf32> to vector<1x96xf32>
    %169 = vector.broadcast %168 : vector<1x96xf32> to vector<224x96xf32>
    %170 = arith.addf %165, %169 : vector<224x96xf32>
    %cst_176 = arith.constant 0.000000e+00 : f32
    %171 = vector.broadcast %cst_176 : f32 to vector<224x96xf32>
    %172 = arith.maximumf %170, %171 : vector<224x96xf32>
    %173 = arith.truncf %172 : vector<224x96xf32> to vector<224x96xbf16>
    %c0_177 = arith.constant 0 : index
    %c0_178 = arith.constant 0 : index
    %c96_179 = arith.constant 96 : index
    %174 = vector.load %arg12[%c0_177, %c0_178, %c96_179] : memref<1x224x192xbf16, #tpu.memory_space<vmem>>, vector<1x224x96xbf16>
    %175 = vector.shape_cast %174 : vector<1x224x96xbf16> to vector<224x96xbf16>
    %176 = vector.shape_cast %173 : vector<224x96xbf16> to vector<1x224x96xbf16>
    tpu.vector_store %arg12[%c0_177, %c0_178, %c96_179], %176 {strides = array<i32>} : memref<1x224x192xbf16, #tpu.memory_space<vmem>>, vector<1x224x96xbf16>,
    return
  }
  func.func @transform_0(%arg0: i32) -> (i32, i32, i32) {
    %c0_i32 = arith.constant 0 : i32
    %c0_i32_0 = arith.constant 0 : i32
    %c0_i32_1 = arith.constant 0 : i32
    return %arg0, %c0_i32, %c0_i32_0 : i32, i32, i32
  }
  func.func @transform_1(%arg0: i32) -> (i32, i32) {
    %c0_i32 = arith.constant 0 : i32
    %c0_i32_0 = arith.constant 0 : i32
    %c0_i32_1 = arith.constant 0 : i32
    return %c0_i32, %c0_i32_0 : i32, i32
  }
  func.func @transform_2(%arg0: i32) -> (i32, i32) {
    %c0_i32 = arith.constant 0 : i32
    %c0_i32_0 = arith.constant 0 : i32
    %c0_i32_1 = arith.constant 0 : i32
    return %c0_i32, %c0_i32_0 : i32, i32
  }
  func.func @transform_3(%arg0: i32) -> (i32, i32) {
    %c0_i32 = arith.constant 0 : i32
    %c0_i32_0 = arith.constant 0 : i32
    %c0_i32_1 = arith.constant 0 : i32
    return %c0_i32, %c0_i32_0 : i32, i32
  }
  func.func @transform_4(%arg0: i32) -> (i32, i32) {
    %c0_i32 = arith.constant 0 : i32
    %c0_i32_0 = arith.constant 0 : i32
    %c0_i32_1 = arith.constant 0 : i32
    return %c0_i32, %c0_i32_0 : i32, i32
  }
  func.func @transform_5(%arg0: i32) -> (i32, i32) {
    %c0_i32 = arith.constant 0 : i32
    %c0_i32_0 = arith.constant 0 : i32
    %c0_i32_1 = arith.constant 0 : i32
    return %c0_i32, %c0_i32_0 : i32, i32
  }
  func.func @transform_6(%arg0: i32) -> (i32, i32) {
    %c0_i32 = arith.constant 0 : i32
    %c0_i32_0 = arith.constant 0 : i32
    %c0_i32_1 = arith.constant 0 : i32
    return %c0_i32, %c0_i32_0 : i32, i32
  }
  func.func @transform_7(%arg0: i32) -> (i32, i32) {
    %c0_i32 = arith.constant 0 : i32
    %c0_i32_0 = arith.constant 0 : i32
    %c0_i32_1 = arith.constant 0 : i32
    return %c0_i32, %c0_i32_0 : i32, i32
  }
  func.func @transform_8(%arg0: i32) -> (i32, i32) {
    %c0_i32 = arith.constant 0 : i32
    %c0_i32_0 = arith.constant 0 : i32
    %c0_i32_1 = arith.constant 0 : i32
    return %c0_i32, %c0_i32_0 : i32, i32
  }
  func.func @transform_9(%arg0: i32) -> (i32, i32) {
    %c0_i32 = arith.constant 0 : i32
    %c0_i32_0 = arith.constant 0 : i32
    %c0_i32_1 = arith.constant 0 : i32
    return %c0_i32, %c0_i32_0 : i32, i32
  }
  func.func @transform_10(%arg0: i32) -> (i32, i32) {
    %c0_i32 = arith.constant 0 : i32
    %c0_i32_0 = arith.constant 0 : i32
    %c0_i32_1 = arith.constant 0 : i32
    return %c0_i32, %c0_i32_0 : i32, i32
  }
  func.func @transform_11(%arg0: i32) -> (i32, i32, i32) {
    %c0_i32 = arith.constant 0 : i32
    %c0_i32_0 = arith.constant 0 : i32
    %c0_i32_1 = arith.constant 0 : i32
    return %arg0, %c0_i32, %c0_i32_0 : i32, i32, i32
  }
}

</mosaic_0001>

<bundles_post_ra>
// kernel: mixed_4a_forward.1
= control target key start
LH: loop header
LB: loop body
LE: loop exit
PB: predicated region body
PF: predicated region fallthrough
CT: control target
= control target key end

     0   :  { %s11438_s17 = smov 0   ;;  %s18113_s0 = inlined_call_operand.vmem [shape: bf16[2,256,160], index: 0, kind: input, shape index: {}]   ;;  %s18114_s1 = inlined_call_operand.vmem [shape: bf16[160,128], index: 1, kind: input, shape index: {}]   ;;  %s18115_s2 = inlined_call_operand.vmem [shape: f32[1,128], index: 2, kind: input, shape index: {}]   ;;  %s18116_s3 = inlined_call_operand.vmem [shape: bf16[576,96], index: 3, kind: input, shape index: {}]   ;;  %s18117_s4 = inlined_call_operand.vmem [shape: f32[1,96], index: 4, kind: input, shape index: {}]   ;;  %s18118_s5 = inlined_call_operand.vmem [shape: bf16[448,64], index: 5, kind: input, shape index: {}]   ;;  %s18119_s6 = inlined_call_operand.vmem [shape: f32[1,64], index: 6, kind: input, shape index: {}]   ;;  %s18120_s7 = inlined_call_operand.vmem [shape: bf16[448,64], index: 7, kind: input, shape index: {}]   ;;  %s18121_s8 = inlined_call_operand.vmem [shape: f32[1,64], index: 8, kind: input, shape index: {}]   ;;  %s18122_s9 = inlined_call_operand.vmem [shape: bf16[576,96], index: 9, kind: input, shape index: {}]   ;;  %s18123_s10 = inlined_call_operand.vmem [shape: f32[1,96], index: 10, kind: input, shape index: {}]   ;;  %s18124_s11 = inlined_call_operand.vmem [shape: bf16[2,224,192], index: 11, kind: output, shape index: {}]  }
   0x1 LB: > { %s9950_s18 = sadd.s32 4294967295, %s11373_s17   ;;  %p9954_p0 = scmp.ge.s32.totalorder %s11373_s17, 1  ;;  %s11373_s17 = sphi %s11438_s17, %s21_s17  }
   0x2   : > { %p337_p1 = scmp.lt.s32.totalorder %s11373_s17, 3 }
   0x4   : > { %p338_p2 = pnand %p9954_p0, %p337_p1 }
   0x6   : > { %341 = sbr.rel (%p338_p2) target bundleno = 1906 (0x772), region = 64 }
   0xd   : > { %v11172_v0 = vld [vmem:[%s18114_s1] sm:$0xff]   ;;  %v11375_v1 = vmov 0   ;;  %p377_p3 = scmp.lt.s32.totalorder %s9950_s18, 1  ;;  %v11173_v2 = vld [vmem:[%s18114_s1 + $0x8] sm:$0xff]   ;;  %v11174_v3 = vld [vmem:[%s18114_s1 + $0x10] sm:$0xff]   ;;  %vm662_vm0 = vcmask 261120   ;;  %v2912_v32 = vlaneseq }
   0xe   : > { %711 = vmatprep.subr.bf16.mxu0 %v11375_v1  ;;  %390 = vst [vmem:[#allocation2] sm:$0xff] %v11375_v1  ;;  %391 = vst [vmem:[#allocation2 + $0x88] sm:$0xff] %v11375_v1  ;;  %v11175_v4 = vld [vmem:[%s18114_s1 + $0x18] sm:$0xff]   ;;  %v11176_v6 = vld [vmem:[%s18114_s1 + $0x20] sm:$0xff]   ;;  %vm392_vm1 = vcmask 523264   ;;  %s11376_s15 = smov 64  }
   0xf   : > { %712 = vmatpush1.bf16.msra.mxu0 %v11172_v0  ;;  %s18752_s18 = smov (!%p377_p3, %s9950_s18), 1  ;;  %v11177_v7 = vld [vmem:[%s18114_s1 + $0x28] sm:$0xff]   ;;  %v11178_v8 = vld [vmem:[%s18114_s1 + $0x30] sm:$0xff]   ;;  %v11179_v9 = vld [vmem:[%s18114_s1 + $0x38] sm:$0xff]   ;;  %v11527_v33 = vshrl.u32 %v2912_v32, 7  ;;  %393 = vst.msk [vmem:[#allocation3] sm:$0xff] %vm392_vm1, %v11375_v1 }
  0x10   : > { %713 = vmatprep.subr.bf16.mxu0 %v11375_v1  ;;  %s10363_s23 = sshll.u32 %s18752_s18, 8  ;;  %v11180_v10 = vld [vmem:[%s18114_s1 + $0x40] sm:$0xff]   ;;  %v11181_v11 = vld [vmem:[%s18114_s1 + $0x48] sm:$0xff]   ;;  %394 = vst.msk [vmem:[#allocation3 + $0x8] sm:$0xff] %vm392_vm1, %v11375_v1  ;;  %395 = vst.msk [vmem:[#allocation3 + $0x10] sm:$0xff] %vm392_vm1, %v11375_v1  ;;  %s11160_s24 = smul.u32 224, %s18752_s18 }
  0x11   : > { %s11466_s28 = scalar_lea.vmem %s18113_s0, %s10363_s23  ;;  %v2914_v35 = vadd.s32 8, %v11527_v33  ;;  %v2915_v36 = vadd.s32 16, %v11527_v33  ;;  %v2945_v37 = vcvt.s32.f32 %v11527_v33  ;;  %v2916_v40 = vadd.s32 24, %v11527_v33  ;;  %396 = vst.msk [vmem:[#allocation3 + $0x98] sm:$0xff] %vm392_vm1, %v11375_v1  ;;  %397 = vst.msk [vmem:[#allocation3 + $0xa0] sm:$0xff] %vm392_vm1, %v11375_v1  ;;  %s11377_s25 = smov 96  }
  0x12   : > { %v11184_v5 = vld [vmem:[%s11466_s28 + $0x4] ss:$8 sps:$4 sm:$0xff]   ;;  %v11182_v12 = vld [vmem:[%s11466_s28] ss:$8 sps:$4 sm:$0xff]   ;;  %v11185_v13 = vld [vmem:[%s11466_s28 + $0x14] ss:$8 sps:$4 sm:$0xff]   ;;  %s16790_s26 = scalar_lea.vmem %s18124_s11, %s11160_s24 }
  0x13   : > { %714 = vmatpush1.bf16.msra.mxu0 %v11173_v2  ;;  %10001 = vmatprep.mubr.msk.bf16.mxu0 %vm662_vm0, %v11184_v5  ;;  %v11187_v14 = vld [vmem:[%s11466_s28 + $0x10] ss:$8 sps:$4 sm:$0xff]   ;;  %v11188_v15 = vld [vmem:[%s11466_s28 + $0x24] ss:$8 sps:$4 sm:$0xff]   ;;  %v11190_v16 = vld [vmem:[%s11466_s28 + $0x20] ss:$8 sps:$4 sm:$0xff]   ;;  %v2946_v38 = vcvt.s32.f32 %v2914_v35  ;;  %v2947_v43 = vcvt.s32.f32 %v2915_v36  ;;  %v2948_v45 = vcvt.s32.f32 %v2916_v40 }
  0x14   : > { %715 = vmatprep.subr.bf16.mxu0 %v11375_v1  ;;  %v11191_v17 = vld [vmem:[%s11466_s28 + $0x34] ss:$8 sps:$4 sm:$0xff]   ;;  %v11193_v18 = vld [vmem:[%s11466_s28 + $0x30] ss:$8 sps:$4 sm:$0xff]   ;;  %v11194_v19 = vld [vmem:[%s11466_s28 + $0x44] ss:$8 sps:$4 sm:$0xff]  }
  0x15   : > { %v11196_v20 = vld [vmem:[%s11466_s28 + $0x40] ss:$8 sps:$4 sm:$0xff]   ;;  %v11197_v21 = vld [vmem:[%s11466_s28 + $0x54] ss:$8 sps:$4 sm:$0xff]   ;;  %v11199_v22 = vld [vmem:[%s11466_s28 + $0x50] ss:$8 sps:$4 sm:$0xff]  }
  0x16   : > { %v11200_v23 = vld [vmem:[%s11466_s28 + $0x64] ss:$8 sps:$4 sm:$0xff]   ;;  %v11202_v24 = vld [vmem:[%s11466_s28 + $0x60] ss:$8 sps:$4 sm:$0xff]   ;;  %v11203_v25 = vld [vmem:[%s11466_s28 + $0x74] ss:$8 sps:$4 sm:$0xff]  }
  0x17   : > { %716 = vmatpush1.bf16.msra.mxu0 %v11174_v3  ;;  %v11205_v26 = vld [vmem:[%s11466_s28 + $0x70] ss:$8 sps:$4 sm:$0xff]   ;;  %v11206_v27 = vld [vmem:[%s11466_s28 + $0x84] ss:$8 sps:$4 sm:$0xff]   ;;  %v11208_v28 = vld [vmem:[%s11466_s28 + $0x80] ss:$8 sps:$4 sm:$0xff]  }
  0x18   : > { %717 = vmatprep.subr.bf16.mxu0 %v11375_v1  ;;  %v11209_v29 = vld [vmem:[%s11466_s28 + $0x94] ss:$8 sps:$4 sm:$0xff]   ;;  %v11211_v30 = vld [vmem:[%s11466_s28 + $0x90] ss:$8 sps:$4 sm:$0xff]   ;;  %v11212_v31 = vld [vmem:[%s11466_s28 + $0xa4] ss:$8 sps:$4 sm:$0xff]  }
  0x19   : > { %v11214_v34 = vld [vmem:[%s11466_s28 + $0xa0] ss:$8 sps:$4 sm:$0xff]   ;;  %v11215_v39 = vld [vmem:[%s11466_s28 + $0xb4] ss:$8 sps:$4 sm:$0xff]   ;;  %v2977_v41 = vadd.f32 0.5, %v2945_v37  ;;  %v2978_v42 = vadd.f32 0.5, %v2946_v38 }
  0x1a   : > { %v11217_v47 = vld [vmem:[%s11466_s28 + $0xb0] ss:$8 sps:$4 sm:$0xff]   ;;  %v2979_v48 = vadd.f32 0.5, %v2947_v43  ;;  %v11218_v50 = vld [vmem:[%s11466_s28 + $0xc4] ss:$8 sps:$4 sm:$0xff]   ;;  %v2980_v51 = vadd.f32 0.5, %v2948_v45 }
  0x1b   : > { %718 = vmatpush1.bf16.msra.mxu0 %v11175_v4  ;;  %v3009_v44 = vmul.f32 0.0625, %v2977_v41  ;;  %v3010_v46 = vmul.f32 0.0625, %v2978_v42  ;;  %v11220_v57 = vld [vmem:[%s11466_s28 + $0xc0] ss:$8 sps:$4 sm:$0xff]   ;;  %398 = vst.msk [vmem:[#allocation3 + $0xa8] sm:$0xff] %vm392_vm1, %v11375_v1  ;;  %v11559_v63 = vadd.s32 32, %v11527_v33 }
  0x1c   : > { %719 = vmatprep.subr.bf16.mxu0 %v11375_v1  ;;  %v3011_v53 = vmul.f32 0.0625, %v2979_v48  ;;  %v3012_v55 = vmul.f32 0.0625, %v2980_v51  ;;  %v11221_v60 = vld [vmem:[%s11466_s28 + $0xd4] ss:$8 sps:$4 sm:$0xff]   ;;  %v11566_v3 = vadd.s32 40, %v11527_v33 }
  0x1d   : > { %v3041_v49 = vfloor.f32 %v3009_v44  ;;  %v3042_v52 = vfloor.f32 %v3010_v46  ;;  %v2949_v4 = vcvt.s32.f32 %v11559_v63  ;;  %v11223_v5 = vld [vmem:[%s11466_s28 + $0xd0] ss:$8 sps:$4 sm:$0xff]  }
  0x1e   : > { %v3043_v58 = vfloor.f32 %v3011_v53  ;;  %v3044_v61 = vfloor.f32 %v3012_v55  ;;  %v4002_v53 = vld [vmem:[#allocation2] sm:$0x80] }
  0x1f   : > { %720 = vmatpush1.bf16.msra.mxu0 %v11176_v6  ;;  %v3073_v54 = vmul.f32 16.0, %v3041_v49  ;;  %v3074_v56 = vmul.f32 16.0, %v3042_v52 }
  0x20   : > { %721 = vmatprep.subr.bf16.mxu0 %v11375_v1  ;;  %v3075_v0 = vmul.f32 16.0, %v3043_v58  ;;  %v3076_v2 = vmul.f32 16.0, %v3044_v61 }
  0x21   : > { %v11553_v59 = vsub.f32 %v2945_v37, %v3073_v54  ;;  %v11556_v62 = vsub.f32 %v2946_v38, %v3074_v56  ;;  %v11641_v56 = vadd.s32 48, %v11527_v33 }
  0x22   : > { %v11571_v6 = vsub.f32 %v2947_v43, %v3075_v0  ;;  %v11229_v43 = vld [vmem:[%s11466_s28 + $0xf0] ss:$8 sps:$4 sm:$0xff]   ;;  %v11649_v0 = vadd.s32 56, %v11527_v33 }
  0x23   : > { %722 = vmatpush1.bf16.msra.mxu0 %v11177_v7  ;;  %18207 = vst [vmem:[#allocation5_spill] sm:$0xff] %v11553_v59  ;;  %18208 = vst [vmem:[#allocation6_spill] sm:$0xff] %v11556_v62  ;;  %vm4019_vm2 = vcmp.ge.f32.partialorder %v11553_v59, 1.0  ;;  %vm4020_vm3 = vcmp.ge.f32.partialorder %v11556_v62, 1.0  ;;  %vm3154_vm4 = vcmp.ge.f32.partialorder %v11553_v59, 3.0  ;;  %vm3155_vm6 = vcmp.ge.f32.partialorder %v11556_v62, 3.0 }
  0x24   : > { %723 = vmatprep.subr.bf16.mxu0 %v11375_v1  ;;  %vm4051_vm5 = vmpackc.low %vm4019_vm2, %vm4019_vm2  ;;  %18209 = vst [vmem:[#allocation7_spill] sm:$0xff] %v11571_v6  ;;  %v11224_v7 = vld [vmem:[%s11466_s28 + $0xe4] ss:$8 sps:$4 sm:$0xff]   ;;  %vm4021_vm9 = vcmp.ge.f32.partialorder %v11571_v6, 1.0  ;;  %vm4570_vm12 = vcmp.lt.f32.partialorder %v11553_v59, 15.0  ;;  %vm4572_vm14 = vcmp.lt.f32.partialorder %v11571_v6, 15.0 }
  0x25   : > { %vm4052_vm7 = vmpackc.low %vm4020_vm3, %vm4020_vm3 }
  0x26   : > { %vm3186_vm8 = vmpackc.low %vm3154_vm4, %vm3154_vm4  ;;  %vm3156_vm4 = vcmp.ge.f32.partialorder %v11571_v6, 3.0 }
  0x27   : > { %724 = vmatpush1.bf16.msra.mxu0 %v11178_v8  ;;  %v11574_v8 = vsub.f32 %v2948_v45, %v3076_v2  ;;  %vm3187_vm10 = vmpackc.low %vm3155_vm6, %vm3155_vm6 }
  0x28   : > { %725 = vmatprep.subr.bf16.mxu0 %v11375_v1  ;;  %vm11585_vm13 = vmpackc.low %vm4021_vm9, %vm4021_vm9 }
  0x29   : > { %18210 = vst [vmem:[#allocation8_spill] sm:$0xff] %v11574_v8  ;;  %vm4022_vm11 = vcmp.ge.f32.partialorder %v11574_v8, 1.0  ;;  %vm4573_vm2 = vcmp.lt.f32.partialorder %v11574_v8, 15.0  ;;  %vm11595_vm3 = vmpackc.low %vm4570_vm12, %vm4570_vm12  ;;  %vm3157_vm6 = vcmp.ge.f32.partialorder %v11574_v8, 3.0  ;;  %vm979_vm12 = vsmask.f32 7424 }
  0x2a   : > { %vm4054_vm15 = vmpackc.low %vm4022_vm11, %vm4022_vm11  ;;  %v4634_v35 = vsel %vm11595_vm3, 65537, %v11375_v1 }
  0x2b   : > { %726 = vmatpush1.bf16.msra.mxu0 %v11179_v9  ;;  %v2950_v9 = vcvt.s32.f32 %v11566_v3  ;;  %vm3188_vm9 = vmpackc.low %vm3156_vm4, %vm3156_vm4  ;;  %v2952_v3 = vcvt.s32.f32 %v11649_v0 }
  0x2c   : > { %727 = vmatprep.subr.bf16.mxu0 %v11375_v1  ;;  %v3220_v36 = vsel %vm3188_vm9, 65537, %v11375_v1  ;;  %vm4324_vm9 = vsmask.f32 256 }
  0x2f   : > { %728 = vmatpush1.bf16.msra.mxu0 %v11180_v10  ;;  %v2981_v10 = vadd.f32 0.5, %v2949_v4 }
  0x30   : > { %729 = vmatprep.subr.bf16.mxu0 %v11375_v1 }
  0x33   : > { %730 = vmatpush1.bf16.msra.mxu0 %v11181_v11  ;;  %v4083_v11 = vsel %vm4051_vm5, 65537, %v11375_v1  ;;  %vm11601_vm5 = vmpackc.low %vm4572_vm14, %vm4572_vm14 }
  0x36   : > { %744 = vmatmul.mubr.bf16.vlgmr.msra.gmra.mrb[0].mxu0 %v11182_v12  ;;  %v4084_v12 = vsel %vm4052_vm7, 65537, %v11375_v1  ;;  %vm4571_vm7 = vcmp.lt.f32.partialorder %v11556_v62, 15.0 }
  0x37   : > { %10002 = vmatprep.mubr.msk.bf16.mxu0 %vm662_vm0, %v11185_v13  ;;  %vm4603_vm11 = vmpackc.low %vm4571_vm7, %vm4571_vm7  ;;  %vm3298_vm7 = vsmask.f32 6400 }
  0x38   : > { %v4635_v41 = vsel %vm4603_vm11, 65537, %v11375_v1 }
  0x3e   : > { %752 = vmatmul.mubr.bf16.gmra.mrb[4].mxu0 %v11187_v14  ;;  %v3218_v14 = vsel %vm3186_vm8, 65537, %v11375_v1  ;;  %vm4605_vm8 = vmpackc.low %vm4573_vm2, %vm4573_vm2  ;;  %vm5398_vm2 = vcmp.lt.f32.partialorder %v11571_v6, 13.0 }
  0x3f   : > { %10003 = vmatprep.mubr.msk.bf16.mxu0 %vm662_vm0, %v11188_v15  ;;  %v3219_v15 = vsel %vm3187_vm10, 65537, %v11375_v1  ;;  %vm3189_vm10 = vmpackc.low %vm3157_vm6, %vm3157_vm6  ;;  %vm5399_vm6 = vcmp.lt.f32.partialorder %v11574_v8, 13.0 }
  0x40   : > { %v3221_v37 = vsel %vm3189_vm10, 65537, %v11375_v1  ;;  %vm11705_vm11 = vmpackc.low %vm5399_vm6, %vm5399_vm6 }
  0x41   : > { %v10097_v49 = vcombine.low %v3220_v36, %v3221_v37  ;;  %v11726_v36 = vld [vmem:[#allocation2] sm:$0xff] }
  0x43   : > { %v3311_v61 = vshll.u32 %v10097_v49, 16 }
  0x46   : > { %760 = vmatmul.mubr.bf16.gmra.mrb[8].mxu0 %v11190_v16  ;;  %v2982_v16 = vadd.f32 0.5, %v2950_v9 }
  0x47   : > { %10004 = vmatprep.mubr.msk.bf16.mxu0 %vm662_vm0, %v11191_v17  ;;  %v10128_v17 = vcombine.low %v4083_v11, %v4084_v12  ;;  %v3137_v11 = vld [vmem:[#allocation2] sm:$0xc0]  ;;  %v11232_v12 = vld [vmem:[%s18116_s3 + $0x110] sm:$0xff]  }
  0x49   : > { %v4167_v40 = vshrl.u32 %v10128_v17, 16 }
  0x4e   : > { %768 = vmatmul.mubr.bf16.gmra.mrb[12].mxu0 %v11193_v18 }
  0x4f   : > { %10005 = vmatprep.mubr.msk.bf16.mxu0 %vm662_vm0, %v11194_v19  ;;  %v3013_v19 = vmul.f32 0.0625, %v2981_v10 }
  0x56   : > { %776 = vmatmul.mubr.bf16.gmra.mrb[16].mxu0 %v11196_v20  ;;  %v11226_v20 = vld [vmem:[%s11466_s28 + $0xe0] ss:$8 sps:$4 sm:$0xff]  }
  0x57   : > { %10006 = vmatprep.mubr.msk.bf16.mxu0 %vm662_vm0, %v11197_v21 }
  0x5e   : > { %784 = vmatmul.mubr.bf16.gmra.mrb[20].mxu0 %v11199_v22  ;;  %v10096_v22 = vcombine.low %v3218_v14, %v3219_v15  ;;  %v3313_v15 = vrot.slane %v3311_v61, 2 }
  0x5f   : > { %10007 = vmatprep.mubr.msk.bf16.mxu0 %vm662_vm0, %v11200_v23  ;;  %v11227_v23 = vld [vmem:[%s11466_s28 + $0xf4] ss:$8 sps:$4 sm:$0xff]  }
  0x60   : > { %v3303_v32 = vshll.u32 %v10096_v22, 16 }
  0x62   : > { %v3305_v45 = vrot.slane %v3303_v32, 2  ;;  %v11721_v32 = vadd.s32 72, %v11527_v33 }
  0x66   : > { %792 = vmatmul.mubr.bf16.gmra.mrb[24].mxu0 %v11202_v24  ;;  %v4085_v24 = vsel %vm11585_vm13, 65537, %v11375_v1  ;;  %vm5397_vm13 = vcmp.lt.f32.partialorder %v11556_v62, 13.0 }
  0x67   : > { %10008 = vmatprep.mubr.msk.bf16.mxu0 %vm662_vm0, %v11203_v25  ;;  %v4086_v25 = vsel %vm4054_vm15, 65537, %v11375_v1 }
  0x6e   : > { %800 = vmatmul.mubr.bf16.gmra.mrb[28].mxu0 %v11205_v26  ;;  %v3014_v26 = vmul.f32 0.0625, %v2982_v16 }
  0x6f   : > { %10009 = vmatprep.mubr.msk.bf16.mxu0 %vm662_vm0, %v11206_v27  ;;  %v4164_v27 = vshll.u32 %v10128_v17, 16 }
  0x70   : > { %v3046_v38 = vfloor.f32 %v3014_v26 }
  0x72   : > { %v3078_v51 = vmul.f32 16.0, %v3046_v38 }
  0x74   : > { %v11654_v63 = vsub.f32 %v2950_v9, %v3078_v51 }
  0x76   : > { %808 = vmatmul.mubr.bf16.gmra.mrb[32].mxu0 %v11208_v28  ;;  %v3045_v28 = vfloor.f32 %v3013_v19  ;;  %18218 = vst [vmem:[#allocation10_spill] sm:$0xff] %v11654_v63  ;;  %vm4024_vm4 = vcmp.ge.f32.partialorder %v11654_v63, 1.0 }
  0x77   : > { %10010 = vmatprep.mubr.msk.bf16.mxu0 %vm662_vm0, %v11209_v29  ;;  %v4636_v29 = vsel %vm11601_vm5, 65537, %v11375_v1  ;;  %vm11696_vm10 = vmpackc.low %vm4024_vm4, %vm4024_vm4  ;;  %vm3159_vm4 = vcmp.ge.f32.partialorder %v11654_v63, 3.0 }
  0x78   : > { %v3077_v46 = vmul.f32 16.0, %v3045_v28  ;;  %v4088_v38 = vsel %vm11696_vm10, 65537, %v11726_v36  ;;  %vm5401_vm10 = vcmp.lt.f32.partialorder %v11654_v63, 13.0 }
  0x7a   : > { %v11638_v55 = vsub.f32 %v2949_v4, %v3077_v46  ;;  %v2951_v4 = vcvt.s32.f32 %v11641_v56 }
  0x7c   : > { %18217 = vst [vmem:[#allocation9_spill] sm:$0xff] %v11638_v55  ;;  %vm4023_vm15 = vcmp.ge.f32.partialorder %v11638_v55, 1.0  ;;  %v2983_v9 = vadd.f32 0.5, %v2951_v4  ;;  %vm5400_vm6 = vcmp.lt.f32.partialorder %v11638_v55, 13.0 }
  0x7d   : > { %vm11673_vm5 = vmpackc.low %vm4023_vm15, %vm4023_vm15 }
  0x7e   : > { %816 = vmatmul.mubr.bf16.gmra.mrb[36].mxu0 %v11211_v30  ;;  %v4637_v30 = vsel %vm4605_vm8, 65537, %v11375_v1  ;;  %vm11685_vm8 = vmpackc.low %vm5398_vm2, %vm5398_vm2  ;;  %v3015_v28 = vmul.f32 0.0625, %v2983_v9  ;;  %vm4574_vm2 = vcmp.lt.f32.partialorder %v11638_v55, 15.0  ;;  %v4087_v37 = vsel %vm11673_vm5, 65537, %v11726_v36 }
  0x7f   : > { %10011 = vmatprep.mubr.msk.bf16.mxu0 %vm662_vm0, %v11212_v31  ;;  %v3300_v31 = vshrl.u32 %v10096_v22, 16  ;;  %v10145_v42 = vcombine.low %v4636_v29, %v4637_v30 }
  0x80   : > { %v3047_v46 = vfloor.f32 %v3015_v28 }
  0x81   : > { %v3302_v44 = vrot.slane %v3300_v31, 1  ;;  %v4722_v52 = vshrl.u32 %v10145_v42, 16  ;;  %v4725_v10 = vshll.u32 %v10145_v42, 16 }
  0x83   : > { %v11634_v54 = vor.u32 %v3305_v45, %v3302_v44 }
  0x85   : > { %vm3442_vm3 = vcmp.ne.s16.totalorder %v11634_v54, 0 }
  0x86   : > { %824 = vmatmul.mubr.bf16.gmra.mrb[40].mxu0 %v11214_v34  ;;  %v11617_v34 = vcombine.low %v4085_v24, %v4086_v25  ;;  %v3459_v22 = vsel %vm3442_vm3, %v3137_v11, 0  ;;  %v11701_v24 = vadd.s32 64, %v11527_v33  ;;  %vm4575_vm3 = vcmp.lt.f32.partialorder %v11654_v63, 15.0 }
  0x87   : > { %10012 = vmatprep.mubr.msk.bf16.mxu0 %vm662_vm0, %v11215_v39  ;;  %v4166_v39 = vrot.slane %v4164_v27, 1  ;;  %v3481_v44 = vshll.u32 %v3459_v22, 16 }
  0x88   : > { %v4171_v48 = vshll.u32 %v11617_v34, 16  ;;  %v4175_v26 = vshrl.u32 %v11617_v34, 16  ;;  %v11233_v34 = vld [vmem:[%s18116_s3 + $0x118] sm:$0xff]  }
  0x89   : > { %v4169_v1 = vor.u32 %v4167_v40, %v4166_v39  ;;  %vm4290_vm14 = vcmp.ne.s16.totalorder %v4166_v39, 0  ;;  %v5462_v40 = vsel %vm11685_vm8, 65537, %v11726_v36  ;;  %vm11770_vm8 = vmpackc.low %vm4575_vm3, %vm4575_vm3  ;;  %v11853_v39 = vadd.s32 88, %v11527_v33 }
  0x8a   : > { %v11646_v58 = vrot.slane %v4171_v48, 1  ;;  %v4639_v16 = vsel %vm11770_vm8, 65537, %v11726_v36 }
  0x8c   : > { %v11680_v17 = vsel %vm979_vm12, %v4169_v1, %v11646_v58  ;;  %v11775_v1 = vcombine.low %v4087_v37, %v4088_v38 }
  0x8e   : > { %832 = vmatmul.mubr.bf16.gmra.mrb[44].mxu0 %v11217_v47  ;;  %v11230_v47 = vld [vmem:[%s18116_s3 + $0x100] sm:$0xff]   ;;  %v4179_v19 = vshll.u32 %v11775_v1, 16 }
  0x8f   : > { %10013 = vmatprep.mubr.msk.bf16.mxu0 %vm662_vm0, %v11218_v50  ;;  %v11630_v50 = vcombine.low %v4634_v35, %v4635_v41  ;;  %11080 = vmatprep.subr.bf16.mxu0 %v11230_v47  ;;  %v3478_v35 = vshrl.u32 %v3459_v22, 16  ;;  %v5463_v41 = vsel %vm11705_vm11, 65537, %v11726_v36  ;;  %vm11786_vm11 = vmpackc.low %vm3159_vm4, %vm3159_vm4 }
  0x90   : > { %11081 = vmatpush3.bf16.msra.mxu0 %v11230_v47  ;;  %v2954_v47 = vcvt.s32.f32 %v11721_v32  ;;  %v3223_v22 = vsel %vm11786_vm11, 65537, %v11726_v36 }
  0x91   : > { %v4715_v2 = vshrl.u32 %v11630_v50, 16  ;;  %v4718_v13 = vshll.u32 %v11630_v50, 16  ;;  %v11810_v9 = vrot.slane %v3478_v35, 6 }
  0x93   : > { %v4717_v18 = vrot.slane %v4715_v2, 7 }
  0x96   : > { %840 = vmatmul.mubr.bf16.gmra.mrb[48].mxu0 %v11220_v57  ;;  %v11231_v57 = vld [vmem:[%s18116_s3 + $0x108] sm:$0xff]  }
  0x97   : > { %10014 = vmatprep.mubr.msk.bf16.mxu0 %vm662_vm0, %v11221_v60  ;;  %v3308_v60 = vshrl.u32 %v10097_v49, 16  ;;  %11082 = vmatprep.subr.bf16.mxu0 %v11231_v57  ;;  %v11768_v49 = vor.u32 %v4718_v13, %v4717_v18  ;;  %v3079_v13 = vmul.f32 16.0, %v3047_v46 }
  0x98   : > { %11083 = vmatpush3.bf16.msra.mxu0 %v11231_v57  ;;  %v10177_v57 = vcombine.low %v5462_v40, %v5463_v41  ;;  %v11855_v40 = vrot.slane %v4179_v19, 1 }
  0x99   : > { %v3310_v14 = vrot.slane %v3308_v60, 1  ;;  %11084 = vmatprep.subr.bf16.mxu0 %v11232_v12  ;;  %v11843_v30 = vsub.f32 %v2951_v4, %v3079_v13 }
  0x9b   : > { %v11710_v29 = vor.u32 %v3313_v15, %v3310_v14  ;;  %18243 = vst [vmem:[#allocation11_spill] sm:$0xff] %v11843_v30  ;;  %vm3160_vm3 = vcmp.ge.f32.partialorder %v11843_v30, 3.0 }
  0x9c   : > { %11085 = vmatpush3.bf16.msra.mxu0 %v11232_v12  ;;  %v11812_v12 = vrot.slane %v3481_v44, 7  ;;  %vm11880_vm11 = vmpackc.low %vm3160_vm3, %vm3160_vm3 }
  0x9d   : > { %11086 = vmatprep.subr.bf16.mxu0 %v11233_v34  ;;  %v11796_v2 = vsel %vm3298_vm7, %v11634_v54, %v11710_v29 }
  0x9e   : > { %848 = vmatmul.mubr.bf16.gmra.mrb[52].mxu0 %v11223_v5  ;;  %v4307_v5 = vsel %vm4290_vm14, %v4002_v53, 0  ;;  %vm3158_vm14 = vcmp.ge.f32.partialorder %v11638_v55, 3.0 }
  0x9f   : > { %10015 = vmatprep.mubr.msk.bf16.mxu0 %vm662_vm0, %v11224_v7  ;;  %v11658_v7 = vrot.slane %v4722_v52, 7  ;;  %v4326_v21 = vshrl.u32 %v4307_v5, 16  ;;  %vm11752_vm5 = vmpackc.low %vm3158_vm14, %vm3158_vm14  ;;  %v11799_v5 = vor.u32 %v4175_v26, %v11646_v58  ;;  %v2986_v58 = vadd.f32 0.5, %v2954_v47 }
  0xa0   : > { %11087 = vmatpush3.bf16.msra.mxu0 %v11233_v34  ;;  %vm11804_vm14 = vmpackc.low %vm5400_vm6, %vm5400_vm6  ;;  %v11846_v34 = vadd.s32 80, %v11527_v33  ;;  %vm4025_vm6 = vcmp.ge.f32.partialorder %v11843_v30, 1.0 }
  0xa1   : > { %v4727_v25 = vor.u32 %v4725_v10, %v11658_v7  ;;  %v11766_v48 = vrot.slane %v4326_v21, 7  ;;  %v3222_v21 = vsel %vm11752_vm5, 65537, %v11726_v36 }
  0xa2   : > { %v10098_v37 = vcombine.low %v3222_v21, %v3223_v22 }
  0xa3   : > { %v11791_v61 = vsel %vm4324_vm9, %v4717_v18, %v4727_v25  ;;  %v5464_v25 = vsel %vm11804_vm14, 65537, %v11726_v36 }
  0xa4   : > { %v3317_v46 = vshrl.u32 %v10098_v37, 16  ;;  %v3320_v50 = vshll.u32 %v10098_v37, 16 }
  0xa6   : > { %856 = vmatmul.mubr.bf16.gmra.mrb[56].mxu0 %v11226_v20  ;;  %v2984_v20 = vadd.f32 0.5, %v2952_v3  ;;  %v3322_v21 = vrot.slane %v3320_v50, 2  ;;  %v11950_v50 = vsel %vm979_vm12, %v11799_v5, %v11855_v40 }
  0xa7   : > { %10016 = vmatprep.mubr.msk.bf16.mxu0 %vm662_vm0, %v11227_v23  ;;  %vm5396_vm0 = vcmp.lt.f32.partialorder %v11553_v59, 13.0  ;;  %v5552_v23 = vshll.u32 %v10177_v57, 16 }
  0xa8   : > { %vm11715_vm15 = vmpackc.low %vm5396_vm0, %vm5396_vm0  ;;  %v3016_v31 = vmul.f32 0.0625, %v2984_v20  ;;  %v5549_v20 = vshrl.u32 %v10177_v57, 16 }
  0xa9   : > { %vm11737_vm0 = vmpackc.low %vm5397_vm13, %vm5397_vm13  ;;  %v5460_v52 = vsel %vm11715_vm15, 65537, %v11726_v36  ;;  %v5554_v4 = vrot.slane %v5552_v23, 7 }
  0xaa   : > { %vm11760_vm13 = vmpackc.low %vm4574_vm2, %vm4574_vm2  ;;  %v3048_v51 = vfloor.f32 %v3016_v31  ;;  %v5461_v53 = vsel %vm11737_vm0, 65537, %v11726_v36  ;;  %v3018_v31 = vmul.f32 0.0625, %v2986_v58  ;;  %vm4576_vm2 = vcmp.lt.f32.partialorder %v11843_v30, 15.0 }
  0xab   : > { %vm11814_vm15 = vmpackc.low %vm5401_vm10, %vm5401_vm10  ;;  %v10176_v14 = vcombine.low %v5460_v52, %v5461_v53  ;;  %v4638_v15 = vsel %vm11760_vm13, 65537, %v11726_v36  ;;  %v5551_v56 = vrot.slane %v5549_v20, 6  ;;  %v2956_v52 = vcvt.s32.f32 %v11853_v39 }
  0xac   : > { %v3080_v18 = vmul.f32 16.0, %v3048_v51  ;;  %v5465_v26 = vsel %vm11814_vm15, 65537, %v11726_v36  ;;  %v11839_v28 = vcombine.low %v4638_v15, %v4639_v16  ;;  %v3050_v0 = vfloor.f32 %v3018_v31  ;;  %vm11862_vm4 = vmpackc.low %vm4576_vm2, %vm4576_vm2 }
  0xad   : > { %v5541_v35 = vshrl.u32 %v10176_v14, 16  ;;  %v5544_v41 = vshll.u32 %v10176_v14, 16  ;;  %v10178_v42 = vcombine.low %v5464_v25, %v5465_v26  ;;  %vm3476_vm13 = vsmask.f32 1280  ;;  %vm11893_vm15 = vmpackc.low %vm4025_vm6, %vm4025_vm6 }
  0xae   : > { %864 = vmatmul.mubr.bf16.gmra.mrb[60].mxu0 %v11229_v43  ;;  %v2953_v43 = vcvt.s32.f32 %v11701_v24  ;;  %v11850_v38 = vsub.f32 %v2952_v3, %v3080_v18  ;;  %v4730_v45 = vshrl.u32 %v11839_v28, 16  ;;  %v2955_v3 = vcvt.s32.f32 %v11846_v34 }
  0xaf   : > { %v5543_v53 = vrot.slane %v5541_v35, 6  ;;  %v5546_v57 = vrot.slane %v5544_v41, 7  ;;  %v5558_v60 = vshrl.u32 %v10178_v42, 16  ;;  %v5561_v13 = vshll.u32 %v10178_v42, 16 }
  0xb0   : > { %v2985_v11 = vadd.f32 0.5, %v2953_v43  ;;  %18244 = vst [vmem:[#allocation12_spill] sm:$0xff] %v11850_v38  ;;  %vm4577_vm0 = vcmp.lt.f32.partialorder %v11850_v38, 15.0  ;;  %vm3161_vm5 = vcmp.ge.f32.partialorder %v11850_v38, 3.0  ;;  %vm4026_vm10 = vcmp.ge.f32.partialorder %v11850_v38, 1.0 }
  0xb1   : > { %vm11872_vm8 = vmpackc.low %vm4577_vm0, %vm4577_vm0  ;;  %v11884_v14 = vrot.slane %v4730_v45, 7  ;;  %v4733_v15 = vshll.u32 %v11839_v28, 16  ;;  %v3082_v18 = vmul.f32 16.0, %v3050_v0  ;;  %v2987_v19 = vadd.f32 0.5, %v2955_v3 }
  0xb2   : > { %v3017_v27 = vmul.f32 0.0625, %v2985_v11  ;;  %v5555_v11 = vor.u32 %v5554_v4, %v5551_v56  ;;  %vm11887_vm14 = vmpackc.low %vm3161_vm5, %vm3161_vm5  ;;  %v3319_v20 = vrot.slane %v3317_v46, 1  ;;  %vm5402_vm2 = vcmp.lt.f32.partialorder %v11843_v30, 13.0  ;;  %v11240_v30 = vld [vmem:[%s18116_s3 + $0x58] sm:$0xff]  }
  0xb3   : > { %v2988_v23 = vadd.f32 0.5, %v2956_v52  ;;  %vm11900_vm0 = vmpackc.low %vm4026_vm10, %vm4026_vm10  ;;  %v5560_v26 = vrot.slane %v5558_v60, 6  ;;  %v4641_v28 = vsel %vm11872_vm8, 65537, %v11726_v36  ;;  %vm5403_vm3 = vcmp.lt.f32.partialorder %v11850_v38, 13.0 }
  0xb4   : > { %v3049_v44 = vfloor.f32 %v3017_v27  ;;  %v4640_v27 = vsel %vm11862_vm4, 65537, %v11726_v36  ;;  %v5563_v31 = vrot.slane %v5561_v13, 7  ;;  %v3224_v35 = vsel %vm11880_vm11, 65537, %v11726_v36  ;;  %vm11929_vm4 = vmpackc.low %vm5402_vm2, %vm5402_vm2 }
  0xb5   : > { %v3225_v37 = vsel %vm11887_vm14, 65537, %v11726_v36  ;;  %v4089_v42 = vsel %vm11893_vm15, 65537, %v11726_v36  ;;  %v4183_v56 = vshrl.u32 %v11775_v1, 16  ;;  %v11927_v4 = vsub.f32 %v2954_v47, %v3082_v18  ;;  %vm11939_vm6 = vmpackc.low %vm5403_vm3, %vm5403_vm3 }
  0xb6   : > { %v3081_v58 = vmul.f32 16.0, %v3049_v44  ;;  %v3019_v45 = vmul.f32 0.0625, %v2987_v19  ;;  %v4090_v24 = vsel %vm11900_vm0, 65537, %v11726_v36  ;;  %v3020_v32 = vmul.f32 0.0625, %v2988_v23 }
  0xb7   : > { %18258 = vst [vmem:[#allocation14_spill] sm:$0xff] %v11927_v4  ;;  %v4735_v1 = vor.u32 %v4733_v15, %v11884_v14  ;;  %v10099_v46 = vcombine.low %v3224_v35, %v3225_v37  ;;  %vm4028_vm8 = vcmp.ge.f32.partialorder %v11927_v4, 1.0  ;;  %v11952_v51 = vor.u32 %v5546_v57, %v5543_v53 }
  0xb8   : > { %v11919_v41 = vsub.f32 %v2953_v43, %v3081_v58  ;;  %v11936_v43 = vcombine.low %v4640_v27, %v4641_v28  ;;  %v11954_v60 = vor.u32 %v3322_v21, %v3319_v20  ;;  %v11956_v10 = vor.u32 %v5563_v31, %v5560_v26  ;;  %vm11976_vm11 = vmpackc.low %vm4028_vm8, %vm4028_vm8 }
  0xb9   : > { %v11958_v13 = vcombine.low %v4089_v42, %v4090_v24  ;;  %v5466_v58 = vsel %vm11929_vm4, 65537, %v11726_v36  ;;  %v5467_v5 = vsel %vm11939_vm6, 65537, %v11726_v36  ;;  %v3051_v53 = vfloor.f32 %v3019_v45 }
  0xba   : > { %18257 = vst [vmem:[#allocation13_spill] sm:$0xff] %v11919_v41  ;;  %vm4027_vm5 = vcmp.ge.f32.partialorder %v11919_v41, 1.0  ;;  %v11972_v57 = vsel %vm3476_vm13, %v11952_v51, %v5555_v11  ;;  %v4185_v15 = vor.u32 %v4183_v56, %v11855_v40  ;;  %v4738_v16 = vshrl.u32 %v11936_v43, 16 }
  0xbb   : > { %vm11960_vm10 = vmpackc.low %vm4027_vm5, %vm4027_vm5  ;;  %v3052_v19 = vfloor.f32 %v3020_v32  ;;  %v11982_v20 = vsel %vm4324_vm9, %v11658_v7, %v4735_v1  ;;  %v3326_v21 = vshrl.u32 %v10099_v46, 16  ;;  %v3329_v22 = vshll.u32 %v10099_v46, 16 }
  0xbc   : > { %vm4578_vm14 = vcmp.lt.f32.partialorder %v11919_v41, 15.0  ;;  %v11988_v23 = vsel %vm3298_vm7, %v11710_v29, %v11954_v60  ;;  %v11992_v40 = vsel %vm3476_vm13, %v5555_v11, %v11956_v10  ;;  %v10179_v25 = vcombine.low %v5466_v58, %v5467_v5 }
  0xbd   : > { %vm4579_vm15 = vcmp.lt.f32.partialorder %v11927_v4, 15.0  ;;  %v4187_v26 = vshll.u32 %v11958_v13, 16  ;;  %v4091_v7 = vsel %vm11960_vm10, 65537, %v11726_v36  ;;  %v4092_v27 = vsel %vm11976_vm11, 65537, %v11726_v36  ;;  %vm12006_vm2 = vmpackc.low %vm4578_vm14, %vm4578_vm14 }
  0xbe   : > { %v3083_v28 = vmul.f32 16.0, %v3051_v53  ;;  %v12002_v29 = vrot.slane %v4738_v16, 7  ;;  %v4741_v31 = vshll.u32 %v11936_v43, 16  ;;  %v4191_v11 = vshrl.u32 %v11958_v13, 16  ;;  %vm12010_vm0 = vmpackc.low %vm4579_vm15, %vm4579_vm15 }
  0xbf   : > { %v3084_v37 = vmul.f32 16.0, %v3052_v19  ;;  %v3328_v42 = vrot.slane %v3326_v21, 1  ;;  %v3331_v56 = vrot.slane %v3329_v22, 2  ;;  %vm3162_vm3 = vcmp.ge.f32.partialorder %v11919_v41, 3.0 }
  0xc0   : > { %v12016_v45 = vadd.s32 96, %v11527_v33  ;;  %v12018_v24 = vcombine.low %v4091_v7, %v4092_v27  ;;  %v5567_v43 = vshrl.u32 %v10179_v25, 16  ;;  %v5570_v0 = vshll.u32 %v10179_v25, 16  ;;  %vm12036_vm6 = vmpackc.low %vm3162_vm3, %vm3162_vm3 }
  0xc1   : > { %vm3163_vm4 = vcmp.ge.f32.partialorder %v11927_v4, 3.0  ;;  %v12023_v32 = vsub.f32 %v2955_v3, %v3083_v28  ;;  %vm5404_vm5 = vcmp.lt.f32.partialorder %v11919_v41, 13.0  ;;  %v12027_v1 = vadd.s32 104, %v11527_v33 }
  0xc2   : > { %v18126_v46 = vcvt.s32.f32 %v12016_v45  ;;  %v4642_v13 = vsel %vm12006_vm2, 65537, %v11726_v36  ;;  %v4643_v54 = vsel %vm12010_vm0, 65537, %v11726_v36  ;;  %v12042_v34 = vsub.f32 %v2956_v52, %v3084_v37  ;;  %vm12045_vm10 = vmpackc.low %vm3163_vm4, %vm3163_vm4 }
  0xc3   : > { %18271 = vst [vmem:[#allocation15_spill] sm:$0xff] %v12023_v32  ;;  %vm5405_vm8 = vcmp.lt.f32.partialorder %v11927_v4, 13.0  ;;  %v4189_v3 = vrot.slane %v4187_v26, 1  ;;  %vm4029_vm11 = vcmp.ge.f32.partialorder %v12023_v32, 1.0  ;;  %v18125_v53 = vcvt.s32.f32 %v12027_v1  ;;  %vm12061_vm15 = vmpackc.low %vm5404_vm5, %vm5404_vm5 }
  0xc4   : > { %18274 = vst [vmem:[#allocation16_spill] sm:$0xff] %v12042_v34  ;;  %v2989_v16 = vadd.f32 0.5, %v18126_v46  ;;  %v4743_v18 = vor.u32 %v4741_v31, %v12002_v29  ;;  %v12054_v19 = vor.u32 %v3331_v56, %v3328_v42  ;;  %v4195_v39 = vshll.u32 %v12018_v24, 16  ;;  %vm12067_vm2 = vmpackc.low %vm5405_vm8, %vm5405_vm8 }
  0xc5   : > { %vm4030_vm14 = vcmp.ge.f32.partialorder %v12042_v34, 1.0  ;;  %v5569_v21 = vrot.slane %v5567_v43, 6  ;;  %v12065_v22 = vcombine.low %v4642_v13, %v4643_v54  ;;  %vm4580_vm0 = vcmp.lt.f32.partialorder %v12023_v32, 15.0  ;;  %vm12083_vm3 = vmpackc.low %vm4029_vm11, %vm4029_vm11 }
  0xc6   : > { %v2990_v26 = vadd.f32 0.5, %v18125_v53  ;;  %v5572_v7 = vrot.slane %v5570_v0, 7  ;;  %v3226_v27 = vsel %vm12036_vm6, 65537, %v11726_v36  ;;  %v3227_v28 = vsel %vm12045_vm10, 65537, %v11726_v36  ;;  %vm12091_vm5 = vmpackc.low %vm4030_vm14, %vm4030_vm14 }
  0xc7   : > { %vm4581_vm4 = vcmp.lt.f32.partialorder %v12042_v34, 15.0  ;;  %v12089_v35 = vsel %vm979_vm12, %v4185_v15, %v4189_v3  ;;  %v4193_v37 = vor.u32 %v4191_v11, %v4189_v3  ;;  %vm3164_vm6 = vcmp.ge.f32.partialorder %v12023_v32, 3.0  ;;  %vm12102_vm8 = vmpackc.low %vm4580_vm0, %vm4580_vm0 }
  0xc8   : > { %v3021_v56 = vmul.f32 0.0625, %v2989_v16  ;;  %v5468_v44 = vsel %vm12061_vm15, 65537, %v11726_v36  ;;  %v5469_v43 = vsel %vm12067_vm2, 65537, %v11726_v36  ;;  %vm3165_vm10 = vcmp.ge.f32.partialorder %v12042_v34, 3.0  ;;  %vm12112_vm11 = vmpackc.low %vm4581_vm4, %vm4581_vm4 }
  0xc9   : > { %v3022_v15 = vmul.f32 0.0625, %v2990_v26  ;;  %v12109_v11 = vsel %vm4324_vm9, %v11884_v14, %v4743_v18  ;;  %v4746_v13 = vshrl.u32 %v12065_v22, 16  ;;  %v10100_v54 = vcombine.low %v3226_v27, %v3227_v28  ;;  %vm12126_vm14 = vmpackc.low %vm3164_vm6, %vm3164_vm6 }
  0xca   : > { %v12117_v3 = vadd.s32 112, %v11527_v33  ;;  %v12122_v5 = vsel %vm3298_vm7, %v11954_v60, %v12054_v19  ;;  %v4197_v16 = vrot.slane %v4195_v39, 1  ;;  %v12124_v52 = vor.u32 %v5572_v7, %v5569_v21  ;;  %vm12137_vm15 = vmpackc.low %vm3165_vm10, %vm3165_vm10 }
  0xcb   : > { %v12131_v18 = vadd.s32 120, %v11527_v33  ;;  %v4749_v25 = vshll.u32 %v12065_v22, 16  ;;  %v4093_v26 = vsel %vm12083_vm3, 65537, %v11726_v36  ;;  %v10180_v27 = vcombine.low %v5468_v44, %v5469_v43 }
  0xcc   : > { %v3053_v39 = vfloor.f32 %v3021_v56  ;;  %v4094_v21 = vsel %vm12091_vm5, 65537, %v11726_v36  ;;  %v3054_v7 = vfloor.f32 %v3022_v15  ;;  %v18131_v28 = vcvt.s32.f32 %v12117_v3 }
  0xcd   : > { %v12146_v22 = vrot.slane %v4746_v13, 7  ;;  %v3335_v53 = vshrl.u32 %v10100_v54, 16  ;;  %v3338_v31 = vshll.u32 %v10100_v54, 16  ;;  %v4199_v44 = vshrl.u32 %v12018_v24, 16 }
  0xce   : > { %v4644_v43 = vsel %vm12102_vm8, 65537, %v11726_v36  ;;  %v4645_v42 = vsel %vm12112_vm11, 65537, %v11726_v36  ;;  %v3228_v56 = vsel %vm12126_vm14, 65537, %v11726_v36  ;;  %v3229_v15 = vsel %vm12137_vm15, 65537, %v11726_v36 }
  0xcf   : > { %v12161_v13 = vcombine.low %v4093_v26, %v4094_v21  ;;  %v5576_v54 = vshrl.u32 %v10180_v27, 16  ;;  %v5579_v24 = vshll.u32 %v10180_v27, 16  ;;  %v3085_v46 = vmul.f32 16.0, %v3053_v39 }
  0xd0   : > { %v3086_v47 = vmul.f32 16.0, %v3054_v7  ;;  %vm5406_vm2 = vcmp.lt.f32.partialorder %v12023_v32, 13.0  ;;  %v2991_v0 = vadd.f32 0.5, %v18131_v28  ;;  %v18293_v58 = vcvt.s32.f32 %v12131_v18 }
  0xd1   : > { %v12169_v14 = vsel %vm979_vm12, %v4193_v37, %v4197_v16  ;;  %v10149_v41 = vcombine.low %v4644_v43, %v4645_v42  ;;  %v10101_v60 = vcombine.low %v3228_v56, %v3229_v15  ;;  %vm5407_vm0 = vcmp.lt.f32.partialorder %v12042_v34, 13.0  ;;  %vm12181_vm3 = vmpackc.low %vm5406_vm2, %vm5406_vm2 }
  0xd2   : > { %v2992_v4 = vadd.f32 0.5, %v18293_v58  ;;  %v3337_v26 = vrot.slane %v3335_v53, 1  ;;  %v3340_v21 = vrot.slane %v3338_v31, 2  ;;  %v3023_v27 = vmul.f32 0.0625, %v2991_v0  ;;  %vm12191_vm4 = vmpackc.low %vm5407_vm0, %vm5407_vm0 }
  0xd3   : > { %v12175_v7 = vsel %vm3476_vm13, %v11956_v10, %v12124_v52  ;;  %v5578_v28 = vrot.slane %v5576_v54, 6  ;;  %v5581_v32 = vrot.slane %v5579_v24, 7  ;;  %v18294_v58 = vcvt.s32.f32 %v12016_v45 }
  0xd4   : > { %v3024_v39 = vmul.f32 0.0625, %v2992_v4  ;;  %v4751_v53 = vor.u32 %v4749_v25, %v12146_v22  ;;  %v4201_v31 = vor.u32 %v4199_v44, %v4197_v16  ;;  %v4203_v4 = vshll.u32 %v12161_v13, 16 }
  0xd5   : > { %v12179_v38 = vsub.f32 %v18294_v58, %v3085_v46  ;;  %v18298_v43 = vcvt.s32.f32 %v12027_v1  ;;  %v4754_v45 = vshrl.u32 %v10149_v41, 16  ;;  %v3344_v46 = vshrl.u32 %v10101_v60, 16 }
  0xd6   : > { %v3055_v56 = vfloor.f32 %v3023_v27  ;;  %v12196_v15 = vor.u32 %v3340_v21, %v3337_v26  ;;  %v3347_v54 = vshll.u32 %v10101_v60, 16  ;;  %v3056_v16 = vfloor.f32 %v3024_v39 }
  0xd7   : > { %18295 = vst [vmem:[#allocation17_spill] sm:$0xff] %v12179_v38  ;;  %v12189_v42 = vsub.f32 %v18298_v43, %v3086_v47  ;;  %vm4031_vm5 = vcmp.ge.f32.partialorder %v12179_v38, 1.0  ;;  %v12199_v25 = vor.u32 %v5581_v32, %v5578_v28  ;;  %v5470_v47 = vsel %vm12181_vm3, 65537, %v11726_v36 }
  0xd8   : > { %v5471_v1 = vsel %vm12191_vm4, 65537, %v11726_v36  ;;  %vm4582_vm8 = vcmp.lt.f32.partialorder %v12179_v38, 15.0  ;;  %v12208_v44 = vrot.slane %v4203_v4, 1  ;;  %v4757_v24 = vshll.u32 %v10149_v41, 16  ;;  %vm12210_vm10 = vmpackc.low %vm4031_vm5, %vm4031_vm5 }
  0xd9   : > { %18299 = vst [vmem:[#allocation18_spill] sm:$0xff] %v12189_v42  ;;  %vm4032_vm6 = vcmp.ge.f32.partialorder %v12189_v42, 1.0  ;;  %vm4583_vm11 = vcmp.lt.f32.partialorder %v12189_v42, 15.0  ;;  %v12216_v32 = vadd.s32 128, %v11527_v33  ;;  %v12218_v28 = vrot.slane %v4754_v45, 7  ;;  %vm12225_vm2 = vmpackc.low %vm4582_vm8, %vm4582_vm8 }
  0xda   : > { %v3346_v60 = vrot.slane %v3344_v46, 1  ;;  %vm12220_vm14 = vmpackc.low %vm4032_vm6, %vm4032_vm6  ;;  %vm3166_vm15 = vcmp.ge.f32.partialorder %v12179_v38, 3.0  ;;  %v3087_v21 = vmul.f32 16.0, %v3055_v56  ;;  %v3349_v41 = vrot.slane %v3347_v54, 2 }
  0xdb   : > { %v10181_v27 = vcombine.low %v5470_v47, %v5471_v1  ;;  %vm3167_vm0 = vcmp.ge.f32.partialorder %v12189_v42, 3.0  ;;  %v3088_v58 = vmul.f32 16.0, %v3056_v16  ;;  %v12232_v37 = vsel %vm4324_vm9, %v12002_v29, %v4751_v53  ;;  %vm12239_vm3 = vmpackc.low %vm4583_vm11, %vm4583_vm11 }
  0xdc   : > { %v12237_v4 = vsel %vm3298_vm7, %v12054_v19, %v12196_v15  ;;  %vm5408_vm4 = vcmp.lt.f32.partialorder %v12179_v38, 13.0  ;;  %v12245_v10 = vadd.s32 136, %v11527_v33  ;;  %v4095_v45 = vsel %vm12210_vm10, 65537, %v11726_v36  ;;  %vm12253_vm5 = vmpackc.low %vm3166_vm15, %vm3166_vm15 }
  0xdd   : > { %v4096_v29 = vsel %vm12220_vm14, 65537, %v11726_v36  ;;  %vm5409_vm6 = vcmp.lt.f32.partialorder %v12189_v42, 13.0  ;;  %v12261_v46 = vsel %vm979_vm12, %v4201_v31, %v12208_v44  ;;  %v12266_v56 = vsel %vm3476_vm13, %v12124_v52, %v12199_v25  ;;  %vm12269_vm8 = vmpackc.low %vm3167_vm0, %vm3167_vm0  ;;  %v11236_v52 = vld [vmem:[%s18116_s3 + $0x48] sm:$0xff]  }
  0xde   : > { %18312 = vst [vmem:[#allocation19_spill] sm:$0xff] %v12266_v56  ;;  %v4207_v54 = vshrl.u32 %v12161_v13, 16  ;;  %v18315_v47 = vcvt.s32.f32 %v12117_v3  ;;  %v4759_v0 = vor.u32 %v4757_v24, %v12218_v28  ;;  %v12278_v26 = vor.u32 %v3349_v41, %v3346_v60  ;;  %vm12287_vm10 = vmpackc.low %vm5408_vm4, %vm5408_vm4  ;;  %v11234_v60 = vld [vmem:[%s18116_s3 + $0x40] sm:$0xff]  }
  0xdf   : > { %v5585_v31 = vshrl.u32 %v10181_v27, 16  ;;  %v18317_v53 = vcvt.s32.f32 %v12131_v18  ;;  %v12291_v13 = vcombine.low %v4095_v45, %v4096_v29  ;;  %v5588_v3 = vshll.u32 %v10181_v27, 16  ;;  %vm12294_vm14 = vmpackc.low %vm5409_vm6, %vm5409_vm6  ;;  %v11235_v45 = vld [vmem:[%s18116_s3] sm:$0xff]   ;;  %10420 = vmatprep.subr.bf16.mxu1 %v11234_v60 }
  0xe0   : > { %v12275_v1 = vsub.f32 %v18315_v47, %v3087_v21  ;;  %v18138_v18 = vcvt.s32.f32 %v12245_v10  ;;  %v4646_v21 = vsel %vm12225_vm2, 65537, %v11726_v36  ;;  %v4647_v41 = vsel %vm12239_vm3, 65537, %v11726_v36  ;;  %10421 = vmatpush3.bf16.msra.mxu1 %v11235_v45  ;;  %v11237_v45 = vld [vmem:[%s18116_s3 + $0x8] sm:$0xff]  }
  0xe1   : > { %v12282_v42 = vsub.f32 %v18317_v53, %v3088_v58  ;;  %v18323_v27 = vcvt.s32.f32 %v12216_v32  ;;  %v3230_v29 = vsel %vm12253_vm5, 65537, %v11726_v36  ;;  %v3231_v39 = vsel %vm12269_vm8, 65537, %v11726_v36  ;;  %10422 = vmatprep.subr.bf16.mxu1 %v11236_v52  ;;  %v11239_v52 = vld [vmem:[%s18116_s3 + $0x10] sm:$0xff]  }
  0xe2   : > { %18316 = vst [vmem:[#allocation20_spill] sm:$0xff] %v12275_v1  ;;  %vm4033_vm11 = vcmp.ge.f32.partialorder %v12275_v1, 1.0  ;;  %vm4584_vm2 = vcmp.lt.f32.partialorder %v12275_v1, 15.0  ;;  %v2994_v43 = vadd.f32 0.5, %v18138_v18  ;;  %v5472_v47 = vsel %vm12287_vm10, 65537, %v11726_v36 }
  0xe3   : > { %18318 = vst [vmem:[#allocation21_spill] sm:$0xff] %v12282_v42  ;;  %vm4034_vm15 = vcmp.ge.f32.partialorder %v12282_v42, 1.0  ;;  %v2993_v58 = vadd.f32 0.5, %v18323_v27  ;;  %vm12323_vm0 = vmpackc.low %vm4033_vm11, %vm4033_vm11  ;;  %v5473_v19 = vsel %vm12294_vm14, 65537, %v11726_v36  ;;  %vm4585_vm3 = vcmp.lt.f32.partialorder %v12282_v42, 15.0 }
  0xe4   : > { %v4211_v27 = vshll.u32 %v12291_v13, 16  ;;  %v5587_v18 = vrot.slane %v5585_v31, 6  ;;  %v5590_v60 = vrot.slane %v5588_v3, 7  ;;  %vm12338_vm4 = vmpackc.low %vm4034_vm15, %vm4034_vm15  ;;  %vm3168_vm5 = vcmp.ge.f32.partialorder %v12275_v1, 3.0  ;;  %10423 = vmatpush3.bf16.msra.mxu1 %v11237_v45 }
  0xe5   : > { %v3025_v16 = vmul.f32 0.0625, %v2993_v58  ;;  %v12346_v24 = vcombine.low %v4646_v21, %v4647_v41  ;;  %vm12351_vm6 = vmpackc.low %vm4584_vm2, %vm4584_vm2  ;;  %vm3169_vm8 = vcmp.ge.f32.partialorder %v12282_v42, 3.0  ;;  %v3026_v3 = vmul.f32 0.0625, %v2994_v43 }
  0xe6   : > { %v12360_v34 = vor.u32 %v4207_v54, %v12208_v44  ;;  %v10102_v21 = vcombine.low %v3230_v29, %v3231_v39  ;;  %v12362_v41 = vcombine.low %v5472_v47, %v5473_v19  ;;  %vm12367_vm10 = vmpackc.low %vm4585_vm3, %vm4585_vm3  ;;  %vm5410_vm11 = vcmp.lt.f32.partialorder %v12275_v1, 13.0 }
  0xe7   : > { %v3057_v58 = vfloor.f32 %v3025_v16  ;;  %v12374_v43 = vsel %vm4324_vm9, %v12146_v22, %v4759_v0  ;;  %v12379_v44 = vsel %vm3298_vm7, %v12196_v15, %v12278_v26  ;;  %vm12384_vm14 = vmpackc.low %vm3168_vm5, %vm3168_vm5  ;;  %v3058_v29 = vfloor.f32 %v3026_v3 }
  0xe8   : > { %18332 = vst [vmem:[#allocation22_spill] sm:$0xff] %v12374_v43  ;;  %18333 = vst [vmem:[#allocation23_spill] sm:$0xff] %v12379_v44  ;;  %vm5411_vm15 = vcmp.lt.f32.partialorder %v12282_v42, 13.0  ;;  %v12389_v39 = vor.u32 %v5590_v60, %v5587_v18  ;;  %v4097_v22 = vsel %vm12323_vm0, 65537, %v11726_v36  ;;  %v4098_v15 = vsel %vm12338_vm4, 65537, %v11726_v36  ;;  %v11238_v18 = vld [vmem:[%s18116_s3 + $0x50] sm:$0xff]  }
  0xe9   : > { %vm12400_vm2 = vmpackc.low %vm3169_vm8, %vm3169_vm8  ;;  %v3089_v47 = vmul.f32 16.0, %v3057_v58  ;;  %v12407_v19 = vrot.slane %v4211_v27, 1  ;;  %v4762_v53 = vshrl.u32 %v12346_v24, 16  ;;  %v3090_v38 = vmul.f32 16.0, %v3058_v29  ;;  %10424 = vmatprep.subr.bf16.mxu1 %v11238_v18  ;;  %v12483_v60 = vld [vmem:[%s18115_s2] ss:$0 sm:$0xff] }
  0xea   : > { %vm12414_vm0 = vmpackc.low %vm5410_vm11, %vm5410_vm11  ;;  %v3353_v3 = vshrl.u32 %v10102_v21, 16  ;;  %v3356_v58 = vshll.u32 %v10102_v21, 16  ;;  %v5594_v27 = vshrl.u32 %v12362_v41, 16  ;;  %v18340_v45 = vcvt.s32.f32 %v12216_v32  ;;  %10425 = vmatpush3.bf16.msra.mxu1 %v11239_v52 }
  0xeb   : > { %vm12429_vm3 = vmpackc.low %vm5411_vm15, %vm5411_vm15  ;;  %v12433_v16 = vcombine.low %v4097_v22, %v4098_v15  ;;  %v4648_v21 = vsel %vm12351_vm6, 65537, %v11726_v36  ;;  %v4649_v32 = vsel %vm12367_vm10, 65537, %v11726_v36  ;;  %v3232_v42 = vsel %vm12384_vm14, 65537, %v11726_v36  ;;  %v11241_v15 = vld [vmem:[%s18116_s3 + $0x18] sm:$0xff]   ;;  %10426 = vmatprep.subr.bf16.mxu1 %v11240_v30 }
  0xec   : > { %v12424_v63 = vsub.f32 %v18340_v45, %v3089_v47  ;;  %v18344_v47 = vcvt.s32.f32 %v12245_v10  ;;  %v3233_v22 = vsel %vm12400_vm2, 65537, %v11726_v36  ;;  %v5474_v31 = vsel %vm12414_vm0, 65537, %v11726_v36  ;;  %v11243_v10 = vld [vmem:[%s18116_s3 + $0x20] sm:$0xff]  }
  0xed   : > { %v5475_v54 = vsel %vm12429_vm3, 65537, %v11726_v36  ;;  %v5597_v18 = vshll.u32 %v12362_v41, 16  ;;  %v12485_v29 = vrot.slane %v4762_v53, 7  ;;  %v10103_v0 = vcombine.low %v3232_v42, %v3233_v22 }
  0xee   : > { %18341 = vst [vmem:[#allocation24_spill] sm:$0xff] %v12424_v63  ;;  %v12443_v45 = vsub.f32 %v18344_v47, %v3090_v38  ;;  %vm4035_vm4 = vcmp.ge.f32.partialorder %v12424_v63, 1.0  ;;  %vm4586_vm5 = vcmp.lt.f32.partialorder %v12424_v63, 15.0  ;;  %v12473_v38 = vcombine.low %v4648_v21, %v4649_v32  ;;  %10427 = vmatpush3.bf16.msra.mxu1 %v11241_v15 }
  0xef   : > { %vm12457_vm8 = vmpackc.low %vm4035_vm4, %vm4035_vm4  ;;  %vm3170_vm14 = vcmp.ge.f32.partialorder %v12424_v63, 3.0  ;;  %v12487_v47 = vrot.slane %v3353_v3, 1  ;;  %v12497_v21 = vrot.slane %v3356_v58, 2  ;;  %v12499_v32 = vrot.slane %v5594_v27, 6  ;;  %v11242_v3 = vld [vmem:[%s18116_s3 + $0x60] sm:$0xff]  }
  0xf0   : > { %18345 = vst [vmem:[#allocation25_spill] sm:$0xff] %v12443_v45  ;;  %vm4036_vm6 = vcmp.ge.f32.partialorder %v12443_v45, 1.0  ;;  %vm4587_vm10 = vcmp.lt.f32.partialorder %v12443_v45, 15.0  ;;  %vm12492_vm15 = vmpackc.low %vm4586_vm5, %vm4586_vm5  ;;  %vm3171_vm2 = vcmp.ge.f32.partialorder %v12443_v45, 3.0  ;;  %v10183_v30 = vcombine.low %v5474_v31, %v5475_v54  ;;  %10428 = vmatprep.subr.bf16.mxu1 %v11242_v3 }
  0xf1   : > { %vm12475_vm11 = vmpackc.low %vm4036_vm6, %vm4036_vm6  ;;  %v4650_v42 = vsel %vm12492_vm15, 65537, %v11726_v36  ;;  %v4219_v22 = vshll.u32 %v12433_v16, 16  ;;  %v4099_v58 = vsel %vm12457_vm8, 65537, %v11726_v36  ;;  %v5599_v1 = vrot.slane %v5597_v18, 7 }
  0xf2   : > { %vm4619_vm0 = vmpackc.low %vm4587_vm10, %vm4587_vm10  ;;  %v4100_v27 = vsel %vm12475_vm11, 65537, %v11726_v36  ;;  %v4770_v52 = vshrl.u32 %v12473_v38, 16  ;;  %10429 = vmatpush3.bf16.msra.mxu1 %v11243_v10  ;;  %v5603_v45 = vshrl.u32 %v10183_v30, 16  ;;  %v5606_v63 = vshll.u32 %v10183_v30, 16 }
  0xf3   : > { %v4651_v31 = vsel %vm4619_vm0, 65537, %v11726_v36  ;;  %vm12521_vm3 = vmpackc.low %vm3170_vm14, %vm3170_vm14  ;;  %v12546_v59 = vcombine.low %v4099_v58, %v4100_v27  ;;  %v12551_v3 = vrot.slane %v4219_v22, 1  ;;  %v4223_v54 = vshrl.u32 %v12433_v16, 16 }
  0xf4   : > { %v12530_v55 = vcombine.low %v4650_v42, %v4651_v31  ;;  %vm12535_vm4 = vmpackc.low %vm3171_vm2, %vm3171_vm2  ;;  %v3234_v62 = vsel %vm12521_vm3, 65537, %v11726_v36  ;;  %v12558_v58 = vrot.slane %v4770_v52, 7  ;;  %v4773_v30 = vshll.u32 %v12473_v38, 16  ;;  %v11246_v38 = vld [vmem:[%s18116_s3 + $0x70] sm:$0xff]  }
  0xf5   : > { %v3235_v18 = vsel %vm12535_vm4, 65537, %v11726_v36  ;;  %18356 = vst [vmem:[#allocation26_spill] sm:$0xff] %v12546_v59  ;;  %vm4291_vm5 = vcmp.ne.s16.totalorder %v11680_v17, 0  ;;  %vm4841_vm6 = vcmp.ne.s16.totalorder %v11768_v49, 0  ;;  %v5605_v16 = vrot.slane %v5603_v45, 6 }
  0xf6   : > { %v4778_v44 = vshrl.u32 %v12530_v55, 16  ;;  %v10104_v8 = vcombine.low %v3234_v62, %v3235_v18  ;;  %v4227_v62 = vshll.u32 %v12546_v59, 16  ;;  %vm3443_vm8 = vcmp.ne.s16.totalorder %v11796_v2, 0  ;;  %v11250_v2 = vld [vmem:[%s18116_s3 + $0xc0] sm:$0xff]  }
  0xf7   : > { %vm1183_vm10 = vcmask 1046528   ;;  %vm5683_vm11 = vcmp.ne.s16.totalorder %v11952_v51, 0  ;;  %vm4842_vm14 = vcmp.ne.s16.totalorder %v11791_v61, 0  ;;  %vm4292_vm15 = vcmp.ne.s16.totalorder %v11950_v50, 0 }
  0xf8   : > { %v3371_v22 = vshrl.u32 %v10104_v8, 16  ;;  %v12568_v52 = vrot.slane %v4778_v44, 7  ;;  %v12579_v44 = vsel %vm3476_vm13, %v12199_v25, %v12389_v39  ;;  %vm5684_vm2 = vcmp.ne.s16.totalorder %v11972_v57, 0 }
  0xf9   : > { %vm4843_vm0 = vcmp.ne.s16.totalorder %v11982_v20, 0  ;;  %vm3444_vm3 = vcmp.ne.s16.totalorder %v11988_v23, 0  ;;  %vm4293_vm4 = vcmp.ne.s16.totalorder %v12089_v35, 0 }
  0xfa   : > { %18357 = vst [vmem:[#allocation27_spill] sm:$0xff] %v12568_v52 }
 0x109   : > { %v745_v53 = vpop.f32.mrb[0].mxu0 }
 0x10a   : > { %v746_v15 = vadd.f32 %v12483_v60, %v745_v53  ;;  %v747_v41 = vpop.f32.mrb[1].mxu0  ;;  %v3362_v53 = vshrl.u32 %v10103_v0, 16 }
 0x10b   : > { %v748_v6 = vpop.f32.mrb[2].mxu0  ;;  %v3365_v41 = vshll.u32 %v10103_v0, 16  ;;  %v11244_v0 = vld [vmem:[%s18116_s3 + $0x68] sm:$0xff]  }
 0x10c   : > { %v749_v42 = vadd.f32 %v12483_v60, %v748_v6  ;;  %v750_v31 = vpop.f32.mrb[3].mxu0  ;;  %v872_v36 = vmax.f32 %v746_v15, 0.0  ;;  %v11245_v6 = vld [vmem:[%s18116_s3 + $0x28] sm:$0xff]   ;;  %10430 = vmatprep.subr.bf16.mxu1 %v11244_v0  ;;  %v3364_v27 = vrot.slane %v3362_v53, 1  ;;  %v5608_v15 = vrot.slane %v5606_v63, 7  ;;  %v11247_v63 = vld [vmem:[%s18116_s3 + $0x30] sm:$0xff]  }
 0x10d   : > { %v3367_v10 = vrot.slane %v3365_v41, 2  ;;  %v3374_v31 = vshll.u32 %v10104_v8, 16  ;;  %10431 = vmatpush3.bf16.msra.mxu1 %v11245_v6  ;;  %v3373_v53 = vrot.slane %v3371_v22, 1  ;;  %v3359_v6 = vor.u32 %v12497_v21, %v12487_v47 }
 0x10e   : > { %v873_v43 = vmax.f32 %v749_v42, 0.0  ;;  %10432 = vmatprep.subr.bf16.mxu1 %v11246_v38  ;;  %v18359_v22 = vshrl.u32 %v12291_v13, 16  ;;  %v11248_v13 = vld [vmem:[%s18116_s3 + $0x78] sm:$0xff]  }
 0x10f   : > { %v3376_v41 = vrot.slane %v3374_v31, 2  ;;  %v3368_v38 = vor.u32 %v3367_v10, %v3364_v27  ;;  %v12610_v27 = vsel %vm979_vm12, %v12360_v34, %v12407_v19 }
 0x110   : > { %v904_v56 = vpack.c.bf16 %v873_v43, %v872_v36  ;;  %v4781_v43 = vshll.u32 %v12530_v55, 16  ;;  %v18358_v55 = vshll.u32 %v12346_v24, 16  ;;  %v4217_v31 = vor.u32 %v18359_v22, %v12407_v19 }
 0x111   : > { %v753_v18 = vpop.f32.mrb[4].mxu0  ;;  %10433 = vmatpush3.bf16.msra.mxu1 %v11247_v63  ;;  %v4775_v24 = vor.u32 %v4773_v30, %v12558_v58  ;;  %v11249_v30 = vld [vmem:[%s18116_s3 + $0x38] sm:$0xff]  }
 0x112   : > { %920 = vst [vmem:[#allocation2 + $0x8] sm:$0xff] %v904_v56  ;;  %v754_v42 = vadd.f32 %v12483_v60, %v753_v18  ;;  %v755_v0 = vpop.f32.mrb[5].mxu0  ;;  %v983_v8 = vshll.u32 %v904_v56, 16  ;;  %950 = vst.msk [vmem:[#allocation4] sm:$0xff] %vm392_vm1, %v904_v56  ;;  %v4767_v45 = vor.u32 %v18358_v55, %v12485_v29  ;;  %v5600_v18 = vor.u32 %v5599_v1, %v12499_v32 }
 0x113   : > { %v756_v36 = vpop.f32.mrb[6].mxu0  ;;  %v4225_v0 = vor.u32 %v4223_v54, %v12551_v3  ;;  %v12594_v55 = vor.u32 %v5608_v15, %v5605_v16  ;;  %v12599_v1 = vrot.slane %v4227_v62, 1  ;;  %v4783_v21 = vor.u32 %v4781_v43, %v12568_v52  ;;  %10434 = vmatprep.subr.bf16.mxu1 %v11248_v13 }
 0x114   : > { %v757_v25 = vadd.f32 %v12483_v60, %v756_v36  ;;  %v758_v59 = vpop.f32.mrb[7].mxu0  ;;  %v985_v47 = vrot.slane %v983_v8, 1  ;;  %v12602_v32 = vor.u32 %v3376_v41, %v3373_v53  ;;  %v12614_v10 = vsel %vm4324_vm9, %v12218_v28, %v4767_v45 }
 0x115   : > { %v874_v59 = vmax.f32 %v754_v42, 0.0  ;;  %v981_v62 = vshrl.u32 %v904_v56, 16  ;;  %v12618_v16 = vsel %vm3298_vm7, %v12278_v26, %v3359_v6  ;;  %v12622_v15 = vsel %vm979_vm12, %v4217_v31, %v12551_v3  ;;  %10435 = vmatpush3.bf16.msra.mxu1 %v11249_v30 }
 0x116   : > { %18360 = vst [vmem:[#allocation28_spill] sm:$0xff] %v12602_v32  ;;  %v875_v54 = vmax.f32 %v757_v25, 0.0  ;;  %v12626_v43 = vsel %vm3476_vm13, %v12389_v39, %v5600_v18  ;;  %v12633_v28 = vsel %vm4324_vm9, %v12485_v29, %v4775_v24  ;;  %v12636_v56 = vsel %vm3298_vm7, %v3359_v6, %v3368_v38  ;;  %10520 = vmatprep.subr.bf16.mxu1 %v11250_v2 }
 0x117   : > { %v12640_v26 = vsel %vm3476_vm13, %v5600_v18, %v12594_v55  ;;  %v986_v3 = vor.u32 %v985_v47, %v981_v62  ;;  %v12644_v41 = vsel %vm979_vm12, %v4225_v0, %v12599_v1  ;;  %v12648_v42 = vsel %vm4324_vm9, %v12558_v58, %v4783_v21 }
 0x118   : > { %v12628_v34 = vpack.c.bf16 %v875_v54, %v874_v59  ;;  %v12652_v29 = vsel %vm3298_vm7, %v3368_v38, %v12602_v32  ;;  %v12661_v58 = vadd.s32 144, %v11527_v33  ;;  %v12669_v0 = vadd.s32 152, %v11527_v33 }
 0x119   : > { %v761_v19 = vpop.f32.mrb[8].mxu0  ;;  %v1153_v39 = vld [vmem:[#allocation2 + $0x8] sm:$0xfe] }
 0x11a   : > { %v4003_v53 = vld [vmem:[#allocation2 + $0x8] sm:$0xff]  ;;  %921 = vst [vmem:[#allocation2 + $0x10] sm:$0xff] %v12628_v34  ;;  %v762_v8 = vadd.f32 %v12483_v60, %v761_v19  ;;  %v763_v63 = vpop.f32.mrb[9].mxu0  ;;  %1269 = vrot.lane.b32.xlu0 %v12628_v34, %s11376_s15  ;;  %v988_v45 = vshll.u32 %v12628_v34, 16  ;;  %v1184_v36 = vrot.slane %v1153_v39, 1  ;;  %v1185_v22 = vrot.slane %v12628_v34, 1 }
 0x11b   : > { %v764_v6 = vpop.f32.mrb[10].mxu0  ;;  %v4308_v31 = vsel %vm4291_vm5, %v4003_v53, 0  ;;  %v4858_v18 = vsel %vm4841_vm6, %v4003_v53, 0  ;;  %v3460_v13 = vsel %vm3443_vm8, %v4003_v53, 0  ;;  %v5379_v21 = vld [vmem:[#allocation2 + $0x8] sm:$0xfe] }
 0x11c   : > { %v765_v25 = vadd.f32 %v12483_v60, %v764_v6  ;;  %v766_v24 = vpop.f32.mrb[11].mxu0  ;;  %v990_v38 = vrot.slane %v988_v45, 1  ;;  %v4330_v47 = vshrl.u32 %v4308_v31, 16  ;;  %v876_v59 = vmax.f32 %v762_v8, 0.0 }
 0x11d   : > { %v992_v17 = vshrl.u32 %v12628_v34, 16  ;;  %v1186_v49 = vsel %vm1183_vm10, %v1184_v36, %v1185_v22  ;;  %v4878_v54 = vshll.u32 %v4858_v18, 16  ;;  %v4333_v39 = vshll.u32 %v4308_v31, 16 }
 0x11e   : > { %v877_v30 = vmax.f32 %v765_v25, 0.0  ;;  %v991_v62 = vsel %vm979_vm12, %v986_v3, %v990_v38  ;;  %1227 = vst.msk [vmem:[#allocation4 + $0x8] sm:$0xff] %vm392_vm1, %v1186_v49  ;;  %v12679_v19 = vrot.slane %v4330_v47, 7  ;;  %v3486_v8 = vshrl.u32 %v3460_v13, 16 }
 0x11f   : > { %1096 = vrot.lane.b32.xlu0 %v991_v62, %s11376_s15  ;;  %v4880_v53 = vrot.slane %v4878_v54, 1  ;;  %v3489_v34 = vshll.u32 %v3460_v13, 16  ;;  %v5700_v63 = vsel %vm5683_vm11, %v5379_v21, 0  ;;  %v4876_v36 = vshrl.u32 %v4858_v18, 16 }
 0x120   : > { %v906_v45 = vpack.c.bf16 %v877_v30, %v876_v59  ;;  %v994_v31 = vor.u32 %v992_v17, %v990_v38  ;;  %v4335_v49 = vor.u32 %v4333_v39, %v12679_v19  ;;  %v3488_v54 = vrot.slane %v3486_v8, 6 }
 0x121   : > { %v769_v25 = vpop.f32.mrb[12].mxu0  ;;  %v1484_v24 = vld [vmem:[#allocation2 + $0x10] sm:$0xfe]  ;;  %v3491_v62 = vrot.slane %v3489_v34, 7  ;;  %v5718_v21 = vshrl.u32 %v5700_v63, 16  ;;  %v5721_v38 = vshll.u32 %v5700_v63, 16  ;;  %v4881_v2 = vor.u32 %v4880_v53, %v4876_v36 }
 0x122   : > { %v12689_v47 = vld [vmem:[#allocation2 + $0x10] sm:$0xff]  ;;  %922 = vst [vmem:[#allocation2 + $0x18] sm:$0xff] %v906_v45  ;;  %v770_v51 = vadd.f32 %v12483_v60, %v769_v25  ;;  %v771_v13 = vpop.f32.mrb[13].mxu0  ;;  %1271 = vrot.lane.b32.xlu1 %v906_v45, %s11376_s15  ;;  %v996_v18 = vshll.u32 %v906_v45, 16  ;;  %v1000_v17 = vshrl.u32 %v906_v45, 16  ;;  %v12697_v30 = vrot.slane %v906_v45, 1 }
 0x123   : > { %951 = vst.msk [vmem:[#allocation4 + $0x28] sm:$0xff] %vm392_vm1, %v12689_v47  ;;  %v772_v59 = vpop.f32.mrb[14].mxu0  ;;  %v12702_v39 = vsel %vm4842_vm14, %v12689_v47, 0  ;;  %v1514_v13 = vrot.slane %v1484_v24, 1  ;;  %v12711_v45 = vsel %vm4324_vm9, %v11766_v48, %v4335_v49  ;;  %v12713_v61 = vor.u32 %v3491_v62, %v3488_v54 }
 0x124   : > { %v773_v8 = vadd.f32 %v12483_v60, %v772_v59  ;;  %v774_v34 = vpop.f32.mrb[15].mxu0  ;;  %v998_v25 = vrot.slane %v996_v18, 1  ;;  %v4883_v6 = vshll.u32 %v12702_v39, 16  ;;  %v1188_v63 = vsel %vm1183_vm10, %v1185_v22, %v12697_v30  ;;  %18361 = vst [vmem:[#allocation29_spill] sm:$0xff] %v12711_v45 }
 0x125   : > { %v4309_v53 = vsel %vm4292_vm15, %v12689_v47, 0  ;;  %v878_v36 = vmax.f32 %v770_v51, 0.0  ;;  %1228 = vst.msk [vmem:[#allocation4 + $0x30] sm:$0xff] %vm392_vm1, %v1188_v63  ;;  %v5701_v50 = vsel %vm5684_vm2, %v12689_v47, 0  ;;  %v5720_v62 = vrot.slane %v5718_v21, 1 }
 0x126   : > { %v879_v24 = vmax.f32 %v773_v8, 0.0  ;;  %v999_v18 = vsel %vm979_vm12, %v994_v31, %v998_v25  ;;  %v1648_v59 = vor.u32 %v1000_v17, %v998_v25  ;;  %v12722_v22 = vrot.slane %v4883_v6, 1 }
 0x127   : > { %1098 = vrot.lane.b32.xlu1 %v999_v18, %s11376_s15  ;;  %v4338_v48 = vshrl.u32 %v4309_v53, 16  ;;  %v4341_v49 = vshll.u32 %v4309_v53, 16  ;;  %v5723_v34 = vrot.slane %v5721_v38, 2  ;;  %v5726_v51 = vshrl.u32 %v5701_v50, 16 }
 0x128   : > { %v907_v54 = vpack.c.bf16 %v879_v24, %v878_v36  ;;  %v12729_v31 = vsel %vm1183_vm10, %v1514_v13, %v12697_v30  ;;  %v18362_v6 = vor.u32 %v11812_v12, %v11810_v9  ;;  %v5729_v21 = vshll.u32 %v5701_v50, 16 }
 0x129   : > { %v1814_v8 = vld [vmem:[#allocation2 + $0x18] sm:$0xfe]  ;;  %v777_v3 = vpop.f32.mrb[16].mxu0  ;;  %v12740_v57 = vrot.slane %v4338_v48, 7  ;;  %v12752_v18 = vsel %vm979_vm12, %v4881_v2, %v12722_v22  ;;  %v5728_v48 = vrot.slane %v5726_v51, 1  ;;  %vm5685_vm5 = vcmp.ne.s16.totalorder %v11992_v40, 0 }
 0x12a   : > { %v12731_v17 = vld [vmem:[#allocation2 + $0x18] sm:$0xff]  ;;  %v12738_v25 = vsel %vm3476_vm13, %v18362_v6, %v12713_v61  ;;  %v1844_v38 = vrot.slane %v1814_v8, 1  ;;  %923 = vst [vmem:[#allocation2 + $0x20] sm:$0xff] %v907_v54  ;;  %v12742_v63 = vrot.slane %v907_v54, 1  ;;  %v778_v53 = vadd.f32 %v12483_v60, %v777_v3  ;;  %v779_v13 = vpop.f32.mrb[17].mxu0  ;;  %1273 = vrot.lane.b32.xlu0 %v907_v54, %s11376_s15  ;;  %18364 = vst [vmem:[#allocation31_spill] sm:$0xff] %v12752_v18 }
 0x12b   : > { %18363 = vst [vmem:[#allocation30_spill] sm:$0xff] %v12738_v25  ;;  %v1004_v36 = vshll.u32 %v907_v54, 16  ;;  %952 = vst.msk [vmem:[#allocation4 + $0x50] sm:$0xff] %vm392_vm1, %v12731_v17  ;;  %v12748_v9 = vld [vmem:[#allocation2 + $0x18] sm:$0xff]  ;;  %v780_v12 = vpop.f32.mrb[18].mxu0  ;;  %v1008_v24 = vshrl.u32 %v907_v54, 16  ;;  %v4343_v13 = vor.u32 %v4341_v49, %v12740_v57  ;;  %v5724_v54 = vor.u32 %v5723_v34, %v5720_v62 }
 0x12c   : > { %1613 = vst.msk [vmem:[#allocation4 + $0x18] sm:$0xff] %vm392_vm1, %v12748_v9  ;;  %v781_v3 = vadd.f32 %v12483_v60, %v780_v12  ;;  %v782_v50 = vpop.f32.mrb[19].mxu0  ;;  %v1846_v6 = vsel %vm1183_vm10, %v1844_v38, %v12742_v63  ;;  %vm4844_vm6 = vcmp.ne.s16.totalorder %v12109_v11, 0  ;;  %v12766_v2 = vsel %vm1183_vm10, %v12697_v30, %v12742_v63 }
 0x12d   : > { %v1006_v8 = vrot.slane %v1004_v36, 1  ;;  %1887 = vst.msk [vmem:[#allocation4 + $0x20] sm:$0xff] %vm392_vm1, %v1846_v6  ;;  %v5731_v51 = vrot.slane %v5729_v21, 2  ;;  %v12771_v36 = vsel %vm4843_vm0, %v12731_v17, 0  ;;  %v880_v38 = vmax.f32 %v778_v53, 0.0 }
 0x12e   : > { %v881_v49 = vmax.f32 %v781_v3, 0.0  ;;  %v4887_v6 = vshrl.u32 %v12702_v39, 16  ;;  %v4891_v62 = vshll.u32 %v12771_v36, 16  ;;  %v3461_v20 = vsel %vm3444_vm3, %v12689_v47, 0 }
 0x12f   : > { %v12774_v12 = vsel %vm979_vm12, %v1648_v59, %v1006_v8  ;;  %v12778_v50 = vor.u32 %v5731_v51, %v5728_v48  ;;  %vm3445_vm8 = vcmp.ne.s16.totalorder %v12122_v5, 0  ;;  %v3495_v21 = vshrl.u32 %v3461_v20, 16 }
 0x130   : > { %1100 = vrot.lane.b32.xlu1 %v12774_v12, %s11376_s15  ;;  %v12786_v34 = vpack.c.bf16 %v881_v49, %v880_v38  ;;  %v3498_v59 = vshll.u32 %v3461_v20, 16  ;;  %v4310_v53 = vsel %vm4293_vm4, %v12731_v17, 0  ;;  %v1010_v3 = vor.u32 %v1008_v24, %v1006_v8 }
 0x131   : > { %v785_v48 = vpop.f32.mrb[20].mxu0  ;;  %v12791_v51 = vld [vmem:[#allocation2 + $0x20] sm:$0xff]  ;;  %v12795_v39 = vsel %vm4324_vm9, %v12679_v19, %v4343_v13  ;;  %v12799_v23 = vsel %vm3298_vm7, %v5724_v54, %v12778_v50  ;;  %v4346_v47 = vshrl.u32 %v4310_v53, 16  ;;  %v4889_v8 = vor.u32 %v4887_v6, %v12722_v22 }
 0x132   : > { %18365 = vst [vmem:[#allocation32_spill] sm:$0xff] %v12795_v39  ;;  %18366 = vst [vmem:[#allocation33_spill] sm:$0xff] %v12799_v23  ;;  %v12801_v38 = vld [vmem:[#allocation2 + $0x20] sm:$0xff]  ;;  %v786_v49 = vadd.f32 %v12483_v60, %v785_v48  ;;  %v787_v24 = vpop.f32.mrb[21].mxu0  ;;  %1275 = vrot.lane.b32.xlu0 %v12786_v34, %s11376_s15  ;;  %v1012_v19 = vshll.u32 %v12786_v34, 16  ;;  %v18170_v54 = vrot.slane %v12791_v51, 1 }
 0x133   : > { %924 = vst [vmem:[#allocation2 + $0x28] sm:$0xff] %v12786_v34  ;;  %953 = vst.msk [vmem:[#allocation4 + $0x78] sm:$0xff] %vm392_vm1, %v12791_v51  ;;  %v788_v13 = vpop.f32.mrb[22].mxu0  ;;  %v12815_v20 = vrot.slane %v4891_v62, 1  ;;  %v3497_v48 = vrot.slane %v3495_v21, 6  ;;  %v3500_v24 = vrot.slane %v3498_v59, 7 }
 0x134   : > { %1614 = vst.msk [vmem:[#allocation4 + $0x40] sm:$0xff] %vm392_vm1, %v12801_v38  ;;  %v789_v35 = vadd.f32 %v12483_v60, %v788_v13  ;;  %v790_v23 = vpop.f32.mrb[23].mxu0  ;;  %v1905_v25 = vld [vmem:[#allocation4 + $0x20] sm:$0xff]  ;;  %v1014_v39 = vrot.slane %v1012_v19, 1  ;;  %v18367_v18 = vrot.slane %v12786_v34, 1  ;;  %v1016_v6 = vshrl.u32 %v12786_v34, 16 }
 0x135   : > { %v12825_v45 = vld [vmem:[#allocation2 + $0x20] sm:$0xff]  ;;  %vm4294_vm11 = vcmp.ne.s16.totalorder %v12169_v14, 0  ;;  %11088 = vmatprep.mubr.msk.bf16.mxu0 %vm392_vm1, %v1905_v25  ;;  %v1190_v62 = vsel %vm1183_vm10, %v12697_v30, %v18170_v54  ;;  %v1641_v21 = vld [vmem:[#allocation2 + $0x88] sm:$0x1]  ;;  %v12835_v59 = vor.u32 %v3500_v24, %v3497_v48  ;;  %v882_v23 = vmax.f32 %v786_v49, 0.0 }
 0x136   : > { %v12822_v22 = vsel %vm1183_vm10, %v12742_v63, %v18367_v18  ;;  %v12837_v63 = vrot.slane %v4346_v47, 7  ;;  %v4349_v18 = vshll.u32 %v4310_v53, 16  ;;  %v883_v19 = vmax.f32 %v789_v35, 0.0  ;;  %1229 = vst.msk [vmem:[#allocation4 + $0x58] sm:$0xff] %vm392_vm1, %v1190_v62  ;;  %v3140_v35 = vld [vmem:[#allocation2 + $0x18] sm:$0xff] }
 0x137   : > { %18368 = vst [vmem:[#allocation34_spill] sm:$0xff] %v12822_v22  ;;  %1888 = vst.msk [vmem:[#allocation4 + $0x48] sm:$0xff] %vm392_vm1, %v12822_v22  ;;  %v12840_v13 = vsel %vm979_vm12, %v1010_v3, %v1014_v39  ;;  %v1754_v25 = vshll.u32 %v1641_v21, 16  ;;  %vm5686_vm14 = vcmp.ne.s16.totalorder %v12175_v7, 0  ;;  %vm4845_vm15 = vcmp.ne.s16.totalorder %v12232_v37, 0 }
 0x138   : > { %1102 = vrot.lane.b32.xlu1 %v12840_v13, %s11376_s15  ;;  %v12849_v30 = vsel %vm979_vm12, %v4889_v8, %v12815_v20  ;;  %v4351_v53 = vor.u32 %v4349_v18, %v12837_v63  ;;  %v5702_v3 = vsel %vm5685_vm5, %v12731_v17, 0  ;;  %v12858_v47 = vsel %vm4844_vm6, %v12825_v45, 0 }
 0x139   : > { %18369 = vst [vmem:[#allocation35_spill] sm:$0xff] %v12849_v30  ;;  %v12860_v49 = vpack.c.bf16 %v883_v19, %v882_v23  ;;  %v1018_v48 = vor.u32 %v1016_v6, %v1014_v39  ;;  %v5735_v24 = vshrl.u32 %v5702_v3, 16  ;;  %v5738_v62 = vshll.u32 %v5702_v3, 16  ;;  %v793_v21 = vpop.f32.mrb[24].mxu0 }
 0x13a   : > { %v12862_v8 = vld [vmem:[#allocation2 + $0x28] sm:$0xff]  ;;  %v12864_v54 = vrot.slane %v1754_v25, 1  ;;  %v12869_v40 = vsel %vm3476_vm13, %v12713_v61, %v12835_v59  ;;  %v12873_v11 = vsel %vm4324_vm9, %v12740_v57, %v4351_v53  ;;  %v4899_v17 = vshll.u32 %v12858_v47, 16  ;;  %v795_v18 = vpop.f32.mrb[25].mxu0 }
 0x13b   : > { %18370 = vst [vmem:[#allocation36_spill] sm:$0xff] %v12869_v40  ;;  %18371 = vst [vmem:[#allocation37_spill] sm:$0xff] %v12873_v11  ;;  %vm3446_vm2 = vcmp.ne.s16.totalorder %v12237_v4, 0  ;;  %v794_v6 = vadd.f32 %v12483_v60, %v793_v21  ;;  %1277 = vrot.lane.b32.xlu0 %v12860_v49, %s11376_s15  ;;  %v1020_v61 = vshll.u32 %v12860_v49, 16  ;;  %v3462_v57 = vsel %vm3445_vm8, %v3140_v35, 0  ;;  %v12887_v23 = vld [vmem:[#allocation2 + $0x28] sm:$0xff] }
 0x13c   : > { %925 = vst [vmem:[#allocation2 + $0x30] sm:$0xff] %v12860_v49  ;;  %954 = vst.msk [vmem:[#allocation4 + $0xa0] sm:$0xff] %vm392_vm1, %v12862_v8  ;;  %v796_v19 = vpop.f32.mrb[26].mxu0  ;;  %v18172_v25 = vrot.slane %v12862_v8, 1  ;;  %v5737_v53 = vrot.slane %v5735_v24, 1  ;;  %v5740_v3 = vrot.slane %v5738_v62, 2 }
 0x13d   : > { %v4895_v21 = vshrl.u32 %v12771_v36, 16  ;;  %1615 = vst.msk [vmem:[#allocation4 + $0x68] sm:$0xff] %vm392_vm1, %v12887_v23  ;;  %v797_v18 = vadd.f32 %v12483_v60, %v796_v19  ;;  %v798_v39 = vpop.f32.mrb[27].mxu0  ;;  %v1022_v11 = vrot.slane %v1020_v61, 1  ;;  %v18372_v5 = vrot.slane %v12860_v49, 1 }
 0x13e   : > { %v1910_v40 = vld [vmem:[#allocation4 + $0x48] sm:$0xff]  ;;  %v18373_v35 = vrot.slane %v12786_v34, 1  ;;  %v1024_v24 = vshrl.u32 %v12860_v49, 16  ;;  %v18375_v36 = vrot.slane %v12791_v51, 1  ;;  %v12910_v39 = vor.u32 %v5740_v3, %v5737_v53 }
 0x13f   : > { %11089 = vmatmul.mubr.msk.bf16.vlgmr.msra.gmra.mrb[64].mxu0 %vm392_vm1, %v1910_v40  ;;  %v12912_v61 = vrot.slane %v4899_v17, 1  ;;  %v3504_v34 = vshrl.u32 %v3462_v57, 16  ;;  %vm4295_vm0 = vcmp.ne.s16.totalorder %v12261_v46, 0  ;;  %v884_v19 = vmax.f32 %v794_v6, 0.0 }
 0x140   : > { %v12899_v30 = vsel %vm1183_vm10, %v18373_v35, %v18372_v5  ;;  %v1192_v62 = vsel %vm1183_vm10, %v18375_v36, %v18172_v25  ;;  %v885_v5 = vmax.f32 %v797_v18, 0.0  ;;  %v12916_v40 = vsel %vm979_vm12, %v1018_v48, %v1022_v11 }
 0x141   : > { %18374 = vst [vmem:[#allocation38_spill] sm:$0xff] %v12899_v30  ;;  %1889 = vst.msk [vmem:[#allocation4 + $0x70] sm:$0xff] %vm392_vm1, %v12899_v30  ;;  %v3507_v35 = vshll.u32 %v3462_v57, 16  ;;  %v12919_v30 = vld [vmem:[#allocation2 + $0x28] sm:$0xff]  ;;  %1104 = vrot.lane.b32.xlu1 %v12916_v40, %s11376_s15  ;;  %v1026_v51 = vor.u32 %v1024_v24, %v1022_v11  ;;  %v4897_v17 = vor.u32 %v4895_v21, %v12815_v20  ;;  %v3506_v53 = vrot.slane %v3504_v34, 6  ;;  %v801_v36 = vpop.f32.mrb[28].mxu0 }
 0x142   : > { %1230 = vst.msk [vmem:[#allocation4 + $0x80] sm:$0xff] %vm392_vm1, %v1192_v62  ;;  %v4311_v6 = vsel %vm4294_vm11, %v12825_v45, 0  ;;  %v12927_v3 = vpack.c.bf16 %v885_v5, %v884_v19  ;;  %v12932_v48 = vsel %vm3298_vm7, %v12778_v50, %v12910_v39  ;;  %v5703_v14 = vsel %vm5686_vm14, %v12825_v45, 0  ;;  %v803_v34 = vpop.f32.mrb[29].mxu0 }
 0x143   : > { %18376 = vst [vmem:[#allocation39_spill] sm:$0xff] %v12932_v48  ;;  %v3509_v57 = vrot.slane %v3507_v35, 7  ;;  %v4354_v18 = vshrl.u32 %v4311_v6, 16  ;;  %v12934_v62 = vld [vmem:[#allocation2 + $0x30] sm:$0xff]  ;;  %v12938_v20 = vsel %vm979_vm12, %v4897_v17, %v12912_v61  ;;  %v4357_v11 = vshll.u32 %v4311_v6, 16  ;;  %v804_v5 = vpop.f32.mrb[30].mxu0 }
 0x144   : > { %18377 = vst [vmem:[#allocation40_spill] sm:$0xff] %v12938_v20  ;;  %v12946_v21 = vsel %vm4845_vm15, %v12919_v30, 0  ;;  %926 = vst [vmem:[#allocation2 + $0x38] sm:$0xff] %v12927_v3  ;;  %v802_v24 = vadd.f32 %v12483_v60, %v801_v36  ;;  %1279 = vrot.lane.b32.xlu0 %v12927_v3, %s11376_s15  ;;  %v1028_v19 = vshll.u32 %v12927_v3, 16  ;;  %v4903_v7 = vshrl.u32 %v12858_v47, 16  ;;  %v12957_v37 = vld [vmem:[#allocation2 + $0x30] sm:$0xff] }
 0x145   : > { %955 = vst.msk [vmem:[#allocation4 + $0xc8] sm:$0xff] %vm392_vm1, %v12934_v62  ;;  %18378 = vst [vmem:[#allocation41_spill] sm:$0xff] %v12957_v37  ;;  %v18174_v35 = vrot.slane %v12934_v62, 1  ;;  %v12960_v17 = vor.u32 %v3509_v57, %v3506_v53  ;;  %v12962_v6 = vrot.slane %v4354_v18, 7  ;;  %v5744_v36 = vshrl.u32 %v5703_v14, 16  ;;  %v18379_v34 = vld [vmem:[#allocation19_spill] sm:$0xff] }
 0x146   : > { %vm5687_vm3 = vcmp.ne.s16.totalorder %v18379_v34, 0  ;;  %1616 = vst.msk [vmem:[#allocation4 + $0x90] sm:$0xff] %vm392_vm1, %v12957_v37  ;;  %v805_v25 = vadd.f32 %v12483_v60, %v804_v5  ;;  %v806_v50 = vpop.f32.mrb[31].mxu0  ;;  %v1030_v47 = vrot.slane %v1028_v19, 1  ;;  %v18380_v20 = vrot.slane %v12927_v3, 1 }
 0x147   : > { %v18381_v32 = vrot.slane %v12860_v49, 1  ;;  %v3463_v57 = vsel %vm3446_vm2, %v12825_v45, 0  ;;  %v886_v18 = vmax.f32 %v802_v24, 0.0  ;;  %v1032_v50 = vshrl.u32 %v12927_v3, 16 }
 0x148   : > { %v1915_v48 = vld [vmem:[#allocation4 + $0x70] sm:$0xff]  ;;  %v18383_v19 = vrot.slane %v12862_v8, 1  ;;  %v887_v4 = vmax.f32 %v805_v25, 0.0  ;;  %v12990_v45 = vsel %vm979_vm12, %v1026_v51, %v1030_v47  ;;  %v5747_v24 = vshll.u32 %v5703_v14, 16 }
 0x149   : > { %v12973_v53 = vsel %vm1183_vm10, %v18381_v32, %v18380_v20  ;;  %11092 = vmatprep.mubr.msk.bf16.mxu0 %vm392_vm1, %v1915_v48  ;;  %v4359_v32 = vor.u32 %v4357_v11, %v12962_v6  ;;  %v18384_v20 = vld [vmem:[#allocation22_spill] sm:$0xff]  ;;  %v12996_v48 = vsel %vm3476_vm13, %v12835_v59, %v12960_v17  ;;  %1106 = vrot.lane.b32.xlu1 %v12990_v45, %s11376_s15  ;;  %v5746_v5 = vrot.slane %v5744_v36, 1  ;;  %v18386_v25 = vld [vmem:[#allocation23_spill] sm:$0xff] }
 0x14a   : > { %18382 = vst [vmem:[#allocation19_spill] sm:$0xff] %v12973_v53  ;;  %1890 = vst.msk [vmem:[#allocation4 + $0x98] sm:$0xff] %vm392_vm1, %v12973_v53  ;;  %v1194_v49 = vsel %vm1183_vm10, %v18383_v19, %v18174_v35  ;;  %vm4846_vm4 = vcmp.ne.s16.totalorder %v18384_v20, 0  ;;  %v1034_v8 = vor.u32 %v1032_v50, %v1030_v47  ;;  %v4907_v11 = vshll.u32 %v12946_v21, 16 }
 0x14b   : > { %1231 = vst.msk [vmem:[#allocation4 + $0xa8] sm:$0xff] %vm392_vm1, %v1194_v49  ;;  %18385 = vst [vmem:[#allocation22_spill] sm:$0xff] %v12996_v48  ;;  %v3513_v19 = vshrl.u32 %v3463_v57, 16  ;;  %vm3447_vm5 = vcmp.ne.s16.totalorder %v18386_v25, 0  ;;  %v13002_v51 = vpack.c.bf16 %v887_v4, %v886_v18  ;;  %v5749_v35 = vrot.slane %v5747_v24, 2  ;;  %v809_v48 = vpop.f32.mrb[32].mxu0 }
 0x14c   : > { %v3516_v49 = vshll.u32 %v3463_v57, 16  ;;  %v4312_v59 = vsel %vm4295_vm0, %v12919_v30, 0  ;;  %v13007_v14 = vld [vmem:[#allocation2 + $0x38] sm:$0xff]  ;;  %v13011_v47 = vsel %vm4324_vm9, %v12837_v63, %v4359_v32  ;;  %v13013_v36 = vrot.slane %v4907_v11, 1  ;;  %v811_v4 = vpop.f32.mrb[33].mxu0 }
 0x14d   : > { %18387 = vst [vmem:[#allocation23_spill] sm:$0xff] %v13011_v47  ;;  %v3515_v50 = vrot.slane %v3513_v19, 6  ;;  %v4362_v53 = vshrl.u32 %v4312_v59, 16  ;;  %927 = vst [vmem:[#allocation2 + $0x40] sm:$0xff] %v13002_v51  ;;  %v810_v57 = vadd.f32 %v12483_v60, %v809_v48  ;;  %1281 = vrot.lane.b32.xlu0 %v13002_v51, %s11376_s15  ;;  %v1036_v46 = vshll.u32 %v13002_v51, 16  ;;  %v13024_v32 = vld [vmem:[#allocation2 + $0x38] sm:$0xff] }
 0x14e   : > { %956 = vst.msk [vmem:[#allocation4 + $0xf0] sm:$0xff] %vm392_vm1, %v13007_v14  ;;  %v4905_v63 = vor.u32 %v4903_v7, %v12912_v61  ;;  %v812_v24 = vpop.f32.mrb[34].mxu0  ;;  %v18180_v11 = vrot.slane %v13007_v14, 1  ;;  %v13027_v19 = vor.u32 %v5749_v35, %v5746_v5  ;;  %v3518_v18 = vrot.slane %v3516_v49, 7  ;;  %1617 = vst.msk [vmem:[#allocation4 + $0xb8] sm:$0xff] %vm392_vm1, %v13024_v32 }
 0x14f   : > { %v4365_v48 = vshll.u32 %v4312_v59, 16  ;;  %v813_v4 = vadd.f32 %v12483_v60, %v812_v24  ;;  %v814_v47 = vpop.f32.mrb[35].mxu0  ;;  %v1038_v22 = vrot.slane %v1036_v46, 1  ;;  %v18388_v52 = vrot.slane %v13002_v51, 1 }
 0x150   : > { %v18389_v61 = vrot.slane %v12927_v3, 1  ;;  %v1040_v35 = vshrl.u32 %v13002_v51, 16  ;;  %vm4296_vm6 = vcmp.ne.s16.totalorder %v12610_v27, 0  ;;  %vm5688_vm8 = vcmp.ne.s16.totalorder %v12579_v44, 0  ;;  %v13058_v47 = vld [vmem:[#allocation2 + $0x30] sm:$0xff] }
 0x151   : > { %v1920_v37 = vld [vmem:[#allocation4 + $0x98] sm:$0xff]  ;;  %v18390_v5 = vrot.slane %v12934_v62, 1  ;;  %v13054_v49 = vor.u32 %v3518_v18, %v3515_v50  ;;  %v13056_v59 = vrot.slane %v4362_v53, 7  ;;  %v889_v46 = vmax.f32 %v813_v4, 0.0 }
 0x152   : > { %v13037_v7 = vsel %vm1183_vm10, %v18389_v61, %v18388_v52  ;;  %11093 = vmatmul.mubr.msk.bf16.gmra.mrb[68].mxu0 %vm392_vm1, %v1920_v37  ;;  %v13052_v52 = vsel %vm979_vm12, %v4905_v63, %v13013_v36  ;;  %v888_v37 = vmax.f32 %v810_v57, 0.0  ;;  %v13061_v24 = vsel %vm979_vm12, %v1034_v8, %v1038_v22  ;;  %v817_v61 = vpop.f32.mrb[36].mxu0 }
 0x153   : > { %1891 = vst.msk [vmem:[#allocation4 + $0xc0] sm:$0xff] %vm392_vm1, %v13037_v7  ;;  %v1196_v3 = vsel %vm1183_vm10, %v18390_v5, %v18180_v11  ;;  %18391 = vst [vmem:[#allocation42_spill] sm:$0xff] %v13052_v52  ;;  %v5704_v62 = vsel %vm5687_vm3, %v12919_v30, 0  ;;  %vm4847_vm11 = vcmp.ne.s16.totalorder %v12614_v10, 0  ;;  %1108 = vrot.lane.b32.xlu1 %v13061_v24, %s11376_s15  ;;  %v13073_v53 = vsel %vm3298_vm7, %v12910_v39, %v13027_v19 }
 0x154   : > { %1232 = vst.msk [vmem:[#allocation4 + $0xd0] sm:$0xff] %vm392_vm1, %v1196_v3  ;;  %18392 = vst [vmem:[#allocation43_spill] sm:$0xff] %v13073_v53  ;;  %v4367_v50 = vor.u32 %v4365_v48, %v13056_v59  ;;  %v5753_v8 = vshrl.u32 %v5704_v62, 16  ;;  %v5756_v18 = vshll.u32 %v5704_v62, 16  ;;  %v13076_v57 = vpack.c.bf16 %v889_v46, %v888_v37  ;;  %v13084_v5 = vld [vmem:[#allocation2 + $0x40] sm:$0xff] }
 0x155   : > { %v1042_v63 = vor.u32 %v1040_v35, %v1038_v22  ;;  %v13081_v34 = vsel %vm4846_vm4, %v13058_v47, 0  ;;  %v4911_v4 = vshrl.u32 %v12946_v21, 16  ;;  %v13089_v39 = vsel %vm3476_vm13, %v12960_v17, %v13054_v49  ;;  %v13092_v22 = vld [vmem:[#allocation2 + $0x40] sm:$0xff]  ;;  %v819_v35 = vpop.f32.mrb[37].mxu0  ;;  %957 = vst.msk [vmem:[#allocation4 + $0x118] sm:$0xff] %vm392_vm1, %v13084_v5 }
 0x156   : > { %18393 = vst [vmem:[#allocation44_spill] sm:$0xff] %v13089_v39  ;;  %v5755_v48 = vrot.slane %v5753_v8, 1  ;;  %v5758_v3 = vrot.slane %v5756_v18, 2  ;;  %v4915_v37 = vshll.u32 %v13081_v34, 16  ;;  %928 = vst [vmem:[#allocation2 + $0x48] sm:$0xff] %v13076_v57  ;;  %v818_v21 = vadd.f32 %v12483_v60, %v817_v61  ;;  %1283 = vrot.lane.b32.xlu0 %v13076_v57, %s11376_s15  ;;  %v820_v62 = vpop.f32.mrb[38].mxu0 }
 0x157   : > { %v1044_v46 = vshll.u32 %v13076_v57, 16  ;;  %v3464_v17 = vsel %vm3447_vm5, %v12919_v30, 0  ;;  %1618 = vst.msk [vmem:[#allocation4 + $0xe0] sm:$0xff] %vm392_vm1, %v13092_v22  ;;  %v13110_v18 = vsel %vm4324_vm9, %v12962_v6, %v4367_v50  ;;  %v821_v11 = vadd.f32 %v12483_v60, %v820_v62  ;;  %v822_v20 = vpop.f32.mrb[39].mxu0 }
 0x158   : > { %18394 = vst [vmem:[#allocation45_spill] sm:$0xff] %v13110_v18  ;;  %v13112_v61 = vor.u32 %v5758_v3, %v5755_v48  ;;  %v13114_v35 = vrot.slane %v4915_v37, 1  ;;  %v18395_v30 = vrot.slane %v13076_v57, 1  ;;  %v18396_v53 = vrot.slane %v13002_v51, 1 }
 0x159   : > { %v1046_v25 = vrot.slane %v1044_v46, 1  ;;  %v1048_v8 = vshrl.u32 %v13076_v57, 16  ;;  %vm3448_vm14 = vcmp.ne.s16.totalorder %v12618_v16, 0  ;;  %v890_v6 = vmax.f32 %v818_v21, 0.0 }
 0x15a   : > { %v1925_v39 = vld [vmem:[#allocation4 + $0xc0] sm:$0xff]  ;;  %v13122_v52 = vsel %vm1183_vm10, %v18396_v53, %v18395_v30  ;;  %v18397_v60 = vrot.slane %v13084_v5, 1  ;;  %v18398_v50 = vrot.slane %v13007_v14, 1  ;;  %v4913_v51 = vor.u32 %v4911_v4, %v13013_v36 }
 0x15b   : > { %11096 = vmatprep.mubr.msk.bf16.mxu0 %vm392_vm1, %v1925_v39  ;;  %1892 = vst.msk [vmem:[#allocation4 + $0xe8] sm:$0xff] %vm392_vm1, %v13122_v52  ;;  %v3522_v53 = vshrl.u32 %v3464_v17, 16  ;;  %vm4297_vm15 = vcmp.ne.s16.totalorder %v12622_v15, 0  ;;  %v891_v3 = vmax.f32 %v821_v11, 0.0  ;;  %v13137_v37 = vsel %vm979_vm12, %v1042_v63, %v1046_v25 }
 0x15c   : > { %v1198_v48 = vsel %vm1183_vm10, %v18398_v50, %v18397_v60  ;;  %v13143_v39 = vsel %vm3298_vm7, %v13027_v19, %v13112_v61  ;;  %v3525_v20 = vshll.u32 %v3464_v17, 16  ;;  %1110 = vrot.lane.b32.xlu1 %v13137_v37, %s11376_s15  ;;  %v13149_v14 = vsel %vm979_vm12, %v4913_v51, %v13114_v35  ;;  %v825_v17 = vpop.f32.mrb[40].mxu0 }
 0x15d   : > { %1233 = vst.msk [vmem:[#allocation4 + $0xf8] sm:$0xff] %vm392_vm1, %v1198_v48  ;;  %18399 = vst [vmem:[#allocation46_spill] sm:$0xff] %v13143_v39  ;;  %v3524_v36 = vrot.slane %v3522_v53, 6  ;;  %v4313_v11 = vsel %vm4296_vm6, %v13058_v47, 0  ;;  %v5705_v63 = vsel %vm5688_vm8, %v13058_v47, 0  ;;  %v13157_v4 = vpack.c.bf16 %v891_v3, %v890_v6  ;;  %v13159_v62 = vld [vmem:[#allocation2 + $0x48] sm:$0xff] }
 0x15e   : > { %18400 = vst [vmem:[#allocation47_spill] sm:$0xff] %v13149_v14  ;;  %v1050_v19 = vor.u32 %v1048_v8, %v1046_v25  ;;  %v3527_v21 = vrot.slane %v3525_v20, 7  ;;  %v4370_v46 = vshrl.u32 %v4313_v11, 16  ;;  %v4373_v30 = vshll.u32 %v4313_v11, 16  ;;  %v13171_v8 = vld [vmem:[%s18115_s2] ss:$0 sm:$0xff] }
 0x15f   : > { %v5762_v60 = vshrl.u32 %v5705_v63, 16  ;;  %v5765_v50 = vshll.u32 %v5705_v63, 16  ;;  %v13164_v27 = vsel %vm4847_vm11, %v13024_v32, 0  ;;  %929 = vst [vmem:[#allocation2 + $0x50] sm:$0xff] %v13157_v4  ;;  %v826_v25 = vadd.f32 %v13171_v8, %v825_v17  ;;  %v827_v6 = vpop.f32.mrb[41].mxu0  ;;  %1285 = vrot.lane.b32.xlu0 %v13157_v4, %s11376_s15  ;;  %958 = vst.msk [vmem:[#allocation4 + $0x140] sm:$0xff] %vm392_vm1, %v13159_v62 }
 0x160   : > { %v1052_v48 = vshll.u32 %v13157_v4, 16  ;;  %v4919_v10 = vshrl.u32 %v13081_v34, 16  ;;  %vm5689_vm2 = vcmp.ne.s16.totalorder %v12626_v43, 0  ;;  %v13181_v51 = vld [vmem:[#allocation2 + $0x48] sm:$0xff]  ;;  %v828_v53 = vpop.f32.mrb[42].mxu0  ;;  %v18181_v3 = vrot.slane %v13159_v62, 1 }
 0x161   : > { %v13184_v20 = vor.u32 %v3527_v21, %v3524_v36  ;;  %v13186_v11 = vrot.slane %v4370_v46, 7  ;;  %v5764_v63 = vrot.slane %v5762_v60, 1  ;;  %1619 = vst.msk [vmem:[#allocation4 + $0x108] sm:$0xff] %vm392_vm1, %v13181_v51  ;;  %v829_v17 = vadd.f32 %v13171_v8, %v828_v53  ;;  %v830_v6 = vpop.f32.mrb[43].mxu0 }
 0x162   : > { %v1930_v44 = vld [vmem:[#allocation4 + $0xe8] sm:$0xff]  ;;  %v1054_v34 = vrot.slane %v1052_v48, 1  ;;  %v18401_v39 = vrot.slane %v13157_v4, 1  ;;  %v18402_v14 = vrot.slane %v13076_v57, 1  ;;  %v4923_v36 = vshll.u32 %v13164_v27, 16 }
 0x163   : > { %vm4848_vm0 = vcmp.ne.s16.totalorder %v12633_v28, 0  ;;  %11097 = vmatmul.mubr.msk.bf16.gmra.mrb[72].mxu0 %vm392_vm1, %v1930_v44  ;;  %v1056_v21 = vshrl.u32 %v13157_v4, 16  ;;  %v18403_v46 = vrot.slane %v13084_v5, 1  ;;  %v892_v60 = vmax.f32 %v826_v25, 0.0 }
 0x164   : > { %v13196_v18 = vsel %vm1183_vm10, %v18402_v14, %v18401_v39  ;;  %v4375_v39 = vor.u32 %v4373_v30, %v13186_v11  ;;  %v5767_v14 = vrot.slane %v5765_v50, 2  ;;  %v893_v48 = vmax.f32 %v829_v17, 0.0 }
 0x165   : > { %1893 = vst.msk [vmem:[#allocation4 + $0x110] sm:$0xff] %vm392_vm1, %v13196_v18  ;;  %v1200_v57 = vsel %vm1183_vm10, %v18403_v46, %v18181_v3  ;;  %v13211_v53 = vsel %vm979_vm12, %v1050_v19, %v1054_v34  ;;  %v13217_v44 = vsel %vm3476_vm13, %v13054_v49, %v13184_v20  ;;  %vm3449_vm3 = vcmp.ne.s16.totalorder %v12636_v56, 0 }
 0x166   : > { %1234 = vst.msk [vmem:[#allocation4 + $0x120] sm:$0xff] %vm392_vm1, %v1200_v57  ;;  %18404 = vst [vmem:[#allocation48_spill] sm:$0xff] %v13217_v44  ;;  %1112 = vrot.lane.b32.xlu1 %v13211_v53, %s11376_s15  ;;  %v1058_v5 = vor.u32 %v1056_v21, %v1054_v34  ;;  %v13222_v30 = vor.u32 %v5767_v14, %v5764_v63  ;;  %v4921_v50 = vor.u32 %v4919_v10, %v13114_v35  ;;  %v833_v63 = vpop.f32.mrb[44].mxu0  ;;  %v13235_v34 = vld [vmem:[#allocation2 + $0x50] sm:$0xff] }
 0x167   : > { %v3465_v19 = vsel %vm3448_vm14, %v13058_v47, 0  ;;  %vm4298_vm4 = vcmp.ne.s16.totalorder %v12644_v41, 0  ;;  %v13229_v25 = vpack.c.bf16 %v893_v48, %v892_v60  ;;  %v4314_v6 = vsel %vm4297_vm15, %v13024_v32, 0  ;;  %v13248_v21 = vld [vmem:[#allocation2 + $0x50] sm:$0xff]  ;;  %v835_v57 = vpop.f32.mrb[45].mxu0  ;;  %959 = vst.msk [vmem:[#allocation4 + $0x168] sm:$0xff] %vm392_vm1, %v13235_v34 }
 0x168   : > { %v3531_v49 = vshrl.u32 %v3465_v19, 16  ;;  %v3534_v17 = vshll.u32 %v3465_v19, 16  ;;  %vm5690_vm5 = vcmp.ne.s16.totalorder %v12640_v26, 0  ;;  %v13239_v35 = vsel %vm4324_vm9, %v13056_v59, %v4375_v39  ;;  %1620 = vst.msk [vmem:[#allocation4 + $0x130] sm:$0xff] %vm392_vm1, %v13248_v21 }
 0x169   : > { %18405 = vst [vmem:[#allocation49_spill] sm:$0xff] %v13239_v35  ;;  %v13244_v16 = vsel %vm3298_vm7, %v13112_v61, %v13222_v30  ;;  %v13246_v47 = vrot.slane %v4923_v36, 1  ;;  %v4378_v10 = vshrl.u32 %v4314_v6, 16  ;;  %930 = vst [vmem:[#allocation2 + $0x58] sm:$0xff] %v13229_v25  ;;  %v1859_v15 = vrot.slane %v13229_v25, 1  ;;  %1287 = vrot.lane.b32.xlu0 %v13229_v25, %s11376_s15  ;;  %v836_v36 = vpop.f32.mrb[46].mxu0 }
 0x16a   : > { %18406 = vst [vmem:[#allocation50_spill] sm:$0xff] %v13244_v16  ;;  %v834_v46 = vadd.f32 %v13171_v8, %v833_v63  ;;  %v1060_v59 = vshll.u32 %v13229_v25, 16  ;;  %v4381_v61 = vshll.u32 %v4314_v6, 16  ;;  %v18182_v39 = vrot.slane %v13235_v34, 1  ;;  %v838_v63 = vpop.f32.mrb[47].mxu0 }
 0x16b   : > { %v3533_v14 = vrot.slane %v3531_v49, 6  ;;  %v3536_v60 = vrot.slane %v3534_v17, 7  ;;  %v13261_v48 = vrot.slane %v4378_v10, 7  ;;  %v837_v19 = vadd.f32 %v13171_v8, %v836_v36 }
 0x16c   : > { %v1935_v57 = vld [vmem:[#allocation4 + $0x110] sm:$0xff]  ;;  %v1062_v3 = vrot.slane %v1060_v59, 1  ;;  %v18407_v16 = vrot.slane %v13157_v4, 1  ;;  %v1064_v44 = vshrl.u32 %v13229_v25, 16  ;;  %v18408_v49 = vrot.slane %v13159_v62, 1 }
 0x16d   : > { %11100 = vmatprep.mubr.msk.bf16.mxu0 %vm392_vm1, %v1935_v57  ;;  %v13280_v10 = vor.u32 %v3536_v60, %v3533_v14  ;;  %v4383_v4 = vor.u32 %v4381_v61, %v13261_v48  ;;  %vm4849_vm6 = vcmp.ne.s16.totalorder %v12648_v42, 0  ;;  %v894_v59 = vmax.f32 %v834_v46, 0.0 }
 0x16e   : > { %v13269_v6 = vsel %vm1183_vm10, %v18407_v16, %v1859_v15  ;;  %v1202_v17 = vsel %vm1183_vm10, %v18408_v49, %v18182_v39  ;;  %v5706_v16 = vsel %vm5689_vm2, %v13024_v32, 0  ;;  %v895_v36 = vmax.f32 %v837_v19, 0.0 }
 0x16f   : > { %1894 = vst.msk [vmem:[#allocation4 + $0x138] sm:$0xff] %vm392_vm1, %v13269_v6  ;;  %v13288_v63 = vsel %vm979_vm12, %v1058_v5, %v1062_v3  ;;  %1235 = vst.msk [vmem:[#allocation4 + $0x148] sm:$0xff] %vm392_vm1, %v1202_v17  ;;  %v5771_v62 = vshrl.u32 %v5706_v16, 16  ;;  %v1066_v14 = vor.u32 %v1064_v44, %v1062_v3  ;;  %v13295_v61 = vsel %vm979_vm12, %v4921_v50, %v13246_v47  ;;  %v841_v44 = vpop.f32.mrb[48].mxu0 }
 0x170   : > { %1114 = vrot.lane.b32.xlu1 %v13288_v63, %s11376_s15  ;;  %18409 = vst [vmem:[#allocation51_spill] sm:$0xff] %v13295_v61  ;;  %v5774_v43 = vshll.u32 %v5706_v16, 16  ;;  %v13300_v46 = vsel %vm4848_vm0, %v13092_v22, 0  ;;  %v13302_v60 = vpack.c.bf16 %v895_v36, %v894_v59  ;;  %v13307_v5 = vsel %vm3476_vm13, %v13184_v20, %v13280_v10  ;;  %v13310_v57 = vld [vmem:[#allocation2 + $0x58] sm:$0xff]  ;;  %v843_v59 = vpop.f32.mrb[49].mxu0 }
 0x171   : > { %18410 = vst [vmem:[#allocation52_spill] sm:$0xff] %v13307_v5  ;;  %v5773_v19 = vrot.slane %v5771_v62, 1  ;;  %v4931_v3 = vshll.u32 %v13300_v46, 16  ;;  %v13314_v50 = vsel %vm4324_vm9, %v13186_v11, %v4383_v4  ;;  %v4927_v49 = vshrl.u32 %v13164_v27, 16  ;;  %960 = vst.msk [vmem:[#allocation4 + $0x190] sm:$0xff] %vm392_vm1, %v13310_v57  ;;  %v844_v27 = vpop.f32.mrb[50].mxu0 }
 0x172   : > { %18411 = vst [vmem:[#allocation53_spill] sm:$0xff] %v13314_v50  ;;  %v5776_v28 = vrot.slane %v5774_v43, 2  ;;  %v3466_v17 = vsel %vm3449_vm3, %v13024_v32, 0  ;;  %931 = vst [vmem:[#allocation2 + $0x60] sm:$0xff] %v13302_v60  ;;  %v18184_v20 = vrot.slane %v13302_v60, 1  ;;  %v842_v16 = vadd.f32 %v13171_v8, %v841_v44  ;;  %1289 = vrot.lane.b32.xlu0 %v13302_v60, %s11376_s15  ;;  %v13331_v32 = vld [vmem:[#allocation2 + $0x58] sm:$0xff] }
 0x173   : > { %v1068_v11 = vshll.u32 %v13302_v60, 16  ;;  %v4315_v56 = vsel %vm4298_vm4, %v13092_v22, 0  ;;  %v18183_v4 = vrot.slane %v13310_v57, 1  ;;  %v13336_v62 = vrot.slane %v4931_v3, 1  ;;  %1621 = vst.msk [vmem:[#allocation4 + $0x158] sm:$0xff] %vm392_vm1, %v13331_v32  ;;  %v846_v44 = vpop.f32.mrb[51].mxu0 }
 0x174   : > { %v13334_v36 = vor.u32 %v5776_v28, %v5773_v19  ;;  %v13341_v43 = vsel %vm5690_vm5, %v13092_v22, 0  ;;  %v845_v41 = vadd.f32 %v13171_v8, %v844_v27  ;;  %v13351_v19 = vsel %vm1183_vm10, %v1859_v15, %v18184_v20 }
 0x175   : > { %v1070_v39 = vrot.slane %v1068_v11, 1  ;;  %v1072_v3 = vshrl.u32 %v13302_v60, 16  ;;  %vm3450_vm8 = vcmp.ne.s16.totalorder %v12652_v29, 0  ;;  %v896_v26 = vmax.f32 %v842_v16, 0.0  ;;  %1895 = vst.msk [vmem:[#allocation4 + $0x160] sm:$0xff] %vm392_vm1, %v13351_v19 }
 0x176   : > { %v1940_v59 = vld [vmem:[#allocation4 + $0x138] sm:$0xff]  ;;  %v18412_v28 = vrot.slane %v13235_v34, 1  ;;  %v4929_v25 = vor.u32 %v4927_v49, %v13246_v47  ;;  %v3540_v15 = vshrl.u32 %v3466_v17, 16  ;;  %v897_v27 = vmax.f32 %v845_v41, 0.0 }
 0x177   : > { %11101 = vmatmul.mubr.msk.bf16.gmra.mrb[76].mxu0 %vm392_vm1, %v1940_v59  ;;  %v13365_v44 = vsel %vm979_vm12, %v1066_v14, %v1070_v39  ;;  %v13371_v16 = vsel %vm3298_vm7, %v13222_v30, %v13334_v36  ;;  %v3543_v59 = vshll.u32 %v3466_v17, 16  ;;  %v4386_v49 = vshrl.u32 %v4315_v56, 16  ;;  %v849_v17 = vpop.f32.mrb[52].mxu0 }
 0x178   : > { %v1204_v11 = vsel %vm1183_vm10, %v18412_v28, %v18183_v4  ;;  %18413 = vst [vmem:[#allocation54_spill] sm:$0xff] %v13371_v16  ;;  %1116 = vrot.lane.b32.xlu1 %v13365_v44, %s11376_s15  ;;  %v13377_v34 = vsel %vm979_vm12, %v4929_v25, %v13336_v62  ;;  %v3542_v47 = vrot.slane %v3540_v15, 6  ;;  %v5780_v14 = vshrl.u32 %v13341_v43, 16 }
 0x179   : > { %1236 = vst.msk [vmem:[#allocation4 + $0x170] sm:$0xff] %vm392_vm1, %v1204_v11  ;;  %18414 = vst [vmem:[#allocation55_spill] sm:$0xff] %v13377_v34  ;;  %v13380_v41 = vpack.c.bf16 %v897_v27, %v896_v26  ;;  %v1074_v28 = vor.u32 %v1072_v3, %v1070_v39  ;;  %v3545_v11 = vrot.slane %v3543_v59, 7  ;;  %v13385_v30 = vsel %vm4849_vm6, %v13181_v51, 0  ;;  %v13387_v4 = vld [vmem:[#allocation2 + $0x60] sm:$0xff]  ;;  %v851_v3 = vpop.f32.mrb[53].mxu0 }
 0x17a   : > { %v13389_v20 = vrot.slane %v4386_v49, 7  ;;  %v4389_v25 = vshll.u32 %v4315_v56, 16  ;;  %v5782_v16 = vrot.slane %v5780_v14, 1  ;;  %v5783_v15 = vshll.u32 %v13341_v43, 16  ;;  %961 = vst.msk [vmem:[#allocation4 + $0x1b8] sm:$0xff] %vm392_vm1, %v13387_v4  ;;  %v13401_v27 = vld [vmem:[#allocation2 + $0x60] sm:$0xff] }
 0x17b   : > { %932 = vst [vmem:[#allocation2 + $0x68] sm:$0xff] %v13380_v41  ;;  %v850_v39 = vadd.f32 %v13171_v8, %v849_v17  ;;  %1291 = vrot.lane.b32.xlu0 %v13380_v41, %s11376_s15  ;;  %v1076_v42 = vshll.u32 %v13380_v41, 16  ;;  %v4935_v56 = vshrl.u32 %v13300_v46, 16  ;;  %18415 = vst [vmem:[#allocation56_spill] sm:$0xff] %v13401_v27  ;;  %v852_v43 = vpop.f32.mrb[54].mxu0  ;;  %v13406_v14 = vor.u32 %v3545_v11, %v3542_v47  ;;  %v1325_v11 = vld [vmem:[#allocation2 + $0x10] sm:$0xff] }
 0x17c   : > { %v13404_v49 = vld [vmem:[#allocation2 + $0x88] sm:$0x1]  ;;  %v4391_v17 = vor.u32 %v4389_v25, %v13389_v20  ;;  %v4939_v3 = vshll.u32 %v13385_v30, 16  ;;  %1622 = vst.msk [vmem:[#allocation4 + $0x180] sm:$0xff] %vm392_vm1, %v13401_v27  ;;  %v853_v26 = vadd.f32 %v13171_v8, %v852_v43  ;;  %v854_v5 = vpop.f32.mrb[55].mxu0  ;;  %v1945_v46 = vld [vmem:[#allocation4 + $0x160] sm:$0xff] }
 0x17d   : > { %v1078_v34 = vrot.slane %v1076_v42, 1  ;;  %v18416_v50 = vrot.slane %v13380_v41, 1  ;;  %v18417_v59 = vrot.slane %v13302_v60, 1  ;;  %v1080_v47 = vshrl.u32 %v13380_v41, 16  ;;  %11104 = vmatprep.mubr.msk.bf16.mxu0 %vm392_vm1, %v1945_v46 }
 0x17e   : > { %v898_v25 = vmax.f32 %v850_v39, 0.0  ;;  %v18419_v5 = vrot.slane %v13387_v4, 1  ;;  %v18420_v42 = vrot.slane %v13310_v57, 1  ;;  %v13438_v39 = vsel %vm3476_vm13, %v13280_v10, %v13406_v14 }
 0x17f   : > { %v13418_v61 = vsel %vm1183_vm10, %v18417_v59, %v18416_v50  ;;  %v4937_v50 = vor.u32 %v4935_v56, %v13336_v62  ;;  %v899_v59 = vmax.f32 %v853_v26, 0.0  ;;  %v13432_v35 = vsel %vm979_vm12, %v1074_v28, %v1078_v34  ;;  %18421 = vst [vmem:[#allocation58_spill] sm:$0xff] %v13438_v39 }
 0x180   : > { %18418 = vst [vmem:[#allocation57_spill] sm:$0xff] %v13418_v61  ;;  %1896 = vst.msk [vmem:[#allocation4 + $0x188] sm:$0xff] %vm392_vm1, %v13418_v61  ;;  %v1206_v43 = vsel %vm1183_vm10, %v18420_v42, %v18419_v5  ;;  %v5785_v46 = vrot.slane %v5783_v15, 2  ;;  %1118 = vrot.lane.b32.xlu1 %v13432_v35, %s11376_s15  ;;  %v13444_v57 = vsel %vm4324_vm9, %v13261_v48, %v4391_v17  ;;  %v13446_v62 = vrot.slane %v4939_v3, 1  ;;  %v857_v15 = vpop.f32.mrb[56].mxu0 }
 0x181   : > { %1237 = vst.msk [vmem:[#allocation4 + $0x198] sm:$0xff] %vm392_vm1, %v1206_v43  ;;  %18422 = vst [vmem:[#allocation59_spill] sm:$0xff] %v13444_v57  ;;  %v3467_v28 = vsel %vm3450_vm8, %v13092_v22, 0  ;;  %v1343_v26 = vshll.u32 %v1325_v11, 16  ;;  %v13451_v56 = vpack.c.bf16 %v899_v59, %v898_v25  ;;  %v1082_v5 = vor.u32 %v1080_v47, %v1078_v34  ;;  %v859_v34 = vpop.f32.mrb[57].mxu0 }
 0x182   : > { %v3549_v10 = vshrl.u32 %v3467_v28, 16  ;;  %v3552_v42 = vshll.u32 %v3467_v28, 16  ;;  %v13453_v43 = vld [vmem:[#allocation2 + $0x68] sm:$0xff]  ;;  %v13455_v60 = vor.u32 %v5785_v46, %v5782_v16  ;;  %v1341_v39 = vshrl.u32 %v1325_v11, 16  ;;  %v860_v11 = vpop.f32.mrb[58].mxu0 }
 0x183   : > { %v1345_v48 = vrot.slane %v1343_v26, 1  ;;  %v1348_v17 = vshll.u32 %v12748_v9, 16  ;;  %v13458_v3 = vld [vmem:[#allocation2 + $0x68] sm:$0xff]  ;;  %933 = vst [vmem:[#allocation2 + $0x70] sm:$0xff] %v13451_v56  ;;  %v858_v22 = vadd.f32 %v13171_v8, %v857_v15  ;;  %1293 = vrot.lane.b32.xlu0 %v13451_v56, %s11376_s15  ;;  %v1084_v47 = vshll.u32 %v13451_v56, 16  ;;  %962 = vst.msk [vmem:[#allocation4 + $0x1e0] sm:$0xff] %vm392_vm1, %v13453_v43 }
 0x184   : > { %18423 = vst [vmem:[#allocation60_spill] sm:$0xff] %v13458_v3  ;;  %v13470_v16 = vsel %vm979_vm12, %v4937_v50, %v13446_v62  ;;  %1623 = vst.msk [vmem:[#allocation4 + $0x1a8] sm:$0xff] %vm392_vm1, %v13458_v3  ;;  %v18189_v25 = vrot.slane %v13453_v43, 1  ;;  %v3551_v59 = vrot.slane %v3549_v10, 6  ;;  %v3554_v46 = vrot.slane %v3552_v42, 7  ;;  %v862_v34 = vpop.f32.mrb[59].mxu0 }
 0x185   : > { %18424 = vst [vmem:[#allocation61_spill] sm:$0xff] %v13470_v16  ;;  %v18425_v28 = vcvt.s32.f32 %v12661_v58  ;;  %v861_v15 = vadd.f32 %v13171_v8, %v860_v11  ;;  %v1086_v57 = vrot.slane %v1084_v47, 1  ;;  %v18426_v27 = vrot.slane %v13451_v56, 1 }
 0x186   : > { %v18427_v50 = vrot.slane %v13380_v41, 1  ;;  %v1088_v3 = vshrl.u32 %v13451_v56, 16  ;;  %v18429_v10 = vrot.slane %v13387_v4, 1  ;;  %v13494_v47 = vor.u32 %v3554_v46, %v3551_v59  ;;  %v18432_v59 = vld [vmem:[#allocation24_spill] sm:$0xff]  ;;  %v18433_v46 = vld [vmem:[#allocation25_spill] sm:$0xff] }
 0x187   : > { %v2995_v26 = vadd.f32 0.5, %v18425_v28  ;;  %v1950_v29 = vld [vmem:[#allocation4 + $0x188] sm:$0xff]  ;;  %v1346_v11 = vor.u32 %v1345_v48, %v1341_v39  ;;  %v1350_v41 = vrot.slane %v1348_v17, 1  ;;  %v900_v28 = vmax.f32 %v858_v22, 0.0 }
 0x188   : > { %v13483_v16 = vsel %vm1183_vm10, %v18427_v50, %v18426_v27  ;;  %11105 = vmatmul.mubr.msk.bf16.gmra.mrb[80].mxu0 %vm392_vm1, %v1950_v29  ;;  %v1208_v42 = vsel %vm1183_vm10, %v18429_v10, %v18189_v25  ;;  %v901_v27 = vmax.f32 %v861_v15, 0.0  ;;  %v13497_v34 = vsel %vm979_vm12, %v1082_v5, %v1086_v57  ;;  %v865_v15 = vpop.f32.mrb[60].mxu0  ;;  %v13547_v25 = vld [vmem:[#allocation2] sm:$0xff] }
 0x189   : > { %18428 = vst [vmem:[#allocation62_spill] sm:$0xff] %v13483_v16  ;;  %1897 = vst.msk [vmem:[#allocation4 + $0x1b0] sm:$0xff] %vm392_vm1, %v13483_v16  ;;  %v18430_v29 = vcvt.s32.f32 %v12669_v0  ;;  %1120 = vrot.lane.b32.xlu1 %v13497_v34, %s11376_s15  ;;  %v13504_v4 = vor.u32 %v1088_v3, %v1086_v57  ;;  %v13509_v39 = vsel %vm3298_vm7, %v13334_v36, %v13455_v60  ;;  %v3027_v17 = vmul.f32 0.0625, %v2995_v26  ;;  %v18435_v3 = vld [vmem:[#allocation26_spill] sm:$0xff] }
 0x18a   : > { %1238 = vst.msk [vmem:[#allocation4 + $0x1c0] sm:$0xff] %vm392_vm1, %v1208_v42  ;;  %18431 = vst [vmem:[#allocation63_spill] sm:$0xff] %v13509_v39  ;;  %v1351_v48 = vsel %vm979_vm12, %v1346_v11, %v1350_v41  ;;  %v918_v5 = vpack.c.bf16 %v901_v27, %v900_v28  ;;  %vm5412_vm11 = vcmp.lt.f32.partialorder %v18432_v59, 13.0  ;;  %vm5413_vm14 = vcmp.lt.f32.partialorder %v18433_v46, 13.0  ;;  %v13515_v10 = vld [vmem:[#allocation2 + $0x70] sm:$0xff] }
 0x18b   : > { %v2996_v50 = vadd.f32 0.5, %v18430_v29  ;;  %1470 = vst.msk [vmem:[#allocation4 + $0x10] sm:$0xff] %vm392_vm1, %v1351_v48  ;;  %v13520_v57 = vsel %vm3476_vm13, %v13406_v14, %v13494_v47  ;;  %v3059_v36 = vfloor.f32 %v3027_v17  ;;  %vm13523_vm15 = vmpackc.low %vm5412_vm11, %vm5412_vm11  ;;  %v1352_v11 = vshrl.u32 %v12748_v9, 16  ;;  %v13528_v28 = vld [vmem:[#allocation2 + $0x70] sm:$0xff] }
 0x18c   : > { %18434 = vst [vmem:[#allocation64_spill] sm:$0xff] %v13520_v57  ;;  %18438 = vst [vmem:[#allocation26_spill] sm:$0xff] %v13528_v28  ;;  %v13530_v27 = vrot.slane %v918_v5, 1  ;;  %v866_v29 = vadd.f32 %v13171_v8, %v865_v15  ;;  %1295 = vrot.lane.b32.xlu0 %v918_v5, %s11376_s15  ;;  %vm1138_vm2 = vcmask 1048064   ;;  %v1738_v14 = vshll.u32 %v918_v5, 16 }
 0x18d   : > { %v3028_v22 = vmul.f32 0.0625, %v2996_v50  ;;  %934 = vst [vmem:[#allocation2 + $0x78] sm:$0xff] %v918_v5  ;;  %v867_v50 = vpop.f32.mrb[61].mxu0  ;;  %963 = vst.msk [vmem:[#allocation4 + $0x208] sm:$0xff] %vm392_vm1, %v13515_v10  ;;  %v1356_v48 = vshll.u32 %v12801_v38, 16  ;;  %v1209_v15 = vrot.slane %v13515_v10, 1  ;;  %v1354_v9 = vor.u32 %v1352_v11, %v1350_v41 }
 0x18e   : > { %vm13539_vm0 = vmpackc.low %vm5413_vm14, %vm5413_vm14  ;;  %1624 = vst.msk [vmem:[#allocation4 + $0x1d0] sm:$0xff] %vm392_vm1, %v13528_v28  ;;  %v868_v17 = vpop.f32.mrb[62].mxu0  ;;  %v3091_v42 = vmul.f32 16.0, %v3059_v36  ;;  %v5476_v46 = vsel %vm13523_vm15, 65537, %v13547_v25  ;;  %v902_v59 = vmax.f32 %v866_v29, 0.0  ;;  %v18441_v16 = vrot.slane %v13451_v56, 1 }
 0x18f   : > { %v3060_v50 = vfloor.f32 %v3028_v22  ;;  %v869_v57 = vadd.f32 %v13171_v8, %v868_v17  ;;  %v1740_v61 = vrot.slane %v1738_v14, 1  ;;  %v870_v10 = vpop.f32.mrb[63].mxu0  ;;  %v18442_v22 = vrot.slane %v13453_v43, 1 }
 0x190   : > { %v1955_v39 = vld [vmem:[#allocation4 + $0x1b0] sm:$0xff]  ;;  %v13557_v28 = vsel %vm1183_vm10, %v18441_v16, %v13530_v27  ;;  %v18443_v8 = vcvt.s32.f32 %v12661_v58  ;;  %v5477_v56 = vsel %vm13539_vm0, 65537, %v13547_v25  ;;  %1758 = vrot.lane.b32.xlu0 %v12774_v12, %s11376_s15  ;;  %v1742_v43 = vshrl.u32 %v918_v5, 16 }
 0x191   : > { %11108 = vmatprep.mubr.msk.bf16.mxu0 %vm392_vm1, %v1955_v39  ;;  %1898 = vst.msk [vmem:[#allocation4 + $0x1d8] sm:$0xff] %vm392_vm1, %v13557_v28  ;;  %v1210_v36 = vsel %vm1183_vm10, %v18442_v22, %v1209_v15  ;;  %v3092_v26 = vmul.f32 16.0, %v3060_v50  ;;  %v903_v16 = vmax.f32 %v869_v57, 0.0  ;;  %v13576_v39 = vsel %vm979_vm12, %v13504_v4, %v1740_v61 }
 0x192   : > { %v13567_v29 = vsub.f32 %v18443_v8, %v3091_v42  ;;  %1239 = vst.msk [vmem:[#allocation4 + $0x1e8] sm:$0xff] %vm392_vm1, %v1210_v36  ;;  %v10184_v14 = vcombine.low %v5476_v46, %v5477_v56  ;;  %v18444_v58 = vcvt.s32.f32 %v12669_v0  ;;  %v13584_v17 = vrot.slane %v1356_v48, 1 }
 0x193   : > { %v919_v57 = vpack.c.bf16 %v903_v16, %v902_v59  ;;  %v1744_v46 = vor.u32 %v1742_v43, %v1740_v61  ;;  %v18451_v12 = vrot.slane %v13404_v49, 1 }
 0x194   : > { %v13581_v42 = vsub.f32 %v18444_v58, %v3092_v26  ;;  %vm4037_vm3 = vcmp.ge.f32.partialorder %v13567_v29, 1.0  ;;  %v5612_v50 = vshrl.u32 %v10184_v14, 16  ;;  %v5615_v10 = vshll.u32 %v10184_v14, 16  ;;  %v978_v5 = vld [vmem:[#allocation2 + $0x78] sm:$0x1]  ;;  %1760 = vrot.lane.b32.xlu0 %v12840_v13, %s11376_s15  ;;  %v1270_v14 = vpop.permute.xlu0 %1269 }
 0x195   : > { %vm13586_vm4 = vmpackc.low %vm4037_vm3, %vm4037_vm3  ;;  %vm4588_vm5 = vcmp.lt.f32.partialorder %v13567_v29, 15.0  ;;  %v1167_v22 = vld [vmem:[#allocation2 + $0x78] sm:$0x1]  ;;  %v1359_v41 = vsel %vm979_vm12, %v1354_v9, %v13584_v17  ;;  %935 = vst [vmem:[#allocation2 + $0x80] sm:$0xff] %v919_v57  ;;  %v1869_v59 = vrot.slane %v919_v57, 1  ;;  %v1092_v11 = vshll.u32 %v978_v5, 16 }
 0x196   : > { %vm4038_vm6 = vcmp.ge.f32.partialorder %v13581_v42, 1.0  ;;  %v4101_v0 = vsel %vm13586_vm4, 65537, %v13547_v25  ;;  %v1746_v48 = vshll.u32 %v919_v57, 16  ;;  %v1750_v36 = vshrl.u32 %v919_v57, 16  ;;  %1471 = vst.msk [vmem:[#allocation4 + $0x38] sm:$0xff] %vm392_vm1, %v1359_v41  ;;  %vm13610_vm11 = vmpackc.low %vm4588_vm5, %vm4588_vm5 }
 0x197   : > { %vm13599_vm8 = vmpackc.low %vm4038_vm6, %vm4038_vm6  ;;  %v1211_v26 = vrot.slane %v1167_v22, 1  ;;  %v5614_v56 = vrot.slane %v5612_v50, 6  ;;  %v5617_v16 = vrot.slane %v5615_v10, 7  ;;  %v1094_v43 = vrot.slane %v1092_v11, 1  ;;  %1311 = vst.msk [vmem:[#allocation4 + $0x8] sm:$0xff] %vm1138_vm2, %v1270_v14 }
 0x198   : > { %v4102_v8 = vsel %vm13599_vm8, 65537, %v13547_v25  ;;  %v1960_v58 = vld [vmem:[#allocation4 + $0x1d8] sm:$0xff]  ;;  %v1870_v9 = vsel %vm1183_vm10, %v13530_v27, %v1869_v59  ;;  %v1748_v57 = vrot.slane %v1746_v48, 1  ;;  %v1872_v5 = vsel %vm1183_vm10, %v1869_v59, %v18451_v12  ;;  %1762 = vrot.lane.b32.xlu0 %v12916_v40, %s11376_s15  ;;  %v1097_v61 = vpop.permute.xlu0 %1096 }
 0x199   : > { %11109 = vmatmul.mubr.msk.bf16.gmra.mrb[84].mxu0 %vm392_vm1, %v1960_v58  ;;  %1899 = vst.msk [vmem:[#allocation4 + $0x200] sm:$0xff] %vm392_vm1, %v1870_v9  ;;  %1900 = vst.msk [vmem:[#allocation4 + $0x228] sm:$0xff] %vm392_vm1, %v1872_v5  ;;  %v1212_v50 = vsel %vm1183_vm10, %v1209_v15, %v1211_v26  ;;  %v13624_v10 = vcombine.low %v4101_v0, %v4102_v8  ;;  %v13626_v22 = vor.u32 %v5617_v16, %v5614_v56  ;;  %v1272_v9 = vpop.permute.xlu1 %1271 }
 0x19a   : > { %vm4589_vm14 = vcmp.lt.f32.partialorder %v13581_v42, 15.0  ;;  %v1095_v49 = vsel %vm979_vm12, %v13504_v4, %v1094_v43  ;;  %v13634_v41 = vsel %vm979_vm12, %v1744_v46, %v1748_v57  ;;  %v1752_v59 = vor.u32 %v1750_v36, %v1748_v57  ;;  %1240 = vst.msk [vmem:[#allocation4 + $0x210] sm:$0xff] %vm392_vm1, %v1212_v50 }
 0x19b   : > { %vm4621_vm15 = vmpackc.low %vm4589_vm14, %vm4589_vm14  ;;  %v4652_v15 = vsel %vm13610_vm11, 65537, %v13547_v25  ;;  %1122 = vrot.lane.b32.xlu1 %v1095_v49, %s11376_s15  ;;  %v18452_v0 = vshrl.u32 %v18435_v3, 16  ;;  %v4235_v11 = vshll.u32 %v13624_v10, 16  ;;  %v5619_v40 = vsel %vm3476_vm13, %v12594_v55, %v13626_v22  ;;  %1139 = vst.msk [vmem:[#allocation4] sm:$0xff] %vm1138_vm2, %v1097_v61 }
 0x19c   : > { %v4653_v46 = vsel %vm4621_vm15, 65537, %v13547_v25  ;;  %vm5691_vm0 = vcmp.ne.s16.totalorder %v5619_v40, 0  ;;  %v4943_v36 = vshrl.u32 %v13385_v30, 16  ;;  %vm3172_vm3 = vcmp.ge.f32.partialorder %v13567_v29, 3.0  ;;  %1764 = vrot.lane.b32.xlu0 %v12990_v45, %s11376_s15  ;;  %1312 = vst.msk [vmem:[#allocation4 + $0x30] sm:$0xff] %vm1138_vm2, %v1272_v9  ;;  %v18458_v9 = vld [vmem:[#allocation34_spill] sm:$0xff] }
 0x19d   : > { %v4233_v4 = vor.u32 %v18452_v0, %v12599_v1  ;;  %v10153_v48 = vcombine.low %v4652_v15, %v4653_v46  ;;  %v13653_v26 = vsel %vm979_vm12, %v1752_v59, %v12864_v54  ;;  %v1498_v1 = vld [vmem:[#allocation2 + $0x80] sm:$0x1]  ;;  %v13655_v3 = vrot.slane %v4235_v11, 1  ;;  %vm13659_vm5 = vmpackc.low %vm3172_vm3, %vm3172_vm3 }
 0x19e   : > { %v5708_v8 = vsel %vm5691_vm0, %v13181_v51, 0  ;;  %vm3173_vm4 = vcmp.ge.f32.partialorder %v13581_v42, 3.0  ;;  %v1541_v30 = vrot.slane %v1498_v1, 1  ;;  %v3236_v58 = vsel %vm13659_vm5, 65537, %v13547_v25  ;;  %v1902_v57 = vld [vmem:[#allocation4 + $0x8] sm:$0xff] }
 0x19f   : > { %v5789_v56 = vshrl.u32 %v5708_v8, 16  ;;  %v5792_v54 = vshll.u32 %v5708_v8, 16  ;;  %v4786_v16 = vshrl.u32 %v10153_v48, 16  ;;  %vm13666_vm6 = vmpackc.low %vm3173_vm4, %vm3173_vm4  ;;  %1543 = vrot.lane.b32.xlu1 %v12729_v31, %s11376_s15  ;;  %v4238_v43 = vsel %vm979_vm12, %v4233_v4, %v13655_v3  ;;  %2340 = vmatprep.mubr.bf16.mxu1 %v1902_v57  ;;  %v11252_v1 = vld [vmem:[%s18116_s3 + $0xc8] sm:$0xff]  }
 0x1a0   : > { %v4789_v14 = vshll.u32 %v10153_v48, 16  ;;  %v3237_v45 = vsel %vm13666_vm6, 65537, %v13547_v25  ;;  %v1965_v12 = vld [vmem:[#allocation4 + $0x200] sm:$0xff]  ;;  %v1970_v5 = vld [vmem:[#allocation4 + $0x228] sm:$0xff]  ;;  %vm4299_vm8 = vcmp.ne.s16.totalorder %v4238_v43, 0  ;;  %v13681_v31 = vor.u32 %v4943_v36, %v13446_v62  ;;  %1766 = vrot.lane.b32.xlu0 %v13061_v24, %s11376_s15 }
 0x1a1   : > { %v5791_v50 = vrot.slane %v5789_v56, 1  ;;  %v5794_v49 = vrot.slane %v5792_v54, 2  ;;  %11112 = vmatprep.mubr.msk.bf16.mxu0 %vm392_vm1, %v1965_v12  ;;  %v13687_v59 = vsel %vm1183_vm10, %v13530_v27, %v1541_v30  ;;  %v4316_v15 = vsel %vm4299_vm8, %v13181_v51, 0  ;;  %v11251_v27 = vld [vmem:[%s18116_s3 + $0x80] sm:$0xff]   ;;  %v1099_v30 = vpop.permute.xlu1 %1098  ;;  %v18457_v54 = vld [vmem:[#allocation27_spill] sm:$0xff]  ;;  %v11253_v57 = vld [vmem:[%s18116_s3 + $0x88] sm:$0xff]  }
 0x1a2   : > { %v13690_v0 = vrot.slane %v4786_v16, 7  ;;  %v10105_v4 = vcombine.low %v3236_v58, %v3237_v45  ;;  %11113 = vmatmul.mubr.msk.bf16.gmra.mrb[88].mxu0 %vm392_vm1, %v1970_v5  ;;  %v4394_v62 = vshrl.u32 %v4316_v15, 16  ;;  %v4397_v11 = vshll.u32 %v4316_v15, 16  ;;  %v1901_v56 = vld [vmem:[#allocation4] sm:$0xff]  ;;  %1140 = vst.msk [vmem:[#allocation4 + $0x28] sm:$0xff] %vm1138_vm2, %v1099_v30  ;;  %v1274_v15 = vpop.permute.xlu0 %1273  ;;  %v18464_v30 = vld [vmem:[#allocation38_spill] sm:$0xff] }
 0x1a3   : > { %v1360_v40 = vshrl.u32 %v12801_v38, 16  ;;  %v1364_v46 = vshll.u32 %v12887_v23, 16  ;;  %1545 = vrot.lane.b32.xlu1 %v12766_v2, %s11376_s15  ;;  %v13702_v48 = vor.u32 %v5794_v49, %v5791_v50  ;;  %v13714_v2 = vadd.s32 160, %v11527_v33  ;;  %2341 = vmatmul.mubr.bf16.vlgmr.msra.gmra.mrb[0].mxu1 %v1901_v56  ;;  %v13741_v49 = vld [vmem:[#allocation2 + $0x78] sm:$0xff]  ;;  %1313 = vst.msk [vmem:[#allocation4 + $0x58] sm:$0xff] %vm1138_vm2, %v1274_v15 }
 0x1a4   : > { %v4791_v36 = vor.u32 %v4789_v14, %v13690_v0  ;;  %v3380_v24 = vshrl.u32 %v10105_v4, 16  ;;  %v3383_v61 = vshll.u32 %v10105_v4, 16  ;;  %v13708_v38 = vrot.slane %v4394_v62, 7  ;;  %1768 = vrot.lane.b32.xlu0 %v13137_v37, %s11376_s15  ;;  %10521 = vmatpush3.bf16.msra.mxu1 %v11251_v27  ;;  %v1907_v4 = vld [vmem:[#allocation4 + $0x30] sm:$0xff]  ;;  %1625 = vst.msk [vmem:[#allocation4 + $0x1f8] sm:$0xff] %vm392_vm1, %v13741_v49 }
 0x1a5   : > { %v1362_v8 = vor.u32 %v1360_v40, %v13584_v17  ;;  %v13711_v55 = vrot.slane %v1364_v46, 1  ;;  %v13719_v14 = vadd.s32 168, %v11527_v33  ;;  %v2965_v45 = vcvt.s32.f32 %v13714_v2  ;;  %10522 = vmatprep.subr.bf16.mxu1 %v11252_v1  ;;  %v11254_v62 = vld [vmem:[%s18116_s3 + $0xd0] sm:$0xff]   ;;  %2348 = vmatprep.mubr.bf16.mxu1 %v1907_v4 }
 0x1a6   : > { %v4792_v16 = vsel %vm4324_vm9, %v18457_v54, %v4791_v36  ;;  %v3382_v13 = vrot.slane %v3380_v24, 1  ;;  %v3385_v43 = vrot.slane %v3383_v61, 2  ;;  %v4399_v17 = vor.u32 %v4397_v11, %v13708_v38  ;;  %v18466_v24 = vld [vmem:[#allocation19_spill] sm:$0xff] }
 0x1a7   : > { %vm4850_vm11 = vcmp.ne.s16.totalorder %v4792_v16, 0  ;;  %v1367_v58 = vsel %vm979_vm12, %v1362_v8, %v13711_v55  ;;  %1547 = vrot.lane.b32.xlu1 %v18458_v9, %s11376_s15  ;;  %v2966_v5 = vcvt.s32.f32 %v13719_v14  ;;  %v4239_v50 = vshrl.u32 %v13624_v10, 16 }
 0x1a8   : > { %v13734_v12 = vsel %vm4850_vm11, %v13248_v21, 0  ;;  %v13736_v37 = vor.u32 %v3385_v43, %v3382_v13  ;;  %1472 = vst.msk [vmem:[#allocation4 + $0x60] sm:$0xff] %vm392_vm1, %v1367_v58  ;;  %v13749_v11 = vsel %vm3298_vm7, %v13455_v60, %v13702_v48  ;;  %v2997_v46 = vadd.f32 0.5, %v2965_v45  ;;  %v18459_v60 = vld [vmem:[#allocation28_spill] sm:$0xff]  ;;  %1770 = vrot.lane.b32.xlu0 %v13211_v53, %s11376_s15  ;;  %10523 = vmatpush3.bf16.msra.mxu1 %v11253_v57  ;;  %v11255_v53 = vld [vmem:[%s18116_s3 + $0x90] sm:$0xff]   ;;  %v1101_v57 = vpop.permute.xlu1 %1100 }
 0x1a9   : > { %v4947_v40 = vshll.u32 %v13734_v12, 16  ;;  %vm5414_vm14 = vcmp.lt.f32.partialorder %v13567_v29, 13.0  ;;  %v13760_v10 = vsel %vm4324_vm9, %v13389_v20, %v4399_v17  ;;  %v2998_v36 = vadd.f32 0.5, %v2966_v5  ;;  %10524 = vmatprep.subr.bf16.mxu1 %v11254_v62  ;;  %v11256_v13 = vld [vmem:[%s18116_s3 + $0xd8] sm:$0xff]   ;;  %1141 = vst.msk [vmem:[#allocation4 + $0x50] sm:$0xff] %vm1138_vm2, %v1101_v57 }
 0x1aa   : > { %v3387_v27 = vsel %vm3298_vm7, %v18459_v60, %v13736_v37  ;;  %vm5415_vm15 = vcmp.lt.f32.partialorder %v13581_v42, 13.0  ;;  %vm13768_vm0 = vmpackc.low %vm5414_vm14, %vm5414_vm14  ;;  %v3029_v61 = vmul.f32 0.0625, %v2997_v46  ;;  %v13775_v20 = vor.u32 %v4239_v50, %v13655_v3  ;;  %v1906_v50 = vld [vmem:[#allocation4 + $0x28] sm:$0xff]  ;;  %v18465_v60 = vld [vmem:[#allocation41_spill] sm:$0xff] }
 0x1ab   : > { %vm3451_vm3 = vcmp.ne.s16.totalorder %v3387_v27, 0  ;;  %vm13777_vm4 = vmpackc.low %vm5415_vm15, %vm5415_vm15  ;;  %v5478_v8 = vsel %vm13768_vm0, 65537, %v13547_v25  ;;  %1549 = vrot.lane.b32.xlu1 %v18464_v30, %s11376_s15  ;;  %v3030_v3 = vmul.f32 0.0625, %v2998_v36  ;;  %v1368_v16 = vshrl.u32 %v12887_v23, 16  ;;  %2349 = vmatmul.mubr.bf16.gmra.mrb[4].mxu1 %v1906_v50 }
 0x1ac   : > { %v3468_v56 = vsel %vm3451_vm3, %v13181_v51, 0  ;;  %v5479_v54 = vsel %vm13777_vm4, 65537, %v13547_v25  ;;  %v4949_v43 = vrot.slane %v4947_v40, 1  ;;  %v3061_v9 = vfloor.f32 %v3029_v61  ;;  %1772 = vrot.lane.b32.xlu0 %v13288_v63, %s11376_s15  ;;  %10525 = vmatpush3.bf16.msra.mxu1 %v11255_v53  ;;  %v1912_v63 = vld [vmem:[#allocation4 + $0x58] sm:$0xff] }
 0x1ad   : > { %v3558_v17 = vshrl.u32 %v3468_v56, 16  ;;  %v3561_v58 = vshll.u32 %v3468_v56, 16  ;;  %v3062_v15 = vfloor.f32 %v3030_v3  ;;  %v10185_v4 = vcombine.low %v5478_v8, %v5479_v54  ;;  %v1276_v56 = vpop.permute.xlu0 %1275  ;;  %10526 = vmatprep.subr.bf16.mxu1 %v11256_v13  ;;  %v11258_v3 = vld [vmem:[%s18116_s3 + $0xe0] sm:$0xff]   ;;  %2356 = vmatprep.mubr.bf16.mxu1 %v1912_v63 }
 0x1ae   : > { %v1370_v46 = vor.u32 %v1368_v16, %v13711_v55  ;;  %v1372_v27 = vshll.u32 %v18465_v60, 16  ;;  %v3093_v40 = vmul.f32 16.0, %v3061_v9  ;;  %v4951_v36 = vshrl.u32 %v13734_v12, 16  ;;  %v11257_v55 = vld [vmem:[%s18116_s3 + $0x98] sm:$0xff]   ;;  %1314 = vst.msk [vmem:[#allocation4 + $0x80] sm:$0xff] %vm1138_vm2, %v1276_v56 }
 0x1af   : > { %v3560_v23 = vrot.slane %v3558_v17, 6  ;;  %v3563_v62 = vrot.slane %v3561_v58, 7  ;;  %1551 = vrot.lane.b32.xlu1 %v18466_v24, %s11376_s15  ;;  %v3094_v61 = vmul.f32 16.0, %v3062_v15  ;;  %v5621_v1 = vshrl.u32 %v10185_v4, 16  ;;  %v13829_v9 = vld [vmem:[#allocation2 + $0x38] sm:$0xff] }
 0x1b0   : > { %v5624_v8 = vshll.u32 %v10185_v4, 16  ;;  %v1374_v30 = vrot.slane %v1372_v27, 1  ;;  %v13813_v12 = vsel %vm979_vm12, %v13681_v31, %v4949_v43  ;;  %v13819_v54 = vsub.f32 %v2965_v45, %v3093_v40  ;;  %1774 = vrot.lane.b32.xlu0 %v13365_v44, %s11376_s15  ;;  %v11269_v45 = vld [vmem:[%s18118_s5 + $0x40] sm:$0xff]   ;;  %10527 = vmatpush3.bf16.msra.mxu1 %v11257_v55  ;;  %v1911_v27 = vld [vmem:[#allocation4 + $0x50] sm:$0xff] }
 0x1b1   : > { %v13815_v53 = vor.u32 %v3563_v62, %v3560_v23  ;;  %v13821_v16 = vor.u32 %v4951_v36, %v4949_v43  ;;  %v13826_v13 = vsub.f32 %v2966_v5, %v3094_v61  ;;  %v5623_v17 = vrot.slane %v5621_v1, 6  ;;  %v11259_v44 = vld [vmem:[%s18116_s3 + $0xa0] sm:$0xff]   ;;  %10528 = vmatprep.subr.bf16.mxu1 %v11258_v3  ;;  %v11260_v43 = vld [vmem:[%s18116_s3 + $0xe8] sm:$0xff]   ;;  %10638 = vmatprep.subr.bf16.mxu0 %v11269_v45  ;;  %v11274_v55 = vld [vmem:[%s18118_s5 + $0x50] sm:$0xff]  }
 0x1b2   : > { %v5626_v58 = vrot.slane %v5624_v8, 7  ;;  %v1375_v31 = vsel %vm979_vm12, %v1370_v46, %v1374_v30  ;;  %vm4039_vm5 = vcmp.ge.f32.partialorder %v13819_v54, 1.0  ;;  %vm4590_vm6 = vcmp.lt.f32.partialorder %v13819_v54, 15.0  ;;  %v13877_v46 = vld [vmem:[#allocation2 + $0x80] sm:$0xff]  ;;  %v11261_v8 = vld [vmem:[%s18116_s3 + $0xa8] sm:$0xff]  }
 0x1b3   : > { %v13836_v2 = vsel %vm3476_vm13, %v13494_v47, %v13815_v53  ;;  %1473 = vst.msk [vmem:[#allocation4 + $0x88] sm:$0xff] %vm392_vm1, %v1375_v31  ;;  %v1376_v14 = vshrl.u32 %v18465_v60, 16  ;;  %1553 = vrot.lane.b32.xlu1 %v13037_v7, %s11376_s15  ;;  %vm4040_vm8 = vcmp.ge.f32.partialorder %v13826_v13, 1.0  ;;  %vm13851_vm11 = vmpackc.low %vm4039_vm5, %vm4039_vm5  ;;  %vm4591_vm14 = vcmp.lt.f32.partialorder %v13826_v13, 15.0  ;;  %v11270_v7 = vld [vmem:[%s18118_s5] sm:$0xff]   ;;  %v1103_v60 = vpop.permute.xlu1 %1102  ;;  %2357 = vmatmul.mubr.bf16.gmra.mrb[8].mxu1 %v1911_v27 }
 0x1b4   : > { %v13855_v5 = vor.u32 %v5626_v58, %v5623_v17  ;;  %vm3174_vm15 = vcmp.ge.f32.partialorder %v13819_v54, 3.0  ;;  %vm13865_vm0 = vmpackc.low %vm4040_vm8, %vm4040_vm8  ;;  %v4103_v50 = vsel %vm13851_vm11, 65537, %v13547_v25  ;;  %vm3175_vm3 = vcmp.ge.f32.partialorder %v13826_v13, 3.0  ;;  %10639 = vmatpush3.bf16.msra.mxu0 %v11270_v7  ;;  %1626 = vst.msk [vmem:[#allocation4 + $0x220] sm:$0xff] %vm392_vm1, %v13877_v46  ;;  %1776 = vrot.lane.b32.xlu0 %v13432_v35, %s11376_s15  ;;  %v11271_v35 = vld [vmem:[%s18118_s5 + $0x48] sm:$0xff]   ;;  %v1278_v58 = vpop.permute.xlu0 %1277 }
 0x1b5   : > { %v1380_v15 = vshll.u32 %v13829_v9, 16  ;;  %v13875_v4 = vadd.s32 176, %v11527_v33  ;;  %v4104_v23 = vsel %vm13865_vm0, 65537, %v13547_v25  ;;  %vm13888_vm4 = vmpackc.low %vm4590_vm6, %vm4590_vm6  ;;  %v1378_v36 = vor.u32 %v1376_v14, %v1374_v30  ;;  %1142 = vst.msk [vmem:[#allocation4 + $0x78] sm:$0xff] %vm1138_vm2, %v1103_v60  ;;  %10529 = vmatpush3.bf16.msra.mxu1 %v11259_v44  ;;  %v11272_v17 = vld [vmem:[%s18118_s5 + $0x8] sm:$0xff]   ;;  %v1917_v31 = vld [vmem:[#allocation4 + $0x80] sm:$0xff]  ;;  %10640 = vmatprep.subr.bf16.mxu0 %v11271_v35 }
 0x1b6   : > { %v5628_v62 = vsel %vm3476_vm13, %v13626_v22, %v13855_v5  ;;  %v13893_v24 = vadd.s32 184, %v11527_v33  ;;  %v13900_v22 = vcombine.low %v4103_v50, %v4104_v23  ;;  %vm13905_vm6 = vmpackc.low %vm4591_vm14, %vm4591_vm14  ;;  %v4654_v61 = vsel %vm13888_vm4, 65537, %v13547_v25  ;;  %10530 = vmatprep.subr.bf16.mxu1 %v11260_v43  ;;  %v11262_v14 = vld [vmem:[%s18116_s3 + $0xf0] sm:$0xff]   ;;  %1315 = vst.msk [vmem:[#allocation4 + $0xa8] sm:$0xff] %vm1138_vm2, %v1278_v58  ;;  %2364 = vmatprep.mubr.bf16.mxu1 %v1917_v31 }
 0x1b7   : > { %vm5692_vm5 = vcmp.ne.s16.totalorder %v5628_v62, 0  ;;  %v13912_v1 = vrot.slane %v1380_v15, 1  ;;  %1555 = vrot.lane.b32.xlu1 %v13122_v52, %s11376_s15  ;;  %v4655_v56 = vsel %vm13905_vm6, 65537, %v13547_v25  ;;  %vm13929_vm8 = vmpackc.low %vm3174_vm15, %vm3174_vm15  ;;  %v2967_v52 = vcvt.s32.f32 %v13875_v4  ;;  %v1105_v58 = vpop.permute.xlu1 %1104 }
 0x1b8   : > { %v5709_v30 = vsel %vm5692_vm5, %v13248_v21, 0  ;;  %v2968_v3 = vcvt.s32.f32 %v13893_v24  ;;  %v4243_v45 = vshll.u32 %v13900_v22, 16  ;;  %v10154_v7 = vcombine.low %v4654_v61, %v4655_v56  ;;  %vm13945_vm11 = vmpackc.low %vm3175_vm3, %vm3175_vm3  ;;  %10641 = vmatpush3.bf16.msra.mxu0 %v11272_v17  ;;  %1778 = vrot.lane.b32.xlu0 %v13497_v34, %s11376_s15  ;;  %v11275_v56 = vld [vmem:[%s18118_s5 + $0x10] sm:$0xff]   ;;  %1143 = vst.msk [vmem:[#allocation4 + $0xa0] sm:$0xff] %vm1138_vm2, %v1105_v58 }
 0x1b9   : > { %v5798_v44 = vshrl.u32 %v5709_v30, 16  ;;  %v5801_v47 = vshll.u32 %v5709_v30, 16  ;;  %v3238_v43 = vsel %vm13929_vm8, 65537, %v13547_v25  ;;  %v3239_v50 = vsel %vm13945_vm11, 65537, %v13547_v25  ;;  %10531 = vmatpush3.bf16.msra.mxu1 %v11261_v8  ;;  %10642 = vmatprep.subr.bf16.mxu0 %v11274_v55 }
 0x1ba   : > { %v1383_v15 = vsel %vm979_vm12, %v1378_v36, %v13912_v1  ;;  %v2999_v60 = vadd.f32 0.5, %v2967_v52  ;;  %v13962_v27 = vrot.slane %v4243_v45, 1  ;;  %v4794_v40 = vshrl.u32 %v10154_v7, 16  ;;  %v11263_v36 = vld [vmem:[%s18116_s3 + $0xb0] sm:$0xff]   ;;  %10532 = vmatprep.subr.bf16.mxu1 %v11262_v14 }
 0x1bb   : > { %v5800_v23 = vrot.slane %v5798_v44, 1  ;;  %v5803_v62 = vrot.slane %v5801_v47, 2  ;;  %1474 = vst.msk [vmem:[#allocation4 + $0xb0] sm:$0xff] %vm392_vm1, %v1383_v15  ;;  %1557 = vrot.lane.b32.xlu1 %v13196_v18, %s11376_s15  ;;  %v4797_v34 = vshll.u32 %v10154_v7, 16  ;;  %v10106_v61 = vcombine.low %v3238_v43, %v3239_v50  ;;  %v11264_v18 = vld [vmem:[%s18116_s3 + $0xf8] sm:$0xff]  }
 0x1bc   : > { %v3000_v35 = vadd.f32 0.5, %v2968_v3  ;;  %v3031_v30 = vmul.f32 0.0625, %v2999_v60  ;;  %v4246_v8 = vsel %vm979_vm12, %v13775_v20, %v13962_v27  ;;  %v13986_v17 = vrot.slane %v4794_v40, 7  ;;  %v1916_v31 = vld [vmem:[#allocation4 + $0x78] sm:$0xff]  ;;  %10643 = vmatpush3.bf16.msra.mxu0 %v11275_v56  ;;  %1780 = vrot.lane.b32.xlu0 %v13576_v39, %s11376_s15 }
 0x1bd   : > { %v13984_v63 = vor.u32 %v5803_v62, %v5800_v23  ;;  %vm5416_vm14 = vcmp.lt.f32.partialorder %v13819_v54, 13.0  ;;  %vm4300_vm15 = vcmp.ne.s16.totalorder %v4246_v8, 0  ;;  %v3389_v45 = vshrl.u32 %v10106_v61, 16  ;;  %2365 = vmatmul.mubr.bf16.gmra.mrb[12].mxu1 %v1916_v31  ;;  %v11276_v43 = vld [vmem:[%s18118_s5 + $0x58] sm:$0xff]   ;;  %v1280_v62 = vpop.permute.xlu0 %1279  ;;  %v1922_v40 = vld [vmem:[#allocation4 + $0xa8] sm:$0xff] }
 0x1be   : > { %v3392_v14 = vshll.u32 %v10106_v61, 16  ;;  %v3032_v44 = vmul.f32 0.0625, %v3000_v35  ;;  %v4317_v20 = vsel %vm4300_vm15, %v13248_v21, 0  ;;  %v4799_v47 = vor.u32 %v4797_v34, %v13986_v17  ;;  %10533 = vmatpush3.bf16.msra.mxu1 %v11263_v36  ;;  %v11265_v39 = vld [vmem:[%s18116_s3 + $0xb8] sm:$0xff]   ;;  %vm14011_vm0 = vmpackc.low %vm5416_vm14, %vm5416_vm14  ;;  %10644 = vmatprep.subr.bf16.mxu0 %v11276_v43  ;;  %1316 = vst.msk [vmem:[#allocation4 + $0xd0] sm:$0xff] %vm1138_vm2, %v1280_v62  ;;  %v11282_v62 = vld [vmem:[%s18118_s5 + $0x28] sm:$0xff]  }
 0x1bf   : > { %v3063_v7 = vfloor.f32 %v3031_v30  ;;  %v4247_v57 = vshrl.u32 %v13900_v22, 16  ;;  %1559 = vrot.lane.b32.xlu1 %v13269_v6, %s11376_s15  ;;  %v4402_v50 = vshrl.u32 %v4317_v20, 16  ;;  %v14006_v15 = vsel %vm3298_vm7, %v13702_v48, %v13984_v63  ;;  %v11277_v6 = vld [vmem:[%s18118_s5 + $0x18] sm:$0xff]   ;;  %10534 = vmatprep.subr.bf16.mxu1 %v11264_v18 }
 0x1c0   : > { %v3391_v60 = vrot.slane %v3389_v45, 1  ;;  %v3394_v22 = vrot.slane %v3392_v14, 2  ;;  %v4405_v55 = vshll.u32 %v4317_v20, 16  ;;  %v4800_v48 = vsel %vm4324_vm9, %v13690_v0, %v4799_v47  ;;  %2372 = vmatprep.mubr.bf16.mxu1 %v1922_v40  ;;  %10645 = vmatpush3.bf16.msra.mxu0 %v11277_v6  ;;  %v11279_v45 = vld [vmem:[%s18118_s5 + $0x20] sm:$0xff]  }
 0x1c1   : > { %v3064_v36 = vfloor.f32 %v3032_v44  ;;  %v3095_v34 = vmul.f32 16.0, %v3063_v7  ;;  %v14021_v61 = vrot.slane %v4402_v50, 7  ;;  %vm4851_vm3 = vcmp.ne.s16.totalorder %v4800_v48, 0  ;;  %1782 = vrot.lane.b32.xlu0 %v13634_v41, %s11376_s15  ;;  %v11278_v41 = vld [vmem:[%s18118_s5 + $0x60] sm:$0xff]   ;;  %v11281_v50 = vld [vmem:[%s18118_s5 + $0x68] sm:$0xff]   ;;  %v1282_v40 = vpop.permute.xlu0 %1281  ;;  %v11283_v7 = vld [vmem:[%s18118_s5 + $0x70] sm:$0xff]  }
 0x1c2   : > { %v14023_v35 = vor.u32 %v3394_v22, %v3391_v60  ;;  %vm5417_vm4 = vcmp.lt.f32.partialorder %v13826_v13, 13.0  ;;  %v14029_v30 = vsel %vm4851_vm3, %v13331_v32, 0  ;;  %v5480_v8 = vsel %vm14011_vm0, 65537, %v13547_v25  ;;  %10535 = vmatpush3.bf16.msra.mxu1 %v11265_v39  ;;  %10646 = vmatprep.subr.bf16.mxu0 %v11278_v41  ;;  %v1921_v14 = vld [vmem:[#allocation4 + $0xa0] sm:$0xff]  ;;  %1317 = vst.msk [vmem:[#allocation4 + $0xf8] sm:$0xff] %vm1138_vm2, %v1282_v40 }
 0x1c3   : > { %v3096_v0 = vmul.f32 16.0, %v3064_v36  ;;  %v14033_v56 = vsub.f32 %v2967_v52, %v3095_v34  ;;  %vm14035_vm5 = vmpackc.low %vm5417_vm4, %vm5417_vm4  ;;  %1561 = vrot.lane.b32.xlu1 %v13351_v19, %s11376_s15  ;;  %v4407_v4 = vor.u32 %v4405_v55, %v14021_v61  ;;  %v4955_v52 = vshll.u32 %v14029_v30, 16  ;;  %6437 = vmatprep.subr.bf16.mxu1 %v13547_v25  ;;  %v18485_v60 = vld [vmem:[#allocation57_spill] sm:$0xff] }
 0x1c4   : > { %v3396_v58 = vsel %vm3298_vm7, %v13736_v37, %v14023_v35  ;;  %v14053_v31 = vor.u32 %v4247_v57, %v13962_v27  ;;  %v5481_v37 = vsel %vm14035_vm5, 65537, %v13547_v25  ;;  %v1107_v27 = vpop.permute.xlu1 %1106  ;;  %v4959_v20 = vshrl.u32 %v14029_v30, 16  ;;  %10647 = vmatpush3.bf16.msra.mxu0 %v11279_v45 }
 0x1c5   : > { %vm3452_vm6 = vcmp.ne.s16.totalorder %v3396_v58, 0  ;;  %v14061_v19 = vsub.f32 %v2968_v3, %v3096_v0  ;;  %vm4041_vm8 = vcmp.ge.f32.partialorder %v14033_v56, 1.0  ;;  %v4957_v44 = vrot.slane %v4955_v52, 1  ;;  %v14073_v3 = vld [vmem:[#allocation2 + $0x40] sm:$0xff]  ;;  %1144 = vst.msk [vmem:[#allocation4 + $0xc8] sm:$0xff] %vm1138_vm2, %v1107_v27  ;;  %1784 = vrot.lane.b32.xlu0 %v13653_v26, %s11376_s15  ;;  %2373 = vmatmul.mubr.bf16.gmra.mrb[16].mxu1 %v1921_v14  ;;  %v1927_v55 = vld [vmem:[#allocation4 + $0xd0] sm:$0xff] }
 0x1c6   : > { %v3469_v47 = vsel %vm3452_vm6, %v13248_v21, 0  ;;  %vm14069_vm11 = vmpackc.low %vm4041_vm8, %vm4041_vm8  ;;  %v10186_v24 = vcombine.low %v5480_v8, %v5481_v37  ;;  %v14089_v22 = vsel %vm4324_vm9, %v13708_v38, %v4407_v4  ;;  %v1384_v6 = vshrl.u32 %v13829_v9, 16  ;;  %10648 = vmatprep.subr.bf16.mxu0 %v11281_v50  ;;  %2380 = vmatprep.mubr.bf16.mxu1 %v1927_v55  ;;  %v18486_v8 = vld [vmem:[#allocation29_spill] sm:$0xff]  ;;  %v18487_v52 = vld [vmem:[#allocation62_spill] sm:$0xff] }
 0x1c7   : > { %v3567_v57 = vshrl.u32 %v3469_v47, 16  ;;  %v3570_v43 = vshll.u32 %v3469_v47, 16  ;;  %vm4042_vm14 = vcmp.ge.f32.partialorder %v14061_v19, 1.0  ;;  %v4105_v39 = vsel %vm14069_vm11, 65537, %v13547_v25  ;;  %1563 = vrot.lane.b32.xlu1 %v18485_v60, %s11376_s15  ;;  %v18494_v60 = vld [vmem:[#allocation31_spill] sm:$0xff] }
 0x1c8   : > { %vm4074_vm15 = vmpackc.low %vm4042_vm14, %vm4042_vm14  ;;  %v5630_v26 = vshrl.u32 %v10186_v24, 16  ;;  %v5633_v23 = vshll.u32 %v10186_v24, 16  ;;  %v1388_v30 = vshll.u32 %v14073_v3, 16  ;;  %v14100_v38 = vsel %vm979_vm12, %v13821_v16, %v4957_v44  ;;  %10649 = vmatpush3.bf16.msra.mxu0 %v11282_v62  ;;  %v1109_v24 = vpop.permute.xlu1 %1108 }
 0x1c9   : > { %v3569_v48 = vrot.slane %v3567_v57, 6  ;;  %v3572_v36 = vrot.slane %v3570_v43, 7  ;;  %v4106_v34 = vsel %vm4074_vm15, 65537, %v13547_v25  ;;  %4457 = vrot.lane.b32.xlu0 %v18486_v8, %s11376_s15  ;;  %v1386_v41 = vor.u32 %v1384_v6, %v13912_v1  ;;  %1145 = vst.msk [vmem:[#allocation4 + $0xf0] sm:$0xff] %vm1138_vm2, %v1109_v24  ;;  %10650 = vmatprep.subr.bf16.mxu0 %v11283_v7 }
 0x1ca   : > { %v14102_v9 = vcombine.low %v4105_v39, %v4106_v34  ;;  %v5632_v0 = vrot.slane %v5630_v26, 6  ;;  %v5635_v18 = vrot.slane %v5633_v23, 7  ;;  %v1390_v4 = vrot.slane %v1388_v30, 1 }
 0x1cb   : > { %vm4592_vm0 = vcmp.lt.f32.partialorder %v14033_v56, 15.0  ;;  %vm4593_vm3 = vcmp.lt.f32.partialorder %v14061_v19, 15.0  ;;  %1565 = vrot.lane.b32.xlu1 %v18487_v52, %s11376_s15  ;;  %v14111_v16 = vor.u32 %v3572_v36, %v3569_v48  ;;  %vm3176_vm5 = vcmp.ge.f32.partialorder %v14033_v56, 3.0  ;;  %v1284_v48 = vpop.permute.xlu0 %1283  ;;  %v1932_v36 = vld [vmem:[#allocation4 + $0xf8] sm:$0xff] }
 0x1cc   : > { %v4251_v58 = vshll.u32 %v14102_v9, 16  ;;  %v14114_v45 = vor.u32 %v5635_v18, %v5632_v0  ;;  %vm14116_vm4 = vmpackc.low %vm4592_vm0, %vm4592_vm0  ;;  %v1391_v1 = vsel %vm979_vm12, %v1386_v41, %v1390_v4  ;;  %v14129_v47 = vor.u32 %v4959_v20, %v4957_v44  ;;  %v1926_v57 = vld [vmem:[#allocation4 + $0xc8] sm:$0xff]  ;;  %1318 = vst.msk [vmem:[#allocation4 + $0x120] sm:$0xff] %vm1138_vm2, %v1284_v48  ;;  %v18497_v41 = vld [vmem:[#allocation32_spill] sm:$0xff] }
 0x1cd   : > { %vm14122_vm6 = vmpackc.low %vm4593_vm3, %vm4593_vm3  ;;  %v4656_v14 = vsel %vm14116_vm4, 65537, %v13547_v25  ;;  %vm3177_vm8 = vcmp.ge.f32.partialorder %v14061_v19, 3.0  ;;  %1475 = vst.msk [vmem:[#allocation4 + $0xd8] sm:$0xff] %vm392_vm1, %v1391_v1  ;;  %v1392_v50 = vshrl.u32 %v14073_v3, 16  ;;  %5007 = vrot.lane.b32.xlu0 %v18494_v60, %s11376_s15  ;;  %2381 = vmatmul.mubr.bf16.gmra.mrb[20].mxu1 %v1926_v57  ;;  %v1396_v6 = vshll.u32 %v13181_v51, 16 }
 0x1ce   : > { %v14135_v43 = vrot.slane %v4251_v58, 1  ;;  %v5637_v39 = vsel %vm3476_vm13, %v13855_v5, %v14114_v45  ;;  %v4657_v44 = vsel %vm14122_vm6, 65537, %v13547_v25  ;;  %vm14144_vm11 = vmpackc.low %vm3176_vm5, %vm3176_vm5  ;;  %2388 = vmatprep.mubr.bf16.mxu1 %v1932_v36  ;;  %v4255_v26 = vshrl.u32 %v14102_v9, 16  ;;  %v11284_v9 = vld [vmem:[%s18118_s5 + $0x30] sm:$0xff]  }
 0x1cf   : > { %vm5693_vm14 = vcmp.ne.s16.totalorder %v5637_v39, 0  ;;  %v10155_v5 = vcombine.low %v4656_v14, %v4657_v44  ;;  %vm14152_vm15 = vmpackc.low %vm3177_vm8, %vm3177_vm8  ;;  %v3240_v23 = vsel %vm14144_vm11, 65537, %v13547_v25  ;;  %1567 = vrot.lane.b32.xlu1 %v13557_v28, %s11376_s15  ;;  %v1394_v55 = vor.u32 %v1392_v50, %v1390_v4  ;;  %10651 = vmatpush3.bf16.msra.mxu0 %v11284_v9 }
 0x1d0   : > { %v4254_v3 = vsel %vm979_vm12, %v14053_v31, %v14135_v43  ;;  %v5710_v62 = vsel %vm5693_vm14, %v13331_v32, 0  ;;  %v3241_v40 = vsel %vm14152_vm15, 65537, %v13547_v25  ;;  %v14171_v8 = vrot.slane %v1396_v6, 1  ;;  %v1931_v20 = vld [vmem:[#allocation4 + $0xf0] sm:$0xff] }
 0x1d1   : > { %vm4301_vm0 = vcmp.ne.s16.totalorder %v4254_v3, 0  ;;  %v5807_v34 = vshrl.u32 %v5710_v62, 16  ;;  %v5810_v30 = vshll.u32 %v5710_v62, 16  ;;  %v4802_v0 = vshrl.u32 %v10155_v5, 16  ;;  %4459 = vrot.lane.b32.xlu0 %v18497_v41, %s11376_s15 }
 0x1d2   : > { %v4318_v28 = vsel %vm4301_vm0, %v13331_v32, 0  ;;  %v4805_v31 = vshll.u32 %v10155_v5, 16  ;;  %v10107_v18 = vcombine.low %v3240_v23, %v3241_v40  ;;  %v1399_v7 = vsel %vm979_vm12, %v1394_v55, %v14171_v8  ;;  %v18498_v23 = vld [vmem:[#allocation35_spill] sm:$0xff]  ;;  %v18499_v55 = vld [vmem:[#allocation30_spill] sm:$0xff] }
 0x1d3   : > { %v4410_v4 = vshrl.u32 %v4318_v28, 16  ;;  %v4413_v52 = vshll.u32 %v4318_v28, 16  ;;  %v5809_v58 = vrot.slane %v5807_v34, 1  ;;  %v5812_v37 = vrot.slane %v5810_v30, 2  ;;  %1569 = vrot.lane.b32.xlu1 %v13687_v59, %s11376_s15  ;;  %1476 = vst.msk [vmem:[#allocation4 + $0x100] sm:$0xff] %vm392_vm1, %v1399_v7  ;;  %v1111_v59 = vpop.permute.xlu1 %1110  ;;  %v11286_v34 = vld [vmem:[%s18118_s5 + $0x78] sm:$0xff]   ;;  %v1286_v30 = vpop.permute.xlu0 %1285 }
 0x1d4   : > { %v14177_v1 = vrot.slane %v4802_v0, 7  ;;  %v3398_v27 = vshrl.u32 %v10107_v18, 16  ;;  %v3401_v14 = vshll.u32 %v10107_v18, 16  ;;  %v14187_v39 = vadd.s32 192, %v11527_v33  ;;  %1146 = vst.msk [vmem:[#allocation4 + $0x118] sm:$0xff] %vm1138_vm2, %v1111_v59  ;;  %v1937_v0 = vld [vmem:[#allocation4 + $0x120] sm:$0xff]  ;;  %10652 = vmatprep.subr.bf16.mxu0 %v11286_v34 }
 0x1d5   : > { %v14181_v24 = vrot.slane %v4410_v4, 7  ;;  %v14183_v57 = vor.u32 %v5812_v37, %v5809_v58  ;;  %v14190_v44 = vadd.s32 200, %v11527_v33  ;;  %5009 = vrot.lane.b32.xlu0 %v18498_v23, %s11376_s15  ;;  %2389 = vmatmul.mubr.bf16.gmra.mrb[24].mxu1 %v1931_v20  ;;  %v14200_v6 = vsel %vm3476_vm13, %v13815_v53, %v14111_v16  ;;  %1319 = vst.msk [vmem:[#allocation4 + $0x148] sm:$0xff] %vm1138_vm2, %v1286_v30  ;;  %v18502_v18 = vld [vmem:[#allocation56_spill] sm:$0xff]  ;;  %v18506_v7 = vld [vmem:[#allocation33_spill] sm:$0xff] }
 0x1d6   : > { %v4807_v50 = vor.u32 %v4805_v31, %v14177_v1  ;;  %v3400_v60 = vrot.slane %v3398_v27, 1  ;;  %v3403_v5 = vrot.slane %v3401_v14, 2  ;;  %v2969_v62 = vcvt.s32.f32 %v14187_v39  ;;  %2396 = vmatprep.mubr.bf16.mxu1 %v1937_v0  ;;  %v14258_v59 = vld [vmem:[#allocation2] sm:$0xff] }
 0x1d7   : > { %v4415_v3 = vor.u32 %v4413_v52, %v14181_v24  ;;  %v2970_v40 = vcvt.s32.f32 %v14190_v44  ;;  %3629 = vrot.lane.b32.xlu1 %v18499_v55, %s11376_s15  ;;  %v14213_v48 = vsel %vm3298_vm7, %v13984_v63, %v14183_v57  ;;  %vm5418_vm3 = vcmp.lt.f32.partialorder %v14033_v56, 13.0  ;;  %v18503_v52 = vld [vmem:[#allocation37_spill] sm:$0xff] }
 0x1d8   : > { %v4808_v53 = vsel %vm4324_vm9, %v13986_v17, %v4807_v50  ;;  %v14217_v36 = vor.u32 %v3403_v5, %v3400_v60  ;;  %v3001_v28 = vadd.f32 0.5, %v2969_v62  ;;  %v14228_v31 = vor.u32 %v4255_v26, %v14135_v43  ;;  %vm14230_vm5 = vmpackc.low %vm5418_vm3, %vm5418_vm3  ;;  %v1113_v55 = vpop.permute.xlu1 %1112 }
 0x1d9   : > { %vm4852_vm4 = vcmp.ne.s16.totalorder %v4808_v53, 0  ;;  %v3002_v63 = vadd.f32 0.5, %v2970_v40  ;;  %vm5419_vm6 = vcmp.lt.f32.partialorder %v14061_v19, 13.0  ;;  %v5482_v43 = vsel %vm14230_vm5, 65537, %v13547_v25  ;;  %4461 = vrot.lane.b32.xlu0 %v18503_v52, %s11376_s15  ;;  %1147 = vst.msk [vmem:[#allocation4 + $0x140] sm:$0xff] %vm1138_vm2, %v1113_v55 }
 0x1da   : > { %v14236_v41 = vsel %vm4852_vm4, %v18502_v18, 0  ;;  %v3405_v4 = vsel %vm3298_vm7, %v14023_v35, %v14217_v36  ;;  %v3033_v37 = vmul.f32 0.0625, %v3001_v28  ;;  %vm14248_vm11 = vmpackc.low %vm5419_vm6, %vm5419_vm6  ;;  %v11287_v35 = vld [vmem:[%s18118_s5 + $0x38] sm:$0xff]   ;;  %v1400_v50 = vshrl.u32 %v13181_v51, 16 }
 0x1db   : > { %v4963_v58 = vshll.u32 %v14236_v41, 16  ;;  %vm3453_vm8 = vcmp.ne.s16.totalorder %v3405_v4, 0  ;;  %v3034_v27 = vmul.f32 0.0625, %v3002_v63  ;;  %5869 = vrot.lane.b32.xlu1 %v18506_v7, %s11376_s15  ;;  %v5483_v20 = vsel %vm14248_vm11, 65537, %v14258_v59  ;;  %10653 = vmatpush3.bf16.msra.mxu0 %v11287_v35  ;;  %v1936_v53 = vld [vmem:[#allocation4 + $0x118] sm:$0xff]  ;;  %v1288_v14 = vpop.permute.xlu0 %1287 }
 0x1dc   : > { %v3470_v25 = vsel %vm3453_vm8, %v13331_v32, 0  ;;  %v1404_v60 = vshll.u32 %v13248_v21, 16  ;;  %v3065_v9 = vfloor.f32 %v3033_v37  ;;  %v10187_v30 = vcombine.low %v5482_v43, %v5483_v20  ;;  %v18507_v63 = vld [vmem:[#allocation40_spill] sm:$0xff]  ;;  %v1942_v35 = vld [vmem:[#allocation4 + $0x148] sm:$0xff]  ;;  %1320 = vst.msk [vmem:[#allocation4 + $0x170] sm:$0xff] %vm1138_vm2, %v1288_v14 }
 0x1dd   : > { %v14265_v5 = vrot.slane %v4963_v58, 1  ;;  %v3576_v26 = vshrl.u32 %v3470_v25, 16  ;;  %v3579_v23 = vshll.u32 %v3470_v25, 16  ;;  %v3066_v34 = vfloor.f32 %v3034_v27  ;;  %5011 = vrot.lane.b32.xlu0 %v18507_v63, %s11376_s15  ;;  %2397 = vmatmul.mubr.bf16.gmra.mrb[28].mxu1 %v1936_v53  ;;  %v18508_v58 = vld [vmem:[#allocation36_spill] sm:$0xff] }
 0x1de   : > { %v1402_v0 = vor.u32 %v1400_v50, %v14171_v8  ;;  %v1406_v28 = vrot.slane %v1404_v60, 1  ;;  %v14273_v51 = vsel %vm4324_vm9, %v14021_v61, %v4415_v3  ;;  %v3097_v52 = vmul.f32 16.0, %v3065_v9  ;;  %2404 = vmatprep.mubr.bf16.mxu1 %v1942_v35 }
 0x1df   : > { %v3578_v17 = vrot.slane %v3576_v26, 6  ;;  %v3581_v4 = vrot.slane %v3579_v23, 7  ;;  %3631 = vrot.lane.b32.xlu1 %v18508_v58, %s11376_s15  ;;  %v3098_v43 = vmul.f32 16.0, %v3066_v34  ;;  %v5639_v37 = vshrl.u32 %v10187_v30, 16  ;;  %v18509_v26 = vld [vmem:[#allocation23_spill] sm:$0xff]  ;;  %v18516_v58 = vld [vmem:[#allocation22_spill] sm:$0xff] }
 0x1e0   : > { %v5642_v8 = vshll.u32 %v10187_v30, 16  ;;  %v1407_v27 = vsel %vm979_vm12, %v1402_v0, %v1406_v28  ;;  %v14281_v7 = vsel %vm979_vm12, %v14129_v47, %v14265_v5  ;;  %v14287_v3 = vsub.f32 %v2969_v62, %v3097_v52  ;;  %v18510_v62 = vld [vmem:[#allocation39_spill] sm:$0xff]  ;;  %v1941_v53 = vld [vmem:[#allocation4 + $0x140] sm:$0xff] }
 0x1e1   : > { %v14283_v61 = vor.u32 %v3581_v4, %v3578_v17  ;;  %1477 = vst.msk [vmem:[#allocation4 + $0x128] sm:$0xff] %vm392_vm1, %v1407_v27  ;;  %v4967_v25 = vshrl.u32 %v14236_v41, 16  ;;  %v14294_v20 = vsub.f32 %v2970_v40, %v3098_v43  ;;  %v5641_v50 = vrot.slane %v5639_v37, 6  ;;  %4463 = vrot.lane.b32.xlu0 %v18509_v26, %s11376_s15  ;;  %v18515_v17 = vld [vmem:[#allocation42_spill] sm:$0xff] }
 0x1e2   : > { %v5644_v47 = vrot.slane %v5642_v8, 7  ;;  %v1412_v60 = vshll.u32 %v13331_v32, 16  ;;  %vm4043_vm14 = vcmp.ge.f32.partialorder %v14287_v3, 1.0  ;;  %vm4594_vm15 = vcmp.lt.f32.partialorder %v14287_v3, 15.0  ;;  %v1115_v55 = vpop.permute.xlu1 %1114 }
 0x1e3   : > { %v14302_v39 = vsel %vm3476_vm13, %v14111_v16, %v14283_v61  ;;  %v1408_v44 = vshrl.u32 %v13248_v21, 16  ;;  %5871 = vrot.lane.b32.xlu1 %v18510_v62, %s11376_s15  ;;  %vm4044_vm0 = vcmp.ge.f32.partialorder %v14294_v20, 1.0  ;;  %vm14310_vm3 = vmpackc.low %vm4043_vm14, %vm4043_vm14  ;;  %vm4595_vm4 = vcmp.lt.f32.partialorder %v14294_v20, 15.0  ;;  %1148 = vst.msk [vmem:[#allocation4 + $0x168] sm:$0xff] %vm1138_vm2, %v1115_v55  ;;  %v18519_v55 = vld [vmem:[#allocation45_spill] sm:$0xff] }
 0x1e4   : > { %v14314_v23 = vor.u32 %v5644_v47, %v5641_v50  ;;  %vm3178_vm5 = vcmp.ge.f32.partialorder %v14287_v3, 3.0  ;;  %vm4076_vm6 = vmpackc.low %vm4044_vm0, %vm4044_vm0  ;;  %v4107_v21 = vsel %vm14310_vm3, 65537, %v14258_v59  ;;  %vm3179_vm8 = vcmp.ge.f32.partialorder %v14294_v20, 3.0  ;;  %v1290_v35 = vpop.permute.xlu0 %1289  ;;  %v1947_v50 = vld [vmem:[#allocation4 + $0x170] sm:$0xff] }
 0x1e5   : > { %v1410_v16 = vor.u32 %v1408_v44, %v1406_v28  ;;  %v14322_v9 = vrot.slane %v1412_v60, 1  ;;  %v4108_v34 = vsel %vm4076_vm6, 65537, %v14258_v59  ;;  %vm14331_vm11 = vmpackc.low %vm4594_vm15, %vm4594_vm15  ;;  %v14336_v63 = vadd.s32 208, %v11527_v33  ;;  %5013 = vrot.lane.b32.xlu0 %v18515_v17, %s11376_s15  ;;  %2405 = vmatmul.mubr.bf16.gmra.mrb[32].mxu1 %v1941_v53  ;;  %1321 = vst.msk [vmem:[#allocation4 + $0x198] sm:$0xff] %vm1138_vm2, %v1290_v35 }
 0x1e6   : > { %v5646_v30 = vsel %vm3476_vm13, %v14114_v45, %v14314_v23  ;;  %v14339_v28 = vadd.s32 216, %v11527_v33  ;;  %v14344_v45 = vcombine.low %v4107_v21, %v4108_v34  ;;  %vm4627_vm15 = vmpackc.low %vm4595_vm4, %vm4595_vm4  ;;  %v4658_v4 = vsel %vm14331_vm11, 65537, %v14258_v59  ;;  %2412 = vmatprep.mubr.bf16.mxu1 %v1947_v50 }
 0x1e7   : > { %vm5694_vm14 = vcmp.ne.s16.totalorder %v5646_v30, 0  ;;  %v1415_v52 = vsel %vm979_vm12, %v1410_v16, %v14322_v9  ;;  %3633 = vrot.lane.b32.xlu1 %v18516_v58, %s11376_s15  ;;  %v4659_v37 = vsel %vm4627_vm15, 65537, %v14258_v59  ;;  %vm14361_vm0 = vmpackc.low %vm3178_vm5, %vm3178_vm5  ;;  %v2971_v27 = vcvt.s32.f32 %v14336_v63  ;;  %v18520_v63 = vld [vmem:[#allocation43_spill] sm:$0xff] }
 0x1e8   : > { %v5711_v43 = vsel %vm5694_vm14, %v18502_v18, 0  ;;  %1478 = vst.msk [vmem:[#allocation4 + $0x150] sm:$0xff] %vm392_vm1, %v1415_v52  ;;  %v2972_v14 = vcvt.s32.f32 %v14339_v28  ;;  %v4259_v47 = vshll.u32 %v14344_v45, 16  ;;  %v10156_v44 = vcombine.low %v4658_v4, %v4659_v37  ;;  %vm3211_vm3 = vmpackc.low %vm3179_vm8, %vm3179_vm8 }
 0x1e9   : > { %v5816_v60 = vshrl.u32 %v5711_v43, 16  ;;  %v5819_v26 = vshll.u32 %v5711_v43, 16  ;;  %v3242_v62 = vsel %vm14361_vm0, 65537, %v14258_v59  ;;  %v3243_v40 = vsel %vm3211_vm3, 65537, %v14258_v59  ;;  %4465 = vrot.lane.b32.xlu0 %v18519_v55, %s11376_s15 }
 0x1ea   : > { %v3003_v21 = vadd.f32 0.5, %v2971_v27  ;;  %v3004_v16 = vadd.f32 0.5, %v2972_v14  ;;  %v14379_v53 = vrot.slane %v4259_v47, 1  ;;  %v4810_v0 = vshrl.u32 %v10156_v44, 16  ;;  %v1117_v35 = vpop.permute.xlu1 %1116  ;;  %v1946_v50 = vld [vmem:[#allocation4 + $0x168] sm:$0xff] }
 0x1eb   : > { %v5818_v34 = vrot.slane %v5816_v60, 1  ;;  %v5821_v30 = vrot.slane %v5819_v26, 2  ;;  %5873 = vrot.lane.b32.xlu1 %v18520_v63, %s11376_s15  ;;  %v4813_v28 = vshll.u32 %v10156_v44, 16  ;;  %v10108_v17 = vcombine.low %v3242_v62, %v3243_v40  ;;  %1149 = vst.msk [vmem:[#allocation4 + $0x190] sm:$0xff] %vm1138_vm2, %v1117_v35  ;;  %v18521_v44 = vld [vmem:[#allocation47_spill] sm:$0xff] }
 0x1ec   : > { %v3035_v4 = vmul.f32 0.0625, %v3003_v21  ;;  %v3036_v52 = vmul.f32 0.0625, %v3004_v16  ;;  %v4262_v58 = vsel %vm979_vm12, %v14228_v31, %v14379_v53  ;;  %v14388_v37 = vrot.slane %v4810_v0, 7 }
 0x1ed   : > { %v14386_v43 = vor.u32 %v5821_v30, %v5818_v34  ;;  %v14393_v8 = vor.u32 %v4967_v25, %v14265_v5  ;;  %vm4302_vm4 = vcmp.ne.s16.totalorder %v4262_v58, 0  ;;  %v3407_v47 = vshrl.u32 %v10108_v17, 16  ;;  %5015 = vrot.lane.b32.xlu0 %v18521_v44, %s11376_s15  ;;  %2413 = vmatmul.mubr.bf16.gmra.mrb[36].mxu1 %v1946_v50  ;;  %v18522_v5 = vld [vmem:[#allocation44_spill] sm:$0xff]  ;;  %v1292_v34 = vpop.permute.xlu0 %1291 }
 0x1ee   : > { %v3410_v60 = vshll.u32 %v10108_v17, 16  ;;  %v3067_v26 = vfloor.f32 %v3035_v4  ;;  %v4319_v31 = vsel %vm4302_vm4, %v18502_v18, 0  ;;  %v4815_v62 = vor.u32 %v4813_v28, %v14388_v37  ;;  %v1952_v30 = vld [vmem:[#allocation4 + $0x198] sm:$0xff]  ;;  %1322 = vst.msk [vmem:[#allocation4 + $0x1c0] sm:$0xff] %vm1138_vm2, %v1292_v34 }
 0x1ef   : > { %v3068_v40 = vfloor.f32 %v3036_v52  ;;  %v4263_v41 = vshrl.u32 %v14344_v45, 16  ;;  %3635 = vrot.lane.b32.xlu1 %v18522_v5, %s11376_s15  ;;  %v4418_v25 = vshrl.u32 %v4319_v31, 16  ;;  %v14406_v21 = vsel %vm3298_vm7, %v14183_v57, %v14386_v43  ;;  %2420 = vmatprep.mubr.bf16.mxu1 %v1952_v30  ;;  %v18523_v57 = vld [vmem:[#allocation49_spill] sm:$0xff]  ;;  %v18524_v52 = vld [vmem:[#allocation60_spill] sm:$0xff] }
 0x1f0   : > { %v3409_v16 = vrot.slane %v3407_v47, 1  ;;  %v3412_v55 = vrot.slane %v3410_v60, 2  ;;  %v4421_v0 = vshll.u32 %v4319_v31, 16  ;;  %v4816_v63 = vsel %vm4324_vm9, %v14177_v1, %v4815_v62  ;;  %v18528_v47 = vld [vmem:[#allocation46_spill] sm:$0xff] }
 0x1f1   : > { %v3099_v28 = vmul.f32 16.0, %v3067_v26  ;;  %v3100_v17 = vmul.f32 16.0, %v3068_v40  ;;  %v14411_v45 = vrot.slane %v4418_v25, 7  ;;  %vm4853_vm5 = vcmp.ne.s16.totalorder %v4816_v63, 0  ;;  %4467 = vrot.lane.b32.xlu0 %v18523_v57, %s11376_s15 }
 0x1f2   : > { %v14413_v4 = vor.u32 %v3412_v55, %v3409_v16  ;;  %vm5420_vm6 = vcmp.lt.f32.partialorder %v14287_v3, 13.0  ;;  %v14419_v58 = vsel %vm4853_vm5, %v18524_v52, 0  ;;  %vm5421_vm8 = vcmp.lt.f32.partialorder %v14294_v20, 13.0  ;;  %v1119_v31 = vpop.permute.xlu1 %1118  ;;  %v1951_v62 = vld [vmem:[#allocation4 + $0x190] sm:$0xff] }
 0x1f3   : > { %v14421_v35 = vsub.f32 %v2971_v27, %v3099_v28  ;;  %v14423_v1 = vsub.f32 %v2972_v14, %v3100_v17  ;;  %vm14426_vm11 = vmpackc.low %vm5420_vm6, %vm5420_vm6  ;;  %5875 = vrot.lane.b32.xlu1 %v18528_v47, %s11376_s15  ;;  %v4423_v60 = vor.u32 %v4421_v0, %v14411_v45  ;;  %v4971_v26 = vshll.u32 %v14419_v58, 16  ;;  %1150 = vst.msk [vmem:[#allocation4 + $0x1b8] sm:$0xff] %vm1138_vm2, %v1119_v31  ;;  %v18531_v55 = vld [vmem:[#allocation51_spill] sm:$0xff] }
 0x1f4   : > { %v3414_v27 = vsel %vm3298_vm7, %v14217_v36, %v14413_v4  ;;  %vm5453_vm14 = vmpackc.low %vm5421_vm8, %vm5421_vm8  ;;  %v5484_v14 = vsel %vm14426_vm11, 65537, %v14258_v59  ;;  %v4265_v25 = vor.u32 %v4263_v41, %v14379_v53  ;;  %v18532_v53 = vld [vmem:[#allocation48_spill] sm:$0xff]  ;;  %v1416_v57 = vshrl.u32 %v13331_v32, 16  ;;  %v18533_v32 = vld [vmem:[#allocation53_spill] sm:$0xff] }
 0x1f5   : > { %18525 = vst [vmem:[#allocation27_spill] sm:$0xff] %v14423_v1  ;;  %vm3454_vm15 = vcmp.ne.s16.totalorder %v3414_v27, 0  ;;  %vm4045_vm0 = vcmp.ge.f32.partialorder %v14421_v35, 1.0  ;;  %vm4046_vm3 = vcmp.ge.f32.partialorder %v14423_v1, 1.0  ;;  %v5485_v44 = vsel %vm5453_vm14, 65537, %v14258_v59  ;;  %5017 = vrot.lane.b32.xlu0 %v18531_v55, %s11376_s15  ;;  %2421 = vmatmul.mubr.bf16.gmra.mrb[40].mxu1 %v1951_v62  ;;  %v1294_v50 = vpop.permute.xlu0 %1293  ;;  %v1957_v47 = vld [vmem:[#allocation4 + $0x1c0] sm:$0xff] }
 0x1f6   : > { %v14443_v40 = vrot.slane %v4971_v26, 1  ;;  %v3471_v5 = vsel %vm3454_vm15, %v18502_v18, 0  ;;  %vm14446_vm4 = vmpackc.low %vm4045_vm0, %vm4045_vm0  ;;  %v10188_v16 = vcombine.low %v5484_v14, %v5485_v44  ;;  %v14456_v34 = vsel %vm4324_vm9, %v14181_v24, %v4423_v60  ;;  %1323 = vst.msk [vmem:[#allocation4 + $0x1e8] sm:$0xff] %vm1138_vm2, %v1294_v50  ;;  %2428 = vmatprep.mubr.bf16.mxu1 %v1957_v47 }
 0x1f7   : > { %v3585_v30 = vshrl.u32 %v3471_v5, 16  ;;  %v3588_v0 = vshll.u32 %v3471_v5, 16  ;;  %vm4078_vm5 = vmpackc.low %vm4046_vm3, %vm4046_vm3  ;;  %v4109_v63 = vsel %vm14446_vm4, 65537, %v14258_v59  ;;  %3637 = vrot.lane.b32.xlu1 %v18532_v53, %s11376_s15  ;;  %v1420_v31 = vshll.u32 %v18502_v18, 16 }
 0x1f8   : > { %v4110_v41 = vsel %vm4078_vm5, 65537, %v14258_v59  ;;  %v5648_v28 = vshrl.u32 %v10188_v16, 16  ;;  %v5651_v17 = vshll.u32 %v10188_v16, 16  ;;  %v14468_v24 = vsel %vm979_vm12, %v14393_v8, %v14443_v40  ;;  %v18536_v16 = vld [vmem:[#allocation50_spill] sm:$0xff] }
 0x1f9   : > { %v3587_v60 = vrot.slane %v3585_v30, 6  ;;  %v3590_v26 = vrot.slane %v3588_v0, 7  ;;  %v14470_v27 = vcombine.low %v4109_v63, %v4110_v41  ;;  %vm4596_vm6 = vcmp.lt.f32.partialorder %v14421_v35, 15.0  ;;  %4469 = vrot.lane.b32.xlu0 %v18533_v32, %s11376_s15 }
 0x1fa   : > { %v5650_v14 = vrot.slane %v5648_v28, 6  ;;  %v5653_v44 = vrot.slane %v5651_v17, 7  ;;  %v1418_v5 = vor.u32 %v1416_v57, %v14322_v9  ;;  %vm4597_vm8 = vcmp.lt.f32.partialorder %v14423_v1, 15.0  ;;  %vm14482_vm11 = vmpackc.low %vm4596_vm6, %vm4596_vm6  ;;  %v1956_v57 = vld [vmem:[#allocation4 + $0x1b8] sm:$0xff] }
 0x1fb   : > { %v14477_v62 = vor.u32 %v3590_v26, %v3587_v60  ;;  %v4267_v8 = vshll.u32 %v14470_v27, 16  ;;  %5877 = vrot.lane.b32.xlu1 %v18536_v16, %s11376_s15  ;;  %v1422_v30 = vrot.slane %v1420_v31, 1  ;;  %vm4629_vm14 = vmpackc.low %vm4597_vm8, %vm4597_vm8  ;;  %v4660_v0 = vsel %vm14482_vm11, 65537, %v14258_v59  ;;  %v1121_v17 = vpop.permute.xlu1 %1120  ;;  %v18539_v60 = vld [vmem:[#allocation55_spill] sm:$0xff] }
 0x1fc   : > { %v14488_v55 = vor.u32 %v5653_v44, %v5650_v14  ;;  %vm3180_vm15 = vcmp.ge.f32.partialorder %v14421_v35, 3.0  ;;  %v4661_v53 = vsel %vm4629_vm14, 65537, %v14258_v59  ;;  %v4975_v41 = vshrl.u32 %v14419_v58, 16  ;;  %1151 = vst.msk [vmem:[#allocation4 + $0x1e0] sm:$0xff] %vm1138_vm2, %v1121_v17  ;;  %v18542_v44 = vld [vmem:[#allocation52_spill] sm:$0xff] }
 0x1fd   : > { %v14497_v9 = vsel %vm3476_vm13, %v14283_v61, %v14477_v62  ;;  %v14499_v63 = vrot.slane %v4267_v8, 1  ;;  %vm14503_vm0 = vmpackc.low %vm3180_vm15, %vm3180_vm15  ;;  %v1423_v47 = vsel %vm979_vm12, %v1418_v5, %v1422_v30  ;;  %v10157_v61 = vcombine.low %v4660_v0, %v4661_v53  ;;  %5019 = vrot.lane.b32.xlu0 %v18539_v60, %s11376_s15  ;;  %2429 = vmatmul.mubr.bf16.gmra.mrb[44].mxu1 %v1956_v57  ;;  %v1962_v5 = vld [vmem:[#allocation4 + $0x1e8] sm:$0xff] }
 0x1fe   : > { %v5655_v50 = vsel %vm3476_vm13, %v14314_v23, %v14488_v55  ;;  %vm3181_vm3 = vcmp.ge.f32.partialorder %v14423_v1, 3.0  ;;  %1479 = vst.msk [vmem:[#allocation4 + $0x178] sm:$0xff] %vm392_vm1, %v1423_v47  ;;  %v3244_v23 = vsel %vm14503_vm0, 65537, %v14258_v59  ;;  %v1424_v14 = vshrl.u32 %v18502_v18, 16  ;;  %v1296_v8 = vpop.permute.xlu0 %1295  ;;  %2436 = vmatprep.mubr.bf16.mxu1 %v1962_v5 }
 0x1ff   : > { %v4270_v58 = vsel %vm979_vm12, %v4265_v25, %v14499_v63  ;;  %vm5695_vm4 = vcmp.ne.s16.totalorder %v5655_v50, 0  ;;  %vm14518_vm5 = vmpackc.low %vm3181_vm3, %vm3181_vm3  ;;  %3639 = vrot.lane.b32.xlu1 %v18542_v44, %s11376_s15  ;;  %v4818_v25 = vshrl.u32 %v10157_v61, 16  ;;  %v4821_v32 = vshll.u32 %v10157_v61, 16  ;;  %1324 = vst.msk [vmem:[#allocation4 + $0x210] sm:$0xff] %vm1138_vm2, %v1296_v8  ;;  %v18543_v50 = vld [vmem:[#allocation59_spill] sm:$0xff]  ;;  %v18544_v44 = vld [vmem:[#allocation54_spill] sm:$0xff] }
 0x200   : > { %vm4303_vm6 = vcmp.ne.s16.totalorder %v4270_v58, 0  ;;  %v5712_v31 = vsel %vm5695_vm4, %v18524_v52, 0  ;;  %v3245_v53 = vsel %vm14518_vm5, 65537, %v14258_v59  ;;  %v1426_v60 = vor.u32 %v1424_v14, %v1422_v30 }
 0x201   : > { %v4320_v36 = vsel %vm4303_vm6, %v18524_v52, 0  ;;  %v5825_v16 = vshrl.u32 %v5712_v31, 16  ;;  %v5828_v0 = vshll.u32 %v5712_v31, 16  ;;  %v14534_v17 = vrot.slane %v4818_v25, 7  ;;  %4471 = vrot.lane.b32.xlu0 %v18543_v50, %s11376_s15 }
 0x202   : > { %v4426_v18 = vshrl.u32 %v4320_v36, 16  ;;  %v4429_v28 = vshll.u32 %v4320_v36, 16  ;;  %v10109_v57 = vcombine.low %v3244_v23, %v3245_v53  ;;  %v1428_v58 = vshll.u32 %v18524_v52, 16  ;;  %v1759_v25 = vpop.permute.xlu0 %1758 }
 0x203   : > { %v5827_v47 = vrot.slane %v5825_v16, 1  ;;  %v5830_v61 = vrot.slane %v5828_v0, 2  ;;  %5879 = vrot.lane.b32.xlu1 %v18544_v44, %s11376_s15  ;;  %v4823_v31 = vor.u32 %v4821_v32, %v14534_v17  ;;  %v14547_v53 = vadd.s32 224, %v11527_v33  ;;  %1800 = vst.msk [vmem:[#allocation4 + $0x18] sm:$0xff] %vm1138_vm2, %v1759_v25  ;;  %v1961_v14 = vld [vmem:[#allocation4 + $0x1e0] sm:$0xff] }
 0x204   : > { %v14541_v26 = vrot.slane %v4426_v18, 7  ;;  %v3416_v8 = vshrl.u32 %v10109_v57, 16  ;;  %v3419_v5 = vshll.u32 %v10109_v57, 16  ;;  %v1430_v23 = vrot.slane %v1428_v58, 1  ;;  %v18545_v57 = vld [vmem:[#allocation61_spill] sm:$0xff]  ;;  %v18546_v58 = vld [vmem:[#allocation58_spill] sm:$0xff] }
 0x205   : > { %v14544_v36 = vor.u32 %v5830_v61, %v5827_v47  ;;  %v14550_v30 = vadd.s32 232, %v11527_v33  ;;  %v4824_v32 = vsel %vm4324_vm9, %v14388_v37, %v4823_v31  ;;  %5021 = vrot.lane.b32.xlu0 %v18545_v57, %s11376_s15  ;;  %2437 = vmatmul.mubr.bf16.gmra.mrb[48].mxu1 %v1961_v14  ;;  %v4977_v50 = vor.u32 %v4975_v41, %v14443_v40 }
 0x206   : > { %v4431_v16 = vor.u32 %v4429_v28, %v14541_v26  ;;  %v3418_v0 = vrot.slane %v3416_v8, 1  ;;  %v3421_v18 = vrot.slane %v3419_v5, 2  ;;  %vm4854_vm8 = vcmp.ne.s16.totalorder %v4824_v32, 0  ;;  %v18547_v28 = vld [vmem:[#allocation26_spill] sm:$0xff]  ;;  %v1761_v41 = vpop.permute.xlu0 %1760 }
 0x207   : > { %v1431_v47 = vsel %vm979_vm12, %v1426_v60, %v1430_v23  ;;  %v2973_v61 = vcvt.s32.f32 %v14547_v53  ;;  %3641 = vrot.lane.b32.xlu1 %v18546_v58, %s11376_s15  ;;  %v14566_v37 = vsel %vm3298_vm7, %v14386_v43, %v14544_v36  ;;  %v4871_v44 = vsel %vm4854_vm8, %v18547_v28, 0  ;;  %v1967_v60 = vld [vmem:[#allocation4 + $0x210] sm:$0xff]  ;;  %1801 = vst.msk [vmem:[#allocation4 + $0x40] sm:$0xff] %vm1138_vm2, %v1761_v41 }
 0x208   : > { %v14569_v31 = vor.u32 %v3421_v18, %v3418_v0  ;;  %1480 = vst.msk [vmem:[#allocation4 + $0x1a0] sm:$0xff] %vm392_vm1, %v1431_v47  ;;  %v2974_v40 = vcvt.s32.f32 %v14550_v30  ;;  %v4979_v8 = vshll.u32 %v4871_v44, 16  ;;  %v4271_v25 = vshrl.u32 %v14470_v27, 16  ;;  %2444 = vmatprep.mubr.bf16.mxu1 %v1967_v60 }
 0x209   : > { %v3005_v5 = vadd.f32 0.5, %v2973_v61  ;;  %vm5422_vm11 = vcmp.lt.f32.partialorder %v14421_v35, 13.0  ;;  %v14578_v43 = vsel %vm4324_vm9, %v14411_v45, %v4431_v16  ;;  %vm5423_vm14 = vcmp.lt.f32.partialorder %v14423_v1, 13.0  ;;  %4473 = vrot.lane.b32.xlu0 %v13760_v10, %s11376_s15  ;;  %v18550_v16 = vld [vmem:[#allocation63_spill] sm:$0xff] }
 0x20a   : > { %v3423_v53 = vsel %vm3298_vm7, %v14413_v4, %v14569_v31  ;;  %v3006_v30 = vadd.f32 0.5, %v2974_v40  ;;  %vm14584_vm15 = vmpackc.low %vm5422_vm11, %vm5422_vm11  ;;  %v4981_v27 = vrot.slane %v4979_v8, 1  ;;  %v1432_v45 = vshrl.u32 %v18524_v52, 16  ;;  %v1763_v47 = vpop.permute.xlu0 %1762 }
 0x20b   : > { %vm3455_vm0 = vcmp.ne.s16.totalorder %v3423_v53, 0  ;;  %v3037_v32 = vmul.f32 0.0625, %v3005_v5  ;;  %vm5455_vm3 = vmpackc.low %vm5423_vm14, %vm5423_vm14  ;;  %5881 = vrot.lane.b32.xlu1 %v18550_v16, %s11376_s15  ;;  %v5486_v18 = vsel %vm14584_vm15, 65537, %v14258_v59  ;;  %v14599_v60 = vor.u32 %v4271_v25, %v14499_v63  ;;  %1802 = vst.msk [vmem:[#allocation4 + $0x68] sm:$0xff] %vm1138_vm2, %v1763_v47  ;;  %v18551_v63 = vld [vmem:[#allocation64_spill] sm:$0xff] }
 0x20c   : > { %v3472_v4 = vsel %vm3455_vm0, %v18524_v52, 0  ;;  %v3038_v0 = vmul.f32 0.0625, %v3006_v30  ;;  %v5487_v57 = vsel %vm5455_vm3, 65537, %v14258_v59  ;;  %v1434_v52 = vor.u32 %v1432_v45, %v1430_v23 }
 0x20d   : > { %v3594_v10 = vshrl.u32 %v3472_v4, 16  ;;  %v3597_v58 = vshll.u32 %v3472_v4, 16  ;;  %v3069_v41 = vfloor.f32 %v3037_v32  ;;  %v1123_v8 = vpop.permute.xlu1 %1122  ;;  %v10189_v53 = vcombine.low %v5486_v18, %v5487_v57  ;;  %5023 = vrot.lane.b32.xlu0 %v13813_v12, %s11376_s15 }
 0x20e   : > { %v3070_v5 = vfloor.f32 %v3038_v0  ;;  %v1436_v30 = vshll.u32 %v18547_v28, 16  ;;  %1152 = vst.msk [vmem:[#allocation4 + $0x208] sm:$0xff] %vm1138_vm2, %v1123_v8  ;;  %v4983_v32 = vshrl.u32 %v4871_v44, 16  ;;  %v1765_v18 = vpop.permute.xlu0 %1764  ;;  %v14609_v23 = vsel %vm979_vm12, %v4977_v50, %v4981_v27 }
 0x20f   : > { %v3596_v14 = vrot.slane %v3594_v10, 6  ;;  %v3599_v16 = vrot.slane %v3597_v58, 7  ;;  %v3101_v4 = vmul.f32 16.0, %v3069_v41  ;;  %3643 = vrot.lane.b32.xlu1 %v18551_v63, %s11376_s15  ;;  %v5657_v1 = vshrl.u32 %v10189_v53, 16  ;;  %1803 = vst.msk [vmem:[#allocation4 + $0x90] sm:$0xff] %vm1138_vm2, %v1765_v18  ;;  %v1904_v63 = vld [vmem:[#allocation4 + $0x18] sm:$0xff] }
 0x210   : > { %v3102_v25 = vmul.f32 16.0, %v3070_v5  ;;  %v5660_v47 = vshll.u32 %v10189_v53, 16  ;;  %v1438_v0 = vrot.slane %v1436_v30, 1  ;;  %v14615_v12 = vor.u32 %v4983_v32, %v4981_v27 }
 0x211   : > { %v14611_v45 = vor.u32 %v3599_v16, %v3596_v14  ;;  %v14613_v57 = vsub.f32 %v2973_v61, %v3101_v4  ;;  %v1544_v10 = vpop.permute.xlu1 %1543  ;;  %v5659_v58 = vrot.slane %v5657_v1, 6  ;;  %4475 = vrot.lane.b32.xlu0 %v14089_v22, %s11376_s15  ;;  %v1440_v1 = vshrl.u32 %v18547_v28, 16 }
 0x212   : > { %v14618_v44 = vsub.f32 %v2974_v40, %v3102_v25  ;;  %v5662_v41 = vrot.slane %v5660_v47, 7  ;;  %v1439_v8 = vsel %vm979_vm12, %v1434_v52, %v1438_v0  ;;  %1585 = vst.msk [vmem:[#allocation4 + $0x10] sm:$0xff] %vm1138_vm2, %v1544_v10  ;;  %v1444_v27 = vshll.u32 %v13741_v49, 16 }
 0x213   : > { %v14627_v50 = vsel %vm3476_vm13, %v14477_v62, %v14611_v45  ;;  %vm4047_vm4 = vcmp.ge.f32.partialorder %v14613_v57, 1.0  ;;  %1481 = vst.msk [vmem:[#allocation4 + $0x1c8] sm:$0xff] %vm392_vm1, %v1439_v8  ;;  %vm4598_vm5 = vcmp.lt.f32.partialorder %v14613_v57, 15.0  ;;  %5883 = vrot.lane.b32.xlu1 %v13749_v11, %s11376_s15  ;;  %vm3182_vm14 = vcmp.ge.f32.partialorder %v14613_v57, 3.0  ;;  %v1767_v62 = vpop.permute.xlu0 %1766 }
 0x214   : > { %vm4048_vm6 = vcmp.ge.f32.partialorder %v14618_v44, 1.0  ;;  %vm14636_vm8 = vmpackc.low %vm4047_vm4, %vm4047_vm4  ;;  %v14640_v61 = vor.u32 %v5662_v41, %v5659_v58  ;;  %vm4599_vm11 = vcmp.lt.f32.partialorder %v14618_v44, 15.0  ;;  %vm3183_vm0 = vcmp.ge.f32.partialorder %v14618_v44, 3.0  ;;  %1804 = vst.msk [vmem:[#allocation4 + $0xb8] sm:$0xff] %vm1138_vm2, %v1767_v62 }
 0x215   : > { %vm14644_vm15 = vmpackc.low %vm4048_vm6, %vm4048_vm6  ;;  %v4111_v11 = vsel %vm14636_vm8, 65537, %v14258_v59  ;;  %v14654_v5 = vadd.s32 240, %v11527_v33  ;;  %v1546_v53 = vpop.permute.xlu1 %1545  ;;  %v1966_v52 = vld [vmem:[#allocation4 + $0x208] sm:$0xff]  ;;  %v1442_v4 = vor.u32 %v1440_v1, %v1438_v0  ;;  %v14671_v32 = vadd.s32 248, %v11527_v33  ;;  %5025 = vrot.lane.b32.xlu0 %v14100_v38, %s11376_s15 }
 0x216   : > { %v4112_v30 = vsel %vm14644_vm15, 65537, %v14258_v59  ;;  %v5664_v14 = vsel %vm3476_vm13, %v14488_v55, %v14640_v61  ;;  %vm14666_vm3 = vmpackc.low %vm4598_vm5, %vm4598_vm5  ;;  %1586 = vst.msk [vmem:[#allocation4 + $0x38] sm:$0xff] %vm1138_vm2, %v1546_v53  ;;  %2445 = vmatmul.mubr.bf16.gmra.mrb[52].mxu1 %v1966_v52  ;;  %v14684_v33 = vrot.slane %v1444_v27, 1 }
 0x217   : > { %v14676_v25 = vcombine.low %v4111_v11, %v4112_v30  ;;  %vm5696_vm4 = vcmp.ne.s16.totalorder %v5664_v14, 0  ;;  %vm4631_vm5 = vmpackc.low %vm4599_vm11, %vm4599_vm11  ;;  %v4662_v55 = vsel %vm14666_vm3, 65537, %v14258_v59  ;;  %3645 = vrot.lane.b32.xlu1 %v13836_v2, %s11376_s15  ;;  %2485 = vmatprep.mubr.bf16.mxu1 %v1904_v63  ;;  %v2975_v18 = vcvt.s32.f32 %v14654_v5  ;;  %v1769_v58 = vpop.permute.xlu0 %1768 }
 0x218   : > { %v5713_v47 = vsel %vm5696_vm4, %v18547_v28, 0  ;;  %v4663_v38 = vsel %vm4631_vm5, 65537, %v14258_v59  ;;  %vm14693_vm6 = vmpackc.low %vm3182_vm14, %vm3182_vm14  ;;  %v2976_v10 = vcvt.s32.f32 %v14671_v32  ;;  %1805 = vst.msk [vmem:[#allocation4 + $0xe0] sm:$0xff] %vm1138_vm2, %v1769_v58  ;;  %v1447_v27 = vsel %vm979_vm12, %v1442_v4, %v14684_v33  ;;  %v11266_v4 = vld [vmem:[%s18118_s5 + $0x80] sm:$0xff]  }
 0x219   : > { %v4275_v41 = vshll.u32 %v14676_v25, 16  ;;  %v5834_v2 = vshrl.u32 %v5713_v47, 16  ;;  %v5837_v8 = vshll.u32 %v5713_v47, 16  ;;  %v10158_v1 = vcombine.low %v4662_v55, %v4663_v38  ;;  %vm14703_vm8 = vmpackc.low %vm3183_vm0, %vm3183_vm0  ;;  %v1548_v62 = vpop.permute.xlu1 %1547  ;;  %4477 = vrot.lane.b32.xlu0 %v14273_v51, %s11376_s15  ;;  %1482 = vst.msk [vmem:[#allocation4 + $0x1f0] sm:$0xff] %vm392_vm1, %v1447_v27  ;;  %v14731_v38 = vpop.f32.mrb[64].mxu0 }
 0x21a   : > { %v3246_v40 = vsel %vm14693_vm6, 65537, %v14258_v59  ;;  %v3247_v11 = vsel %vm14703_vm8, 65537, %v14258_v59  ;;  %v3007_v53 = vadd.f32 0.5, %v2975_v18  ;;  %1587 = vst.msk [vmem:[#allocation4 + $0x60] sm:$0xff] %vm1138_vm2, %v1548_v62  ;;  %v3008_v47 = vadd.f32 0.5, %v2976_v10 }
 0x21b   : > { %v14721_v52 = vrot.slane %v4275_v41, 1  ;;  %v5836_v30 = vrot.slane %v5834_v2, 1  ;;  %v5839_v14 = vrot.slane %v5837_v8, 2  ;;  %v4826_v16 = vshrl.u32 %v10158_v1, 16  ;;  %5885 = vrot.lane.b32.xlu1 %v14006_v15, %s11376_s15  ;;  %v1771_v0 = vpop.permute.xlu0 %1770  ;;  %v1903_v8 = vld [vmem:[#allocation4 + $0x10] sm:$0xff] }
 0x21c   : > { %v4829_v63 = vshll.u32 %v10158_v1, 16  ;;  %v10110_v55 = vcombine.low %v3246_v40, %v3247_v11  ;;  %v3039_v51 = vmul.f32 0.0625, %v3007_v53  ;;  %vm5424_vm11 = vcmp.lt.f32.partialorder %v14613_v57, 13.0  ;;  %1806 = vst.msk [vmem:[#allocation4 + $0x108] sm:$0xff] %vm1138_vm2, %v1771_v0  ;;  %v14742_v1 = vpop.f32.mrb[65].mxu0 }
 0x21d   : > { %v4278_v58 = vsel %vm979_vm12, %v14599_v60, %v14721_v52  ;;  %v14736_v41 = vor.u32 %v5839_v14, %v5836_v30  ;;  %v14738_v15 = vrot.slane %v4826_v16, 7  ;;  %v1550_v2 = vpop.permute.xlu1 %1549  ;;  %v3040_v40 = vmul.f32 0.0625, %v3008_v47  ;;  %v14745_v60 = vpop.f32.mrb[66].mxu0  ;;  %5027 = vrot.lane.b32.xlu0 %v14281_v7, %s11376_s15  ;;  %v1909_v14 = vld [vmem:[#allocation4 + $0x40] sm:$0xff]  ;;  %vm14767_vm15 = vmpackc.low %vm5424_vm11, %vm5424_vm11 }
 0x21e   : > { %vm4304_vm14 = vcmp.ne.s16.totalorder %v4278_v58, 0  ;;  %v3425_v22 = vshrl.u32 %v10110_v55, 16  ;;  %v3428_v62 = vshll.u32 %v10110_v55, 16  ;;  %1588 = vst.msk [vmem:[#allocation4 + $0x88] sm:$0xff] %vm1138_vm2, %v1550_v2  ;;  %2486 = vmatmul.mubr.bf16.vlgmr.msra.gmra.mrb[56].mxu1 %v1903_v8  ;;  %v3071_v53 = vfloor.f32 %v3039_v51  ;;  %v14754_v16 = vpop.f32.mrb[67].mxu0  ;;  %v11267_v55 = vld [vmem:[%s18118_s5 + $0x88] sm:$0xff]  }
 0x21f   : > { %v4321_v11 = vsel %vm4304_vm14, %v18547_v28, 0  ;;  %v4831_v27 = vor.u32 %v4829_v63, %v14738_v15  ;;  %v4279_v30 = vshrl.u32 %v14676_v25, 16  ;;  %6438 = vmatpush1.bf16.msra.mxu1 %v11266_v4  ;;  %3647 = vrot.lane.b32.xlu1 %v14200_v6, %s11376_s15  ;;  %v14762_v7 = vsel %vm3298_vm7, %v14544_v36, %v14736_v41  ;;  %v1773_v25 = vpop.permute.xlu0 %1772 }
 0x220   : > { %v4434_v47 = vshrl.u32 %v4321_v11, 16  ;;  %v3427_v63 = vrot.slane %v3425_v22, 1  ;;  %v3430_v51 = vrot.slane %v3428_v62, 2  ;;  %2493 = vmatprep.mubr.bf16.mxu1 %v1909_v14  ;;  %6439 = vmatprep.subr.bf16.mxu1 %v14258_v59  ;;  %v4437_v4 = vshll.u32 %v4321_v11, 16  ;;  %1807 = vst.msk [vmem:[#allocation4 + $0x130] sm:$0xff] %vm1138_vm2, %v1773_v25  ;;  %v11268_v14 = vld [vmem:[%s18118_s5 + $0x90] sm:$0xff]  }
 0x221   : > { %v4832_v0 = vsel %vm4324_vm9, %v14534_v17, %v4831_v27  ;;  %v3072_v58 = vfloor.f32 %v3040_v40  ;;  %v3103_v36 = vmul.f32 16.0, %v3071_v53  ;;  %v1552_v2 = vpop.permute.xlu1 %1551  ;;  %vm5425_vm3 = vcmp.lt.f32.partialorder %v14618_v44, 13.0  ;;  %4479 = vrot.lane.b32.xlu0 %v14456_v34, %s11376_s15 }
 0x222   : > { %v14775_v8 = vrot.slane %v4434_v47, 7  ;;  %vm4855_vm0 = vcmp.ne.s16.totalorder %v4832_v0, 0  ;;  %v14777_v22 = vor.u32 %v3430_v51, %v3427_v63  ;;  %1589 = vst.msk [vmem:[#allocation4 + $0xb0] sm:$0xff] %vm1138_vm2, %v1552_v2  ;;  %vm5457_vm4 = vmpackc.low %vm5425_vm3, %vm5425_vm3  ;;  %v5488_v11 = vsel %vm14767_vm15, 65537, %v14258_v59  ;;  %v1908_v63 = vld [vmem:[#allocation4 + $0x38] sm:$0xff] }
 0x223   : > { %v14784_v62 = vsel %vm4855_vm0, %v13741_v49, 0  ;;  %v3104_v17 = vmul.f32 16.0, %v3072_v58  ;;  %v14788_v40 = vsub.f32 %v2975_v18, %v3103_v36  ;;  %5887 = vrot.lane.b32.xlu1 %v14213_v48, %s11376_s15  ;;  %6440 = vmatpush1.bf16.msra.mxu1 %v11267_v55  ;;  %v5489_v5 = vsel %vm5457_vm4, 65537, %v14258_v59  ;;  %v1775_v18 = vpop.permute.xlu0 %1774  ;;  %v11273_v2 = vld [vmem:[%s18118_s5 + $0x98] sm:$0xff]  }
 0x224   : > { %v4439_v27 = vor.u32 %v4437_v4, %v14775_v8  ;;  %v4987_v34 = vshll.u32 %v14784_v62, 16  ;;  %v3432_v53 = vsel %vm3298_vm7, %v14569_v31, %v14777_v22  ;;  %6441 = vmatprep.subr.bf16.mxu1 %v14258_v59  ;;  %v10190_v55 = vcombine.low %v5488_v11, %v5489_v5  ;;  %1808 = vst.msk [vmem:[#allocation4 + $0x158] sm:$0xff] %vm1138_vm2, %v1775_v18  ;;  %v1914_v4 = vld [vmem:[#allocation4 + $0x68] sm:$0xff] }
 0x225   : > { %vm3456_vm5 = vcmp.ne.s16.totalorder %v3432_v53, 0  ;;  %v14807_v48 = vsub.f32 %v2976_v10, %v3104_v17  ;;  %vm4049_vm6 = vcmp.ge.f32.partialorder %v14788_v40, 1.0  ;;  %v1554_v47 = vpop.permute.xlu1 %1553  ;;  %v14823_v32 = vor.u32 %v4279_v30, %v14721_v52  ;;  %v1339_v10 = vld [vmem:[#allocation2 + $0x80] sm:$0x1]  ;;  %5029 = vrot.lane.b32.xlu0 %v14468_v24, %s11376_s15  ;;  %v14873_v25 = vpop.f32.mrb[68].mxu0 }
 0x226   : > { %v14813_v31 = vsel %vm4324_vm9, %v14541_v26, %v4439_v27  ;;  %v14815_v51 = vrot.slane %v4987_v34, 1  ;;  %v3473_v6 = vsel %vm3456_vm5, %v18547_v28, 0  ;;  %vm14818_vm8 = vmpackc.low %vm4049_vm6, %vm4049_vm6  ;;  %1590 = vst.msk [vmem:[#allocation4 + $0xd8] sm:$0xff] %vm1138_vm2, %v1554_v47  ;;  %2494 = vmatmul.mubr.bf16.gmra.mrb[60].mxu1 %v1908_v63  ;;  %v5666_v30 = vshrl.u32 %v10190_v55, 16 }
 0x227   : > { %v3603_v26 = vshrl.u32 %v3473_v6, 16  ;;  %v3606_v0 = vshll.u32 %v3473_v6, 16  ;;  %vm4050_vm11 = vcmp.ge.f32.partialorder %v14807_v48, 1.0  ;;  %v4113_v28 = vsel %vm14818_vm8, 65537, %v14258_v59  ;;  %3649 = vrot.lane.b32.xlu1 %v14302_v39, %s11376_s15  ;;  %2501 = vmatprep.mubr.bf16.mxu1 %v1914_v4  ;;  %v1777_v36 = vpop.permute.xlu0 %1776  ;;  %v11280_v4 = vld [vmem:[%s18118_s5 + $0xa0] sm:$0xff]  }
 0x228   : > { %v14837_v52 = vsel %vm979_vm12, %v14615_v12, %v14815_v51  ;;  %vm4082_vm14 = vmpackc.low %vm4050_vm11, %vm4050_vm11  ;;  %v5669_v24 = vshll.u32 %v10190_v55, 16  ;;  %v1448_v58 = vshrl.u32 %v13741_v49, 16  ;;  %6442 = vmatpush1.bf16.msra.mxu1 %v11268_v14  ;;  %v1452_v27 = vshll.u32 %v1339_v10, 16  ;;  %1809 = vst.msk [vmem:[#allocation4 + $0x180] sm:$0xff] %vm1138_vm2, %v1777_v36 }
 0x229   : > { %v3605_v17 = vrot.slane %v3603_v26, 6  ;;  %v3608_v11 = vrot.slane %v3606_v0, 7  ;;  %v4114_v39 = vsel %vm4082_vm14, 65537, %v14258_v59  ;;  %v1556_v34 = vpop.permute.xlu1 %1555  ;;  %6443 = vmatprep.subr.bf16.mxu1 %v14258_v59  ;;  %v5668_v53 = vrot.slane %v5666_v30, 6  ;;  %4481 = vrot.lane.b32.xlu0 %v14578_v43, %s11376_s15  ;;  %v11285_v43 = vld [vmem:[%s18118_s5 + $0xa8] sm:$0xff]  }
 0x22a   : > { %v14846_v12 = vcombine.low %v4113_v28, %v4114_v39  ;;  %v5671_v5 = vrot.slane %v5669_v24, 7  ;;  %vm4600_vm15 = vcmp.lt.f32.partialorder %v14788_v40, 15.0  ;;  %1591 = vst.msk [vmem:[#allocation4 + $0x100] sm:$0xff] %vm1138_vm2, %v1556_v34  ;;  %v1450_v14 = vor.u32 %v1448_v58, %v14684_v33  ;;  %v1913_v58 = vld [vmem:[#allocation4 + $0x60] sm:$0xff] }
 0x22b   : > { %v14852_v18 = vor.u32 %v3608_v11, %v3605_v17  ;;  %v1454_v55 = vrot.slane %v1452_v27, 1  ;;  %vm4601_vm0 = vcmp.lt.f32.partialorder %v14807_v48, 15.0  ;;  %vm14856_vm3 = vmpackc.low %vm4600_vm15, %vm4600_vm15  ;;  %5889 = vrot.lane.b32.xlu1 %v14406_v21, %s11376_s15  ;;  %vm3184_vm5 = vcmp.ge.f32.partialorder %v14788_v40, 3.0  ;;  %v1779_v10 = vpop.permute.xlu0 %1778  ;;  %v14900_v17 = vld [vmem:[#allocation2] sm:$0xff] }
 0x22c   : > { %v4283_v63 = vshll.u32 %v14846_v12, 16  ;;  %v14863_v6 = vor.u32 %v5671_v5, %v5668_v53  ;;  %vm14865_vm4 = vmpackc.low %vm4601_vm0, %vm4601_vm0  ;;  %v4664_v33 = vsel %vm14856_vm3, 65537, %v14258_v59  ;;  %6444 = vmatpush1.bf16.msra.mxu1 %v11273_v2  ;;  %v4991_v28 = vshrl.u32 %v14784_v62, 16  ;;  %1810 = vst.msk [vmem:[#allocation4 + $0x1a8] sm:$0xff] %vm1138_vm2, %v1779_v10  ;;  %v1919_v62 = vld [vmem:[#allocation4 + $0x90] sm:$0xff]  ;;  %v18574_v34 = vld [vmem:[#allocation5_spill] sm:$0xff] }
 0x22d   : > { %v14878_v21 = vsel %vm3476_vm13, %v14611_v45, %v14852_v18  ;;  %v1455_v26 = vsel %vm979_vm12, %v1450_v14, %v1454_v55  ;;  %v4665_v0 = vsel %vm14865_vm4, 65537, %v14258_v59  ;;  %vm14888_vm6 = vmpackc.low %vm3184_vm5, %vm3184_vm5  ;;  %v1558_v24 = vpop.permute.xlu1 %1557  ;;  %v14893_v45 = vpop.f32.mrb[69].mxu0  ;;  %6445 = vmatprep.subr.bf16.mxu1 %v14900_v17  ;;  %vm3185_vm8 = vcmp.ge.f32.partialorder %v14807_v48, 3.0  ;;  %5031 = vrot.lane.b32.xlu0 %v14609_v23, %s11376_s15 }
 0x22e   : > { %v14895_v36 = vrot.slane %v4283_v63, 1  ;;  %v5673_v2 = vsel %vm3476_vm13, %v14640_v61, %v14863_v6  ;;  %1483 = vst.msk [vmem:[#allocation4 + $0x218] sm:$0xff] %vm392_vm1, %v1455_v26  ;;  %v10159_v59 = vcombine.low %v4664_v33, %v4665_v0  ;;  %2502 = vmatmul.mubr.bf16.gmra.mrb[64].mxu1 %v1913_v58  ;;  %v14906_v11 = vpop.f32.mrb[70].mxu0  ;;  %v14911_v61 = vor.u32 %v4991_v28, %v14815_v51  ;;  %vm14913_vm14 = vmpackc.low %vm3185_vm8, %vm3185_vm8  ;;  %v18575_v0 = vld [vmem:[#allocation6_spill] sm:$0xff] }
 0x22f   : > { %1592 = vst.msk [vmem:[#allocation4 + $0x128] sm:$0xff] %vm1138_vm2, %v1558_v24  ;;  %vm5697_vm11 = vcmp.ne.s16.totalorder %v5673_v2, 0  ;;  %v3248_v27 = vsel %vm14888_vm6, 65537, %v14900_v17  ;;  %vm5088_vm15 = vcmp.lt.f32.partialorder %v18574_v34, 14.0  ;;  %3651 = vrot.lane.b32.xlu1 %v14497_v9, %s11376_s15  ;;  %2509 = vmatprep.mubr.bf16.mxu1 %v1919_v62  ;;  %v14923_v53 = vpop.f32.mrb[71].mxu0  ;;  %v1781_v55 = vpop.permute.xlu0 %1780  ;;  %v3249_v9 = vsel %vm14913_vm14, 65537, %v14900_v17 }
 0x230   : > { %v4286_v23 = vsel %vm979_vm12, %v14823_v32, %v14895_v36  ;;  %v5714_v51 = vsel %vm5697_vm11, %v13741_v49, 0  ;;  %v4834_v5 = vshrl.u32 %v10159_v59, 16  ;;  %v4837_v14 = vshll.u32 %v10159_v59, 16  ;;  %6446 = vmatpush1.bf16.msra.mxu1 %v11280_v4  ;;  %1811 = vst.msk [vmem:[#allocation4 + $0x1d0] sm:$0xff] %vm1138_vm2, %v1781_v55  ;;  %vm14943_vm4 = vmpackc.low %vm5088_vm15, %vm5088_vm15  ;;  %v1924_v4 = vld [vmem:[#allocation4 + $0xb8] sm:$0xff] }
 0x231   : > { %vm4305_vm0 = vcmp.ne.s16.totalorder %v4286_v23, 0  ;;  %v5843_v47 = vshrl.u32 %v5714_v51, 16  ;;  %v5846_v63 = vshll.u32 %v5714_v51, 16  ;;  %v1560_v33 = vpop.permute.xlu1 %1559  ;;  %v10111_v26 = vcombine.low %v3248_v27, %v3249_v9  ;;  %6447 = vmatprep.subr.bf16.mxu1 %v14900_v17  ;;  %4483 = vrot.lane.b32.xlu0 %v14813_v31, %s11376_s15  ;;  %v18580_v27 = vld [vmem:[#allocation7_spill] sm:$0xff] }
 0x232   : > { %v4322_v32 = vsel %vm4305_vm0, %v13741_v49, 0  ;;  %v14937_v10 = vrot.slane %v4834_v5, 7  ;;  %vm5089_vm3 = vcmp.lt.f32.partialorder %v18575_v0, 14.0  ;;  %1593 = vst.msk [vmem:[#allocation4 + $0x150] sm:$0xff] %vm1138_vm2, %v1560_v33  ;;  %vm3936_vm6 = vcmask 1040384   ;;  %v18581_v5 = vld [vmem:[#allocation8_spill] sm:$0xff] }
 0x233   : > { %v4442_v28 = vshrl.u32 %v4322_v32, 16  ;;  %v4445_v30 = vshll.u32 %v4322_v32, 16  ;;  %v5845_v24 = vrot.slane %v5843_v47, 1  ;;  %v5848_v58 = vrot.slane %v5846_v63, 2  ;;  %vm14951_vm5 = vmpackc.low %vm5089_vm3, %vm5089_vm3  ;;  %5891 = vrot.lane.b32.xlu1 %v14566_v37, %s11376_s15  ;;  %v1783_v23 = vpop.permute.xlu0 %1782  ;;  %v1918_v63 = vld [vmem:[#allocation4 + $0x88] sm:$0xff] }
 0x234   : > { %v4839_v59 = vor.u32 %v4837_v14, %v14937_v10  ;;  %v3434_v62 = vshrl.u32 %v10111_v26, 16  ;;  %v3437_v39 = vshll.u32 %v10111_v26, 16  ;;  %vm5090_vm8 = vcmp.lt.f32.partialorder %v18580_v27, 14.0  ;;  %6448 = vmatpush1.bf16.msra.mxu1 %v11285_v43  ;;  %v11288_v14 = vld [vmem:[%s18118_s5 + $0xb0] sm:$0xff]   ;;  %1812 = vst.msk [vmem:[#allocation4 + $0x1f8] sm:$0xff] %vm1138_vm2, %v1783_v23 }
 0x235   : > { %v14959_v31 = vrot.slane %v4442_v28, 7  ;;  %v14961_v51 = vor.u32 %v5848_v58, %v5845_v24  ;;  %vm5091_vm11 = vcmp.lt.f32.partialorder %v18581_v5, 14.0  ;;  %vm14964_vm14 = vmpackc.low %vm5090_vm8, %vm5090_vm8  ;;  %v5152_v37 = vsel %vm14943_vm4, 65537, %v14900_v17  ;;  %v1562_v47 = vpop.permute.xlu1 %1561  ;;  %6449 = vmatprep.subr.bf16.mxu1 %v14900_v17  ;;  %5033 = vrot.lane.b32.xlu0 %v14837_v52, %s11376_s15 }
 0x236   : > { %v4840_v9 = vsel %vm4324_vm9, %v14738_v15, %v4839_v59  ;;  %v3436_v33 = vrot.slane %v3434_v62, 1  ;;  %v3439_v32 = vrot.slane %v3437_v39, 2  ;;  %vm14977_vm15 = vmpackc.low %vm5091_vm11, %vm5091_vm11  ;;  %v5153_v43 = vsel %vm14951_vm5, 65537, %v14900_v17  ;;  %1594 = vst.msk [vmem:[#allocation4 + $0x178] sm:$0xff] %vm1138_vm2, %v1562_v47  ;;  %2510 = vmatmul.mubr.bf16.gmra.mrb[68].mxu1 %v1918_v63  ;;  %v15040_v47 = vld [vmem:[#allocation2 + $0x10] sm:$0xff] }
 0x237   : > { %v4447_v15 = vor.u32 %v4445_v30, %v14959_v31  ;;  %v14992_v28 = vsel %vm3298_vm7, %v14736_v41, %v14961_v51  ;;  %vm4856_vm0 = vcmp.ne.s16.totalorder %v4840_v9, 0  ;;  %v5154_v24 = vsel %vm14964_vm14, 65537, %v14900_v17  ;;  %3653 = vrot.lane.b32.xlu1 %v14627_v50, %s11376_s15  ;;  %2517 = vmatprep.mubr.bf16.mxu1 %v1924_v4  ;;  %v1785_v2 = vpop.permute.xlu0 %1784  ;;  %v11289_v50 = vld [vmem:[%s18118_s5 + $0xb8] sm:$0xff]  }
 0x238   : > { %v15000_v58 = vsel %vm4856_vm0, %v13877_v46, 0  ;;  %v15002_v52 = vor.u32 %v3439_v32, %v3436_v33  ;;  %v5155_v30 = vsel %vm14977_vm15, 65537, %v14900_v17  ;;  %v10160_v41 = vcombine.low %v5152_v37, %v5153_v43  ;;  %6450 = vmatpush1.bf16.msra.mxu1 %v11288_v14  ;;  %1813 = vst.msk [vmem:[#allocation4 + $0x220] sm:$0xff] %vm1138_vm2, %v1785_v2  ;;  %v5071_v14 = vld [vmem:[#allocation2 + $0x8] sm:$0xfe]  ;;  %v15056_v32 = vpop.f32.mrb[72].mxu0 }
 0x239   : > { %v4448_v59 = vsel %vm4324_vm9, %v14775_v8, %v4447_v15  ;;  %v4995_v62 = vshll.u32 %v15000_v58, 16  ;;  %v15010_v39 = vcombine.low %v5154_v24, %v5155_v30  ;;  %vm3710_vm3 = vcmp.ge.f32.partialorder %v18574_v34, 2.0  ;;  %v1564_v23 = vpop.permute.xlu1 %1563  ;;  %6451 = vmatprep.subr.bf16.mxu1 %v14900_v17 }
 0x23a   : > { %v3441_v55 = vsel %vm3298_vm7, %v14777_v22, %v15002_v52  ;;  %v5232_v37 = vrot.slane %v10160_v41, 7  ;;  %vm3711_vm4 = vcmp.ge.f32.partialorder %v18575_v0, 2.0  ;;  %vm3712_vm5 = vcmp.ge.f32.partialorder %v18580_v27, 2.0  ;;  %vm15022_vm8 = vmpackc.low %vm3710_vm3, %vm3710_vm3  ;;  %1595 = vst.msk [vmem:[#allocation4 + $0x1a0] sm:$0xff] %vm1138_vm2, %v1564_v23  ;;  %4485 = vrot.lane.b32.xlu0 %v4448_v59, %s11376_s15  ;;  %v11290_v41 = vld [vmem:[%s18118_s5 + $0xc0] sm:$0xff]   ;;  %v15077_v59 = vpop.f32.mrb[73].mxu0 }
 0x23b   : > { %v15029_v34 = vrot.slane %v4995_v62, 1  ;;  %vm3457_vm11 = vcmp.ne.s16.totalorder %v3441_v55, 0  ;;  %v5233_v22 = vrot.slane %v15010_v39, 7  ;;  %vm3713_vm14 = vcmp.ge.f32.partialorder %v18581_v5, 2.0  ;;  %vm15033_vm15 = vmpackc.low %vm3711_vm4, %vm3711_vm4  ;;  %5893 = vrot.lane.b32.xlu1 %v14762_v7, %s11376_s15  ;;  %v4458_v26 = vpop.permute.xlu0 %4457  ;;  %v1929_v23 = vld [vmem:[#allocation4 + $0xe0] sm:$0xff]  ;;  %v15091_v55 = vpop.f32.mrb[74].mxu0 }
 0x23c   : > { %v3474_v27 = vsel %vm3457_vm11, %v13741_v49, 0  ;;  %vm15042_vm0 = vcmp.ne.s16.totalorder %v5232_v37, 0  ;;  %vm15046_vm3 = vmpackc.low %vm3712_vm5, %vm3712_vm5  ;;  %v3774_v33 = vsel %vm15022_vm8, 65537, %v14900_v17  ;;  %v3775_v7 = vsel %vm15033_vm15, 65537, %v14900_v17  ;;  %v15058_v49 = vld [vmem:[#allocation2 + $0x8] sm:$0xff]  ;;  %6452 = vmatpush1.bf16.msra.mxu1 %v11289_v50  ;;  %4505 = vst.msk [vmem:[#allocation4 + $0x8] sm:$0xff] %vm392_vm1, %v4458_v26 }
 0x23d   : > { %v4998_v43 = vsel %vm979_vm12, %v14911_v61, %v15029_v34  ;;  %v3612_v4 = vshrl.u32 %v3474_v27, 16  ;;  %v3615_v15 = vshll.u32 %v3474_v27, 16  ;;  %v5234_v24 = vsel %vm3936_vm6, %v5232_v37, %v5233_v22  ;;  %vm15069_vm4 = vmpackc.low %vm3713_vm14, %vm3713_vm14  ;;  %v1566_v2 = vpop.permute.xlu1 %1565  ;;  %v1923_v61 = vld [vmem:[#allocation4 + $0xb0] sm:$0xff]  ;;  %6453 = vmatprep.subr.bf16.mxu1 %v14900_v17  ;;  %4537 = vst.msk [vmem:[#allocation4 + $0x8] sm:$0xff] %vm1138_vm2, %v15058_v49  ;;  %v15099_v27 = vpop.f32.mrb[75].mxu0 }
 0x23e   : > { %vm5264_vm5 = vcmp.ne.s16.totalorder %v5234_v24, 0  ;;  %v5280_v5 = vsel %vm15042_vm0, %v5071_v14, 0  ;;  %v3776_v62 = vsel %vm15046_vm3, 65537, %v14900_v17  ;;  %v3777_v50 = vsel %vm15069_vm4, 65537, %v14900_v17  ;;  %1596 = vst.msk [vmem:[#allocation4 + $0x1c8] sm:$0xff] %vm1138_vm2, %v1566_v2  ;;  %2518 = vmatmul.mubr.bf16.gmra.mrb[72].mxu1 %v1923_v61  ;;  %5035 = vrot.lane.b32.xlu0 %v4998_v43, %s11376_s15 }
 0x23f   : > { %v3614_v37 = vrot.slane %v3612_v4, 6  ;;  %v3617_v8 = vrot.slane %v3615_v15, 7  ;;  %v15095_v14 = vsel %vm5264_vm5, %v15040_v47, 0  ;;  %v5314_v0 = vrot.slane %v5280_v5, 1  ;;  %3655 = vrot.lane.b32.xlu1 %v14878_v21, %s11376_s15  ;;  %2525 = vmatprep.mubr.bf16.mxu1 %v1929_v23  ;;  %v4569_v43 = vld [vmem:[#allocation2 + $0x88] sm:$0x1]  ;;  %v5008_v15 = vpop.permute.xlu0 %5007 }
 0x240   : > { %v5315_v63 = vrot.slane %v15095_v14, 1  ;;  %v10112_v9 = vcombine.low %v3774_v33, %v3775_v7  ;;  %v15102_v26 = vcombine.low %v3776_v62, %v3777_v50  ;;  %v4287_v24 = vshrl.u32 %v14846_v12, 16  ;;  %6454 = vmatpush1.bf16.msra.mxu1 %v11290_v41  ;;  %v11291_v21 = vld [vmem:[%s18118_s5 + $0xc8] sm:$0xff]   ;;  %5055 = vst.msk [vmem:[#allocation4 + $0x10] sm:$0xff] %vm392_vm1, %v5008_v15  ;;  %v3693_v7 = vld [vmem:[#allocation2] sm:$0x80] }
 0x241   : > { %v15105_v4 = vor.u32 %v3617_v8, %v3614_v37  ;;  %vm5426_vm8 = vcmp.lt.f32.partialorder %v14788_v40, 13.0  ;;  %vm5427_vm11 = vcmp.lt.f32.partialorder %v14807_v48, 13.0  ;;  %vm4857_vm14 = vcmp.ne.s16.totalorder %v14937_v10, 0  ;;  %v1568_v33 = vpop.permute.xlu1 %1567  ;;  %6455 = vmatprep.subr.bf16.mxu1 %v14900_v17 }
 0x242   : > { %v5316_v12 = vsel %vm1183_vm10, %v5314_v0, %v5315_v63  ;;  %v3854_v30 = vrot.slane %v10112_v9, 1  ;;  %v3855_v2 = vrot.slane %v15102_v26, 1  ;;  %v4289_v61 = vor.u32 %v4287_v24, %v14895_v36  ;;  %vm15119_vm15 = vmpackc.low %vm5426_vm8, %vm5426_vm8  ;;  %1597 = vst.msk [vmem:[#allocation4 + $0x1f0] sm:$0xff] %vm1138_vm2, %v1568_v33  ;;  %v3153_v9 = vld [vmem:[#allocation2 + $0x80] sm:$0x7f]  ;;  %v1928_v24 = vld [vmem:[#allocation4 + $0xd8] sm:$0xff] }
 0x243   : > { %v3619_v41 = vsel %vm3476_vm13, %v14852_v18, %v15105_v4  ;;  %5363 = vst.msk [vmem:[#allocation4 + $0x10] sm:$0xff] %vm1138_vm2, %v5316_v12  ;;  %vm5459_vm0 = vmpackc.low %vm5427_vm11, %vm5427_vm11  ;;  %v5490_v36 = vsel %vm15119_vm15, 65537, %v14900_v17  ;;  %v4874_v62 = vsel %vm4857_vm14, %v4569_v43, 0  ;;  %v4999_v50 = vshrl.u32 %v15000_v58, 16  ;;  %5895 = vrot.lane.b32.xlu1 %v14992_v28, %s11376_s15  ;;  %v4460_v10 = vpop.permute.xlu0 %4459  ;;  %v11292_v28 = vld [vmem:[%s18118_s5 + $0xd0] sm:$0xff]  }
 0x244   : > { %v3856_v18 = vsel %vm1183_vm10, %v3854_v30, %v3855_v2  ;;  %vm3885_vm3 = vcmp.ne.s16.totalorder %v3854_v30, 0  ;;  %vm4306_vm4 = vcmp.ne.s16.totalorder %v4289_v61, 0  ;;  %v5491_v23 = vsel %vm5459_vm0, 65537, %v14900_v17  ;;  %6456 = vmatpush1.bf16.msra.mxu1 %v11291_v21  ;;  %4506 = vst.msk [vmem:[#allocation4 + $0x30] sm:$0xff] %vm392_vm1, %v4460_v10  ;;  %v1934_v21 = vld [vmem:[#allocation4 + $0x108] sm:$0xff] }
 0x245   : > { %vm3886_vm5 = vcmp.ne.s16.totalorder %v3856_v18, 0  ;;  %v3902_v37 = vsel %vm3885_vm3, %v3693_v7, 0  ;;  %v4323_v8 = vsel %vm4306_vm4, %v13877_v46, 0  ;;  %v10191_v0 = vcombine.low %v5490_v36, %v5491_v23  ;;  %v1570_v58 = vpop.permute.xlu1 %1569  ;;  %v5934_v7 = vld [vmem:[#allocation4 + $0x8] sm:$0xff]  ;;  %6457 = vmatprep.subr.bf16.mxu1 %v14900_v17  ;;  %4538 = vst.msk [vmem:[#allocation4 + $0x30] sm:$0xff] %vm1138_vm2, %v15040_v47  ;;  %v18598_v23 = vld [vmem:[#allocation9_spill] sm:$0xff] }
 0x246   : > { %v15149_v43 = vsel %vm3886_vm5, %v15058_v49, 0  ;;  %v3937_v15 = vrot.slane %v3902_v37, 7  ;;  %v4450_v33 = vshrl.u32 %v4323_v8, 16  ;;  %v4453_v12 = vshll.u32 %v4323_v8, 16  ;;  %1598 = vst.msk [vmem:[#allocation4 + $0x218] sm:$0xff] %vm1138_vm2, %v1570_v58  ;;  %2526 = vmatmul.mubr.bf16.gmra.mrb[76].mxu1 %v1928_v24  ;;  %6308 = vmatprep.mubr.bf16.mxu0 %v5934_v7 }
 0x247   : > { %v3938_v30 = vrot.slane %v15149_v43, 7  ;;  %v5675_v61 = vshrl.u32 %v10191_v0, 16  ;;  %v5678_v5 = vshll.u32 %v10191_v0, 16  ;;  %v5001_v49 = vor.u32 %v4999_v50, %v15029_v34  ;;  %3657 = vrot.lane.b32.xlu1 %v3619_v41, %s11376_s15  ;;  %2533 = vmatprep.mubr.bf16.mxu1 %v1934_v21  ;;  %v5010_v34 = vpop.permute.xlu0 %5009  ;;  %v11293_v41 = vld [vmem:[%s18118_s5 + $0xd8] sm:$0xff]  }
 0x248   : > { %v4452_v36 = vrot.slane %v4450_v33, 7  ;;  %v5003_v18 = vshll.u32 %v4874_v62, 16  ;;  %vm3458_vm8 = vcmp.ne.s16.totalorder %v15002_v52, 0  ;;  %vm5092_vm11 = vcmp.lt.f32.partialorder %v18598_v23, 14.0  ;;  %6458 = vmatpush1.bf16.msra.mxu1 %v11292_v28  ;;  %5056 = vst.msk [vmem:[#allocation4 + $0x38] sm:$0xff] %vm392_vm1, %v5010_v34 }
 0x249   : > { %v3939_v37 = vsel %vm3936_vm6, %v3937_v15, %v3938_v30  ;;  %v5677_v8 = vrot.slane %v5675_v61, 6  ;;  %v5680_v0 = vrot.slane %v5678_v5, 7  ;;  %v3475_v10 = vsel %vm3458_vm8, %v3153_v9, 0  ;;  %vm15164_vm14 = vmpackc.low %vm5092_vm11, %vm5092_vm11  ;;  %v3630_v52 = vpop.permute.xlu1 %3629  ;;  %6459 = vmatprep.subr.bf16.mxu1 %v14900_v17  ;;  %v18601_v15 = vld [vmem:[#allocation10_spill] sm:$0xff] }
 0x24a   : > { %v4455_v62 = vor.u32 %v4453_v12, %v4452_v36  ;;  %v5005_v50 = vrot.slane %v5003_v18, 1  ;;  %v3621_v24 = vshrl.u32 %v3475_v10, 16  ;;  %v3624_v33 = vshll.u32 %v3475_v10, 16  ;;  %3677 = vst.msk [vmem:[#allocation4] sm:$0xff] %vm392_vm1, %v3630_v52  ;;  %v5395_v36 = vld [vmem:[#allocation2 + $0x88] sm:$0x3] }
 0x24b   : > { %v5681_v9 = vor.u32 %v5680_v0, %v5677_v8  ;;  %vm5093_vm15 = vcmp.lt.f32.partialorder %v18601_v15, 14.0  ;;  %v5156_v28 = vsel %vm15164_vm14, 65537, %v14900_v17  ;;  %vm3714_vm0 = vcmp.ge.f32.partialorder %v18598_v23, 2.0  ;;  %3986 = vst.msk [vmem:[#allocation4] sm:$0xff] %vm1138_vm2, %v3939_v37  ;;  %v4462_v37 = vpop.permute.xlu0 %4461  ;;  %v1933_v0 = vld [vmem:[#allocation4 + $0x100] sm:$0xff] }
 0x24c   : > { %v4456_v12 = vsel %vm4324_vm9, %v14959_v31, %v4455_v62  ;;  %v5006_v7 = vsel %vm979_vm12, %v5001_v49, %v5005_v50  ;;  %v3623_v21 = vrot.slane %v3621_v24, 6  ;;  %v3626_v61 = vrot.slane %v3624_v33, 7  ;;  %vm15183_vm3 = vmpackc.low %vm5093_vm15, %vm5093_vm15  ;;  %v15198_v49 = vpop.f32.mrb[76].mxu0  ;;  %6460 = vmatpush1.bf16.msra.mxu1 %v11293_v41  ;;  %4507 = vst.msk [vmem:[#allocation4 + $0x58] sm:$0xff] %vm392_vm1, %v4462_v37  ;;  %v1939_v50 = vld [vmem:[#allocation4 + $0x130] sm:$0xff]  ;;  %v18611_v31 = vld [vmem:[#allocation12_spill] sm:$0xff] }
 0x24d   : > { %4487 = vrot.lane.b32.xlu0 %v4456_v12, %s11376_s15  ;;  %v5682_v18 = vsel %vm3476_vm13, %v14863_v6, %v5681_v9  ;;  %v5157_v23 = vsel %vm15183_vm3, 65537, %v14900_v17  ;;  %vm3715_vm9 = vcmp.ge.f32.partialorder %v18601_v15, 2.0  ;;  %vm15194_vm4 = vmpackc.low %vm3714_vm0, %vm3714_vm0  ;;  %vm5699_vm5 = vcmp.ne.s16.totalorder %v5681_v9, 0  ;;  %v5870_v8 = vpop.permute.xlu1 %5869  ;;  %v15200_v6 = vld [vmem:[#allocation2 + $0x18] sm:$0xff]  ;;  %v15212_v62 = vpop.f32.mrb[77].mxu0  ;;  %7582 = vmatprep.subr.bf16.mxu1 %v14900_v17 }
 0x24e   : > { %vm5698_vm8 = vcmp.ne.s16.totalorder %v5682_v18, 0  ;;  %v3627_v10 = vor.u32 %v3626_v61, %v3623_v21  ;;  %v15202_v58 = vcombine.low %v5156_v28, %v5157_v23  ;;  %vm15204_vm11 = vmpackc.low %vm3715_vm9, %vm3715_vm9  ;;  %v3778_v52 = vsel %vm15194_vm4, 65537, %v14900_v17  ;;  %5917 = vst.msk [vmem:[#allocation4 + $0x18] sm:$0xff] %vm392_vm1, %v5870_v8  ;;  %2534 = vmatmul.mubr.bf16.gmra.mrb[80].mxu1 %v1933_v0  ;;  %v15223_v15 = vpop.f32.mrb[78].mxu0  ;;  %v18608_v28 = vld [vmem:[#allocation11_spill] sm:$0xff] }
 0x24f   : > { %v5715_v41 = vsel %vm5698_vm8, %v13877_v46, 0  ;;  %v3779_v24 = vsel %vm15204_vm11, 65537, %v14900_v17  ;;  %v5716_v33 = vsel %vm5699_vm5, %v5395_v36, 0  ;;  %4539 = vst.msk [vmem:[#allocation4 + $0x58] sm:$0xff] %vm1138_vm2, %v15200_v6  ;;  %vm5094_vm14 = vcmp.lt.f32.partialorder %v18608_v28, 14.0  ;;  %2541 = vmatprep.mubr.bf16.mxu1 %v1939_v50  ;;  %v15231_v5 = vpop.f32.mrb[79].mxu0  ;;  %v5012_v37 = vpop.permute.xlu0 %5011 }
 0x250   : > { %v5852_v12 = vshrl.u32 %v5715_v41, 16  ;;  %v5855_v21 = vshll.u32 %v5715_v41, 16  ;;  %v15228_v46 = vsel %vm3476_vm13, %v15105_v4, %v3627_v10  ;;  %v5235_v61 = vrot.slane %v15202_v58, 7  ;;  %vm15233_vm15 = vmpackc.low %vm5094_vm14, %vm5094_vm14  ;;  %5057 = vst.msk [vmem:[#allocation4 + $0x60] sm:$0xff] %vm392_vm1, %v5012_v37 }
 0x251   : > { %5037 = vrot.lane.b32.xlu0 %v5006_v7, %s11376_s15  ;;  %v15238_v36 = vcombine.low %v3778_v52, %v3779_v24  ;;  %v5861_v18 = vshrl.u32 %v5716_v33, 16  ;;  %v5864_v23 = vshll.u32 %v5716_v33, 16  ;;  %vm5095_vm0 = vcmp.lt.f32.partialorder %v18611_v31, 14.0  ;;  %v3632_v10 = vpop.permute.xlu1 %3631  ;;  %v5938_v24 = vld [vmem:[#allocation4 + $0x30] sm:$0xff] }
 0x252   : > { %v5854_v4 = vrot.slane %v5852_v12, 1  ;;  %v5857_v8 = vrot.slane %v5855_v21, 2  ;;  %v5236_v0 = vsel %vm3936_vm6, %v5233_v22, %v5235_v61  ;;  %vm15244_vm13 = vmpackc.low %vm5095_vm0, %vm5095_vm0  ;;  %v5158_v7 = vsel %vm15233_vm15, 65537, %v14900_v17  ;;  %3678 = vst.msk [vmem:[#allocation4 + $0x28] sm:$0xff] %vm392_vm1, %v3632_v10  ;;  %v5933_v41 = vld [vmem:[#allocation4] sm:$0xff] }
 0x253   : > { %vm5265_vm3 = vcmp.ne.s16.totalorder %v5236_v0, 0  ;;  %v3857_v34 = vrot.slane %v15238_v36, 1  ;;  %v5863_v52 = vrot.slane %v5861_v18, 1  ;;  %v5866_v39 = vrot.slane %v5864_v23, 2  ;;  %6309 = vmatmul.mubr.bf16.vlgmr.msra.gmra.mrb[92].mxu0 %v5933_v41  ;;  %v4464_v37 = vpop.permute.xlu0 %4463  ;;  %v15275_v0 = vld [vmem:[#allocation2 + $0x20] sm:$0xff]  ;;  %v18633_v23 = vld [vmem:[#allocation18_spill] sm:$0xff] }
 0x254   : > { %v5858_v22 = vor.u32 %v5857_v8, %v5854_v4  ;;  %v15255_v50 = vsel %vm5265_vm3, %v15200_v6, 0  ;;  %v5159_v33 = vsel %vm15244_vm13, 65537, %v14900_v17  ;;  %vm3716_vm9 = vcmp.ge.f32.partialorder %v18608_v28, 2.0  ;;  %6316 = vmatprep.mubr.bf16.mxu0 %v5938_v24  ;;  %v1938_v8 = vld [vmem:[#allocation4 + $0x128] sm:$0xff]  ;;  %4508 = vst.msk [vmem:[#allocation4 + $0x80] sm:$0xff] %vm392_vm1, %v4464_v37  ;;  %v18623_v37 = vld [vmem:[#allocation16_spill] sm:$0xff] }
 0x255   : > { %v5317_v12 = vrot.slane %v15255_v50, 1  ;;  %v3858_v21 = vsel %vm1183_vm10, %v3855_v2, %v3857_v34  ;;  %v5867_v9 = vor.u32 %v5866_v39, %v5863_v52  ;;  %v15267_v18 = vcombine.low %v5158_v7, %v5159_v33  ;;  %vm15269_vm4 = vmpackc.low %vm3716_vm9, %vm3716_vm9  ;;  %v5872_v4 = vpop.permute.xlu1 %5871  ;;  %4540 = vst.msk [vmem:[#allocation4 + $0x80] sm:$0xff] %vm1138_vm2, %v15275_v0  ;;  %v18617_v7 = vld [vmem:[#allocation14_spill] sm:$0xff] }
 0x256   : > { %v5859_v28 = vsel %vm3298_vm7, %v14961_v51, %v5858_v22  ;;  %vm3887_vm5 = vcmp.ne.s16.totalorder %v3858_v21, 0  ;;  %vm3717_vm8 = vcmp.ge.f32.partialorder %v18611_v31, 2.0  ;;  %v3780_v26 = vsel %vm15269_vm4, 65537, %v14900_v17  ;;  %5918 = vst.msk [vmem:[#allocation4 + $0x40] sm:$0xff] %vm392_vm1, %v5872_v4  ;;  %2542 = vmatmul.mubr.bf16.gmra.mrb[84].mxu1 %v1938_v8  ;;  %v1944_v31 = vld [vmem:[#allocation4 + $0x158] sm:$0xff]  ;;  %v18620_v21 = vld [vmem:[#allocation15_spill] sm:$0xff] }
 0x257   : > { %5897 = vrot.lane.b32.xlu1 %v5859_v28, %s11376_s15  ;;  %v5318_v51 = vsel %vm1183_vm10, %v5315_v63, %v5317_v12  ;;  %v15289_v2 = vsel %vm3887_vm5, %v15040_v47, 0  ;;  %v5868_v10 = vsel %vm3298_vm7, %v5858_v22, %v5867_v9  ;;  %v5237_v58 = vrot.slane %v15267_v18, 7  ;;  %vm3749_vm11 = vmpackc.low %vm3717_vm8, %vm3717_vm8  ;;  %2549 = vmatprep.mubr.bf16.mxu1 %v1944_v31  ;;  %v18616_v63 = vld [vmem:[#allocation13_spill] sm:$0xff]  ;;  %v5014_v22 = vpop.permute.xlu0 %5013 }
 0x258   : > { %5364 = vst.msk [vmem:[#allocation4 + $0x38] sm:$0xff] %vm1138_vm2, %v5318_v51  ;;  %v3940_v14 = vrot.slane %v15289_v2, 7  ;;  %v3781_v47 = vsel %vm3749_vm11, 65537, %v14900_v17  ;;  %vm5096_vm14 = vcmp.lt.f32.partialorder %v18616_v63, 14.0  ;;  %vm5097_vm7 = vcmp.lt.f32.partialorder %v18617_v7, 14.0  ;;  %v5942_v2 = vld [vmem:[#allocation4 + $0x58] sm:$0xff] }
 0x259   : > { %v5238_v52 = vsel %vm3936_vm6, %v5235_v61, %v5237_v58  ;;  %v15304_v39 = vcombine.low %v3780_v26, %v3781_v47  ;;  %vm15306_vm15 = vmpackc.low %vm5096_vm14, %vm5096_vm14  ;;  %vm3718_vm0 = vcmp.ge.f32.partialorder %v18616_v63, 2.0  ;;  %vm3719_vm13 = vcmp.ge.f32.partialorder %v18617_v7, 2.0  ;;  %v3634_v33 = vpop.permute.xlu1 %3633  ;;  %5058 = vst.msk [vmem:[#allocation4 + $0x88] sm:$0xff] %vm392_vm1, %v5014_v22  ;;  %v18628_v7 = vld [vmem:[#allocation17_spill] sm:$0xff] }
 0x25a   : > { %v3941_v24 = vsel %vm3936_vm6, %v3938_v30, %v3940_v14  ;;  %vm5266_vm3 = vcmp.ne.s16.totalorder %v5238_v52, 0  ;;  %vm5129_vm9 = vmpackc.low %vm5097_vm7, %vm5097_vm7  ;;  %v5160_v61 = vsel %vm15306_vm15, 65537, %v14900_v17  ;;  %vm5098_vm4 = vcmp.lt.f32.partialorder %v18620_v21, 14.0  ;;  %3679 = vst.msk [vmem:[#allocation4 + $0x50] sm:$0xff] %vm392_vm1, %v3634_v33  ;;  %v1943_v52 = vld [vmem:[#allocation4 + $0x150] sm:$0xff]  ;;  %v1949_v33 = vld [vmem:[#allocation4 + $0x180] sm:$0xff] }
 0x25b   : > { %3659 = vrot.lane.b32.xlu1 %v15228_v46, %s11376_s15  ;;  %3987 = vst.msk [vmem:[#allocation4 + $0x28] sm:$0xff] %vm1138_vm2, %v3941_v24  ;;  %v15326_v43 = vsel %vm5266_vm3, %v15275_v0, 0  ;;  %v3859_v30 = vrot.slane %v15304_v39, 1  ;;  %v5161_v9 = vsel %vm5129_vm9, 65537, %v14900_v17  ;;  %vm15331_vm5 = vmpackc.low %vm3718_vm0, %vm3718_vm0  ;;  %vm5099_vm8 = vcmp.lt.f32.partialorder %v18623_v37, 14.0  ;;  %v15356_v31 = vpop.f32.mrb[80].mxu0  ;;  %v4466_v47 = vpop.permute.xlu0 %4465 }
 0x25c   : > { %v5319_v28 = vrot.slane %v15326_v43, 1  ;;  %v15337_v46 = vcombine.low %v5160_v61, %v5161_v9  ;;  %vm15342_vm11 = vmpackc.low %vm3719_vm13, %vm3719_vm13  ;;  %v3782_v8 = vsel %vm15331_vm5, 65537, %v14900_v17  ;;  %vm3720_vm14 = vcmp.ge.f32.partialorder %v18620_v21, 2.0  ;;  %v15372_v39 = vld [vmem:[#allocation2 + $0x28] sm:$0xff]  ;;  %4509 = vst.msk [vmem:[#allocation4 + $0xa8] sm:$0xff] %vm392_vm1, %v4466_v47  ;;  %v15378_v24 = vpop.f32.mrb[81].mxu0 }
 0x25d   : > { %v3860_v26 = vsel %vm1183_vm10, %v3857_v34, %v3859_v30  ;;  %v3783_v51 = vsel %vm15342_vm11, 65537, %v14900_v17  ;;  %vm15361_vm7 = vmpackc.low %vm5098_vm4, %vm5098_vm4  ;;  %vm3721_vm15 = vcmp.ge.f32.partialorder %v18623_v37, 2.0  ;;  %vm5100_vm0 = vcmp.lt.f32.partialorder %v18628_v7, 14.0  ;;  %v5874_v34 = vpop.permute.xlu1 %5873  ;;  %4541 = vst.msk [vmem:[#allocation4 + $0xa8] sm:$0xff] %vm1138_vm2, %v15372_v39  ;;  %v15393_v61 = vpop.f32.mrb[82].mxu0 }
 0x25e   : > { %v5320_v36 = vsel %vm1183_vm10, %v5317_v12, %v5319_v28  ;;  %vm3888_vm13 = vcmp.ne.s16.totalorder %v3860_v26, 0  ;;  %v5239_v41 = vrot.slane %v15337_v46, 7  ;;  %v15375_v22 = vcombine.low %v3782_v8, %v3783_v51  ;;  %vm15383_vm3 = vmpackc.low %vm5099_vm8, %vm5099_vm8  ;;  %5919 = vst.msk [vmem:[#allocation4 + $0x68] sm:$0xff] %vm392_vm1, %v5874_v34  ;;  %2550 = vmatmul.mubr.bf16.gmra.mrb[88].mxu1 %v1943_v52  ;;  %v15413_v26 = vpop.f32.mrb[83].mxu0 }
 0x25f   : > { %5899 = vrot.lane.b32.xlu1 %v5868_v10, %s11376_s15  ;;  %5365 = vst.msk [vmem:[#allocation4 + $0x60] sm:$0xff] %vm1138_vm2, %v5320_v36  ;;  %v3905_v12 = vsel %vm3888_vm13, %v15200_v6, 0  ;;  %v5162_v9 = vsel %vm15361_vm7, 65537, %v14900_v17  ;;  %v5163_v10 = vsel %vm15383_vm3, 65537, %v14900_v17  ;;  %vm15404_vm9 = vmpackc.low %vm3720_vm14, %vm3720_vm14  ;;  %vm5101_vm4 = vcmp.lt.f32.partialorder %v18633_v23, 14.0  ;;  %2557 = vmatprep.mubr.bf16.mxu1 %v1949_v33  ;;  %v5016_v47 = vpop.permute.xlu0 %5015 }
 0x260   : > { %v3942_v46 = vrot.slane %v3905_v12, 7  ;;  %v5240_v4 = vsel %vm3936_vm6, %v5237_v58, %v5239_v41  ;;  %v3861_v8 = vrot.slane %v15375_v22, 1  ;;  %v15415_v51 = vcombine.low %v5162_v9, %v5163_v10  ;;  %vm15420_vm5 = vmpackc.low %vm3721_vm15, %vm3721_vm15  ;;  %5059 = vst.msk [vmem:[#allocation4 + $0xb0] sm:$0xff] %vm392_vm1, %v5016_v47 }
 0x261   : > { %vm5267_vm8 = vcmp.ne.s16.totalorder %v5240_v4, 0  ;;  %v3784_v18 = vsel %vm15404_vm9, 65537, %v14900_v17  ;;  %v3785_v58 = vsel %vm15420_vm5, 65537, %v14900_v17  ;;  %vm15433_vm11 = vmpackc.low %vm5100_vm0, %vm5100_vm0  ;;  %vm3722_vm14 = vcmp.ge.f32.partialorder %v18628_v7, 2.0  ;;  %v3636_v22 = vpop.permute.xlu1 %3635 }
 0x262   : > { %v3943_v63 = vsel %vm3936_vm6, %v3940_v14, %v3942_v46  ;;  %v5937_v36 = vld [vmem:[#allocation4 + $0x28] sm:$0xff]  ;;  %v5284_v34 = vsel %vm5267_vm8, %v15372_v39, 0  ;;  %v3862_v52 = vsel %vm1183_vm10, %v3859_v30, %v3861_v8  ;;  %v5241_v50 = vrot.slane %v15415_v51, 7  ;;  %vm15448_vm7 = vmpackc.low %vm5101_vm4, %vm5101_vm4  ;;  %3680 = vst.msk [vmem:[#allocation4 + $0x78] sm:$0xff] %vm392_vm1, %v3636_v22  ;;  %v15454_v30 = vld [vmem:[#allocation2 + $0x30] sm:$0xff] }
 0x263   : > { %3988 = vst.msk [vmem:[#allocation4 + $0x50] sm:$0xff] %vm1138_vm2, %v3943_v63  ;;  %6317 = vmatmul.mubr.bf16.gmra.mrb[96].mxu0 %v5937_v36  ;;  %v5321_v14 = vrot.slane %v5284_v34, 1  ;;  %vm3889_vm15 = vcmp.ne.s16.totalorder %v3862_v52, 0  ;;  %v10117_v33 = vcombine.low %v3784_v18, %v3785_v58  ;;  %v5164_v9 = vsel %vm15433_vm11, 65537, %v14900_v17  ;;  %vm15462_vm0 = vmpackc.low %vm3722_vm14, %vm3722_vm14  ;;  %v4468_v18 = vpop.permute.xlu0 %4467  ;;  %v1954_v36 = vld [vmem:[#allocation4 + $0x1a8] sm:$0xff]  ;;  %v5946_v58 = vld [vmem:[#allocation4 + $0x80] sm:$0xff] }
 0x264   : > { %6324 = vmatprep.mubr.bf16.mxu0 %v5942_v2  ;;  %v3906_v6 = vsel %vm3889_vm15, %v15275_v0, 0  ;;  %v5242_v4 = vsel %vm3936_vm6, %v5239_v41, %v5241_v50  ;;  %v5165_v51 = vsel %vm15448_vm7, 65537, %v14900_v17  ;;  %vm3723_vm13 = vcmp.ge.f32.partialorder %v18633_v23, 2.0  ;;  %v1948_v41 = vld [vmem:[#allocation4 + $0x178] sm:$0xff]  ;;  %4510 = vst.msk [vmem:[#allocation4 + $0xd0] sm:$0xff] %vm392_vm1, %v4468_v18  ;;  %v18645_v2 = vld [vmem:[#allocation21_spill] sm:$0xff] }
 0x265   : > { %v5322_v7 = vsel %vm1183_vm10, %v5319_v28, %v5321_v14  ;;  %v3944_v21 = vrot.slane %v3906_v6, 7  ;;  %vm5268_vm3 = vcmp.ne.s16.totalorder %v5242_v4, 0  ;;  %v3863_v47 = vrot.slane %v10117_v33, 1  ;;  %vm15475_vm9 = vmpackc.low %vm3723_vm13, %vm3723_vm13  ;;  %v5876_v0 = vpop.permute.xlu1 %5875  ;;  %4542 = vst.msk [vmem:[#allocation4 + $0xd0] sm:$0xff] %vm1138_vm2, %v15454_v30 }
 0x266   : > { %5366 = vst.msk [vmem:[#allocation4 + $0x88] sm:$0xff] %vm1138_vm2, %v5322_v7  ;;  %v15481_v37 = vsel %vm5268_vm3, %v15454_v30, 0  ;;  %v15484_v43 = vcombine.low %v5164_v9, %v5165_v51  ;;  %v3786_v28 = vsel %vm15462_vm0, 65537, %v14900_v17  ;;  %v3787_v23 = vsel %vm15475_vm9, 65537, %v14900_v17  ;;  %2558 = vmatmul.mubr.bf16.gmra.mrb[92].mxu1 %v1948_v41 }
 0x267   : > { %v3945_v63 = vsel %vm3936_vm6, %v3942_v46, %v3944_v21  ;;  %5920 = vst.msk [vmem:[#allocation4 + $0x90] sm:$0xff] %vm392_vm1, %v5876_v0  ;;  %v5323_v34 = vrot.slane %v15481_v37, 1  ;;  %v3864_v52 = vsel %vm1183_vm10, %v3861_v8, %v3863_v47  ;;  %v15498_v22 = vcombine.low %v3786_v28, %v3787_v23  ;;  %2565 = vmatprep.mubr.bf16.mxu1 %v1954_v36  ;;  %v18644_v46 = vld [vmem:[#allocation20_spill] sm:$0xff]  ;;  %v5018_v10 = vpop.permute.xlu0 %5017 }
 0x268   : > { %3989 = vst.msk [vmem:[#allocation4 + $0x78] sm:$0xff] %vm1138_vm2, %v3945_v63  ;;  %vm3890_vm4 = vcmp.ne.s16.totalorder %v3864_v52, 0  ;;  %v5243_v12 = vrot.slane %v15484_v43, 7  ;;  %vm5102_vm5 = vcmp.lt.f32.partialorder %v18644_v46, 14.0  ;;  %vm5103_vm8 = vcmp.lt.f32.partialorder %v18645_v2, 14.0  ;;  %v15506_v8 = vld [vmem:[#allocation2 + $0x38] sm:$0xff] }
 0x269   : > { %v5324_v33 = vsel %vm1183_vm10, %v5321_v14, %v5323_v34  ;;  %v3907_v9 = vsel %vm3890_vm4, %v15372_v39, 0  ;;  %v3865_v6 = vrot.slane %v15498_v22, 1  ;;  %vm15509_vm11 = vmpackc.low %vm5102_vm5, %vm5102_vm5  ;;  %vm3724_vm14 = vcmp.ge.f32.partialorder %v18644_v46, 2.0  ;;  %v3638_v18 = vpop.permute.xlu1 %3637  ;;  %5060 = vst.msk [vmem:[#allocation4 + $0xd8] sm:$0xff] %vm392_vm1, %v5018_v10  ;;  %v18650_v37 = vld [vmem:[#allocation24_spill] sm:$0xff]  ;;  %v1953_v10 = vld [vmem:[#allocation4 + $0x1a0] sm:$0xff] }
 0x26a   : > { %v5941_v51 = vld [vmem:[#allocation4 + $0x50] sm:$0xff]  ;;  %5367 = vst.msk [vmem:[#allocation4 + $0xb0] sm:$0xff] %vm1138_vm2, %v5324_v33  ;;  %v3946_v7 = vrot.slane %v3907_v9, 7  ;;  %v5244_v39 = vsel %vm3936_vm6, %v5241_v50, %v5243_v12  ;;  %vm5135_vm7 = vmpackc.low %vm5103_vm8, %vm5103_vm8  ;;  %v5166_v14 = vsel %vm15509_vm11, 65537, %v14900_v17  ;;  %vm3725_vm15 = vcmp.ge.f32.partialorder %v18645_v2, 2.0 }
 0x26b   : > { %6325 = vmatmul.mubr.bf16.gmra.mrb[100].mxu0 %v5941_v51  ;;  %3681 = vst.msk [vmem:[#allocation4 + $0xa0] sm:$0xff] %vm392_vm1, %v3638_v18  ;;  %vm5269_vm0 = vcmp.ne.s16.totalorder %v5244_v39, 0  ;;  %v3866_v0 = vsel %vm1183_vm10, %v3863_v47, %v3865_v6  ;;  %v5167_v50 = vsel %vm5135_vm7, 65537, %v14900_v17  ;;  %vm15531_vm13 = vmpackc.low %vm3724_vm14, %vm3724_vm14  ;;  %vm5104_vm3 = vcmp.lt.f32.partialorder %v18650_v37, 14.0  ;;  %v4470_v46 = vpop.permute.xlu0 %4469  ;;  %v18653_v39 = vld [vmem:[#allocation25_spill] sm:$0xff] }
 0x26c   : > { %6332 = vmatprep.mubr.bf16.mxu0 %v5946_v58  ;;  %v3947_v28 = vsel %vm3936_vm6, %v3944_v21, %v3946_v7  ;;  %v15538_v23 = vsel %vm5269_vm0, %v15506_v8, 0  ;;  %vm3891_vm9 = vcmp.ne.s16.totalorder %v3866_v0, 0  ;;  %v15540_v63 = vcombine.low %v5166_v14, %v5167_v50  ;;  %vm3757_vm4 = vmpackc.low %vm3725_vm15, %vm3725_vm15  ;;  %v15547_v52 = vpop.f32.mrb[84].mxu0  ;;  %4511 = vst.msk [vmem:[#allocation4 + $0xf8] sm:$0xff] %vm392_vm1, %v4470_v46  ;;  %v1959_v14 = vld [vmem:[#allocation4 + $0x1d0] sm:$0xff]  ;;  %v15573_v50 = vld [vmem:[#allocation2 + $0x40] sm:$0xff] }
 0x26d   : > { %3990 = vst.msk [vmem:[#allocation4 + $0xa0] sm:$0xff] %vm1138_vm2, %v3947_v28  ;;  %v5325_v47 = vrot.slane %v15538_v23, 1  ;;  %v15545_v36 = vsel %vm3891_vm9, %v15454_v30, 0  ;;  %v3788_v21 = vsel %vm15531_vm13, 65537, %v14900_v17  ;;  %v3789_v2 = vsel %vm3757_vm4, 65537, %v14900_v17  ;;  %vm15553_vm5 = vmpackc.low %vm5104_vm3, %vm5104_vm3  ;;  %v5878_v9 = vpop.permute.xlu1 %5877  ;;  %v15559_v30 = vpop.f32.mrb[85].mxu0 }
 0x26e   : > { %v3948_v4 = vrot.slane %v15545_v36, 7  ;;  %v5245_v51 = vrot.slane %v15540_v63, 7  ;;  %v15562_v18 = vcombine.low %v3788_v21, %v3789_v2  ;;  %vm5105_vm8 = vcmp.lt.f32.partialorder %v18653_v39, 14.0  ;;  %5921 = vst.msk [vmem:[#allocation4 + $0xb8] sm:$0xff] %vm392_vm1, %v5878_v9  ;;  %2566 = vmatmul.mubr.bf16.gmra.mrb[96].mxu1 %v1953_v10  ;;  %v15571_v0 = vpop.f32.mrb[86].mxu0  ;;  %v15601_v10 = vld [vmem:[#allocation2] sm:$0xff] }
 0x26f   : > { %v5326_v58 = vsel %vm1183_vm10, %v5323_v34, %v5325_v47  ;;  %4543 = vst.msk [vmem:[#allocation4 + $0xf8] sm:$0xff] %vm1138_vm2, %v15506_v8  ;;  %18654 = vst [vmem:[#allocation34_spill] sm:$0xff] %v15571_v0  ;;  %v5168_v41 = vsel %vm15553_vm5, 65537, %v14900_v17  ;;  %vm3726_vm14 = vcmp.ge.f32.partialorder %v18650_v37, 2.0  ;;  %vm3727_vm7 = vcmp.ge.f32.partialorder %v18653_v39, 2.0  ;;  %v5945_v28 = vld [vmem:[#allocation4 + $0x78] sm:$0xff]  ;;  %2573 = vmatprep.mubr.bf16.mxu1 %v1959_v14  ;;  %v5020_v33 = vpop.permute.xlu0 %5019 }
 0x270   : > { %vm5137_vm11 = vmpackc.low %vm5105_vm8, %vm5105_vm8  ;;  %5368 = vst.msk [vmem:[#allocation4 + $0xd8] sm:$0xff] %vm1138_vm2, %v5326_v58  ;;  %v3949_v34 = vsel %vm3936_vm6, %v3946_v7, %v3948_v4  ;;  %v15584_v63 = vpop.f32.mrb[87].mxu0  ;;  %v5246_v46 = vsel %vm3936_vm6, %v5243_v12, %v5245_v51  ;;  %v3867_v21 = vrot.slane %v15562_v18, 1  ;;  %vm5106_vm3 = vcmp.lt.f32.partialorder %v13567_v29, 14.0  ;;  %v5950_v58 = vld [vmem:[#allocation4 + $0xa8] sm:$0xff]  ;;  %v5954_v36 = vld [vmem:[#allocation4 + $0xd0] sm:$0xff] }
 0x271   : > { %v5169_v37 = vsel %vm5137_vm11, 65537, %v14900_v17  ;;  %vm15591_vm15 = vmpackc.low %vm3726_vm14, %vm3726_vm14  ;;  %vm5270_vm0 = vcmp.ne.s16.totalorder %v5246_v46, 0  ;;  %v3640_v17 = vpop.permute.xlu1 %3639  ;;  %5061 = vst.msk [vmem:[#allocation4 + $0x100] sm:$0xff] %vm392_vm1, %v5020_v33  ;;  %vm5107_vm9 = vcmp.lt.f32.partialorder %v13581_v42, 14.0  ;;  %vm3728_vm11 = vcmp.ge.f32.partialorder %v13567_v29, 2.0 }
 0x272   : > { %v15595_v9 = vcombine.low %v5168_v41, %v5169_v37  ;;  %vm15597_vm13 = vmpackc.low %vm3727_vm7, %vm3727_vm7  ;;  %v3790_v43 = vsel %vm15591_vm15, 65537, %v15601_v10  ;;  %v15608_v12 = vsel %vm5270_vm0, %v15573_v50, 0  ;;  %v3868_v18 = vsel %vm1183_vm10, %v3865_v6, %v3867_v21  ;;  %3682 = vst.msk [vmem:[#allocation4 + $0xc8] sm:$0xff] %vm392_vm1, %v3640_v17 }
 0x273   : > { %v3791_v39 = vsel %vm15597_vm13, 65537, %v15601_v10  ;;  %vm15618_vm4 = vmpackc.low %vm5106_vm3, %vm5106_vm3  ;;  %6333 = vmatmul.mubr.bf16.gmra.mrb[104].mxu0 %v5945_v28  ;;  %v5327_v41 = vrot.slane %v15608_v12, 1  ;;  %vm3892_vm5 = vcmp.ne.s16.totalorder %v3868_v18, 0  ;;  %3991 = vst.msk [vmem:[#allocation4 + $0xc8] sm:$0xff] %vm1138_vm2, %v3949_v34  ;;  %v15635_v28 = vld [vmem:[#allocation2 + $0x48] sm:$0xff]  ;;  %vm3729_vm15 = vcmp.ge.f32.partialorder %v13581_v42, 2.0 }
 0x274   : > { %v5247_v22 = vrot.slane %v15595_v9, 7  ;;  %v15625_v6 = vcombine.low %v3790_v43, %v3791_v39  ;;  %vm15627_vm8 = vmpackc.low %vm5107_vm9, %vm5107_vm9  ;;  %6340 = vmatprep.mubr.bf16.mxu0 %v5950_v58  ;;  %v15633_v37 = vsel %vm3892_vm5, %v15506_v8, 0  ;;  %v5170_v2 = vsel %vm15618_vm4, 65537, %v15601_v10  ;;  %v4472_v8 = vpop.permute.xlu0 %4471  ;;  %v1958_v18 = vld [vmem:[#allocation4 + $0x1c8] sm:$0xff]  ;;  %v5949_v58 = vld [vmem:[#allocation4 + $0xa0] sm:$0xff] }
 0x275   : > { %v5171_v33 = vsel %vm15627_vm8, 65537, %v15601_v10  ;;  %v5328_v9 = vsel %vm1183_vm10, %v5325_v47, %v5327_v41  ;;  %v18198_v34 = vrot.slane %v15633_v37, 7  ;;  %vm15650_vm14 = vmpackc.low %vm3728_vm11, %vm3728_vm11  ;;  %v5880_v12 = vpop.permute.xlu1 %5879  ;;  %4512 = vst.msk [vmem:[#allocation4 + $0x120] sm:$0xff] %vm392_vm1, %v4472_v8  ;;  %v15662_v47 = vpop.f32.mrb[88].mxu0  ;;  %vm5108_vm13 = vcmp.lt.f32.partialorder %v13819_v54, 14.0 }
 0x276   : > { %v5248_v7 = vsel %vm3936_vm6, %v5245_v51, %v5247_v22  ;;  %v18197_v43 = vrot.slane %v15625_v6, 1  ;;  %5369 = vst.msk [vmem:[#allocation4 + $0x100] sm:$0xff] %vm1138_vm2, %v5328_v9  ;;  %v15656_v29 = vcombine.low %v5170_v2, %v5171_v33  ;;  %v3792_v23 = vsel %vm15650_vm14, 65537, %v15601_v10  ;;  %18665 = vst [vmem:[#allocation28_spill] sm:$0xff] %v15662_v47  ;;  %2574 = vmatmul.mubr.bf16.gmra.mrb[100].mxu1 %v1958_v18  ;;  %v1964_v51 = vld [vmem:[#allocation4 + $0x1f8] sm:$0xff]  ;;  %v15674_v14 = vpop.f32.mrb[89].mxu0 }
 0x277   : > { %vm5271_vm7 = vcmp.ne.s16.totalorder %v5248_v7, 0  ;;  %5922 = vst.msk [vmem:[#allocation4 + $0xe0] sm:$0xff] %vm392_vm1, %v5880_v12  ;;  %vm3761_vm0 = vmpackc.low %vm3729_vm15, %vm3729_vm15  ;;  %2581 = vmatprep.mubr.bf16.mxu1 %v1964_v51  ;;  %v15683_v8 = vpop.f32.mrb[90].mxu0  ;;  %v15685_v7 = vld [vmem:[#allocation2 + $0x50] sm:$0xff]  ;;  %vm5109_vm4 = vcmp.lt.f32.partialorder %v13826_v13, 14.0  ;;  %vm3730_vm8 = vcmp.ge.f32.partialorder %v13819_v54, 2.0 }
 0x278   : > { %4544 = vst.msk [vmem:[#allocation4 + $0x120] sm:$0xff] %vm1138_vm2, %v15573_v50  ;;  %v15668_v39 = vsel %vm5271_vm7, %v15635_v28, 0  ;;  %v3870_v42 = vsel %vm1183_vm10, %v3867_v21, %v18197_v43  ;;  %18666 = vst [vmem:[#allocation38_spill] sm:$0xff] %v15674_v14  ;;  %v5249_v2 = vrot.slane %v15656_v29, 7  ;;  %v3793_v33 = vsel %vm3761_vm0, 65537, %v15601_v10  ;;  %v5022_v21 = vpop.permute.xlu0 %5021  ;;  %v15693_v18 = vpop.f32.mrb[91].mxu0 }
 0x279   : > { %v5329_v46 = vrot.slane %v15668_v39, 1  ;;  %vm15679_vm3 = vmpackc.low %vm5108_vm13, %vm5108_vm13  ;;  %18669 = vst [vmem:[#allocation41_spill] sm:$0xff] %v15683_v8  ;;  %vm3893_vm9 = vcmp.ne.s16.totalorder %v3870_v42, 0  ;;  %v15687_v17 = vcombine.low %v3792_v23, %v3793_v33  ;;  %v3951_v29 = vsel %vm3936_vm6, %v3948_v4, %v18198_v34  ;;  %v3642_v51 = vpop.permute.xlu1 %3641  ;;  %v10436_v33 = vpop.f32.mrb[0].mxu1  ;;  %v5958_v39 = vld [vmem:[#allocation4 + $0xf8] sm:$0xff] }
 0x27a   : > { %v5172_v12 = vsel %vm15679_vm3, 65537, %v15601_v10  ;;  %18670 = vst [vmem:[#allocation19_spill] sm:$0xff] %v15693_v18  ;;  %5062 = vst.msk [vmem:[#allocation4 + $0x128] sm:$0xff] %vm392_vm1, %v5022_v21  ;;  %v5250_v43 = vsel %vm3936_vm6, %v5247_v22, %v5249_v2  ;;  %v10437_v4 = vpop.f32.mrb[1].mxu1  ;;  %vm3731_vm14 = vcmp.ge.f32.partialorder %v13826_v13, 2.0  ;;  %v15724_v54 = vsel %vm3893_vm9, %v15573_v50, 0 }
 0x27b   : > { %v5330_v23 = vsel %vm1183_vm10, %v5327_v41, %v5329_v46  ;;  %vm15705_vm5 = vmpackc.low %vm5109_vm4, %vm5109_vm4  ;;  %6341 = vmatmul.mubr.bf16.gmra.mrb[108].mxu0 %v5949_v58  ;;  %3683 = vst.msk [vmem:[#allocation4 + $0xf0] sm:$0xff] %vm392_vm1, %v3642_v51  ;;  %vm5272_vm11 = vcmp.ne.s16.totalorder %v5250_v43, 0  ;;  %v3871_v41 = vrot.slane %v15687_v17, 1  ;;  %v15726_v43 = vadd.f32 %v10437_v4, %v10436_v33  ;;  %v10439_v58 = vpop.f32.mrb[2].mxu1  ;;  %v1963_v4 = vld [vmem:[#allocation4 + $0x1f0] sm:$0xff] }
 0x27c   : > { %5370 = vst.msk [vmem:[#allocation4 + $0x128] sm:$0xff] %vm1138_vm2, %v5330_v23  ;;  %v5173_v22 = vsel %vm15705_vm5, 65537, %v15601_v10  ;;  %vm15717_vm7 = vmpackc.low %vm3730_vm8, %vm3730_vm8  ;;  %6348 = vmatprep.mubr.bf16.mxu0 %v5954_v36  ;;  %v15729_v17 = vsel %vm5272_vm11, %v15685_v7, 0  ;;  %v4474_v13 = vpop.permute.xlu0 %4473  ;;  %v10440_v23 = vpop.f32.mrb[3].mxu1  ;;  %v18675_v36 = vrot.slane %v15625_v6, 1  ;;  %v1969_v6 = vld [vmem:[#allocation4 + $0x220] sm:$0xff] }
 0x27d   : > { %3992 = vst.msk [vmem:[#allocation4 + $0xf0] sm:$0xff] %vm1138_vm2, %v3951_v29  ;;  %v15731_v51 = vcombine.low %v5172_v12, %v5173_v22  ;;  %vm3763_vm15 = vmpackc.low %vm3731_vm14, %vm3731_vm14  ;;  %v18201_v9 = vrot.slane %v15729_v17, 1  ;;  %v3794_v50 = vsel %vm15717_vm7, 65537, %v15601_v10  ;;  %v5882_v33 = vpop.permute.xlu1 %5881  ;;  %v15742_v12 = vadd.f32 %v10440_v23, %v10439_v58  ;;  %v5953_v58 = vld [vmem:[#allocation4 + $0xc8] sm:$0xff] }
 0x27e   : > { %v3872_v29 = vsel %vm1183_vm10, %v18675_v36, %v3871_v41  ;;  %v3795_v42 = vsel %vm3763_vm15, 65537, %v15601_v10  ;;  %4513 = vst.msk [vmem:[#allocation4 + $0x148] sm:$0xff] %vm392_vm1, %v4474_v13  ;;  %5923 = vst.msk [vmem:[#allocation4 + $0x108] sm:$0xff] %vm392_vm1, %v5882_v33  ;;  %2582 = vmatmul.mubr.bf16.gmra.mrb[104].mxu1 %v1963_v4  ;;  %v18202_v21 = vrot.slane %v15724_v54, 7  ;;  %v15751_v36 = vld [vmem:[#allocation2 + $0x58] sm:$0xff]  ;;  %vm5110_vm13 = vcmp.lt.f32.partialorder %v14033_v56, 14.0 }
 0x27f   : > { %vm3894_vm0 = vcmp.ne.s16.totalorder %v3872_v29, 0  ;;  %v18199_v22 = vrot.slane %v15731_v51, 7  ;;  %v15745_v34 = vcombine.low %v3794_v50, %v3795_v42  ;;  %4545 = vst.msk [vmem:[#allocation4 + $0x148] sm:$0xff] %vm1138_vm2, %v15635_v28  ;;  %vm5111_vm3 = vcmp.lt.f32.partialorder %v14061_v19, 14.0  ;;  %2589 = vmatprep.mubr.bf16.mxu1 %v1969_v6  ;;  %vm15762_vm9 = vmpackc.low %vm5110_vm13, %vm5110_vm13  ;;  %v10442_v4 = vpop.f32.mrb[4].mxu1 }
 0x280   : > { %v15756_v13 = vsel %vm3894_vm0, %v15635_v28, 0  ;;  %vm3732_vm4 = vcmp.ge.f32.partialorder %v14033_v56, 2.0  ;;  %v5024_v42 = vpop.permute.xlu0 %5023  ;;  %vm15767_vm8 = vmpackc.low %vm5111_vm3, %vm5111_vm3  ;;  %v5174_v28 = vsel %vm15762_vm9, 65537, %v15601_v10  ;;  %vm3733_vm11 = vcmp.ge.f32.partialorder %v14061_v19, 2.0 }
 0x281   : > { %v5252_v23 = vsel %vm3936_vm6, %v5249_v2, %v18199_v22  ;;  %v18200_v29 = vrot.slane %v15745_v34, 1  ;;  %vm5112_vm14 = vcmp.lt.f32.partialorder %v14287_v3, 14.0  ;;  %v3644_v2 = vpop.permute.xlu1 %3643  ;;  %v5332_v56 = vsel %vm1183_vm10, %v5329_v46, %v18201_v9  ;;  %5063 = vst.msk [vmem:[#allocation4 + $0x150] sm:$0xff] %vm392_vm1, %v5024_v42  ;;  %vm15791_vm7 = vmpackc.low %vm3732_vm4, %vm3732_vm4 }
 0x282   : > { %vm5273_vm5 = vcmp.ne.s16.totalorder %v5252_v23, 0  ;;  %v5175_v50 = vsel %vm15767_vm8, 65537, %v15601_v10  ;;  %v18682_v46 = vrot.slane %v15633_v37, 7  ;;  %3684 = vst.msk [vmem:[#allocation4 + $0x118] sm:$0xff] %vm392_vm1, %v3644_v2  ;;  %vm3765_vm15 = vmpackc.low %vm3733_vm11, %vm3733_vm11  ;;  %v18204_v37 = vrot.slane %v15756_v13, 7 }
 0x283   : > { %v15783_v6 = vsel %vm5273_vm5, %v15751_v36, 0  ;;  %v3874_v23 = vsel %vm1183_vm10, %v3871_v41, %v18200_v29  ;;  %6349 = vmatmul.mubr.bf16.gmra.mrb[112].mxu0 %v5953_v58  ;;  %5371 = vst.msk [vmem:[#allocation4 + $0x150] sm:$0xff] %vm1138_vm2, %v5332_v56  ;;  %v10443_v41 = vpop.f32.mrb[5].mxu1  ;;  %v15802_v29 = vcombine.low %v5174_v28, %v5175_v50  ;;  %v3796_v58 = vsel %vm15791_vm7, 65537, %v15601_v10  ;;  %vm15819_vm13 = vmpackc.low %vm5112_vm14, %vm5112_vm14 }
 0x284   : > { %v3953_v42 = vsel %vm3936_vm6, %v18682_v46, %v18202_v21  ;;  %6356 = vmatprep.mubr.bf16.mxu0 %v5958_v39  ;;  %v15812_v33 = vadd.f32 %v10443_v41, %v10442_v4  ;;  %v10445_v2 = vpop.f32.mrb[6].mxu1  ;;  %v3797_v56 = vsel %vm3765_vm15, 65537, %v15601_v10  ;;  %vm5113_vm0 = vcmp.lt.f32.partialorder %v14294_v20, 14.0  ;;  %v4476_v22 = vpop.permute.xlu0 %4475  ;;  %v5957_v19 = vld [vmem:[#allocation4 + $0xf0] sm:$0xff] }
 0x285   : > { %3993 = vst.msk [vmem:[#allocation4 + $0x118] sm:$0xff] %vm1138_vm2, %v3953_v42  ;;  %v10446_v28 = vpop.f32.mrb[7].mxu1  ;;  %v18203_v50 = vrot.slane %v15783_v6, 1  ;;  %vm3895_vm3 = vcmp.ne.s16.totalorder %v3874_v23, 0  ;;  %v5253_v4 = vrot.slane %v15802_v29, 7  ;;  %v15825_v39 = vcombine.low %v3796_v58, %v3797_v56  ;;  %vm5145_vm9 = vmpackc.low %vm5113_vm0, %vm5113_vm0  ;;  %v5884_v46 = vpop.permute.xlu1 %5883  ;;  %v1968_v42 = vld [vmem:[#allocation4 + $0x218] sm:$0xff] }
 0x286   : > { %4514 = vst.msk [vmem:[#allocation4 + $0x170] sm:$0xff] %vm392_vm1, %v4476_v22  ;;  %v15828_v41 = vadd.f32 %v10446_v28, %v10445_v2  ;;  %v5176_v9 = vsel %vm15819_vm13, 65537, %v15601_v10  ;;  %v5177_v21 = vsel %vm5145_vm9, 65537, %v15601_v10  ;;  %vm3734_vm4 = vcmp.ge.f32.partialorder %v14287_v3, 2.0  ;;  %5924 = vst.msk [vmem:[#allocation4 + $0x130] sm:$0xff] %vm392_vm1, %v5884_v46  ;;  %2590 = vmatmul.mubr.bf16.gmra.mrb[108].mxu1 %v1968_v42  ;;  %v5936_v29 = vld [vmem:[#allocation4 + $0x18] sm:$0xff] }
 0x287   : > { %4546 = vst.msk [vmem:[#allocation4 + $0x170] sm:$0xff] %vm1138_vm2, %v15685_v7  ;;  %v15838_v58 = vld [vmem:[#allocation2 + $0x60] sm:$0xff]  ;;  %v18685_v2 = vrot.slane %v15731_v51, 7  ;;  %v15843_v22 = vcombine.low %v5176_v9, %v5177_v21  ;;  %10221 = vmatprep.mubr.msk.bf16.mxu1 %vm392_vm1, %v5936_v29  ;;  %vm3735_vm8 = vcmp.ge.f32.partialorder %v14294_v20, 2.0  ;;  %vm15847_vm11 = vmpackc.low %vm3734_vm4, %vm3734_vm4  ;;  %vm5114_vm14 = vcmp.lt.f32.partialorder %v14421_v35, 14.0  ;;  %v18690_v46 = vld [vmem:[#allocation27_spill] sm:$0xff] }
 0x288   : > { %v5026_v28 = vpop.permute.xlu0 %5025  ;;  %v15854_v51 = vsel %vm3895_vm3, %v15685_v7, 0  ;;  %vm15857_vm7 = vmpackc.low %vm3735_vm8, %vm3735_vm8  ;;  %vm5115_vm15 = vcmp.lt.f32.partialorder %v18690_v46, 14.0  ;;  %v18691_v20 = vrot.slane %v15724_v54, 7  ;;  %v18692_v7 = vrot.slane %v15729_v17, 1  ;;  %v5962_v54 = vld [vmem:[#allocation4 + $0x120] sm:$0xff] }
 0x289   : > { %v5254_v56 = vsel %vm3936_vm6, %v18685_v2, %v5253_v4  ;;  %v3646_v29 = vpop.permute.xlu1 %3645  ;;  %5064 = vst.msk [vmem:[#allocation4 + $0x178] sm:$0xff] %vm392_vm1, %v5026_v28  ;;  %v10448_v2 = vpop.f32.mrb[8].mxu1  ;;  %vm15877_vm0 = vmpackc.low %vm5114_vm14, %vm5114_vm14  ;;  %v3798_v28 = vsel %vm15847_vm11, 65537, %v15601_v10  ;;  %vm3736_vm3 = vcmp.ge.f32.partialorder %v14421_v35, 2.0  ;;  %vm3737_vm9 = vcmp.ge.f32.partialorder %v18690_v46, 2.0 }
 0x28a   : > { %vm5274_vm5 = vcmp.ne.s16.totalorder %v5254_v56, 0  ;;  %v3955_v42 = vsel %vm3936_vm6, %v18691_v20, %v18204_v37  ;;  %v5334_v23 = vsel %vm1183_vm10, %v18692_v7, %v18203_v50  ;;  %3685 = vst.msk [vmem:[#allocation4 + $0x140] sm:$0xff] %vm392_vm1, %v3646_v29  ;;  %v10449_v17 = vpop.f32.mrb[9].mxu1  ;;  %v3799_v20 = vsel %vm15857_vm7, 65537, %v15601_v10  ;;  %vm15892_vm13 = vmpackc.low %vm5115_vm15, %vm5115_vm15 }
 0x28b   : > { %v15874_v56 = vsel %vm5274_vm5, %v15838_v58, 0  ;;  %6357 = vmatmul.mubr.bf16.gmra.mrb[116].mxu0 %v5957_v19  ;;  %5372 = vst.msk [vmem:[#allocation4 + $0x178] sm:$0xff] %vm1138_vm2, %v5334_v23  ;;  %v5178_v19 = vsel %vm15877_vm0, 65537, %v15601_v10  ;;  %3994 = vst.msk [vmem:[#allocation4 + $0x140] sm:$0xff] %vm1138_vm2, %v3955_v42  ;;  %v15902_v21 = vadd.f32 %v10449_v17, %v10448_v2  ;;  %v10451_v29 = vpop.f32.mrb[10].mxu1  ;;  %v18697_v23 = vrot.slane %v15843_v22, 7 }
 0x28c   : > { %6364 = vmatprep.mubr.bf16.mxu0 %v5962_v54  ;;  %v4478_v37 = vpop.permute.xlu0 %4477  ;;  %v10452_v9 = vpop.f32.mrb[11].mxu1  ;;  %v5179_v8 = vsel %vm15892_vm13, 65537, %v15601_v10  ;;  %v5935_v54 = vld [vmem:[#allocation4 + $0x10] sm:$0xff]  ;;  %v18698_v17 = vrot.slane %v15825_v39, 1  ;;  %v15920_v3 = vcombine.low %v3798_v28, %v3799_v20  ;;  %vm15927_vm4 = vmpackc.low %vm3736_vm3, %vm3736_vm3  ;;  %vm5116_vm11 = vcmp.lt.f32.partialorder %v14613_v57, 14.0  ;;  %v5961_v35 = vld [vmem:[#allocation4 + $0x118] sm:$0xff] }
 0x28d   : > { %v5256_v50 = vsel %vm3936_vm6, %v5253_v4, %v18697_v23  ;;  %v5886_v42 = vpop.permute.xlu1 %5885  ;;  %4515 = vst.msk [vmem:[#allocation4 + $0x198] sm:$0xff] %vm392_vm1, %v4478_v37  ;;  %v15913_v2 = vadd.f32 %v10452_v9, %v10451_v29  ;;  %v18699_v4 = vrot.slane %v15745_v34, 1  ;;  %v15922_v47 = vcombine.low %v5178_v19, %v5179_v8  ;;  %v5940_v37 = vld [vmem:[#allocation4 + $0x40] sm:$0xff]  ;;  %v15934_v34 = vld [vmem:[#allocation2 + $0x68] sm:$0xff]  ;;  %vm15936_vm8 = vmpackc.low %vm3737_vm9, %vm3737_vm9 }
 0x28e   : > { %5925 = vst.msk [vmem:[#allocation4 + $0x158] sm:$0xff] %vm392_vm1, %v5886_v42  ;;  %6470 = vmatmul.mubr.bf16.vlgmr.msra.gmra.mrb[112].mxu1 %v5935_v54  ;;  %vm5275_vm5 = vcmp.ne.s16.totalorder %v5256_v50, 0  ;;  %v18704_v28 = vrot.slane %v15854_v51, 7  ;;  %v18705_v20 = vrot.slane %v15756_v13, 7  ;;  %vm15947_vm14 = vmpackc.low %vm5116_vm11, %vm5116_vm11  ;;  %v18708_v50 = vrot.slane %v15874_v56, 1  ;;  %v5970_v18 = vld [vmem:[#allocation4 + $0x170] sm:$0xff] }
 0x28f   : > { %v3876_v23 = vsel %vm1183_vm10, %v18699_v4, %v18698_v17  ;;  %4547 = vst.msk [vmem:[#allocation4 + $0x198] sm:$0xff] %vm1138_vm2, %v15751_v36  ;;  %10222 = vmatprep.mubr.msk.bf16.mxu1 %vm392_vm1, %v5940_v37  ;;  %v18709_v29 = vrot.slane %v15783_v6, 1  ;;  %v18205_v54 = vrot.slane %v15922_v47, 7  ;;  %vm5117_vm15 = vcmp.lt.f32.partialorder %v14618_v44, 14.0 }
 0x290   : > { %v3957_v7 = vsel %vm3936_vm6, %v18705_v20, %v18704_v28  ;;  %v5028_v42 = vpop.permute.xlu0 %5027  ;;  %vm3896_vm7 = vcmp.ne.s16.totalorder %v3876_v23, 0  ;;  %v10454_v13 = vpop.f32.mrb[12].mxu1  ;;  %v15960_v4 = vsel %vm5275_vm5, %v15934_v34, 0  ;;  %vm15963_vm0 = vmpackc.low %vm5117_vm15, %vm5117_vm15  ;;  %v5180_v6 = vsel %vm15947_vm14, 65537, %v15601_v10  ;;  %v5966_v20 = vld [vmem:[#allocation4 + $0x148] sm:$0xff] }
 0x291   : > { %v5336_v8 = vsel %vm1183_vm10, %v18709_v29, %v18708_v50  ;;  %v3648_v17 = vpop.permute.xlu1 %3647  ;;  %5065 = vst.msk [vmem:[#allocation4 + $0x1a0] sm:$0xff] %vm392_vm1, %v5028_v42  ;;  %vm3738_vm13 = vcmp.ge.f32.partialorder %v14613_v57, 2.0  ;;  %v10455_v50 = vpop.f32.mrb[13].mxu1  ;;  %v3800_v29 = vsel %vm15927_vm4, 65537, %v15601_v10  ;;  %v3801_v42 = vsel %vm15936_vm8, 65537, %v15601_v10 }
 0x292   : > { %3686 = vst.msk [vmem:[#allocation4 + $0x168] sm:$0xff] %vm392_vm1, %v3648_v17  ;;  %v5181_v19 = vsel %vm15963_vm0, 65537, %v15601_v10  ;;  %vm5118_vm3 = vcmp.lt.f32.partialorder %v14788_v40, 14.0  ;;  %v10457_v46 = vpop.f32.mrb[14].mxu1  ;;  %vm5119_vm9 = vcmp.lt.f32.partialorder %v14807_v48, 14.0  ;;  %v18712_v28 = vrot.slane %v15843_v22, 7  ;;  %vm16002_vm5 = vmpackc.low %vm3738_vm13, %vm3738_vm13 }
 0x293   : > { %6365 = vmatmul.mubr.bf16.gmra.mrb[120].mxu0 %v5961_v35  ;;  %5373 = vst.msk [vmem:[#allocation4 + $0x1a0] sm:$0xff] %vm1138_vm2, %v5336_v8  ;;  %3995 = vst.msk [vmem:[#allocation4 + $0x168] sm:$0xff] %vm1138_vm2, %v3957_v7  ;;  %v15986_v35 = vsel %vm3896_vm7, %v15751_v36, 0  ;;  %v15988_v8 = vadd.f32 %v10455_v50, %v10454_v13  ;;  %v10458_v17 = vpop.f32.mrb[15].mxu1  ;;  %vm3739_vm4 = vcmp.ge.f32.partialorder %v14618_v44, 2.0  ;;  %v5939_v7 = vld [vmem:[#allocation4 + $0x38] sm:$0xff]  ;;  %v16015_v57 = vcombine.low %v3800_v29, %v3801_v42 }
 0x294   : > { %6372 = vmatprep.mubr.bf16.mxu0 %v5966_v20  ;;  %v4480_v9 = vpop.permute.xlu0 %4479  ;;  %v5258_v37 = vsel %vm3936_vm6, %v18712_v28, %v18205_v54  ;;  %v15996_v20 = vcombine.low %v5180_v6, %v5181_v19  ;;  %v16007_v13 = vadd.f32 %v10458_v17, %v10457_v46  ;;  %v18206_v22 = vrot.slane %v15960_v4, 1  ;;  %vm16020_vm8 = vmpackc.low %vm5118_vm3, %vm5118_vm3  ;;  %v5944_v46 = vld [vmem:[#allocation4 + $0x68] sm:$0xff]  ;;  %v5965_v29 = vld [vmem:[#allocation4 + $0x140] sm:$0xff] }
 0x295   : > { %v5888_v23 = vpop.permute.xlu1 %5887  ;;  %4516 = vst.msk [vmem:[#allocation4 + $0x1c0] sm:$0xff] %vm392_vm1, %v4480_v9  ;;  %v18715_v6 = vrot.slane %v15920_v3, 1  ;;  %v18716_v50 = vrot.slane %v15825_v39, 1  ;;  %vm16031_vm11 = vmpackc.low %vm5119_vm9, %vm5119_vm9  ;;  %v16036_v42 = vld [vmem:[#allocation2 + $0x70] sm:$0xff]  ;;  %vm5276_vm14 = vcmp.ne.s16.totalorder %v5258_v37, 0  ;;  %v3879_v44 = vrot.slane %v16015_v57, 1 }
 0x296   : > { %5926 = vst.msk [vmem:[#allocation4 + $0x180] sm:$0xff] %vm392_vm1, %v5888_v23  ;;  %6478 = vmatmul.mubr.bf16.gmra.mrb[116].mxu1 %v5939_v7  ;;  %vm16041_vm7 = vmpackc.low %vm3739_vm4, %vm3739_vm4  ;;  %v5182_v9 = vsel %vm16020_vm8, 65537, %v15601_v10  ;;  %v5183_v7 = vsel %vm16031_vm11, 65537, %v15601_v10  ;;  %v18724_v14 = vrot.slane %v15986_v35, 7  ;;  %v16068_v28 = vsel %vm5276_vm14, %v16036_v42, 0 }
 0x297   : > { %v3878_v19 = vsel %vm1183_vm10, %v18716_v50, %v18715_v6  ;;  %4548 = vst.msk [vmem:[#allocation4 + $0x1c0] sm:$0xff] %vm1138_vm2, %v15838_v58  ;;  %10223 = vmatprep.mubr.msk.bf16.mxu1 %vm392_vm1, %v5944_v46  ;;  %v18723_v50 = vrot.slane %v15874_v56, 1  ;;  %v18725_v56 = vrot.slane %v15854_v51, 7  ;;  %v3802_v39 = vsel %vm16002_vm5, 65537, %v15601_v10 }
 0x298   : > { %v5030_v23 = vpop.permute.xlu0 %5029  ;;  %vm3897_vm15 = vcmp.ne.s16.totalorder %v3878_v19, 0  ;;  %v10460_v54 = vpop.f32.mrb[16].mxu1  ;;  %vm3740_vm0 = vcmp.ge.f32.partialorder %v14788_v40, 2.0  ;;  %v18726_v36 = vrot.slane %v15996_v20, 7  ;;  %vm3741_vm13 = vcmp.ge.f32.partialorder %v14807_v48, 2.0  ;;  %v5974_v48 = vld [vmem:[#allocation4 + $0x198] sm:$0xff] }
 0x299   : > { %v3650_v6 = vpop.permute.xlu1 %3649  ;;  %v5338_v46 = vsel %vm1183_vm10, %v18723_v50, %v18206_v22  ;;  %5066 = vst.msk [vmem:[#allocation4 + $0x1c8] sm:$0xff] %vm392_vm1, %v5030_v23  ;;  %v3959_v50 = vsel %vm3936_vm6, %v18725_v56, %v18724_v14  ;;  %v10461_v23 = vpop.f32.mrb[17].mxu1  ;;  %v16079_v14 = vsel %vm3897_vm15, %v15838_v58, 0  ;;  %v18727_v56 = vrot.slane %v15922_v47, 7  ;;  %v5943_v58 = vld [vmem:[#allocation4 + $0x60] sm:$0xff]  ;;  %vm16110_vm3 = vmpackc.low %vm3740_vm0, %vm3740_vm0 }
 0x29a   : > { %3687 = vst.msk [vmem:[#allocation4 + $0x190] sm:$0xff] %vm392_vm1, %v3650_v6  ;;  %v16081_v51 = vadd.f32 %v10461_v23, %v10460_v54  ;;  %v10463_v37 = vpop.f32.mrb[18].mxu1  ;;  %v18728_v23 = vrot.slane %v15920_v3, 1  ;;  %v5969_v3 = vld [vmem:[#allocation4 + $0x168] sm:$0xff]  ;;  %vm16120_vm4 = vmpackc.low %vm3741_vm13, %vm3741_vm13 }
 0x29b   : > { %6373 = vmatmul.mubr.bf16.gmra.mrb[124].mxu0 %v5965_v29  ;;  %5374 = vst.msk [vmem:[#allocation4 + $0x1c8] sm:$0xff] %vm1138_vm2, %v5338_v46  ;;  %v3803_v29 = vsel %vm16041_vm7, 65537, %v15601_v10  ;;  %3996 = vst.msk [vmem:[#allocation4 + $0x190] sm:$0xff] %vm1138_vm2, %v3959_v50  ;;  %v10464_v46 = vpop.f32.mrb[19].mxu1  ;;  %v5260_v17 = vsel %vm3936_vm6, %v18727_v56, %v18726_v36  ;;  %v5339_v50 = vrot.slane %v16068_v28, 1  ;;  %v18735_v28 = vrot.slane %v15996_v20, 7 }
 0x29c   : > { %6380 = vmatprep.mubr.bf16.mxu0 %v5970_v18  ;;  %v4482_v6 = vpop.permute.xlu0 %4481  ;;  %v16089_v18 = vcombine.low %v5182_v9, %v5183_v7  ;;  %v16093_v54 = vadd.f32 %v10464_v46, %v10463_v37  ;;  %v3880_v47 = vsel %vm1183_vm10, %v18728_v23, %v3879_v44  ;;  %v16101_v22 = vcombine.low %v3802_v39, %v3803_v29  ;;  %v5948_v9 = vld [vmem:[#allocation4 + $0x90] sm:$0xff]  ;;  %v16115_v39 = vld [vmem:[#allocation2 + $0x78] sm:$0xff] }
 0x29d   : > { %v5890_v19 = vpop.permute.xlu1 %5889  ;;  %4517 = vst.msk [vmem:[#allocation4 + $0x1e8] sm:$0xff] %vm392_vm1, %v4482_v6  ;;  %v3960_v7 = vrot.slane %v16079_v14, 7  ;;  %vm5277_vm9 = vcmp.ne.s16.totalorder %v5260_v17, 0  ;;  %vm3898_vm5 = vcmp.ne.s16.totalorder %v3880_v47, 0  ;;  %v18733_v6 = vrot.slane %v15960_v4, 1  ;;  %v5952_v20 = vld [vmem:[#allocation4 + $0xb8] sm:$0xff] }
 0x29e   : > { %5927 = vst.msk [vmem:[#allocation4 + $0x1a8] sm:$0xff] %vm392_vm1, %v5890_v19  ;;  %6486 = vmatmul.mubr.bf16.gmra.mrb[120].mxu1 %v5943_v58  ;;  %v5261_v40 = vrot.slane %v16089_v18, 7  ;;  %v3881_v56 = vrot.slane %v16101_v22, 1  ;;  %v18734_v19 = vrot.slane %v15986_v35, 7  ;;  %v16137_v4 = vsel %vm5277_vm9, %v16115_v39, 0 }
 0x29f   : > { %4549 = vst.msk [vmem:[#allocation4 + $0x1e8] sm:$0xff] %vm1138_vm2, %v15934_v34  ;;  %10224 = vmatprep.mubr.msk.bf16.mxu1 %vm392_vm1, %v5948_v9  ;;  %v5340_v46 = vsel %vm1183_vm10, %v18733_v6, %v5339_v50  ;;  %v3804_v9 = vsel %vm16110_vm3, 65537, %v15601_v10  ;;  %v3805_v22 = vsel %vm16120_vm4, 65537, %v15601_v10  ;;  %v16148_v35 = vsel %vm3898_vm5, %v15934_v34, 0  ;;  %v5947_v10 = vld [vmem:[#allocation4 + $0x88] sm:$0xff] }
 0x2a0   : > { %v5032_v14 = vpop.permute.xlu0 %5031  ;;  %v10466_v36 = vpop.f32.mrb[20].mxu1  ;;  %v3961_v58 = vsel %vm3936_vm6, %v18734_v19, %v3960_v7  ;;  %v5262_v6 = vsel %vm3936_vm6, %v18735_v28, %v5261_v40  ;;  %v5341_v34 = vrot.slane %v16137_v4, 1  ;;  %v3882_v47 = vsel %vm1183_vm10, %v3879_v44, %v3881_v56 }
 0x2a1   : > { %v3652_v37 = vpop.permute.xlu1 %3651  ;;  %5067 = vst.msk [vmem:[#allocation4 + $0x1f0] sm:$0xff] %vm392_vm1, %v5032_v14  ;;  %v10467_v23 = vpop.f32.mrb[21].mxu1  ;;  %vm5278_vm8 = vcmp.ne.s16.totalorder %v5262_v6, 0  ;;  %vm3899_vm11 = vcmp.ne.s16.totalorder %v3882_v47, 0  ;;  %vm16217_vm7 = vcmp.ne.s16.totalorder %v5261_v40, 0  ;;  %v7059_v40 = vld [vmem:[#allocation3 + $0x98] sm:$0xff] }
 0x2a2   : > { %3688 = vst.msk [vmem:[#allocation4 + $0x1b8] sm:$0xff] %vm392_vm1, %v3652_v37  ;;  %v10469_v17 = vpop.f32.mrb[22].mxu1  ;;  %v5973_v19 = vld [vmem:[#allocation4 + $0x190] sm:$0xff] }
 0x2a3   : > { %6381 = vmatmul.mubr.bf16.gmra.mrb[128].mxu0 %v5969_v3  ;;  %5375 = vst.msk [vmem:[#allocation4 + $0x1f0] sm:$0xff] %vm1138_vm2, %v5340_v46  ;;  %3997 = vst.msk [vmem:[#allocation4 + $0x1b8] sm:$0xff] %vm1138_vm2, %v3961_v58  ;;  %v16150_v3 = vadd.f32 %v10467_v23, %v10466_v36  ;;  %v10470_v37 = vpop.f32.mrb[23].mxu1  ;;  %v16164_v36 = vcombine.low %v3804_v9, %v3805_v22  ;;  %v16171_v58 = vld [vmem:[#allocation2 + $0x80] sm:$0xff]  ;;  %v5342_v23 = vsel %vm1183_vm10, %v5339_v50, %v5341_v34 }
 0x2a4   : > { %6388 = vmatprep.mubr.bf16.mxu0 %v5974_v48  ;;  %v4484_v14 = vpop.permute.xlu0 %4483  ;;  %v16158_v46 = vadd.f32 %v10470_v37, %v10469_v17  ;;  %v3962_v48 = vrot.slane %v16148_v35, 7  ;;  %v5978_v22 = vld [vmem:[#allocation4 + $0x1c0] sm:$0xff]  ;;  %v3916_v50 = vsel %vm3899_vm11, %v16036_v42, 0 }
 0x2a5   : > { %v5892_v29 = vpop.permute.xlu1 %5891  ;;  %4518 = vst.msk [vmem:[#allocation4 + $0x210] sm:$0xff] %vm392_vm1, %v4484_v14  ;;  %v3883_v9 = vrot.slane %v16164_v36, 1  ;;  %v16180_v14 = vsel %vm5278_vm8, %v16171_v58, 0 }
 0x2a6   : > { %5928 = vst.msk [vmem:[#allocation4 + $0x1d0] sm:$0xff] %vm392_vm1, %v5892_v29  ;;  %6494 = vmatmul.mubr.bf16.gmra.mrb[124].mxu1 %v5947_v10  ;;  %v3963_v35 = vsel %vm3936_vm6, %v3960_v7, %v3962_v48  ;;  %v5951_v7 = vld [vmem:[#allocation4 + $0xb0] sm:$0xff] }
 0x2a7   : > { %4550 = vst.msk [vmem:[#allocation4 + $0x210] sm:$0xff] %vm1138_vm2, %v16036_v42  ;;  %10225 = vmatprep.mubr.msk.bf16.mxu1 %vm392_vm1, %v5952_v20  ;;  %v5343_v20 = vrot.slane %v16180_v14, 1  ;;  %v5956_v42 = vld [vmem:[#allocation4 + $0xe0] sm:$0xff]  ;;  %vm3901_vm15 = vcmp.ne.s16.totalorder %v3883_v9, 0  ;;  %v5968_v14 = vld [vmem:[#allocation4 + $0x158] sm:$0xff] }
 0x2a8   : > { %v5034_v57 = vpop.permute.xlu0 %5033  ;;  %v10472_v4 = vpop.f32.mrb[24].mxu1 }
 0x2a9   : > { %v3654_v44 = vpop.permute.xlu1 %3653  ;;  %5068 = vst.msk [vmem:[#allocation4 + $0x218] sm:$0xff] %vm392_vm1, %v5034_v57  ;;  %v10473_v17 = vpop.f32.mrb[25].mxu1  ;;  %v3964_v57 = vrot.slane %v3916_v50, 7 }
 0x2aa   : > { %3689 = vst.msk [vmem:[#allocation4 + $0x1e0] sm:$0xff] %vm392_vm1, %v3654_v44  ;;  %v16184_v37 = vadd.f32 %v10473_v17, %v10472_v4  ;;  %v10475_v28 = vpop.f32.mrb[26].mxu1  ;;  %v5977_v44 = vld [vmem:[#allocation4 + $0x1b8] sm:$0xff]  ;;  %v5983_v0 = vld [vmem:[#allocation4 + $0x1f0] sm:$0xff] }
 0x2ab   : > { %6389 = vmatmul.mubr.bf16.gmra.mrb[132].mxu0 %v5973_v19  ;;  %5376 = vst.msk [vmem:[#allocation4 + $0x218] sm:$0xff] %vm1138_vm2, %v5342_v23  ;;  %3998 = vst.msk [vmem:[#allocation4 + $0x1e0] sm:$0xff] %vm1138_vm2, %v3963_v35  ;;  %v10476_v29 = vpop.f32.mrb[27].mxu1  ;;  %v3884_v19 = vsel %vm1183_vm10, %v3881_v56, %v3883_v9  ;;  %v5982_v35 = vld [vmem:[#allocation4 + $0x1e8] sm:$0xff]  ;;  %v3965_v17 = vsel %vm3936_vm6, %v3962_v48, %v3964_v57 }
 0x2ac   : > { %6396 = vmatprep.mubr.bf16.mxu0 %v5978_v22  ;;  %v4486_v6 = vpop.permute.xlu0 %4485  ;;  %v16187_v47 = vadd.f32 %v10476_v29, %v10475_v28  ;;  %vm3900_vm14 = vcmp.ne.s16.totalorder %v3884_v19, 0  ;;  %v5344_v22 = vsel %vm1183_vm10, %v5341_v34, %v5343_v20  ;;  %v5960_v48 = vld [vmem:[#allocation4 + $0x108] sm:$0xff] }
 0x2ad   : > { %v5894_v10 = vpop.permute.xlu1 %5893  ;;  %4519 = vst.msk [vmem:[#allocation4 + $0x238] sm:$0xff] %vm392_vm1, %v4486_v6  ;;  %v16206_v28 = vsel %vm3900_vm14, %v16115_v39, 0 }
 0x2ae   : > { %5929 = vst.msk [vmem:[#allocation4 + $0x1f8] sm:$0xff] %vm392_vm1, %v5894_v10  ;;  %6502 = vmatmul.mubr.bf16.gmra.mrb[128].mxu1 %v5951_v7  ;;  %v5955_v7 = vld [vmem:[#allocation4 + $0xd8] sm:$0xff] }
 0x2af   : > { %4551 = vst.msk [vmem:[#allocation4 + $0x238] sm:$0xff] %vm1138_vm2, %v16115_v39  ;;  %10226 = vmatprep.mubr.msk.bf16.mxu1 %vm392_vm1, %v5956_v42  ;;  %v3966_v42 = vrot.slane %v16206_v28, 7  ;;  %v5087_v39 = vld [vmem:[#allocation2 + $0x88] sm:$0x1] }
 0x2b0   : > { %v5036_v23 = vpop.permute.xlu0 %5035  ;;  %v10478_v56 = vpop.f32.mrb[28].mxu1 }
 0x2b1   : > { %v3656_v4 = vpop.permute.xlu1 %3655  ;;  %5069 = vst.msk [vmem:[#allocation4 + $0x240] sm:$0xff] %vm392_vm1, %v5036_v23  ;;  %v10479_v50 = vpop.f32.mrb[29].mxu1 }
 0x2b2   : > { %3690 = vst.msk [vmem:[#allocation4 + $0x208] sm:$0xff] %vm392_vm1, %v3656_v4  ;;  %v16208_v6 = vadd.f32 %v10479_v50, %v10478_v56  ;;  %v10481_v34 = vpop.f32.mrb[30].mxu1  ;;  %v5986_v56 = vld [vmem:[#allocation4 + $0x210] sm:$0xff] }
 0x2b3   : > { %6397 = vmatmul.mubr.bf16.gmra.mrb[136].mxu0 %v5977_v44  ;;  %5377 = vst.msk [vmem:[#allocation4 + $0x240] sm:$0xff] %vm1138_vm2, %v5344_v22  ;;  %3999 = vst.msk [vmem:[#allocation4 + $0x208] sm:$0xff] %vm1138_vm2, %v3965_v17  ;;  %v10482_v29 = vpop.f32.mrb[31].mxu1  ;;  %v5981_v44 = vld [vmem:[#allocation4 + $0x1e0] sm:$0xff] }
 0x2b4   : > { %6404 = vmatprep.mubr.bf16.mxu0 %v5982_v35  ;;  %v16210_v19 = vadd.f32 %v10482_v29, %v10481_v34  ;;  %v3967_v35 = vsel %vm3936_vm6, %v3964_v57, %v3966_v42  ;;  %v5296_v34 = vsel %vm16217_vm7, %v5087_v39, 0 }
 0x2b5   : > { %v5896_v10 = vpop.permute.xlu1 %5895 }
 0x2b6   : > { %5930 = vst.msk [vmem:[#allocation4 + $0x220] sm:$0xff] %vm392_vm1, %v5896_v10  ;;  %6510 = vmatmul.mubr.bf16.gmra.mrb[132].mxu1 %v5955_v7  ;;  %v5959_v10 = vld [vmem:[#allocation4 + $0x100] sm:$0xff]  ;;  %v5990_v4 = vld [vmem:[#allocation4 + $0x238] sm:$0xff] }
 0x2b7   : > { %10227 = vmatprep.mubr.msk.bf16.mxu1 %vm392_vm1, %v5960_v48 }
 0x2b8   : > { %v10484_v22 = vpop.f32.mrb[32].mxu1 }
 0x2b9   : > { %v3658_v23 = vpop.permute.xlu1 %3657  ;;  %v10485_v17 = vpop.f32.mrb[33].mxu1 }
 0x2ba   : > { %3691 = vst.msk [vmem:[#allocation4 + $0x230] sm:$0xff] %vm392_vm1, %v3658_v23  ;;  %v16226_v50 = vadd.f32 %v10485_v17, %v10484_v22  ;;  %v10487_v18 = vpop.f32.mrb[34].mxu1  ;;  %v5985_v23 = vld [vmem:[#allocation4 + $0x208] sm:$0xff]  ;;  %v5345_v22 = vrot.slane %v5296_v34, 1 }
 0x2bb   : > { %6405 = vmatmul.mubr.bf16.gmra.mrb[140].mxu0 %v5981_v44  ;;  %4000 = vst.msk [vmem:[#allocation4 + $0x230] sm:$0xff] %vm1138_vm2, %v3967_v35  ;;  %v10488_v29 = vpop.f32.mrb[35].mxu1  ;;  %v5964_v44 = vld [vmem:[#allocation4 + $0x130] sm:$0xff] }
 0x2bc   : > { %6412 = vmatprep.mubr.bf16.mxu0 %v5986_v56  ;;  %v16230_v7 = vadd.f32 %v10488_v29, %v10487_v18  ;;  %v5346_v17 = vsel %vm1183_vm10, %v5343_v20, %v5345_v22  ;;  %v3709_v18 = vld [vmem:[#allocation2 + $0x80] sm:$0x7f]  ;;  %v5963_v29 = vld [vmem:[#allocation4 + $0x128] sm:$0xff] }
 0x2bd   : > { %v16232_v48 = vld [vmem:[#allocation4 + $0x220] sm:$0xff] }
 0x2be   : > { %6518 = vmatmul.mubr.bf16.gmra.mrb[136].mxu1 %v5959_v10  ;;  %7075 = vst.msk [vmem:[#allocation4 + $0x220] sm:$0xff] %vm392_vm1, %v7059_v40 }
 0x2bf   : > { %v4488_v57 = vpop.permute.xlu0 %4487  ;;  %10228 = vmatprep.mubr.msk.bf16.mxu1 %vm392_vm1, %v5964_v44 }
 0x2c0   : > { %4520 = vst.msk [vmem:[#allocation4 + $0x260] sm:$0xff] %vm392_vm1, %v4488_v57  ;;  %v10490_v39 = vpop.f32.mrb[36].mxu1  ;;  %v3918_v57 = vsel %vm3901_vm15, %v3709_v18, 0  ;;  %v5967_v18 = vld [vmem:[#allocation4 + $0x150] sm:$0xff] }
 0x2c1   : > { %4552 = vst.msk [vmem:[#allocation4 + $0x260] sm:$0xff] %vm1138_vm2, %v16171_v58  ;;  %v10491_v35 = vpop.f32.mrb[37].mxu1  ;;  %v3968_v36 = vrot.slane %v3918_v57, 7 }
 0x2c2   : > { %v16245_v40 = vadd.f32 %v10491_v35, %v10490_v39  ;;  %v10493_v34 = vpop.f32.mrb[38].mxu1  ;;  %v5989_v44 = vld [vmem:[#allocation4 + $0x230] sm:$0xff] }
 0x2c3   : > { %6413 = vmatmul.mubr.bf16.gmra.mrb[144].mxu0 %v5985_v23  ;;  %v5038_v56 = vpop.permute.xlu0 %5037  ;;  %v10494_v58 = vpop.f32.mrb[39].mxu1 }
 0x2c4   : > { %6420 = vmatprep.mubr.bf16.mxu0 %v5990_v4  ;;  %5070 = vst.msk [vmem:[#allocation4 + $0x268] sm:$0xff] %vm392_vm1, %v5038_v56  ;;  %v16248_v10 = vadd.f32 %v10494_v58, %v10493_v34  ;;  %v5972_v58 = vld [vmem:[#allocation4 + $0x180] sm:$0xff] }
 0x2c5   : > { %5378 = vst.msk [vmem:[#allocation4 + $0x268] sm:$0xff] %vm1138_vm2, %v5346_v17  ;;  %v3969_v17 = vsel %vm3936_vm6, %v3966_v42, %v3968_v36  ;;  %vm2883_vm6 = vcmask 781312  }
 0x2c6   : > { %6526 = vmatmul.mubr.bf16.gmra.mrb[140].mxu1 %v5963_v29  ;;  %v7060_v29 = vld [vmem:[#allocation3 + $0xa0] sm:$0xff] }
 0x2c7   : > { %10229 = vmatprep.mubr.msk.bf16.mxu1 %vm392_vm1, %v5968_v14 }
 0x2c8   : > { %v10496_v9 = vpop.f32.mrb[40].mxu1  ;;  %v5994_v23 = vld [vmem:[#allocation4 + $0x260] sm:$0xff] }
 0x2c9   : > { %v5898_v20 = vpop.permute.xlu1 %5897  ;;  %v10497_v22 = vpop.f32.mrb[41].mxu1 }
 0x2ca   : > { %5931 = vst.msk [vmem:[#allocation4 + $0x248] sm:$0xff] %vm392_vm1, %v5898_v20  ;;  %v16252_v39 = vadd.f32 %v10497_v22, %v10496_v9  ;;  %v10499_v4 = vpop.f32.mrb[42].mxu1 }
 0x2cb   : > { %6421 = vmatmul.mubr.bf16.gmra.mrb[148].mxu0 %v5989_v44  ;;  %v10500_v35 = vpop.f32.mrb[43].mxu1 }
 0x2cc   : > { %6428 = vmatprep.mubr.bf16.mxu0 %v5994_v23  ;;  %v16258_v34 = vadd.f32 %v10500_v35, %v10499_v4  ;;  %v5971_v23 = vld [vmem:[#allocation4 + $0x178] sm:$0xff]  ;;  %v5976_v4 = vld [vmem:[#allocation4 + $0x1a8] sm:$0xff] }
 0x2cd   : > { %v3660_v56 = vpop.permute.xlu1 %3659 }
 0x2ce   : > { %3692 = vst.msk [vmem:[#allocation4 + $0x258] sm:$0xff] %vm392_vm1, %v3660_v56  ;;  %6534 = vmatmul.mubr.bf16.gmra.mrb[144].mxu1 %v5967_v18  ;;  %v7061_v56 = vld [vmem:[#allocation3 + $0xa8] sm:$0xff] }
 0x2cf   : > { %4001 = vst.msk [vmem:[#allocation4 + $0x258] sm:$0xff] %vm1138_vm2, %v3969_v17  ;;  %10230 = vmatprep.mubr.msk.bf16.mxu1 %vm392_vm1, %v5972_v58 }
 0x2d0   : > { %v10502_v44 = vpop.f32.mrb[44].mxu1 }
 0x2d1   : > { %v5900_v57 = vpop.permute.xlu1 %5899  ;;  %v5992_v14 = vld [vmem:[#allocation4 + $0x248] sm:$0xff]  ;;  %v10503_v28 = vpop.f32.mrb[45].mxu1 }
 0x2d2   : > { %5932 = vst.msk [vmem:[#allocation4 + $0x270] sm:$0xff] %vm392_vm1, %v5900_v57  ;;  %7076 = vst.msk [vmem:[#allocation4 + $0x248] sm:$0xff] %vm392_vm1, %v7060_v29  ;;  %v16264_v42 = vadd.f32 %v10503_v28, %v10502_v44  ;;  %v10505_v20 = vpop.f32.mrb[46].mxu1  ;;  %v5975_v44 = vld [vmem:[#allocation4 + $0x1a0] sm:$0xff] }
 0x2d3   : > { %v10506_v36 = vpop.f32.mrb[47].mxu1 }
 0x2d4   : > { %v16266_v22 = vadd.f32 %v10506_v36, %v10505_v20  ;;  %v5980_v20 = vld [vmem:[#allocation4 + $0x1d0] sm:$0xff]  ;;  %v5979_v36 = vld [vmem:[#allocation4 + $0x1c8] sm:$0xff] }
 0x2d6   : > { %v5993_v9 = vld [vmem:[#allocation4 + $0x258] sm:$0xff]  ;;  %6542 = vmatmul.mubr.bf16.gmra.mrb[148].mxu1 %v5971_v23 }
 0x2d7   : > { %6429 = vmatmul.mubr.bf16.gmra.mrb[152].mxu0 %v5993_v9  ;;  %10231 = vmatprep.mubr.msk.bf16.mxu1 %vm392_vm1, %v5976_v4  ;;  %v5984_v9 = vld [vmem:[#allocation4 + $0x1f8] sm:$0xff] }
 0x2d8   : > { %v10508_v17 = vpop.f32.mrb[48].mxu1 }
 0x2d9   : > { %v5996_v35 = vld [vmem:[#allocation4 + $0x270] sm:$0xff]  ;;  %v10509_v18 = vpop.f32.mrb[49].mxu1 }
 0x2da   : > { %7077 = vst.msk [vmem:[#allocation4 + $0x270] sm:$0xff] %vm392_vm1, %v7061_v56  ;;  %v16270_v58 = vadd.f32 %v10509_v18, %v10508_v17  ;;  %v10511_v29 = vpop.f32.mrb[50].mxu1 }
 0x2db   : > { %v10512_v57 = vpop.f32.mrb[51].mxu1 }
 0x2dc   : > { %18738 = vst [vmem:[#allocation57_spill] sm:$0xff] %v16270_v58  ;;  %v16272_v28 = vadd.f32 %v10512_v57, %v10511_v29  ;;  %v16285_v29 = vld [vmem:[%s18117_s4] ss:$0 sm:$0xff] }
 0x2de   : > { %6550 = vmatmul.mubr.bf16.gmra.mrb[152].mxu1 %v5975_v44 }
 0x2df   : > { %10232 = vmatprep.mubr.msk.bf16.mxu1 %vm392_vm1, %v5980_v20  ;;  %v2343_v20 = vadd.f32 %v15726_v43, %v16285_v29 }
 0x2e6   : > { %6558 = vmatmul.mubr.bf16.gmra.mrb[156].mxu1 %v5979_v36 }
 0x2e7   : > { %10233 = vmatprep.mubr.msk.bf16.mxu1 %vm392_vm1, %v5984_v9 }
 0x2e9   : > { %v10514_v23 = vpop.f32.mrb[52].mxu1 }
 0x2ea   : > { %v10515_v4 = vpop.f32.mrb[53].mxu1 }
 0x2eb   : > { %v16276_v56 = vadd.f32 %v10515_v4, %v10514_v23  ;;  %v10517_v17 = vpop.f32.mrb[54].mxu1 }
 0x2ec   : > { %v10518_v18 = vpop.f32.mrb[55].mxu1 }
 0x2ed   : > { %18739 = vst [vmem:[#allocation29_spill] sm:$0xff] %v16276_v56  ;;  %v16278_v58 = vadd.f32 %v10518_v18, %v10517_v17  ;;  %v5987_v18 = vld [vmem:[#allocation4 + $0x218] sm:$0xff] }
 0x2ee   : > { %6566 = vmatmul.mubr.bf16.gmra.mrb[160].mxu1 %v5983_v0  ;;  %v2346_v0 = vadd.f32 %v15742_v12, %v16285_v29 }
 0x2ef   : > { %18740 = vst [vmem:[#allocation62_spill] sm:$0xff] %v16278_v58  ;;  %10234 = vmatprep.mubr.msk.bf16.mxu1 %vm392_vm1, %v16232_v48 }
 0x2f1   : > { %v10536_v57 = vpop.f32.mrb[56].mxu1 }
 0x2f2   : > { %v10537_v44 = vpop.f32.mrb[57].mxu1 }
 0x2f3   : > { %v10538_v36 = vadd.f32 %v10537_v44, %v10536_v57  ;;  %v10539_v9 = vpop.f32.mrb[58].mxu1  ;;  %v6694_v44 = vld [vmem:[#allocation3 + $0x8] sm:$0xff] }
 0x2f4   : > { %v10540_v23 = vpop.f32.mrb[59].mxu1  ;;  %6726 = vrot.lane.b32.xlu1 %v6694_v44, %s11376_s15  ;;  %6679 = vst.msk [vmem:[#allocation4 + $0x28] sm:$0xff] %vm392_vm1, %v6694_v44 }
 0x2f5   : > { %v2488_v4 = vadd.f32 %v10538_v36, %v2343_v20  ;;  %v10541_v17 = vadd.f32 %v10540_v23, %v10539_v9  ;;  %v2351_v20 = vadd.f32 %v15812_v33, %v16285_v29  ;;  %v11294_v33 = vld [vmem:[%s18120_s7 + $0x40] sm:$0xff]  }
 0x2f6   : > { %6574 = vmatmul.mubr.bf16.gmra.mrb[164].mxu1 %v5987_v18  ;;  %10750 = vmatprep.subr.bf16.mxu0 %v11294_v33 }
 0x2f7   : > { %v16292_v48 = vadd.f32 %v14742_v1, %v2488_v4  ;;  %v2491_v58 = vadd.f32 %v10541_v17, %v2346_v0  ;;  %10235 = vmatprep.mubr.msk.bf16.mxu1 %vm392_vm1, %v5992_v14  ;;  %v2354_v14 = vadd.f32 %v15828_v41, %v16285_v29  ;;  %v11295_v41 = vld [vmem:[%s18120_s7] sm:$0xff]  }
 0x2f8   : > { %10751 = vmatpush3.bf16.msra.mxu0 %v11295_v41 }
 0x2f9   : > { %v16296_v56 = vadd.f32 %v14754_v16, %v2491_v58  ;;  %v10542_v43 = vpop.f32.mrb[60].mxu1  ;;  %v5991_v16 = vld [vmem:[#allocation4 + $0x240] sm:$0xff] }
 0x2fa   : > { %v10543_v57 = vpop.f32.mrb[61].mxu1 }
 0x2fb   : > { %v10544_v36 = vadd.f32 %v10543_v57, %v10542_v43  ;;  %v10545_v12 = vpop.f32.mrb[62].mxu1 }
 0x2fc   : > { %v10546_v1 = vpop.f32.mrb[63].mxu1 }
 0x2fd   : > { %v2496_v9 = vadd.f32 %v10544_v36, %v2351_v20  ;;  %v10547_v23 = vadd.f32 %v10546_v1, %v10545_v12  ;;  %v2362_v20 = vadd.f32 %v15913_v2, %v16285_v29  ;;  %v5995_v36 = vld [vmem:[#allocation4 + $0x268] sm:$0xff] }
 0x2fe   : > { %6582 = vmatmul.mubr.bf16.gmra.mrb[168].mxu1 %v5991_v16  ;;  %v2367_v16 = vadd.f32 %v15988_v8, %v16285_v29 }
 0x2ff   : > { %v16305_v58 = vadd.f32 %v14731_v38, %v2496_v9  ;;  %v2499_v4 = vadd.f32 %v10547_v23, %v2354_v14  ;;  %10236 = vmatprep.mubr.msk.bf16.mxu1 %vm392_vm1, %v5996_v35  ;;  %v2359_v38 = vadd.f32 %v15902_v21, %v16285_v29  ;;  %v11296_v23 = vld [vmem:[%s18120_s7 + $0x80] sm:$0xff]  }
 0x300   : > { %7583 = vmatpush1.bf16.msra.mxu1 %v11296_v23 }
 0x301   : > { %v16312_v0 = vadd.f32 %v14745_v60, %v2499_v4  ;;  %v10548_v17 = vpop.f32.mrb[64].mxu1 }
 0x302   : > { %v10549_v18 = vpop.f32.mrb[65].mxu1 }
 0x303   : > { %v10550_v43 = vadd.f32 %v10549_v18, %v10548_v17  ;;  %v10551_v57 = vpop.f32.mrb[66].mxu1 }
 0x304   : > { %v10552_v35 = vpop.f32.mrb[67].mxu1 }
 0x305   : > { %v2504_v44 = vadd.f32 %v10550_v43, %v2359_v38  ;;  %v10553_v60 = vadd.f32 %v10552_v35, %v10551_v57  ;;  %v16343_v35 = vld [vmem:[#allocation3 + $0x10] sm:$0xff] }
 0x306   : > { %6590 = vmatmul.mubr.bf16.gmra.mrb[172].mxu1 %v5995_v36  ;;  %6806 = vst.msk [vmem:[#allocation4 + $0x8] sm:$0xff] %vm392_vm1, %v16343_v35  ;;  %6680 = vst.msk [vmem:[#allocation4 + $0x50] sm:$0xff] %vm392_vm1, %v16343_v35 }
 0x307   : > { %v16322_v12 = vadd.f32 %v14893_v45, %v2504_v44  ;;  %v2507_v1 = vadd.f32 %v10553_v60, %v2362_v20  ;;  %v2370_v45 = vadd.f32 %v16007_v13, %v16285_v29  ;;  %v11297_v13 = vld [vmem:[%s18120_s7 + $0x48] sm:$0xff]  }
 0x308   : > { %v11298_v44 = vld [vmem:[%s18120_s7 + $0x8] sm:$0xff]   ;;  %10752 = vmatprep.subr.bf16.mxu0 %v11297_v13 }
 0x309   : > { %v16325_v9 = vadd.f32 %v14923_v53, %v2507_v1  ;;  %v10554_v14 = vpop.f32.mrb[68].mxu1  ;;  %v16334_v53 = vld [vmem:[#allocation2] sm:$0xff]  ;;  %10753 = vmatpush3.bf16.msra.mxu0 %v11298_v44 }
 0x30a   : > { %v10555_v21 = vpop.f32.mrb[69].mxu1  ;;  %7584 = vmatprep.subr.bf16.mxu1 %v16334_v53 }
 0x30b   : > { %v10556_v2 = vadd.f32 %v10555_v21, %v10554_v14  ;;  %v10557_v4 = vpop.f32.mrb[70].mxu1  ;;  %v2378_v14 = vadd.f32 %v16093_v54, %v16285_v29 }
 0x30c   : > { %v10558_v33 = vpop.f32.mrb[71].mxu1 }
 0x30d   : > { %v2512_v17 = vadd.f32 %v10556_v2, %v2367_v16  ;;  %v10559_v41 = vadd.f32 %v10558_v33, %v10557_v4  ;;  %v2383_v33 = vadd.f32 %v16150_v3, %v16285_v29  ;;  %v11300_v3 = vld [vmem:[%s18120_s7 + $0x90] sm:$0xff]  }
 0x30f   : > { %v16338_v18 = vadd.f32 %v14873_v25, %v2512_v17  ;;  %v2515_v38 = vadd.f32 %v10559_v41, %v2370_v45  ;;  %v2375_v25 = vadd.f32 %v16081_v51, %v16285_v29 }
 0x311   : > { %v16341_v43 = vadd.f32 %v14906_v11, %v2515_v38  ;;  %v10560_v8 = vpop.f32.mrb[72].mxu1  ;;  %v11299_v11 = vld [vmem:[%s18120_s7 + $0x88] sm:$0xff]   ;;  %v2386_v38 = vadd.f32 %v16158_v46, %v16285_v29  ;;  %v11302_v46 = vld [vmem:[%s18120_s7 + $0x10] sm:$0xff]  }
 0x312   : > { %v10561_v57 = vpop.f32.mrb[73].mxu1  ;;  %7585 = vmatpush1.bf16.msra.mxu1 %v11299_v11 }
 0x313   : > { %v10562_v20 = vadd.f32 %v10561_v57, %v10560_v8  ;;  %v10563_v60 = vpop.f32.mrb[74].mxu1  ;;  %7586 = vmatprep.subr.bf16.mxu1 %v16334_v53 }
 0x314   : > { %v10564_v36 = vpop.f32.mrb[75].mxu1 }
 0x315   : > { %v2520_v1 = vadd.f32 %v10562_v20, %v2375_v25  ;;  %v10565_v21 = vadd.f32 %v10564_v36, %v10563_v60  ;;  %v11301_v25 = vld [vmem:[%s18120_s7 + $0x50] sm:$0xff]   ;;  %v2394_v36 = vadd.f32 %v16187_v47, %v16285_v29 }
 0x316   : > { %7587 = vmatpush1.bf16.msra.mxu1 %v11300_v3  ;;  %10754 = vmatprep.subr.bf16.mxu0 %v11301_v25 }
 0x317   : > { %v16364_v51 = vadd.f32 %v15077_v59, %v2520_v1  ;;  %v2523_v23 = vadd.f32 %v10565_v21, %v2378_v14  ;;  %10755 = vmatpush3.bf16.msra.mxu0 %v11302_v46  ;;  %7588 = vmatprep.subr.bf16.mxu1 %v16334_v53 }
 0x319   : > { %v16367_v16 = vadd.f32 %v15099_v27, %v2523_v23  ;;  %v10566_v2 = vpop.f32.mrb[76].mxu1 }
 0x31a   : > { %v10567_v4 = vpop.f32.mrb[77].mxu1 }
 0x31b   : > { %v10568_v17 = vadd.f32 %v10567_v4, %v10566_v2  ;;  %v10569_v45 = vpop.f32.mrb[78].mxu1 }
 0x31c   : > { %v10570_v54 = vpop.f32.mrb[79].mxu1 }
 0x31d   : > { %v2528_v41 = vadd.f32 %v10568_v17, %v2383_v33  ;;  %v10571_v8 = vadd.f32 %v10570_v54, %v10569_v45 }
 0x31f   : > { %v16374_v59 = vadd.f32 %v15056_v32, %v2528_v41  ;;  %v2531_v57 = vadd.f32 %v10571_v8, %v2386_v38  ;;  %v2391_v32 = vadd.f32 %v16184_v37, %v16285_v29  ;;  %v11303_v41 = vld [vmem:[%s18120_s7 + $0x98] sm:$0xff]  }
 0x320   : > { %7589 = vmatpush1.bf16.msra.mxu1 %v11303_v41 }
 0x321   : > { %v16377_v27 = vadd.f32 %v15091_v55, %v2531_v57  ;;  %v10572_v13 = vpop.f32.mrb[80].mxu1  ;;  %7590 = vmatprep.subr.bf16.mxu1 %v16334_v53 }
 0x322   : > { %v10573_v44 = vpop.f32.mrb[81].mxu1 }
 0x323   : > { %v10574_v20 = vadd.f32 %v10573_v44, %v10572_v13  ;;  %v10575_v55 = vpop.f32.mrb[82].mxu1 }
 0x324   : > { %v10576_v60 = vpop.f32.mrb[83].mxu1 }
 0x325   : > { %v2536_v11 = vadd.f32 %v10574_v20, %v2391_v32  ;;  %v10577_v1 = vadd.f32 %v10576_v60, %v10575_v55  ;;  %v11304_v20 = vld [vmem:[%s18120_s7 + $0x58] sm:$0xff]   ;;  %v11306_v55 = vld [vmem:[%s18120_s7 + $0xa0] sm:$0xff]  }
 0x326   : > { %v10654_v14 = vpop.f32.mrb[92].mxu0  ;;  %10756 = vmatprep.subr.bf16.mxu0 %v11304_v20  ;;  %7591 = vmatpush1.bf16.msra.mxu1 %v11306_v55 }
 0x327   : > { %v16394_v21 = vadd.f32 %v15212_v62, %v2536_v11  ;;  %v2539_v23 = vadd.f32 %v10577_v1, %v2394_v36  ;;  %v10655_v2 = vpop.f32.mrb[93].mxu0  ;;  %v2399_v62 = vadd.f32 %v16208_v6, %v16285_v29  ;;  %7592 = vmatprep.subr.bf16.mxu1 %v16334_v53 }
 0x328   : > { %v16396_v37 = vadd.f32 %v10655_v2, %v10654_v14  ;;  %v10657_v4 = vpop.f32.mrb[94].mxu0  ;;  %v2410_v14 = vadd.f32 %v16230_v7, %v16285_v29 }
 0x329   : > { %v16399_v33 = vadd.f32 %v15231_v5, %v2539_v23  ;;  %v10578_v17 = vpop.f32.mrb[84].mxu1  ;;  %v10658_v45 = vpop.f32.mrb[95].mxu0  ;;  %v2402_v5 = vadd.f32 %v16210_v19, %v16285_v29  ;;  %v11305_v19 = vld [vmem:[%s18120_s7 + $0x18] sm:$0xff]  }
 0x32a   : > { %v16401_v54 = vadd.f32 %v10658_v45, %v10657_v4  ;;  %v10579_v47 = vpop.f32.mrb[85].mxu1  ;;  %10757 = vmatpush3.bf16.msra.mxu0 %v11305_v19 }
 0x32b   : > { %v10580_v38 = vadd.f32 %v10579_v47, %v10578_v17  ;;  %v10581_v8 = vpop.f32.mrb[86].mxu1 }
 0x32c   : > { %v10582_v57 = vpop.f32.mrb[87].mxu1 }
 0x32d   : > { %v2544_v13 = vadd.f32 %v10580_v38, %v2399_v62  ;;  %v10583_v44 = vadd.f32 %v10582_v57, %v10581_v8  ;;  %v2415_v8 = vadd.f32 %v16245_v40, %v16285_v29 }
 0x32f   : > { %v16412_v3 = vadd.f32 %v15198_v49, %v2544_v13  ;;  %v2547_v25 = vadd.f32 %v10583_v44, %v2402_v5  ;;  %v2407_v49 = vadd.f32 %v16226_v50, %v16285_v29 }
 0x331   : > { %v16415_v46 = vadd.f32 %v15223_v15, %v2547_v25  ;;  %v10584_v32 = vpop.f32.mrb[88].mxu1 }
 0x332   : > { %v10585_v6 = vpop.f32.mrb[89].mxu1 }
 0x333   : > { %v10586_v60 = vadd.f32 %v10585_v6, %v10584_v32  ;;  %v10587_v15 = vpop.f32.mrb[90].mxu1 }
 0x334   : > { %v10588_v11 = vpop.f32.mrb[91].mxu1 }
 0x335   : > { %v2552_v1 = vadd.f32 %v10586_v60, %v2407_v49  ;;  %v10589_v23 = vadd.f32 %v10588_v11, %v10587_v15 }
 0x336   : > { %v10660_v36 = vpop.f32.mrb[96].mxu0 }
 0x337   : > { %v10661_v2 = vpop.f32.mrb[97].mxu0  ;;  %v16434_v50 = vadd.f32 %v15378_v24, %v2552_v1  ;;  %v2555_v45 = vadd.f32 %v10589_v23, %v2410_v14  ;;  %v2418_v24 = vadd.f32 %v16248_v10, %v16285_v29  ;;  %v11307_v10 = vld [vmem:[%s18120_s7 + $0xa8] sm:$0xff]   ;;  %v2423_v1 = vadd.f32 %v16252_v39, %v16285_v29 }
 0x338   : > { %v16431_v4 = vadd.f32 %v10661_v2, %v10660_v36  ;;  %v10663_v17 = vpop.f32.mrb[98].mxu0  ;;  %v11308_v36 = vld [vmem:[%s18120_s7 + $0x60] sm:$0xff]   ;;  %7593 = vmatpush1.bf16.msra.mxu1 %v11307_v10 }
 0x339   : > { %v10664_v47 = vpop.f32.mrb[99].mxu0  ;;  %v16439_v62 = vadd.f32 %v15413_v26, %v2555_v45  ;;  %v10590_v38 = vpop.f32.mrb[92].mxu1  ;;  %10758 = vmatprep.subr.bf16.mxu0 %v11308_v36  ;;  %v2426_v45 = vadd.f32 %v16258_v34, %v16285_v29  ;;  %7594 = vmatprep.subr.bf16.mxu1 %v16334_v53 }
 0x33a   : > { %v16436_v41 = vadd.f32 %v10664_v47, %v10663_v17  ;;  %v10591_v7 = vpop.f32.mrb[93].mxu1 }
 0x33b   : > { %v10592_v57 = vadd.f32 %v10591_v7, %v10590_v38  ;;  %v10593_v13 = vpop.f32.mrb[94].mxu1 }
 0x33c   : > { %v10594_v5 = vpop.f32.mrb[95].mxu1 }
 0x33d   : > { %v2560_v25 = vadd.f32 %v10592_v57, %v2415_v8  ;;  %v10595_v32 = vadd.f32 %v10594_v5, %v10593_v13 }
 0x33e   : > { %v10666_v44 = vpop.f32.mrb[100].mxu0 }
 0x33f   : > { %v10667_v6 = vpop.f32.mrb[101].mxu0  ;;  %v16448_v26 = vadd.f32 %v15356_v31, %v2560_v25  ;;  %v2563_v55 = vadd.f32 %v10595_v32, %v2418_v24  ;;  %v11309_v31 = vld [vmem:[%s18120_s7 + $0x20] sm:$0xff]   ;;  %v11310_v24 = vld [vmem:[%s18120_s7 + $0xb0] sm:$0xff]   ;;  %v2431_v32 = vadd.f32 %v16264_v42, %v16285_v29 }
 0x340   : > { %v16445_v20 = vadd.f32 %v10667_v6, %v10666_v44  ;;  %v10669_v19 = vpop.f32.mrb[102].mxu0  ;;  %10759 = vmatpush3.bf16.msra.mxu0 %v11309_v31  ;;  %7595 = vmatpush1.bf16.msra.mxu1 %v11310_v24 }
 0x341   : > { %v10670_v49 = vpop.f32.mrb[103].mxu0  ;;  %v16453_v40 = vadd.f32 %v15393_v61, %v2563_v55  ;;  %v10596_v15 = vpop.f32.mrb[96].mxu1  ;;  %v2434_v55 = vadd.f32 %v16266_v22, %v16285_v29  ;;  %7596 = vmatprep.subr.bf16.mxu1 %v16334_v53 }
 0x342   : > { %v16450_v60 = vadd.f32 %v10670_v49, %v10669_v19  ;;  %v10597_v11 = vpop.f32.mrb[97].mxu1 }
 0x343   : > { %v10598_v14 = vadd.f32 %v10597_v11, %v10596_v15  ;;  %v10599_v61 = vpop.f32.mrb[98].mxu1 }
 0x344   : > { %v10600_v23 = vpop.f32.mrb[99].mxu1 }
 0x345   : > { %v2568_v17 = vadd.f32 %v10598_v14, %v2423_v1  ;;  %v10601_v47 = vadd.f32 %v10600_v23, %v10599_v61  ;;  %v18741_v61 = vld [vmem:[#allocation34_spill] sm:$0xff] }
 0x346   : > { %v10672_v2 = vpop.f32.mrb[104].mxu0 }
 0x347   : > { %v10673_v38 = vpop.f32.mrb[105].mxu0  ;;  %v16472_v39 = vadd.f32 %v15559_v30, %v2568_v17  ;;  %v2571_v57 = vadd.f32 %v10601_v47, %v2426_v45  ;;  %v11311_v17 = vld [vmem:[%s18120_s7 + $0x68] sm:$0xff]   ;;  %v18742_v47 = vld [vmem:[#allocation57_spill] sm:$0xff] }
 0x348   : > { %v16469_v7 = vadd.f32 %v10673_v38, %v10672_v2  ;;  %v10675_v8 = vpop.f32.mrb[106].mxu0  ;;  %v11312_v45 = vld [vmem:[%s18120_s7 + $0x28] sm:$0xff]   ;;  %v2439_v38 = vadd.f32 %v18742_v47, %v16285_v29  ;;  %10760 = vmatprep.subr.bf16.mxu0 %v11311_v17 }
 0x349   : > { %v10676_v13 = vpop.f32.mrb[107].mxu0  ;;  %v16477_v44 = vadd.f32 %v15584_v63, %v2571_v57  ;;  %v10602_v25 = vpop.f32.mrb[100].mxu1  ;;  %10761 = vmatpush3.bf16.msra.mxu0 %v11312_v45 }
 0x34a   : > { %v16474_v5 = vadd.f32 %v10676_v13, %v10675_v8  ;;  %v10603_v34 = vpop.f32.mrb[101].mxu1 }
 0x34b   : > { %v10604_v6 = vadd.f32 %v10603_v34, %v10602_v25  ;;  %v10605_v19 = vpop.f32.mrb[102].mxu1  ;;  %v2442_v25 = vadd.f32 %v16272_v28, %v16285_v29 }
 0x34c   : > { %v10606_v30 = vpop.f32.mrb[103].mxu1 }
 0x34d   : > { %v2576_v15 = vadd.f32 %v10604_v6, %v2431_v32  ;;  %v10607_v63 = vadd.f32 %v10606_v30, %v10605_v19 }
 0x34e   : > { %v10678_v49 = vpop.f32.mrb[108].mxu0 }
 0x34f   : > { %v10679_v11 = vpop.f32.mrb[109].mxu0  ;;  %v16490_v31 = vadd.f32 %v15547_v52, %v2576_v15  ;;  %v2579_v42 = vadd.f32 %v10607_v63, %v2434_v55  ;;  %v11313_v52 = vld [vmem:[%s18120_s7 + $0xb8] sm:$0xff]   ;;  %v18743_v55 = vld [vmem:[#allocation38_spill] sm:$0xff] }
 0x350   : > { %v16487_v10 = vadd.f32 %v10679_v11, %v10678_v49  ;;  %v10681_v36 = vpop.f32.mrb[110].mxu0  ;;  %7597 = vmatpush1.bf16.msra.mxu1 %v11313_v52  ;;  %v18746_v52 = vld [vmem:[#allocation62_spill] sm:$0xff] }
 0x351   : > { %v10682_v1 = vpop.f32.mrb[111].mxu0  ;;  %v16495_v23 = vadd.f32 %v18741_v61, %v2579_v42  ;;  %v10608_v22 = vpop.f32.mrb[104].mxu1  ;;  %7598 = vmatprep.subr.bf16.mxu1 %v16334_v53  ;;  %v18745_v61 = vld [vmem:[#allocation29_spill] sm:$0xff]  ;;  %v2450_v47 = vadd.f32 %v18746_v52, %v16285_v29 }
 0x352   : > { %v16492_v14 = vadd.f32 %v10682_v1, %v10681_v36  ;;  %v10609_v2 = vpop.f32.mrb[105].mxu1  ;;  %v18744_v36 = vld [vmem:[#allocation19_spill] sm:$0xff] }
 0x353   : > { %v10610_v8 = vadd.f32 %v10609_v2, %v10608_v22  ;;  %v10611_v57 = vpop.f32.mrb[106].mxu1  ;;  %v2447_v22 = vadd.f32 %v18745_v61, %v16285_v29 }
 0x354   : > { %v10612_v13 = vpop.f32.mrb[107].mxu1 }
 0x355   : > { %v2584_v24 = vadd.f32 %v10610_v8, %v2439_v38  ;;  %v10613_v32 = vadd.f32 %v10612_v13, %v10611_v57  ;;  %v16528_v13 = vld [vmem:[%s18119_s6] ss:$0 sm:$0xff] }
 0x356   : > { %v10684_v34 = vpop.f32.mrb[112].mxu0  ;;  %v6311_v29 = vadd.f32 %v16396_v37, %v16528_v13  ;;  %v11316_v37 = vld [vmem:[%s18120_s7 + $0x30] sm:$0xff]  }
 0x357   : > { %v10685_v6 = vpop.f32.mrb[113].mxu0  ;;  %v16514_v49 = vadd.f32 %v18743_v55, %v2584_v24  ;;  %v2587_v15 = vadd.f32 %v10613_v32, %v2442_v25  ;;  %v18747_v32 = vld [vmem:[#allocation28_spill] sm:$0xff] }
 0x358   : > { %v16511_v19 = vadd.f32 %v10685_v6, %v10684_v34  ;;  %v10687_v30 = vpop.f32.mrb[114].mxu0 }
 0x359   : > { %v10688_v63 = vpop.f32.mrb[115].mxu0  ;;  %v16519_v42 = vadd.f32 %v18744_v36, %v2587_v15  ;;  %v10614_v28 = vpop.f32.mrb[108].mxu1 }
 0x35a   : > { %v16516_v11 = vadd.f32 %v10688_v63, %v10687_v30  ;;  %v10615_v1 = vpop.f32.mrb[109].mxu1  ;;  %v18748_v63 = vld [vmem:[#allocation41_spill] sm:$0xff] }
 0x35b   : > { %v10616_v2 = vadd.f32 %v10615_v1, %v10614_v28  ;;  %v10617_v17 = vpop.f32.mrb[110].mxu1 }
 0x35c   : > { %v10618_v45 = vpop.f32.mrb[111].mxu1 }
 0x35d   : > { %v2592_v8 = vadd.f32 %v10616_v2, %v2447_v22  ;;  %v10619_v57 = vadd.f32 %v10618_v45, %v10617_v17  ;;  %v6314_v22 = vadd.f32 %v16401_v54, %v16528_v13  ;;  %v11314_v2 = vld [vmem:[%s18120_s7 + $0xc0] sm:$0xff]   ;;  %v11315_v17 = vld [vmem:[%s18120_s7 + $0x70] sm:$0xff]  }
 0x35e   : > { %v10690_v38 = vpop.f32.mrb[116].mxu0  ;;  %7599 = vmatpush1.bf16.msra.mxu1 %v11314_v2  ;;  %10762 = vmatprep.subr.bf16.mxu0 %v11315_v17  ;;  %v6662_v2 = vld [vmem:[#allocation3] sm:$0xff]  ;;  %v11318_v17 = vld [vmem:[%s18120_s7 + $0x78] sm:$0xff]  }
 0x35f   : > { %v10691_v25 = vpop.f32.mrb[117].mxu0  ;;  %v16533_v6 = vadd.f32 %v18747_v32, %v2592_v8  ;;  %v2595_v30 = vadd.f32 %v10619_v57, %v2450_v47  ;;  %10763 = vmatpush3.bf16.msra.mxu0 %v11316_v37  ;;  %7600 = vmatprep.subr.bf16.mxu1 %v16334_v53  ;;  %6678 = vst.msk [vmem:[#allocation4] sm:$0xff] %vm392_vm1, %v6662_v2  ;;  %v11319_v37 = vld [vmem:[%s18120_s7 + $0x38] sm:$0xff]  }
 0x360   : > { %v16530_v34 = vadd.f32 %v10691_v25, %v10690_v38  ;;  %v10693_v24 = vpop.f32.mrb[118].mxu0  ;;  %10764 = vmatprep.subr.bf16.mxu0 %v11318_v17 }
 0x361   : > { %v10694_v55 = vpop.f32.mrb[119].mxu0  ;;  %v16540_v36 = vadd.f32 %v18748_v63, %v2595_v30  ;;  %v6471_v28 = vpop.f32.mrb[112].mxu1 }
 0x362   : > { %v16537_v15 = vadd.f32 %v10694_v55, %v10693_v24  ;;  %v6472_v1 = vadd.f32 %v6471_v28, %v6311_v29  ;;  %v6473_v61 = vpop.f32.mrb[113].mxu1  ;;  %v6319_v55 = vadd.f32 %v16431_v4, %v16528_v13 }
 0x363   : > { %v6474_v45 = vpop.f32.mrb[114].mxu1  ;;  %10765 = vmatpush3.bf16.msra.mxu0 %v11319_v37 }
 0x364   : > { %v6475_v52 = vadd.f32 %v6474_v45, %v6314_v22  ;;  %v6476_v47 = vpop.f32.mrb[115].mxu1  ;;  %v6598_v8 = vmax.f32 %v6472_v1, 0.0  ;;  %v6322_v22 = vadd.f32 %v16436_v41, %v16528_v13  ;;  %v11317_v1 = vld [vmem:[%s18120_s7 + $0xc8] sm:$0xff]   ;;  %v11320_v41 = vld [vmem:[%s18120_s7 + $0xd0] sm:$0xff]  }
 0x365   : > { %7601 = vmatpush1.bf16.msra.mxu1 %v11317_v1 }
 0x366   : > { %v10696_v38 = vpop.f32.mrb[120].mxu0  ;;  %v6599_v57 = vmax.f32 %v6475_v52, 0.0  ;;  %7602 = vmatprep.subr.bf16.mxu1 %v16334_v53 }
 0x367   : > { %v10697_v54 = vpop.f32.mrb[121].mxu0 }
 0x368   : > { %v16554_v25 = vadd.f32 %v10697_v54, %v10696_v38  ;;  %v10699_v24 = vpop.f32.mrb[122].mxu0  ;;  %v6630_v30 = vpack.c.bf16 %v6599_v57, %v6598_v8  ;;  %v6727_v38 = vpop.permute.xlu1 %6726  ;;  %v16577_v54 = vld [vmem:[#allocation3 + $0x98] sm:$0xff] }
 0x369   : > { %v10700_v32 = vpop.f32.mrb[123].mxu0  ;;  %v6479_v63 = vpop.f32.mrb[116].mxu1  ;;  %6774 = vst.msk [vmem:[#allocation4] sm:$0xff] %vm1138_vm2, %v6727_v38  ;;  %7603 = vmatpush1.bf16.msra.mxu1 %v11320_v41 }
 0x36a   : > { %v16558_v29 = vadd.f32 %v10700_v32, %v10699_v24  ;;  %6646 = vst.msk [vmem:[#allocation3 + $0x18] sm:$0xff] %vm392_vm1, %v6630_v30  ;;  %v6480_v28 = vadd.f32 %v6479_v63, %v6319_v55  ;;  %v6481_v61 = vpop.f32.mrb[117].mxu1  ;;  %6949 = vst.msk [vmem:[#allocation4 + $0x268] sm:$0xff] %vm392_vm1, %v16577_v54  ;;  %7604 = vmatprep.subr.bf16.mxu1 %v16334_v53 }
 0x36b   : > { %v6482_v4 = vpop.f32.mrb[118].mxu1  ;;  %v6327_v61 = vadd.f32 %v16445_v20, %v16528_v13  ;;  %v11321_v20 = vld [vmem:[%s18120_s7 + $0xd8] sm:$0xff]  }
 0x36c   : > { %v6483_v45 = vadd.f32 %v6482_v4, %v6322_v22  ;;  %v6484_v52 = vpop.f32.mrb[119].mxu1  ;;  %v6600_v57 = vmax.f32 %v6480_v28, 0.0  ;;  %v6330_v4 = vadd.f32 %v16450_v60, %v16528_v13 }
 0x36d   : > { %7605 = vmatpush1.bf16.msra.mxu1 %v11321_v20 }
 0x36e   : > { %v10702_v47 = vpop.f32.mrb[124].mxu0  ;;  %v6601_v24 = vmax.f32 %v6483_v45, 0.0 }
 0x36f   : > { %v10703_v8 = vpop.f32.mrb[125].mxu0 }
 0x370   : > { %v16582_v32 = vadd.f32 %v10703_v8, %v10702_v47  ;;  %v10705_v30 = vpop.f32.mrb[126].mxu0  ;;  %v6631_v63 = vpack.c.bf16 %v6601_v24, %v6600_v57 }
 0x371   : > { %v10706_v55 = vpop.f32.mrb[127].mxu0  ;;  %v6487_v1 = vpop.f32.mrb[120].mxu1  ;;  %v16588_v2 = vld [vmem:[#allocation3 + $0x18] sm:$0xff] }
 0x372   : > { %v16586_v22 = vadd.f32 %v10706_v55, %v10705_v30  ;;  %6647 = vst.msk [vmem:[#allocation3 + $0x20] sm:$0xff] %vm392_vm1, %v6631_v63  ;;  %v6488_v28 = vadd.f32 %v6487_v1, %v6327_v61  ;;  %v6489_v17 = vpop.f32.mrb[121].mxu1  ;;  %6854 = vrot.lane.b32.xlu0 %v16588_v2, %s11376_s15  ;;  %6807 = vst.msk [vmem:[#allocation4 + $0x30] sm:$0xff] %vm392_vm1, %v16588_v2  ;;  %v6335_v30 = vadd.f32 %v16469_v7, %v16528_v13 }
 0x373   : > { %6681 = vst.msk [vmem:[#allocation4 + $0x78] sm:$0xff] %vm392_vm1, %v16588_v2  ;;  %v6490_v53 = vpop.f32.mrb[122].mxu1 }
 0x374   : > { %v6491_v37 = vadd.f32 %v6490_v53, %v6330_v4  ;;  %v6492_v45 = vpop.f32.mrb[123].mxu1  ;;  %v6602_v47 = vmax.f32 %v6488_v28, 0.0  ;;  %v6338_v28 = vadd.f32 %v16474_v5, %v16528_v13 }
 0x376   : > { %v10708_v52 = vpop.f32.mrb[128].mxu0  ;;  %v6603_v38 = vmax.f32 %v6491_v37, 0.0 }
 0x377   : > { %v10709_v41 = vpop.f32.mrb[129].mxu0 }
 0x378   : > { %v16603_v8 = vadd.f32 %v10709_v41, %v10708_v52  ;;  %v10711_v60 = vpop.f32.mrb[130].mxu0  ;;  %v6632_v24 = vpack.c.bf16 %v6603_v38, %v6602_v47 }
 0x379   : > { %v10712_v57 = vpop.f32.mrb[131].mxu0  ;;  %v6495_v63 = vpop.f32.mrb[124].mxu1  ;;  %v16609_v61 = vld [vmem:[#allocation3 + $0x20] sm:$0xff] }
 0x37a   : > { %v16607_v55 = vadd.f32 %v10712_v57, %v10711_v60  ;;  %6648 = vst.msk [vmem:[#allocation3 + $0x28] sm:$0xff] %vm392_vm1, %v6632_v24  ;;  %v6496_v1 = vadd.f32 %v6495_v63, %v6335_v30  ;;  %v6497_v17 = vpop.f32.mrb[125].mxu1  ;;  %6856 = vrot.lane.b32.xlu1 %v16609_v61, %s11376_s15  ;;  %6934 = vst.msk [vmem:[#allocation4 + $0x10] sm:$0xff] %vm392_vm1, %v16609_v61  ;;  %v6343_v60 = vadd.f32 %v16487_v10, %v16528_v13 }
 0x37b   : > { %6808 = vst.msk [vmem:[#allocation4 + $0x58] sm:$0xff] %vm392_vm1, %v16609_v61  ;;  %6682 = vst.msk [vmem:[#allocation4 + $0xa0] sm:$0xff] %vm392_vm1, %v16609_v61  ;;  %v6498_v7 = vpop.f32.mrb[126].mxu1 }
 0x37c   : > { %v6499_v4 = vadd.f32 %v6498_v7, %v6338_v28  ;;  %v6500_v20 = vpop.f32.mrb[127].mxu1  ;;  %v6604_v45 = vmax.f32 %v6496_v1, 0.0  ;;  %v6346_v1 = vadd.f32 %v16492_v14, %v16528_v13 }
 0x37e   : > { %v10714_v53 = vpop.f32.mrb[132].mxu0  ;;  %v6605_v52 = vmax.f32 %v6499_v4, 0.0 }
 0x37f   : > { %v10715_v37 = vpop.f32.mrb[133].mxu0 }
 0x380   : > { %v16622_v41 = vadd.f32 %v10715_v37, %v10714_v53  ;;  %v10717_v47 = vpop.f32.mrb[134].mxu0  ;;  %v6633_v38 = vpack.c.bf16 %v6605_v52, %v6604_v45 }
 0x381   : > { %v10718_v5 = vpop.f32.mrb[135].mxu0  ;;  %v6503_v24 = vpop.f32.mrb[128].mxu1  ;;  %v16628_v30 = vld [vmem:[#allocation3 + $0x28] sm:$0xff] }
 0x382   : > { %v16626_v57 = vadd.f32 %v10718_v5, %v10717_v47  ;;  %6649 = vst.msk [vmem:[#allocation3 + $0x30] sm:$0xff] %vm392_vm1, %v6633_v38  ;;  %v6504_v63 = vadd.f32 %v6503_v24, %v6343_v60  ;;  %v6505_v17 = vpop.f32.mrb[129].mxu1  ;;  %6982 = vrot.lane.b32.xlu0 %v16628_v30, %s11376_s15  ;;  %6935 = vst.msk [vmem:[#allocation4 + $0x38] sm:$0xff] %vm392_vm1, %v16628_v30  ;;  %v6351_v5 = vadd.f32 %v16511_v19, %v16528_v13 }
 0x383   : > { %6809 = vst.msk [vmem:[#allocation4 + $0x80] sm:$0xff] %vm392_vm1, %v16628_v30  ;;  %6683 = vst.msk [vmem:[#allocation4 + $0xc8] sm:$0xff] %vm392_vm1, %v16628_v30  ;;  %v6506_v10 = vpop.f32.mrb[130].mxu1  ;;  %v6354_v19 = vadd.f32 %v16516_v11, %v16528_v13  ;;  %v2743_v17 = vmax.f32 %v16292_v48, 0.0 }
 0x384   : > { %v6507_v28 = vadd.f32 %v6506_v10, %v6346_v1  ;;  %v6508_v7 = vpop.f32.mrb[131].mxu1  ;;  %v6606_v53 = vmax.f32 %v6504_v63, 0.0 }
 0x385   : > { %v2744_v7 = vmax.f32 %v16296_v56, 0.0  ;;  %v16668_v11 = vpack.c.bf16 %v2743_v17, %v2743_v17  ;;  %v2748_v56 = vmax.f32 %v16325_v9, 0.0  ;;  %v2752_v9 = vmax.f32 %v16367_v16, 0.0 }
 0x386   : > { %v10720_v4 = vpop.f32.mrb[136].mxu0  ;;  %v6607_v37 = vmax.f32 %v6507_v28, 0.0  ;;  %6728 = vrot.lane.b32.xlu0 %v16343_v35, %s11376_s15  ;;  %v2753_v16 = vmax.f32 %v16374_v59, 0.0  ;;  %v2756_v59 = vmax.f32 %v16399_v33, 0.0 }
 0x387   : > { %v10721_v20 = vpop.f32.mrb[137].mxu0  ;;  %2884 = vst.msk [vmem:[%s16790_s26] sm:$0xf] %vm2883_vm6, %v16668_v11 }
 0x388   : > { %v16643_v14 = vadd.f32 %v10721_v20, %v10720_v4  ;;  %v10723_v45 = vpop.f32.mrb[138].mxu0  ;;  %v6634_v47 = vpack.c.bf16 %v6607_v37, %v6606_v53 }
 0x389   : > { %v10724_v52 = vpop.f32.mrb[139].mxu0  ;;  %v16647_v38 = vld [vmem:[#allocation3 + $0x30] sm:$0xff]  ;;  %v6511_v24 = vpop.f32.mrb[132].mxu1 }
 0x38a   : > { %v16649_v60 = vadd.f32 %v10724_v52, %v10723_v45  ;;  %7062 = vst.msk [vmem:[#allocation4 + $0x18] sm:$0xff] %vm392_vm1, %v16647_v38  ;;  %6650 = vst.msk [vmem:[#allocation3 + $0x38] sm:$0xff] %vm392_vm1, %v6634_v47  ;;  %v6512_v63 = vadd.f32 %v6511_v24, %v6351_v5  ;;  %v6513_v35 = vpop.f32.mrb[133].mxu1  ;;  %6984 = vrot.lane.b32.xlu1 %v16647_v38, %s11376_s15  ;;  %6858 = vrot.lane.b32.xlu0 %v16628_v30, %s11376_s15  ;;  %v2745_v45 = vmax.f32 %v16305_v58, 0.0 }
 0x38b   : > { %6936 = vst.msk [vmem:[#allocation4 + $0x60] sm:$0xff] %vm392_vm1, %v16647_v38  ;;  %6810 = vst.msk [vmem:[#allocation4 + $0xa8] sm:$0xff] %vm392_vm1, %v16647_v38  ;;  %v6514_v1 = vpop.f32.mrb[134].mxu1  ;;  %v2746_v52 = vmax.f32 %v16312_v0, 0.0  ;;  %v2747_v5 = vmax.f32 %v16322_v12, 0.0  ;;  %v2750_v58 = vmax.f32 %v16341_v43, 0.0 }
 0x38c   : > { %v6515_v10 = vadd.f32 %v6514_v1, %v6354_v19  ;;  %v6516_v28 = vpop.f32.mrb[135].mxu1  ;;  %v6608_v53 = vmax.f32 %v6512_v63, 0.0  ;;  %v6359_v63 = vadd.f32 %v16530_v34, %v16528_v13  ;;  %v16678_v19 = vpack.c.bf16 %v2744_v7, %v2744_v7 }
 0x38d   : > { %v2751_v12 = vmax.f32 %v16364_v51, 0.0  ;;  %v16700_v43 = vpack.c.bf16 %v2745_v45, %v2745_v45  ;;  %v16702_v51 = vpack.c.bf16 %v2746_v52, %v2746_v52  ;;  %v2754_v7 = vmax.f32 %v16377_v27, 0.0 }
 0x38e   : > { %v10726_v4 = vpop.f32.mrb[140].mxu0  ;;  %v6609_v37 = vmax.f32 %v6515_v10, 0.0  ;;  %6730 = vrot.lane.b32.xlu1 %v16588_v2, %s11376_s15  ;;  %v2749_v2 = vmax.f32 %v16338_v18, 0.0  ;;  %v6362_v18 = vadd.f32 %v16537_v15, %v16528_v13  ;;  %v16710_v15 = vpack.c.bf16 %v2748_v56, %v2748_v56  ;;  %2885 = vst.msk [vmem:[%s16790_s26 + $0x8] sm:$0xf] %vm2883_vm6, %v16678_v19 }
 0x38f   : > { %v10727_v20 = vpop.f32.mrb[141].mxu0  ;;  %v16715_v52 = vpack.c.bf16 %v2750_v58, %v2750_v58  ;;  %v2757_v27 = vmax.f32 %v16412_v3, 0.0  ;;  %v2758_v58 = vmax.f32 %v16415_v46, 0.0  ;;  %2886 = vst.msk [vmem:[%s16790_s26 + $0x10] sm:$0xf] %vm2883_vm6, %v16700_v43 }
 0x390   : > { %v16672_v47 = vadd.f32 %v10727_v20, %v10726_v4  ;;  %v10729_v48 = vpop.f32.mrb[142].mxu0  ;;  %v6635_v35 = vpack.c.bf16 %v6609_v37, %v6608_v53  ;;  %v16708_v20 = vpack.c.bf16 %v2747_v5, %v2747_v5  ;;  %v2755_v53 = vmax.f32 %v16394_v21, 0.0  ;;  %2887 = vst.msk [vmem:[%s16790_s26 + $0x18] sm:$0xf] %vm2883_vm6, %v16702_v51  ;;  %2889 = vst.msk [vmem:[%s16790_s26 + $0x28] sm:$0xf] %vm2883_vm6, %v16710_v15 }
 0x391   : > { %v10730_v24 = vpop.f32.mrb[143].mxu0  ;;  %v16682_v17 = vld [vmem:[#allocation3 + $0x38] sm:$0xff]  ;;  %v6519_v1 = vpop.f32.mrb[136].mxu1  ;;  %v7081_v10 = vld [vmem:[#allocation4 + $0x18] sm:$0xff]  ;;  %v16713_v45 = vpack.c.bf16 %v2749_v2, %v2749_v2  ;;  %v16725_v21 = vpack.c.bf16 %v2753_v16, %v2753_v16  ;;  %v16727_v2 = vpack.c.bf16 %v2754_v7, %v2754_v7  ;;  %v2760_v16 = vmax.f32 %v16439_v62, 0.0 }
 0x392   : > { %v16684_v0 = vadd.f32 %v10730_v24, %v10729_v48  ;;  %7063 = vst.msk [vmem:[#allocation4 + $0x40] sm:$0xff] %vm392_vm1, %v16682_v17  ;;  %6651 = vst.msk [vmem:[#allocation3 + $0x40] sm:$0xff] %vm392_vm1, %v6635_v35  ;;  %v6520_v34 = vadd.f32 %v6519_v1, %v6359_v63  ;;  %v6521_v28 = vpop.f32.mrb[137].mxu1  ;;  %10266 = vmatprep.mubr.msk.bf16.mxu1 %vm392_vm1, %v7081_v10  ;;  %6986 = vrot.lane.b32.xlu0 %v16682_v17, %s11376_s15  ;;  %v6669_v19 = vld [vmem:[#allocation3 + $0x38] sm:$0xff] }
 0x393   : > { %6937 = vst.msk [vmem:[#allocation4 + $0x88] sm:$0xff] %vm392_vm1, %v16682_v17  ;;  %6811 = vst.msk [vmem:[#allocation4 + $0xd0] sm:$0xff] %vm392_vm1, %v16682_v17  ;;  %6860 = vrot.lane.b32.xlu1 %v16647_v38, %s11376_s15  ;;  %v6522_v4 = vpop.f32.mrb[138].mxu1  ;;  %v16719_v35 = vpack.c.bf16 %v2751_v12, %v2751_v12  ;;  %v16721_v63 = vpack.c.bf16 %v2752_v9, %v2752_v9  ;;  %v16732_v10 = vpack.c.bf16 %v2755_v53, %v2755_v53 }
 0x394   : > { %v6523_v37 = vadd.f32 %v6522_v4, %v6362_v18  ;;  %v6524_v48 = vpop.f32.mrb[139].mxu1  ;;  %v6610_v56 = vmax.f32 %v6520_v34, 0.0  ;;  %v2759_v12 = vmax.f32 %v16434_v50, 0.0  ;;  %v6367_v34 = vadd.f32 %v16554_v25, %v16528_v13  ;;  %2888 = vst.msk [vmem:[%s16790_s26 + $0x20] sm:$0xf] %vm2883_vm6, %v16708_v20 }
 0x395   : > { %v16737_v18 = vpack.c.bf16 %v2756_v59, %v2756_v59  ;;  %v2761_v53 = vmax.f32 %v16448_v26, 0.0  ;;  %v2762_v50 = vmax.f32 %v16453_v40, 0.0  ;;  %v6370_v62 = vadd.f32 %v16558_v29, %v16528_v13  ;;  %2890 = vst.msk [vmem:[%s16790_s26 + $0x30] sm:$0xf] %vm2883_vm6, %v16713_v45  ;;  %2891 = vst.msk [vmem:[%s16790_s26 + $0x38] sm:$0xf] %vm2883_vm6, %v16715_v52 }
 0x396   : > { %v10732_v24 = vpop.f32.mrb[144].mxu0  ;;  %v6611_v1 = vmax.f32 %v6523_v37, 0.0  ;;  %6732 = vrot.lane.b32.xlu0 %v16609_v61, %s11376_s15  ;;  %v16739_v61 = vpack.c.bf16 %v2757_v27, %v2757_v27  ;;  %v16763_v26 = vpack.c.bf16 %v2758_v58, %v2758_v58  ;;  %v2763_v40 = vmax.f32 %v16472_v39, 0.0  ;;  %2892 = vst.msk [vmem:[%s16790_s26 + $0x40] sm:$0xf] %vm2883_vm6, %v16719_v35 }
 0x397   : > { %v10733_v5 = vpop.f32.mrb[145].mxu0  ;;  %v2764_v48 = vmax.f32 %v16477_v44, 0.0  ;;  %v2765_v59 = vmax.f32 %v16490_v31, 0.0  ;;  %v16768_v29 = vpack.c.bf16 %v2759_v12, %v2759_v12  ;;  %v2769_v58 = vmax.f32 %v16533_v6, 0.0  ;;  %2893 = vst.msk [vmem:[%s16790_s26 + $0x48] sm:$0xf] %vm2883_vm6, %v16721_v63 }
 0x398   : > { %v16730_v33 = vadd.f32 %v10733_v5, %v10732_v24  ;;  %v10735_v3 = vpop.f32.mrb[146].mxu0  ;;  %v6636_v28 = vpack.c.bf16 %v6611_v1, %v6610_v56  ;;  %v2766_v24 = vmax.f32 %v16495_v23, 0.0  ;;  %v2767_v5 = vmax.f32 %v16514_v49, 0.0  ;;  %v6668_v23 = vld [vmem:[#allocation3 + $0x30] sm:$0xff]  ;;  %2894 = vst.msk [vmem:[%s16790_s26 + $0x50] sm:$0xf] %vm2883_vm6, %v16725_v21 }
 0x399   : > { %v10736_v9 = vpop.f32.mrb[147].mxu0  ;;  %v16742_v7 = vld [vmem:[#allocation3 + $0x40] sm:$0xff]  ;;  %v6527_v4 = vpop.f32.mrb[140].mxu1  ;;  %v2770_v39 = vmax.f32 %v16540_v36, 0.0  ;;  %v10382_v44 = vpack.c.bf16 %v2761_v53, %v2761_v53  ;;  %v10383_v31 = vpack.c.bf16 %v2762_v50, %v2762_v50  ;;  %v10384_v49 = vpack.c.bf16 %v2763_v40, %v2763_v40  ;;  %6684 = vst.msk [vmem:[#allocation4 + $0xf0] sm:$0xff] %vm392_vm1, %v6668_v23  ;;  %6685 = vst.msk [vmem:[#allocation4 + $0x118] sm:$0xff] %vm392_vm1, %v6669_v19 }
 0x39a   : > { %v16744_v46 = vadd.f32 %v10736_v9, %v10735_v3  ;;  %7064 = vst.msk [vmem:[#allocation4 + $0x68] sm:$0xff] %vm392_vm1, %v16742_v7  ;;  %6652 = vst.msk [vmem:[#allocation3 + $0x48] sm:$0xff] %vm392_vm1, %v6636_v28  ;;  %v6528_v25 = vadd.f32 %v6527_v4, %v6367_v34  ;;  %v6529_v37 = vpop.f32.mrb[141].mxu1  ;;  %6862 = vrot.lane.b32.xlu0 %v16682_v17, %s11376_s15  ;;  %6988 = vrot.lane.b32.xlu1 %v16742_v7, %s11376_s15  ;;  %v2768_v9 = vmax.f32 %v16519_v42, 0.0 }
 0x39b   : > { %6938 = vst.msk [vmem:[#allocation4 + $0xb0] sm:$0xff] %vm392_vm1, %v16742_v7  ;;  %6812 = vst.msk [vmem:[#allocation4 + $0xf8] sm:$0xff] %vm392_vm1, %v16742_v7  ;;  %v6530_v27 = vpop.f32.mrb[142].mxu1  ;;  %v10381_v3 = vpack.c.bf16 %v2760_v16, %v2760_v16  ;;  %v10385_v37 = vpack.c.bf16 %v2764_v48, %v2764_v48  ;;  %v10386_v16 = vpack.c.bf16 %v2765_v59, %v2765_v59 }
 0x39c   : > { %6686 = vst.msk [vmem:[#allocation4 + $0x140] sm:$0xff] %vm392_vm1, %v16742_v7  ;;  %v6531_v56 = vadd.f32 %v6530_v27, %v6370_v62  ;;  %v6532_v1 = vpop.f32.mrb[143].mxu1  ;;  %v6612_v12 = vmax.f32 %v6528_v25, 0.0  ;;  %v10387_v6 = vpack.c.bf16 %v2766_v24, %v2766_v24  ;;  %v10388_v36 = vpack.c.bf16 %v2767_v5, %v2767_v5 }
 0x39d   : > { %v6375_v50 = vadd.f32 %v16582_v32, %v16528_v13  ;;  %v10389_v25 = vpack.c.bf16 %v2768_v9, %v2768_v9  ;;  %v10391_v1 = vpack.c.bf16 %v2770_v39, %v2770_v39  ;;  %v6378_v24 = vadd.f32 %v16586_v22, %v16528_v13  ;;  %2895 = vst.msk [vmem:[%s16790_s26 + $0x58] sm:$0xf] %vm2883_vm6, %v16727_v2 }
 0x39e   : > { %v10738_v28 = vpop.f32.mrb[148].mxu0  ;;  %v6613_v4 = vmax.f32 %v6531_v56, 0.0  ;;  %6734 = vrot.lane.b32.xlu1 %v16628_v30, %s11376_s15  ;;  %v10390_v56 = vpack.c.bf16 %v2769_v58, %v2769_v58  ;;  %2896 = vst.msk [vmem:[%s16790_s26 + $0x60] sm:$0xf] %vm2883_vm6, %v16732_v10  ;;  %2897 = vst.msk [vmem:[%s16790_s26 + $0x68] sm:$0xf] %vm2883_vm6, %v16737_v18  ;;  %v6383_v51 = vadd.f32 %v16603_v8, %v16528_v13 }
 0x39f   : > { %v10739_v34 = vpop.f32.mrb[149].mxu0  ;;  %2898 = vst.msk [vmem:[%s16790_s26 + $0x70] sm:$0xf] %vm2883_vm6, %v16739_v61  ;;  %2899 = vst.msk [vmem:[%s16790_s26 + $0x78] sm:$0xf] %vm2883_vm6, %v16763_v26  ;;  %v6386_v8 = vadd.f32 %v16607_v55, %v16528_v13  ;;  %v6391_v39 = vadd.f32 %v16622_v41, %v16528_v13 }
 0x3a0   : > { %v16778_v62 = vadd.f32 %v10739_v34, %v10738_v28  ;;  %v10741_v42 = vpop.f32.mrb[150].mxu0  ;;  %v6637_v53 = vpack.c.bf16 %v6613_v4, %v6612_v12  ;;  %2900 = vst.msk [vmem:[%s16790_s26 + $0x80] sm:$0xf] %vm2883_vm6, %v16768_v29  ;;  %2901 = vst.msk [vmem:[%s16790_s26 + $0x88] sm:$0xf] %vm2883_vm6, %v10381_v3 }
 0x3a1   : > { %v10742_v27 = vpop.f32.mrb[151].mxu0  ;;  %v16783_v30 = vld [vmem:[#allocation3 + $0x48] sm:$0xff]  ;;  %v6535_v48 = vpop.f32.mrb[144].mxu1  ;;  %2902 = vst.msk [vmem:[%s16790_s26 + $0x90] sm:$0xf] %vm2883_vm6, %v10382_v44 }
 0x3a2   : > { %v16785_v40 = vadd.f32 %v10742_v27, %v10741_v42  ;;  %7065 = vst.msk [vmem:[#allocation4 + $0x90] sm:$0xff] %vm392_vm1, %v16783_v30  ;;  %6653 = vst.msk [vmem:[#allocation3 + $0x50] sm:$0xff] %vm392_vm1, %v6637_v53  ;;  %v6536_v32 = vadd.f32 %v6535_v48, %v6375_v50  ;;  %v6537_v59 = vpop.f32.mrb[145].mxu1  ;;  %6990 = vrot.lane.b32.xlu0 %v16783_v30, %s11376_s15  ;;  %6864 = vrot.lane.b32.xlu1 %v16742_v7, %s11376_s15 }
 0x3a3   : > { %6939 = vst.msk [vmem:[#allocation4 + $0xd8] sm:$0xff] %vm392_vm1, %v16783_v30  ;;  %6813 = vst.msk [vmem:[#allocation4 + $0x120] sm:$0xff] %vm392_vm1, %v16783_v30  ;;  %v6538_v5 = vpop.f32.mrb[146].mxu1 }
 0x3a4   : > { %6687 = vst.msk [vmem:[#allocation4 + $0x168] sm:$0xff] %vm392_vm1, %v16783_v30  ;;  %v6539_v9 = vadd.f32 %v6538_v5, %v6378_v24  ;;  %v6540_v58 = vpop.f32.mrb[147].mxu1  ;;  %v6614_v22 = vmax.f32 %v6536_v32, 0.0 }
 0x3a5   : > { %2903 = vst.msk [vmem:[%s16790_s26 + $0x98] sm:$0xf] %vm2883_vm6, %v10383_v31  ;;  %2904 = vst.msk [vmem:[%s16790_s26 + $0xa0] sm:$0xf] %vm2883_vm6, %v10384_v49 }
 0x3a6   : > { %2905 = vst.msk [vmem:[%s16790_s26 + $0xa8] sm:$0xf] %vm2883_vm6, %v10385_v37  ;;  %2906 = vst.msk [vmem:[%s16790_s26 + $0xb0] sm:$0xf] %vm2883_vm6, %v10386_v16  ;;  %v6615_v11 = vmax.f32 %v6539_v9, 0.0  ;;  %6736 = vrot.lane.b32.xlu0 %v16647_v38, %s11376_s15 }
 0x3a7   : > { %2907 = vst.msk [vmem:[%s16790_s26 + $0xb8] sm:$0xf] %vm2883_vm6, %v10387_v6  ;;  %2908 = vst.msk [vmem:[%s16790_s26 + $0xc0] sm:$0xf] %vm2883_vm6, %v10388_v36 }
 0x3a8   : > { %2909 = vst.msk [vmem:[%s16790_s26 + $0xc8] sm:$0xf] %vm2883_vm6, %v10389_v25  ;;  %2910 = vst.msk [vmem:[%s16790_s26 + $0xd0] sm:$0xf] %vm2883_vm6, %v10390_v56  ;;  %v6638_v43 = vpack.c.bf16 %v6615_v11, %v6614_v22 }
 0x3a9   : > { %2911 = vst.msk [vmem:[%s16790_s26 + $0xd8] sm:$0xf] %vm2883_vm6, %v10391_v1  ;;  %v16885_v20 = vld [vmem:[#allocation3 + $0x50] sm:$0xff]  ;;  %v6543_v45 = vpop.f32.mrb[148].mxu1 }
 0x3aa   : > { %v10744_v15 = vpop.f32.mrb[152].mxu0  ;;  %7066 = vst.msk [vmem:[#allocation4 + $0xb8] sm:$0xff] %vm392_vm1, %v16885_v20  ;;  %6654 = vst.msk [vmem:[#allocation3 + $0x58] sm:$0xff] %vm392_vm1, %v6638_v43  ;;  %v6544_v35 = vadd.f32 %v6543_v45, %v6383_v51  ;;  %v6545_v63 = vpop.f32.mrb[149].mxu1  ;;  %6866 = vrot.lane.b32.xlu0 %v16783_v30, %s11376_s15  ;;  %6992 = vrot.lane.b32.xlu1 %v16885_v20, %s11376_s15 }
 0x3ab   : > { %v10745_v52 = vpop.f32.mrb[153].mxu0  ;;  %6940 = vst.msk [vmem:[#allocation4 + $0x100] sm:$0xff] %vm392_vm1, %v16885_v20  ;;  %6814 = vst.msk [vmem:[#allocation4 + $0x148] sm:$0xff] %vm392_vm1, %v16885_v20  ;;  %v6546_v2 = vpop.f32.mrb[150].mxu1 }
 0x3ac   : > { %6688 = vst.msk [vmem:[#allocation4 + $0x190] sm:$0xff] %vm392_vm1, %v16885_v20  ;;  %v16902_v38 = vadd.f32 %v10745_v52, %v10744_v15  ;;  %v10747_v21 = vpop.f32.mrb[154].mxu0  ;;  %v6547_v18 = vadd.f32 %v6546_v2, %v6386_v8  ;;  %v6548_v61 = vpop.f32.mrb[151].mxu1  ;;  %v6616_v29 = vmax.f32 %v6544_v35, 0.0 }
 0x3ad   : > { %v10748_v10 = vpop.f32.mrb[155].mxu0 }
 0x3ae   : > { %v16904_v26 = vadd.f32 %v10748_v10, %v10747_v21  ;;  %v6617_v55 = vmax.f32 %v6547_v18, 0.0  ;;  %6738 = vrot.lane.b32.xlu1 %v16682_v17, %s11376_s15  ;;  %v6394_v17 = vadd.f32 %v16626_v57, %v16528_v13  ;;  %v6399_v57 = vadd.f32 %v16643_v14, %v16528_v13 }
 0x3af   : > { %v6426_v18 = vadd.f32 %v16785_v40, %v16528_v13 }
 0x3b0   : > { %v6639_v3 = vpack.c.bf16 %v6617_v55, %v6616_v29 }
 0x3b1   : > { %v16910_v28 = vld [vmem:[#allocation3 + $0x58] sm:$0xff]  ;;  %v6551_v44 = vpop.f32.mrb[152].mxu1 }
 0x3b2   : > { %7067 = vst.msk [vmem:[#allocation4 + $0xe0] sm:$0xff] %vm392_vm1, %v16910_v28  ;;  %6655 = vst.msk [vmem:[#allocation3 + $0x60] sm:$0xff] %vm392_vm1, %v6639_v3  ;;  %v6552_v31 = vadd.f32 %v6551_v44, %v6391_v39  ;;  %v6553_v34 = vpop.f32.mrb[153].mxu1  ;;  %6994 = vrot.lane.b32.xlu0 %v16910_v28, %s11376_s15  ;;  %6868 = vrot.lane.b32.xlu1 %v16885_v20, %s11376_s15 }
 0x3b3   : > { %6941 = vst.msk [vmem:[#allocation4 + $0x128] sm:$0xff] %vm392_vm1, %v16910_v28  ;;  %6815 = vst.msk [vmem:[#allocation4 + $0x170] sm:$0xff] %vm392_vm1, %v16910_v28  ;;  %v6554_v41 = vpop.f32.mrb[154].mxu1 }
 0x3b4   : > { %6689 = vst.msk [vmem:[#allocation4 + $0x1b8] sm:$0xff] %vm392_vm1, %v16910_v28  ;;  %v6555_v12 = vadd.f32 %v6554_v41, %v6394_v17  ;;  %v6556_v4 = vpop.f32.mrb[155].mxu1  ;;  %v6618_v23 = vmax.f32 %v6552_v31, 0.0  ;;  %v6434_v17 = vadd.f32 %v16904_v26, %v16528_v13 }
 0x3b6   : > { %v6619_v49 = vmax.f32 %v6555_v12, 0.0  ;;  %6740 = vrot.lane.b32.xlu0 %v16742_v7, %s11376_s15  ;;  %v6402_v7 = vadd.f32 %v16649_v60, %v16528_v13  ;;  %v6407_v60 = vadd.f32 %v16672_v47, %v16528_v13 }
 0x3b8   : > { %v6640_v37 = vpack.c.bf16 %v6619_v49, %v6618_v23 }
 0x3b9   : > { %v16931_v16 = vld [vmem:[#allocation3 + $0x60] sm:$0xff]  ;;  %v6559_v42 = vpop.f32.mrb[156].mxu1 }
 0x3ba   : > { %7068 = vst.msk [vmem:[#allocation4 + $0x108] sm:$0xff] %vm392_vm1, %v16931_v16  ;;  %6656 = vst.msk [vmem:[#allocation3 + $0x68] sm:$0xff] %vm392_vm1, %v6640_v37  ;;  %v6560_v6 = vadd.f32 %v6559_v42, %v6399_v57  ;;  %v6561_v36 = vpop.f32.mrb[157].mxu1  ;;  %6870 = vrot.lane.b32.xlu0 %v16910_v28, %s11376_s15  ;;  %6996 = vrot.lane.b32.xlu1 %v16931_v16, %s11376_s15  ;;  %v7078_v42 = vld [vmem:[#allocation4] sm:$0xff] }
 0x3bb   : > { %6942 = vst.msk [vmem:[#allocation4 + $0x150] sm:$0xff] %vm392_vm1, %v16931_v16  ;;  %6816 = vst.msk [vmem:[#allocation4 + $0x198] sm:$0xff] %vm392_vm1, %v16931_v16  ;;  %v6562_v14 = vpop.f32.mrb[158].mxu1 }
 0x3bc   : > { %6690 = vst.msk [vmem:[#allocation4 + $0x1e0] sm:$0xff] %vm392_vm1, %v16931_v16  ;;  %v6563_v27 = vadd.f32 %v6562_v14, %v6402_v7  ;;  %v6564_v53 = vpop.f32.mrb[159].mxu1  ;;  %v6620_v50 = vmax.f32 %v6560_v6, 0.0  ;;  %v6965_v6 = vld [vmem:[#allocation3 + $0xa0] sm:$0xff] }
 0x3be   : > { %v6621_v25 = vmax.f32 %v6563_v27, 0.0  ;;  %6742 = vrot.lane.b32.xlu1 %v16783_v30, %s11376_s15  ;;  %v6410_v30 = vadd.f32 %v16684_v0, %v16528_v13  ;;  %v6415_v0 = vadd.f32 %v16730_v33, %v16528_v13 }
 0x3c0   : > { %v6641_v56 = vpack.c.bf16 %v6621_v25, %v6620_v50  ;;  %v7085_v50 = vld [vmem:[#allocation4 + $0x40] sm:$0xff] }
 0x3c1   : > { %v16952_v1 = vld [vmem:[#allocation3 + $0x68] sm:$0xff]  ;;  %v6567_v48 = vpop.f32.mrb[160].mxu1 }
 0x3c2   : > { %7069 = vst.msk [vmem:[#allocation4 + $0x130] sm:$0xff] %vm392_vm1, %v16952_v1  ;;  %6657 = vst.msk [vmem:[#allocation3 + $0x70] sm:$0xff] %vm392_vm1, %v6641_v56  ;;  %v6568_v32 = vadd.f32 %v6567_v48, %v6407_v60  ;;  %v6569_v59 = vpop.f32.mrb[161].mxu1  ;;  %6998 = vrot.lane.b32.xlu0 %v16952_v1, %s11376_s15  ;;  %6872 = vrot.lane.b32.xlu1 %v16931_v16, %s11376_s15 }
 0x3c3   : > { %6943 = vst.msk [vmem:[#allocation4 + $0x178] sm:$0xff] %vm392_vm1, %v16952_v1  ;;  %6817 = vst.msk [vmem:[#allocation4 + $0x1c0] sm:$0xff] %vm392_vm1, %v16952_v1  ;;  %v6570_v47 = vpop.f32.mrb[162].mxu1  ;;  %v7089_v59 = vld [vmem:[#allocation4 + $0x68] sm:$0xff] }
 0x3c4   : > { %6691 = vst.msk [vmem:[#allocation4 + $0x208] sm:$0xff] %vm392_vm1, %v16952_v1  ;;  %v6571_v24 = vadd.f32 %v6570_v47, %v6410_v30  ;;  %v6572_v5 = vpop.f32.mrb[163].mxu1  ;;  %v6622_v9 = vmax.f32 %v6568_v32, 0.0 }
 0x3c6   : > { %v6623_v58 = vmax.f32 %v6571_v24, 0.0  ;;  %6744 = vrot.lane.b32.xlu0 %v16885_v20, %s11376_s15  ;;  %v6418_v20 = vadd.f32 %v16744_v46, %v16528_v13  ;;  %v6423_v46 = vadd.f32 %v16778_v62, %v16528_v13 }
 0x3c8   : > { %v6642_v22 = vpack.c.bf16 %v6623_v58, %v6622_v9 }
 0x3c9   : > { %v16973_v11 = vld [vmem:[#allocation3 + $0x70] sm:$0xff]  ;;  %v6575_v19 = vpop.f32.mrb[164].mxu1 }
 0x3ca   : > { %7070 = vst.msk [vmem:[#allocation4 + $0x158] sm:$0xff] %vm392_vm1, %v16973_v11  ;;  %6658 = vst.msk [vmem:[#allocation3 + $0x78] sm:$0xff] %vm392_vm1, %v6642_v22  ;;  %v6576_v43 = vadd.f32 %v6575_v19, %v6415_v0  ;;  %v6577_v51 = vpop.f32.mrb[165].mxu1  ;;  %6874 = vrot.lane.b32.xlu0 %v16952_v1, %s11376_s15  ;;  %7000 = vrot.lane.b32.xlu1 %v16973_v11, %s11376_s15  ;;  %v7093_v22 = vld [vmem:[#allocation4 + $0x90] sm:$0xff] }
 0x3cb   : > { %6944 = vst.msk [vmem:[#allocation4 + $0x1a0] sm:$0xff] %vm392_vm1, %v16973_v11  ;;  %6818 = vst.msk [vmem:[#allocation4 + $0x1e8] sm:$0xff] %vm392_vm1, %v16973_v11  ;;  %v6578_v33 = vpop.f32.mrb[166].mxu1 }
 0x3cc   : > { %6692 = vst.msk [vmem:[#allocation4 + $0x230] sm:$0xff] %vm392_vm1, %v16973_v11  ;;  %v6579_v15 = vadd.f32 %v6578_v33, %v6418_v20  ;;  %v6580_v45 = vpop.f32.mrb[167].mxu1  ;;  %v6624_v52 = vmax.f32 %v6576_v43, 0.0  ;;  %v7097_v33 = vld [vmem:[#allocation4 + $0xb8] sm:$0xff] }
 0x3ce   : > { %v6625_v35 = vmax.f32 %v6579_v15, 0.0  ;;  %6746 = vrot.lane.b32.xlu1 %v16910_v28, %s11376_s15  ;;  %v6431_v28 = vadd.f32 %v16902_v38, %v16528_v13 }
 0x3d0   : > { %v6643_v63 = vpack.c.bf16 %v6625_v35, %v6624_v52 }
 0x3d1   : > { %v7055_v8 = vld [vmem:[#allocation3 + $0x78] sm:$0xff]  ;;  %v6583_v21 = vpop.f32.mrb[168].mxu1 }
 0x3d2   : > { %7071 = vst.msk [vmem:[#allocation4 + $0x180] sm:$0xff] %vm392_vm1, %v7055_v8  ;;  %6659 = vst.msk [vmem:[#allocation3 + $0x80] sm:$0xff] %vm392_vm1, %v6643_v63  ;;  %v6584_v2 = vadd.f32 %v6583_v21, %v6423_v46  ;;  %v6585_v10 = vpop.f32.mrb[169].mxu1  ;;  %7002 = vrot.lane.b32.xlu0 %v7055_v8, %s11376_s15  ;;  %6876 = vrot.lane.b32.xlu1 %v16973_v11, %s11376_s15 }
 0x3d3   : > { %6945 = vst.msk [vmem:[#allocation4 + $0x1c8] sm:$0xff] %vm392_vm1, %v7055_v8  ;;  %6819 = vst.msk [vmem:[#allocation4 + $0x210] sm:$0xff] %vm392_vm1, %v7055_v8  ;;  %v6586_v62 = vpop.f32.mrb[170].mxu1 }
 0x3d4   : > { %6693 = vst.msk [vmem:[#allocation4 + $0x258] sm:$0xff] %vm392_vm1, %v7055_v8  ;;  %v6587_v61 = vadd.f32 %v6586_v62, %v6426_v18  ;;  %v6588_v29 = vpop.f32.mrb[171].mxu1  ;;  %v6626_v55 = vmax.f32 %v6584_v2, 0.0 }
 0x3d5   : > { %v7105_v29 = vld [vmem:[#allocation4 + $0x108] sm:$0xff] }
 0x3d6   : > { %v6627_v3 = vmax.f32 %v6587_v61, 0.0  ;;  %6748 = vrot.lane.b32.xlu0 %v16931_v16, %s11376_s15 }
 0x3d8   : > { %v6644_v39 = vpack.c.bf16 %v6627_v3, %v6626_v55 }
 0x3d9   : > { %v7056_v44 = vld [vmem:[#allocation3 + $0x80] sm:$0xff]  ;;  %v6591_v40 = vpop.f32.mrb[172].mxu1 }
 0x3da   : > { %7072 = vst.msk [vmem:[#allocation4 + $0x1a8] sm:$0xff] %vm392_vm1, %v7056_v44  ;;  %6660 = vst.msk [vmem:[#allocation3 + $0x88] sm:$0xff] %vm392_vm1, %v6644_v39  ;;  %v6592_v31 = vadd.f32 %v6591_v40, %v6431_v28  ;;  %v6593_v34 = vpop.f32.mrb[173].mxu1  ;;  %6878 = vrot.lane.b32.xlu0 %v7055_v8, %s11376_s15  ;;  %7004 = vrot.lane.b32.xlu1 %v7056_v44, %s11376_s15 }
 0x3db   : > { %6946 = vst.msk [vmem:[#allocation4 + $0x1f0] sm:$0xff] %vm392_vm1, %v7056_v44  ;;  %6820 = vst.msk [vmem:[#allocation4 + $0x238] sm:$0xff] %vm392_vm1, %v7056_v44  ;;  %v6594_v38 = vpop.f32.mrb[174].mxu1 }
 0x3dc   : > { %v6595_v41 = vadd.f32 %v6594_v38, %v6434_v17  ;;  %v6596_v12 = vpop.f32.mrb[175].mxu1  ;;  %v6628_v4 = vmax.f32 %v6592_v31, 0.0  ;;  %v7109_v31 = vld [vmem:[#allocation4 + $0x130] sm:$0xff] }
 0x3de   : > { %v6629_v23 = vmax.f32 %v6595_v41, 0.0  ;;  %6750 = vrot.lane.b32.xlu1 %v16952_v1, %s11376_s15 }
 0x3e0   : > { %v6645_v49 = vpack.c.bf16 %v6629_v23, %v6628_v4  ;;  %v7113_v23 = vld [vmem:[#allocation4 + $0x158] sm:$0xff] }
 0x3e1   : > { %v7057_v37 = vld [vmem:[#allocation3 + $0x88] sm:$0xff] }
 0x3e2   : > { %7073 = vst.msk [vmem:[#allocation4 + $0x1d0] sm:$0xff] %vm392_vm1, %v7057_v37  ;;  %6661 = vst.msk [vmem:[#allocation3 + $0x90] sm:$0xff] %vm392_vm1, %v6645_v49  ;;  %7006 = vrot.lane.b32.xlu0 %v7057_v37, %s11376_s15  ;;  %6880 = vrot.lane.b32.xlu1 %v7056_v44, %s11376_s15 }
 0x3e3   : > { %6947 = vst.msk [vmem:[#allocation4 + $0x218] sm:$0xff] %vm392_vm1, %v7057_v37  ;;  %6821 = vst.msk [vmem:[#allocation4 + $0x260] sm:$0xff] %vm392_vm1, %v7057_v37 }
 0x3e4   : > { %v6855_v13 = vpop.permute.xlu0 %6854 }
 0x3e5   : > { %6902 = vst.msk [vmem:[#allocation4 + $0x8] sm:$0xff] %vm1138_vm2, %v6855_v13 }
 0x3e6   : > { %6752 = vrot.lane.b32.xlu0 %v16973_v11, %s11376_s15 }
 0x3e9   : > { %v7058_v26 = vld [vmem:[#allocation3 + $0x90] sm:$0xff] }
 0x3ea   : > { %7074 = vst.msk [vmem:[#allocation4 + $0x1f8] sm:$0xff] %vm392_vm1, %v7058_v26  ;;  %6882 = vrot.lane.b32.xlu0 %v7057_v37, %s11376_s15  ;;  %7008 = vrot.lane.b32.xlu1 %v7058_v26, %s11376_s15  ;;  %6948 = vst.msk [vmem:[#allocation4 + $0x240] sm:$0xff] %vm392_vm1, %v7058_v26 }
 0x3ec   : > { %v6857_v57 = vpop.permute.xlu1 %6856  ;;  %v7079_v16 = vld [vmem:[#allocation4 + $0x8] sm:$0xff] }
 0x3ed   : > { %6903 = vst.msk [vmem:[#allocation4 + $0x30] sm:$0xff] %vm1138_vm2, %v6857_v57  ;;  %7453 = vmatprep.mubr.bf16.mxu0 %v7079_v16 }
 0x3ee   : > { %7010 = vrot.lane.b32.xlu0 %v16577_v54, %s11376_s15  ;;  %6754 = vrot.lane.b32.xlu1 %v7055_v8, %s11376_s15  ;;  %v7101_v8 = vld [vmem:[#allocation4 + $0xe0] sm:$0xff] }
 0x3ef   : > { %7454 = vmatmul.mubr.bf16.vlgmr.msra.gmra.mrb[156].mxu0 %v7078_v42  ;;  %v7117_v42 = vld [vmem:[#allocation4 + $0x180] sm:$0xff] }
 0x3f2   : > { %6756 = vrot.lane.b32.xlu0 %v7056_v44, %s11376_s15  ;;  %6884 = vrot.lane.b32.xlu1 %v7058_v26, %s11376_s15 }
 0x3f4   : > { %v6983_v36 = vpop.permute.xlu0 %6982  ;;  %v7083_v7 = vld [vmem:[#allocation4 + $0x30] sm:$0xff] }
 0x3f5   : > { %7030 = vst.msk [vmem:[#allocation4 + $0x10] sm:$0xff] %vm1138_vm2, %v6983_v36  ;;  %7461 = vmatprep.mubr.bf16.mxu0 %v7083_v7 }
 0x3f6   : > { %7012 = vrot.lane.b32.xlu1 %v6965_v6, %s11376_s15 }
 0x3f8   : > { %v6729_v14 = vpop.permute.xlu0 %6728 }
 0x3f9   : > { %6775 = vst.msk [vmem:[#allocation4 + $0x28] sm:$0xff] %vm1138_vm2, %v6729_v14 }
 0x3fc   : > { %v6985_v27 = vpop.permute.xlu1 %6984  ;;  %v6859_v54 = vpop.permute.xlu0 %6858  ;;  %v7080_v53 = vld [vmem:[#allocation4 + $0x10] sm:$0xff] }
 0x3fd   : > { %7031 = vst.msk [vmem:[#allocation4 + $0x38] sm:$0xff] %vm1138_vm2, %v6985_v27  ;;  %6904 = vst.msk [vmem:[#allocation4 + $0x58] sm:$0xff] %vm1138_vm2, %v6859_v54  ;;  %7615 = vmatmul.mubr.bf16.vlgmr.msra.gmra.mrb[176].mxu1 %v7080_v53  ;;  %v7121_v53 = vld [vmem:[#allocation4 + $0x1a8] sm:$0xff] }
 0x3fe   : > { %10267 = vmatprep.mubr.msk.bf16.mxu1 %vm392_vm1, %v7085_v50 }
 0x400   : > { %v6731_v25 = vpop.permute.xlu1 %6730  ;;  %v7082_v56 = vld [vmem:[#allocation4 + $0x28] sm:$0xff] }
 0x401   : > { %6776 = vst.msk [vmem:[#allocation4 + $0x50] sm:$0xff] %vm1138_vm2, %v6731_v25  ;;  %7462 = vmatmul.mubr.bf16.gmra.mrb[160].mxu0 %v7082_v56 }
 0x404   : > { %v6987_v60 = vpop.permute.xlu0 %6986  ;;  %v7087_v1 = vld [vmem:[#allocation4 + $0x58] sm:$0xff] }
 0x405   : > { %v7084_v48 = vld [vmem:[#allocation4 + $0x38] sm:$0xff]  ;;  %7032 = vst.msk [vmem:[#allocation4 + $0x60] sm:$0xff] %vm1138_vm2, %v6987_v60  ;;  %v6861_v32 = vpop.permute.xlu1 %6860  ;;  %7469 = vmatprep.mubr.bf16.mxu0 %v7087_v1 }
 0x406   : > { %7623 = vmatmul.mubr.bf16.gmra.mrb[180].mxu1 %v7084_v48  ;;  %6905 = vst.msk [vmem:[#allocation4 + $0x80] sm:$0xff] %vm1138_vm2, %v6861_v32  ;;  %v7125_v32 = vld [vmem:[#allocation4 + $0x1d0] sm:$0xff] }
 0x407   : > { %10268 = vmatprep.mubr.msk.bf16.mxu1 %vm392_vm1, %v7089_v59 }
 0x408   : > { %v6733_v30 = vpop.permute.xlu0 %6732  ;;  %v7086_v47 = vld [vmem:[#allocation4 + $0x50] sm:$0xff] }
 0x409   : > { %6777 = vst.msk [vmem:[#allocation4 + $0x78] sm:$0xff] %vm1138_vm2, %v6733_v30  ;;  %7470 = vmatmul.mubr.bf16.gmra.mrb[164].mxu0 %v7086_v47 }
 0x40c   : > { %v6863_v24 = vpop.permute.xlu0 %6862  ;;  %v6989_v5 = vpop.permute.xlu1 %6988  ;;  %v7088_v9 = vld [vmem:[#allocation4 + $0x60] sm:$0xff] }
 0x40d   : > { %6906 = vst.msk [vmem:[#allocation4 + $0xa8] sm:$0xff] %vm1138_vm2, %v6863_v24  ;;  %7033 = vst.msk [vmem:[#allocation4 + $0x88] sm:$0xff] %vm1138_vm2, %v6989_v5  ;;  %v7091_v58 = vld [vmem:[#allocation4 + $0x80] sm:$0xff] }
 0x40e   : > { %7631 = vmatmul.mubr.bf16.gmra.mrb[184].mxu1 %v7088_v9  ;;  %7477 = vmatprep.mubr.bf16.mxu0 %v7091_v58  ;;  %v7129_v58 = vld [vmem:[#allocation4 + $0x1f8] sm:$0xff] }
 0x40f   : > { %10269 = vmatprep.mubr.msk.bf16.mxu1 %vm392_vm1, %v7093_v22 }
 0x410   : > { %v6735_v0 = vpop.permute.xlu1 %6734  ;;  %v7090_v11 = vld [vmem:[#allocation4 + $0x78] sm:$0xff] }
 0x411   : > { %6778 = vst.msk [vmem:[#allocation4 + $0xa0] sm:$0xff] %vm1138_vm2, %v6735_v0  ;;  %7478 = vmatmul.mubr.bf16.gmra.mrb[168].mxu0 %v7090_v11  ;;  %v7133_v11 = vld [vmem:[#allocation4 + $0x220] sm:$0xff] }
 0x414   : > { %v6991_v19 = vpop.permute.xlu0 %6990  ;;  %v6865_v43 = vpop.permute.xlu1 %6864  ;;  %v7095_v51 = vld [vmem:[#allocation4 + $0xa8] sm:$0xff] }
 0x415   : > { %v7092_v20 = vld [vmem:[#allocation4 + $0x88] sm:$0xff]  ;;  %7034 = vst.msk [vmem:[#allocation4 + $0xb0] sm:$0xff] %vm1138_vm2, %v6991_v19  ;;  %6907 = vst.msk [vmem:[#allocation4 + $0xd0] sm:$0xff] %vm1138_vm2, %v6865_v43  ;;  %7485 = vmatprep.mubr.bf16.mxu0 %v7095_v51 }
 0x416   : > { %7639 = vmatmul.mubr.bf16.gmra.mrb[188].mxu1 %v7092_v20 }
 0x417   : > { %10270 = vmatprep.mubr.msk.bf16.mxu1 %vm392_vm1, %v7097_v33 }
 0x418   : > { %v6737_v15 = vpop.permute.xlu0 %6736  ;;  %v7094_v45 = vld [vmem:[#allocation4 + $0xa0] sm:$0xff] }
 0x419   : > { %6779 = vst.msk [vmem:[#allocation4 + $0xc8] sm:$0xff] %vm1138_vm2, %v6737_v15  ;;  %7486 = vmatmul.mubr.bf16.gmra.mrb[172].mxu0 %v7094_v45 }
 0x41c   : > { %v6867_v52 = vpop.permute.xlu0 %6866  ;;  %v6993_v35 = vpop.permute.xlu1 %6992  ;;  %v7099_v63 = vld [vmem:[#allocation4 + $0xd0] sm:$0xff] }
 0x41d   : > { %v7096_v46 = vld [vmem:[#allocation4 + $0xb0] sm:$0xff]  ;;  %6908 = vst.msk [vmem:[#allocation4 + $0xf8] sm:$0xff] %vm1138_vm2, %v6867_v52  ;;  %7035 = vst.msk [vmem:[#allocation4 + $0xd8] sm:$0xff] %vm1138_vm2, %v6993_v35  ;;  %7493 = vmatprep.mubr.bf16.mxu0 %v7099_v63  ;;  %v7137_v52 = vld [vmem:[#allocation4 + $0x248] sm:$0xff] }
 0x41e   : > { %7647 = vmatmul.mubr.bf16.gmra.mrb[192].mxu1 %v7096_v46 }
 0x41f   : > { %10271 = vmatprep.mubr.msk.bf16.mxu1 %vm392_vm1, %v7101_v8 }
 0x420   : > { %v6739_v21 = vpop.permute.xlu1 %6738  ;;  %v7098_v2 = vld [vmem:[#allocation4 + $0xc8] sm:$0xff] }
 0x421   : > { %6780 = vst.msk [vmem:[#allocation4 + $0xf0] sm:$0xff] %vm1138_vm2, %v6739_v21  ;;  %7494 = vmatmul.mubr.bf16.gmra.mrb[176].mxu0 %v7098_v2 }
 0x424   : > { %v6995_v10 = vpop.permute.xlu0 %6994  ;;  %v6869_v18 = vpop.permute.xlu1 %6868  ;;  %v7103_v62 = vld [vmem:[#allocation4 + $0xf8] sm:$0xff] }
 0x425   : > { %v7100_v61 = vld [vmem:[#allocation4 + $0xd8] sm:$0xff]  ;;  %7036 = vst.msk [vmem:[#allocation4 + $0x100] sm:$0xff] %vm1138_vm2, %v6995_v10  ;;  %6909 = vst.msk [vmem:[#allocation4 + $0x120] sm:$0xff] %vm1138_vm2, %v6869_v18  ;;  %7501 = vmatprep.mubr.bf16.mxu0 %v7103_v62  ;;  %v7141_v18 = vld [vmem:[#allocation4 + $0x270] sm:$0xff] }
 0x426   : > { %7655 = vmatmul.mubr.bf16.gmra.mrb[196].mxu1 %v7100_v61 }
 0x427   : > { %10272 = vmatprep.mubr.msk.bf16.mxu1 %vm392_vm1, %v7105_v29 }
 0x428   : > { %v6741_v55 = vpop.permute.xlu0 %6740  ;;  %v7102_v3 = vld [vmem:[#allocation4 + $0xf0] sm:$0xff] }
 0x429   : > { %6781 = vst.msk [vmem:[#allocation4 + $0x118] sm:$0xff] %vm1138_vm2, %v6741_v55  ;;  %7502 = vmatmul.mubr.bf16.gmra.mrb[180].mxu0 %v7102_v3  ;;  %v11322_v55 = vld [vmem:[%s18122_s9 + $0x40] sm:$0xff]  }
 0x42a   : > { %v11323_v3 = vld [vmem:[%s18122_s9] sm:$0xff]   ;;  %10862 = vmatprep.subr.bf16.mxu0 %v11322_v55 }
 0x42b   : > { %10863 = vmatpush3.bf16.msra.mxu0 %v11323_v3 }
 0x42c   : > { %v6871_v39 = vpop.permute.xlu0 %6870  ;;  %v6997_v28 = vpop.permute.xlu1 %6996  ;;  %v7107_v44 = vld [vmem:[#allocation4 + $0x120] sm:$0xff] }
 0x42d   : > { %v7104_v40 = vld [vmem:[#allocation4 + $0x100] sm:$0xff]  ;;  %6910 = vst.msk [vmem:[#allocation4 + $0x148] sm:$0xff] %vm1138_vm2, %v6871_v39  ;;  %7037 = vst.msk [vmem:[#allocation4 + $0x128] sm:$0xff] %vm1138_vm2, %v6997_v28  ;;  %7509 = vmatprep.mubr.bf16.mxu0 %v7107_v44  ;;  %v11324_v39 = vld [vmem:[%s18122_s9 + $0x48] sm:$0xff]  }
 0x42e   : > { %7663 = vmatmul.mubr.bf16.gmra.mrb[200].mxu1 %v7104_v40  ;;  %v11325_v28 = vld [vmem:[%s18122_s9 + $0x8] sm:$0xff]   ;;  %10864 = vmatprep.subr.bf16.mxu0 %v11324_v39  ;;  %v11326_v44 = vld [vmem:[%s18122_s9 + $0xc0] sm:$0xff]  }
 0x42f   : > { %10273 = vmatprep.mubr.msk.bf16.mxu1 %vm392_vm1, %v7109_v31  ;;  %10865 = vmatpush3.bf16.msra.mxu0 %v11325_v28  ;;  %v11327_v40 = vld [vmem:[%s18122_s9 + $0x80] sm:$0xff]   ;;  %v11328_v31 = vld [vmem:[%s18122_s9 + $0x50] sm:$0xff]  }
 0x430   : > { %v6743_v34 = vpop.permute.xlu1 %6742  ;;  %v7106_v17 = vld [vmem:[#allocation4 + $0x118] sm:$0xff]  ;;  %10962 = vmatprep.subr.bf16.mxu1 %v11326_v44  ;;  %10866 = vmatprep.subr.bf16.mxu0 %v11328_v31 }
 0x431   : > { %6782 = vst.msk [vmem:[#allocation4 + $0x140] sm:$0xff] %vm1138_vm2, %v6743_v34  ;;  %7510 = vmatmul.mubr.bf16.gmra.mrb[184].mxu0 %v7106_v17  ;;  %10963 = vmatpush3.bf16.msra.mxu1 %v11327_v40  ;;  %v11329_v34 = vld [vmem:[%s18122_s9 + $0x10] sm:$0xff]   ;;  %v11330_v17 = vld [vmem:[%s18122_s9 + $0xc8] sm:$0xff]  }
 0x432   : > { %10964 = vmatprep.subr.bf16.mxu1 %v11330_v17 }
 0x433   : > { %10867 = vmatpush3.bf16.msra.mxu0 %v11329_v34 }
 0x434   : > { %v6999_v38 = vpop.permute.xlu0 %6998  ;;  %v6873_v41 = vpop.permute.xlu1 %6872  ;;  %v7111_v12 = vld [vmem:[#allocation4 + $0x148] sm:$0xff] }
 0x435   : > { %v7108_v4 = vld [vmem:[#allocation4 + $0x128] sm:$0xff]  ;;  %7038 = vst.msk [vmem:[#allocation4 + $0x150] sm:$0xff] %vm1138_vm2, %v6999_v38  ;;  %6911 = vst.msk [vmem:[#allocation4 + $0x170] sm:$0xff] %vm1138_vm2, %v6873_v41  ;;  %7517 = vmatprep.mubr.bf16.mxu0 %v7111_v12  ;;  %v11332_v41 = vld [vmem:[%s18122_s9 + $0x58] sm:$0xff]  }
 0x436   : > { %7671 = vmatmul.mubr.bf16.gmra.mrb[204].mxu1 %v7108_v4  ;;  %v11331_v38 = vld [vmem:[%s18122_s9 + $0x88] sm:$0xff]   ;;  %v11333_v12 = vld [vmem:[%s18122_s9 + $0x18] sm:$0xff]   ;;  %10868 = vmatprep.subr.bf16.mxu0 %v11332_v41  ;;  %v11334_v4 = vld [vmem:[%s18122_s9 + $0xd0] sm:$0xff]  }
 0x437   : > { %10274 = vmatprep.mubr.msk.bf16.mxu1 %vm392_vm1, %v7113_v23  ;;  %10965 = vmatpush3.bf16.msra.mxu1 %v11331_v38  ;;  %v11335_v23 = vld [vmem:[%s18122_s9 + $0x90] sm:$0xff]   ;;  %v11347_v41 = vld [vmem:[%s18122_s9 + $0xa8] sm:$0xff]  }
 0x438   : > { %v6745_v49 = vpop.permute.xlu0 %6744  ;;  %v7110_v37 = vld [vmem:[#allocation4 + $0x140] sm:$0xff]  ;;  %10869 = vmatpush3.bf16.msra.mxu0 %v11333_v12  ;;  %10966 = vmatprep.subr.bf16.mxu1 %v11334_v4 }
 0x439   : > { %6783 = vst.msk [vmem:[#allocation4 + $0x168] sm:$0xff] %vm1138_vm2, %v6745_v49  ;;  %7518 = vmatmul.mubr.bf16.gmra.mrb[188].mxu0 %v7110_v37  ;;  %v11336_v37 = vld [vmem:[%s18122_s9 + $0x60] sm:$0xff]  }
 0x43a   : > { %10870 = vmatprep.subr.bf16.mxu0 %v11336_v37 }
 0x43b   : > { %10967 = vmatpush3.bf16.msra.mxu1 %v11335_v23 }
 0x43c   : > { %v6875_v13 = vpop.permute.xlu0 %6874  ;;  %v7001_v26 = vpop.permute.xlu1 %7000  ;;  %v7115_v57 = vld [vmem:[#allocation4 + $0x170] sm:$0xff] }
 0x43d   : > { %v7112_v16 = vld [vmem:[#allocation4 + $0x150] sm:$0xff]  ;;  %6912 = vst.msk [vmem:[#allocation4 + $0x198] sm:$0xff] %vm1138_vm2, %v6875_v13  ;;  %7039 = vst.msk [vmem:[#allocation4 + $0x178] sm:$0xff] %vm1138_vm2, %v7001_v26  ;;  %7525 = vmatprep.mubr.bf16.mxu0 %v7115_v57  ;;  %v11337_v13 = vld [vmem:[%s18122_s9 + $0x20] sm:$0xff]  }
 0x43e   : > { %7679 = vmatmul.mubr.bf16.gmra.mrb[208].mxu1 %v7112_v16  ;;  %10871 = vmatpush3.bf16.msra.mxu0 %v11337_v13  ;;  %v11348_v13 = vld [vmem:[%s18122_s9 + $0x78] sm:$0xff]  }
 0x43f   : > { %10275 = vmatprep.mubr.msk.bf16.mxu1 %vm392_vm1, %v7117_v42  ;;  %v11338_v42 = vld [vmem:[%s18122_s9 + $0xd8] sm:$0xff]  }
 0x440   : > { %v6747_v6 = vpop.permute.xlu1 %6746  ;;  %v7114_v36 = vld [vmem:[#allocation4 + $0x168] sm:$0xff]  ;;  %10968 = vmatprep.subr.bf16.mxu1 %v11338_v42 }
 0x441   : > { %6784 = vst.msk [vmem:[#allocation4 + $0x190] sm:$0xff] %vm1138_vm2, %v6747_v6  ;;  %7526 = vmatmul.mubr.bf16.gmra.mrb[192].mxu0 %v7114_v36  ;;  %v11339_v6 = vld [vmem:[%s18122_s9 + $0x98] sm:$0xff]  }
 0x442   : > { %10969 = vmatpush3.bf16.msra.mxu1 %v11339_v6 }
 0x444   : > { %v7003_v7 = vpop.permute.xlu0 %7002  ;;  %v6877_v14 = vpop.permute.xlu1 %6876  ;;  %v7119_v27 = vld [vmem:[#allocation4 + $0x198] sm:$0xff] }
 0x445   : > { %v7116_v54 = vld [vmem:[#allocation4 + $0x178] sm:$0xff]  ;;  %7040 = vst.msk [vmem:[#allocation4 + $0x1a0] sm:$0xff] %vm1138_vm2, %v7003_v7  ;;  %6913 = vst.msk [vmem:[#allocation4 + $0x1c0] sm:$0xff] %vm1138_vm2, %v6877_v14  ;;  %7533 = vmatprep.mubr.bf16.mxu0 %v7119_v27  ;;  %v17155_v14 = vld [vmem:[%s18121_s8] ss:$0 sm:$0xff] }
 0x446   : > { %7687 = vmatmul.mubr.bf16.gmra.mrb[212].mxu1 %v7116_v54  ;;  %v11340_v27 = vld [vmem:[%s18122_s9 + $0x68] sm:$0xff]  }
 0x447   : > { %10276 = vmatprep.mubr.msk.bf16.mxu1 %vm392_vm1, %v7121_v53  ;;  %10872 = vmatprep.subr.bf16.mxu0 %v11340_v27 }
 0x448   : > { %v6749_v50 = vpop.permute.xlu0 %6748  ;;  %v7118_v25 = vld [vmem:[#allocation4 + $0x190] sm:$0xff] }
 0x449   : > { %6785 = vst.msk [vmem:[#allocation4 + $0x1b8] sm:$0xff] %vm1138_vm2, %v6749_v50  ;;  %7534 = vmatmul.mubr.bf16.gmra.mrb[196].mxu0 %v7118_v25 }
 0x44c   : > { %v6879_v56 = vpop.permute.xlu0 %6878  ;;  %v7005_v60 = vpop.permute.xlu1 %7004  ;;  %v7123_v1 = vld [vmem:[#allocation4 + $0x1c0] sm:$0xff] }
 0x44d   : > { %v7120_v48 = vld [vmem:[#allocation4 + $0x1a0] sm:$0xff]  ;;  %6914 = vst.msk [vmem:[#allocation4 + $0x1e8] sm:$0xff] %vm1138_vm2, %v6879_v56  ;;  %7041 = vst.msk [vmem:[#allocation4 + $0x1c8] sm:$0xff] %vm1138_vm2, %v7005_v60  ;;  %7541 = vmatprep.mubr.bf16.mxu0 %v7123_v1  ;;  %v11341_v1 = vld [vmem:[%s18122_s9 + $0x28] sm:$0xff]  }
 0x44e   : > { %7695 = vmatmul.mubr.bf16.gmra.mrb[216].mxu1 %v7120_v48  ;;  %v11342_v48 = vld [vmem:[%s18122_s9 + $0xe0] sm:$0xff]   ;;  %10873 = vmatpush3.bf16.msra.mxu0 %v11341_v1 }
 0x44f   : > { %10277 = vmatprep.mubr.msk.bf16.mxu1 %vm392_vm1, %v7125_v32  ;;  %v11343_v32 = vld [vmem:[%s18122_s9 + $0xa0] sm:$0xff]   ;;  %10970 = vmatprep.subr.bf16.mxu1 %v11342_v48 }
 0x450   : > { %v6751_v59 = vpop.permute.xlu1 %6750  ;;  %v7122_v30 = vld [vmem:[#allocation4 + $0x1b8] sm:$0xff]  ;;  %10971 = vmatpush3.bf16.msra.mxu1 %v11343_v32 }
 0x451   : > { %6786 = vst.msk [vmem:[#allocation4 + $0x1e0] sm:$0xff] %vm1138_vm2, %v6751_v59  ;;  %7542 = vmatmul.mubr.bf16.gmra.mrb[200].mxu0 %v7122_v30 }
 0x454   : > { %v7007_v47 = vpop.permute.xlu0 %7006  ;;  %v6881_v24 = vpop.permute.xlu1 %6880  ;;  %v7127_v5 = vld [vmem:[#allocation4 + $0x1e8] sm:$0xff] }
 0x455   : > { %v7124_v9 = vld [vmem:[#allocation4 + $0x1c8] sm:$0xff]  ;;  %7042 = vst.msk [vmem:[#allocation4 + $0x1f0] sm:$0xff] %vm1138_vm2, %v7007_v47  ;;  %6915 = vst.msk [vmem:[#allocation4 + $0x210] sm:$0xff] %vm1138_vm2, %v6881_v24  ;;  %7549 = vmatprep.mubr.bf16.mxu0 %v7127_v5 }
 0x456   : > { %7703 = vmatmul.mubr.bf16.gmra.mrb[220].mxu1 %v7124_v9 }
 0x457   : > { %10278 = vmatprep.mubr.msk.bf16.mxu1 %vm392_vm1, %v7129_v58 }
 0x458   : > { %v6753_v22 = vpop.permute.xlu0 %6752  ;;  %v7126_v0 = vld [vmem:[#allocation4 + $0x1e0] sm:$0xff] }
 0x459   : > { %6787 = vst.msk [vmem:[#allocation4 + $0x208] sm:$0xff] %vm1138_vm2, %v6753_v22  ;;  %7550 = vmatmul.mubr.bf16.gmra.mrb[204].mxu0 %v7126_v0 }
 0x45c   : > { %v6883_v19 = vpop.permute.xlu0 %6882  ;;  %v7009_v43 = vpop.permute.xlu1 %7008  ;;  %v7131_v51 = vld [vmem:[#allocation4 + $0x210] sm:$0xff] }
 0x45d   : > { %v7128_v20 = vld [vmem:[#allocation4 + $0x1f0] sm:$0xff]  ;;  %6916 = vst.msk [vmem:[#allocation4 + $0x238] sm:$0xff] %vm1138_vm2, %v6883_v19  ;;  %7043 = vst.msk [vmem:[#allocation4 + $0x218] sm:$0xff] %vm1138_vm2, %v7009_v43  ;;  %7557 = vmatprep.mubr.bf16.mxu0 %v7131_v51 }
 0x45e   : > { %7711 = vmatmul.mubr.bf16.gmra.mrb[224].mxu1 %v7128_v20  ;;  %v11344_v19 = vld [vmem:[%s18122_s9 + $0x70] sm:$0xff]  }
 0x45f   : > { %10279 = vmatprep.mubr.msk.bf16.mxu1 %vm392_vm1, %v7133_v11  ;;  %v11345_v43 = vld [vmem:[%s18122_s9 + $0x30] sm:$0xff]   ;;  %10874 = vmatprep.subr.bf16.mxu0 %v11344_v19 }
 0x460   : > { %v7011_v33 = vpop.permute.xlu0 %7010  ;;  %v6755_v15 = vpop.permute.xlu1 %6754  ;;  %v7130_v45 = vld [vmem:[#allocation4 + $0x208] sm:$0xff]  ;;  %10875 = vmatpush3.bf16.msra.mxu0 %v11345_v43 }
 0x461   : > { %7044 = vst.msk [vmem:[#allocation4 + $0x240] sm:$0xff] %vm1138_vm2, %v7011_v33  ;;  %6788 = vst.msk [vmem:[#allocation4 + $0x230] sm:$0xff] %vm1138_vm2, %v6755_v15  ;;  %7558 = vmatmul.mubr.bf16.gmra.mrb[208].mxu0 %v7130_v45  ;;  %10876 = vmatprep.subr.bf16.mxu0 %v11348_v13 }
 0x464   : > { %v6757_v35 = vpop.permute.xlu0 %6756  ;;  %v6885_v63 = vpop.permute.xlu1 %6884  ;;  %v7135_v46 = vld [vmem:[#allocation4 + $0x238] sm:$0xff] }
 0x465   : > { %v7132_v8 = vld [vmem:[#allocation4 + $0x218] sm:$0xff]  ;;  %6789 = vst.msk [vmem:[#allocation4 + $0x258] sm:$0xff] %vm1138_vm2, %v6757_v35  ;;  %6917 = vst.msk [vmem:[#allocation4 + $0x260] sm:$0xff] %vm1138_vm2, %v6885_v63  ;;  %7565 = vmatprep.mubr.bf16.mxu0 %v7135_v46 }
 0x466   : > { %7719 = vmatmul.mubr.bf16.gmra.mrb[228].mxu1 %v7132_v8 }
 0x467   : > { %10280 = vmatprep.mubr.msk.bf16.mxu1 %vm392_vm1, %v7137_v52 }
 0x468   : > { %v7134_v21 = vld [vmem:[#allocation4 + $0x230] sm:$0xff]  ;;  %v7013_v2 = vpop.permute.xlu1 %7012  ;;  %v7136_v10 = vld [vmem:[#allocation4 + $0x240] sm:$0xff] }
 0x469   : > { %7566 = vmatmul.mubr.bf16.gmra.mrb[212].mxu0 %v7134_v21  ;;  %7045 = vst.msk [vmem:[#allocation4 + $0x268] sm:$0xff] %vm1138_vm2, %v7013_v2 }
 0x46c   : > { %v7139_v62 = vld [vmem:[#allocation4 + $0x260] sm:$0xff]  ;;  %v7138_v61 = vld [vmem:[#allocation4 + $0x258] sm:$0xff] }
 0x46d   : > { %7573 = vmatprep.mubr.bf16.mxu0 %v7139_v62 }
 0x46e   : > { %7727 = vmatmul.mubr.bf16.gmra.mrb[232].mxu1 %v7136_v10 }
 0x46f   : > { %10281 = vmatprep.mubr.msk.bf16.mxu1 %vm392_vm1, %v7141_v18 }
 0x470   : > { %v7140_v29 = vld [vmem:[#allocation4 + $0x268] sm:$0xff] }
 0x471   : > { %7574 = vmatmul.mubr.bf16.gmra.mrb[216].mxu0 %v7138_v61 }
 0x476   : > { %7735 = vmatmul.mubr.bf16.gmra.mrb[236].mxu1 %v7140_v29  ;;  %v11346_v29 = vld [vmem:[%s18122_s9 + $0xe8] sm:$0xff]  }
 0x477   : > { %10972 = vmatprep.subr.bf16.mxu1 %v11346_v29 }
 0x478   : > { %10973 = vmatpush3.bf16.msra.mxu1 %v11347_v41 }
 0x4c2   : > { %v10766_v49 = vpop.f32.mrb[156].mxu0 }
 0x4c3   : > { %v10767_v26 = vpop.f32.mrb[157].mxu0 }
 0x4c4   : > { %v10768_v57 = vadd.f32 %v10767_v26, %v10766_v49  ;;  %v10769_v16 = vpop.f32.mrb[158].mxu0  ;;  %v11349_v26 = vld [vmem:[%s18122_s9 + $0x38] sm:$0xff]  }
 0x4c5   : > { %v10770_v36 = vpop.f32.mrb[159].mxu0  ;;  %10877 = vmatpush3.bf16.msra.mxu0 %v11349_v26 }
 0x4c6   : > { %v10771_v7 = vadd.f32 %v10770_v36, %v10769_v16  ;;  %v7456_v54 = vadd.f32 %v10768_v57, %v17155_v14 }
 0x4c8   : > { %v7459_v56 = vadd.f32 %v10771_v7, %v17155_v14 }
 0x4d0   : > { %v7616_v53 = vpop.f32.mrb[176].mxu1 }
 0x4d1   : > { %v7617_v50 = vadd.f32 %v7616_v53, %v7456_v54  ;;  %v7618_v25 = vpop.f32.mrb[177].mxu1 }
 0x4d2   : > { %v7619_v60 = vpop.f32.mrb[178].mxu1 }
 0x4d3   : > { %v7620_v59 = vadd.f32 %v7619_v60, %v7459_v56  ;;  %v7621_v30 = vpop.f32.mrb[179].mxu1  ;;  %v7743_v24 = vmax.f32 %v7617_v50, 0.0 }
 0x4d4   : > { %v10772_v47 = vpop.f32.mrb[160].mxu0 }
 0x4d5   : > { %v7744_v5 = vmax.f32 %v7620_v59, 0.0  ;;  %v10773_v9 = vpop.f32.mrb[161].mxu0 }
 0x4d6   : > { %v10774_v58 = vadd.f32 %v10773_v9, %v10772_v47  ;;  %v10775_v22 = vpop.f32.mrb[162].mxu0 }
 0x4d7   : > { %v7775_v0 = vpack.c.bf16 %v7744_v5, %v7743_v24  ;;  %v10776_v11 = vpop.f32.mrb[163].mxu0 }
 0x4d8   : > { %v10777_v51 = vadd.f32 %v10776_v11, %v10775_v22  ;;  %v7464_v20 = vadd.f32 %v10774_v58, %v17155_v14 }
 0x4d9   : > { %v7624_v33 = vpop.f32.mrb[180].mxu1  ;;  %7791 = vst.msk [vmem:[#allocation2 + $0x8] sm:$0xff] %vm392_vm1, %v7775_v0 }
 0x4da   : > { %v7626_v15 = vpop.f32.mrb[181].mxu1  ;;  %v7625_v45 = vadd.f32 %v7624_v33, %v7464_v20  ;;  %v7467_v52 = vadd.f32 %v10777_v51, %v17155_v14  ;;  %v11350_v51 = vld [vmem:[%s18122_s9 + $0xf0] sm:$0xff]  }
 0x4db   : > { %v7627_v35 = vpop.f32.mrb[182].mxu1  ;;  %10974 = vmatprep.subr.bf16.mxu1 %v11350_v51 }
 0x4dc   : > { %v7629_v63 = vpop.f32.mrb[183].mxu1  ;;  %v7628_v46 = vadd.f32 %v7627_v35, %v7467_v52  ;;  %v10778_v8 = vpop.f32.mrb[164].mxu0  ;;  %v7745_v2 = vmax.f32 %v7625_v45, 0.0 }
 0x4dd   : > { %v10779_v21 = vpop.f32.mrb[165].mxu0 }
 0x4de   : > { %v7746_v10 = vmax.f32 %v7628_v46, 0.0  ;;  %v10780_v18 = vadd.f32 %v10779_v21, %v10778_v8  ;;  %v10781_v62 = vpop.f32.mrb[166].mxu0 }
 0x4df   : > { %v10782_v61 = vpop.f32.mrb[167].mxu0 }
 0x4e0   : > { %v7776_v55 = vpack.c.bf16 %v7746_v10, %v7745_v2  ;;  %v10783_v3 = vadd.f32 %v10782_v61, %v10781_v62  ;;  %v7472_v39 = vadd.f32 %v10780_v18, %v17155_v14  ;;  %v7807_v44 = vld [vmem:[#allocation2 + $0x8] sm:$0xff] }
 0x4e1   : > { %v7632_v28 = vpop.f32.mrb[184].mxu1  ;;  %v7835_v31 = vld [vmem:[#allocation2 + $0x8] sm:$0xff]  ;;  %7821 = vst.msk [vmem:[#allocation4] sm:$0xff] %vm392_vm1, %v7807_v44 }
 0x4e2   : > { %v7634_v40 = vpop.f32.mrb[185].mxu1  ;;  %7792 = vst.msk [vmem:[#allocation2 + $0x10] sm:$0xff] %vm392_vm1, %v7776_v55  ;;  %v7633_v34 = vadd.f32 %v7632_v28, %v7472_v39  ;;  %v7475_v17 = vadd.f32 %v10783_v3, %v17155_v14  ;;  %v7853_v49 = vshll.u32 %v7835_v31, 16  ;;  %v8022_v25 = vld [vmem:[#allocation2 + $0x8] sm:$0xfe]  ;;  %v7851_v30 = vshrl.u32 %v7835_v31, 16 }
 0x4e3   : > { %v7635_v38 = vpop.f32.mrb[186].mxu1  ;;  %v8052_v5 = vrot.slane %v8022_v25, 1  ;;  %v11351_v39 = vld [vmem:[%s18122_s9 + $0xb0] sm:$0xff]  }
 0x4e4   : > { %v7637_v12 = vpop.f32.mrb[187].mxu1  ;;  %v7636_v4 = vadd.f32 %v7635_v38, %v7475_v17  ;;  %v10784_v23 = vpop.f32.mrb[168].mxu0  ;;  %v7747_v57 = vmax.f32 %v7633_v34, 0.0  ;;  %v7855_v50 = vrot.slane %v7853_v49, 1  ;;  %10975 = vmatpush3.bf16.msra.mxu1 %v11351_v39 }
 0x4e5   : > { %v10785_v37 = vpop.f32.mrb[169].mxu0 }
 0x4e6   : > { %v7748_v16 = vmax.f32 %v7636_v4, 0.0  ;;  %v10786_v42 = vadd.f32 %v10785_v37, %v10784_v23  ;;  %v10787_v6 = vpop.f32.mrb[170].mxu0  ;;  %v7856_v0 = vor.u32 %v7855_v50, %v7851_v30 }
 0x4e7   : > { %v10788_v36 = vpop.f32.mrb[171].mxu0 }
 0x4e8   : > { %v7777_v7 = vpack.c.bf16 %v7748_v16, %v7747_v57  ;;  %v10789_v27 = vadd.f32 %v10788_v36, %v10787_v6  ;;  %v7480_v54 = vadd.f32 %v10786_v42, %v17155_v14 }
 0x4e9   : > { %v7640_v53 = vpop.f32.mrb[188].mxu1  ;;  %v8109_v60 = vld [vmem:[#allocation2 + $0x10] sm:$0xff] }
 0x4ea   : > { %v7642_v56 = vpop.f32.mrb[189].mxu1  ;;  %v17197_v1 = vld [vmem:[#allocation2 + $0x10] sm:$0xff]  ;;  %7793 = vst.msk [vmem:[#allocation2 + $0x18] sm:$0xff] %vm392_vm1, %v7777_v7  ;;  %v7641_v48 = vadd.f32 %v7640_v53, %v7480_v54  ;;  %8137 = vrot.lane.b32.xlu0 %v8109_v60, %s11376_s15  ;;  %v7483_v32 = vadd.f32 %v10789_v27, %v17155_v14  ;;  %v7858_v47 = vshll.u32 %v8109_v60, 16  ;;  %v7862_v55 = vshrl.u32 %v8109_v60, 16 }
 0x4eb   : > { %v7643_v59 = vpop.f32.mrb[190].mxu1  ;;  %7822 = vst.msk [vmem:[#allocation4 + $0x28] sm:$0xff] %vm392_vm1, %v17197_v1  ;;  %v8053_v9 = vrot.slane %v17197_v1, 1  ;;  %v11352_v56 = vld [vmem:[%s18122_s9 + $0x100] sm:$0xff]  }
 0x4ec   : > { %v7645_v24 = vpop.f32.mrb[191].mxu1  ;;  %v7644_v58 = vadd.f32 %v7643_v59, %v7483_v32  ;;  %v10790_v22 = vpop.f32.mrb[172].mxu0  ;;  %v7860_v11 = vrot.slane %v7858_v47, 1  ;;  %v7749_v20 = vmax.f32 %v7641_v48, 0.0  ;;  %11116 = vmatprep.subr.bf16.mxu0 %v11352_v56 }
 0x4ed   : > { %v10791_v19 = vpop.f32.mrb[173].mxu0  ;;  %v8054_v43 = vsel %vm1183_vm10, %v8052_v5, %v8053_v9 }
 0x4ee   : > { %v7750_v33 = vmax.f32 %v7644_v58, 0.0  ;;  %v10792_v15 = vadd.f32 %v10791_v19, %v10790_v22  ;;  %v10793_v45 = vpop.f32.mrb[174].mxu0  ;;  %v7861_v52 = vsel %vm979_vm12, %v7856_v0, %v7860_v11  ;;  %8095 = vst.msk [vmem:[#allocation4 + $0x8] sm:$0xff] %vm392_vm1, %v8054_v43  ;;  %v7864_v34 = vor.u32 %v7862_v55, %v7860_v11 }
 0x4ef   : > { %7966 = vrot.lane.b32.xlu1 %v7861_v52, %s11376_s15  ;;  %v10794_v35 = vpop.f32.mrb[175].mxu0 }
 0x4f0   : > { %v7778_v63 = vpack.c.bf16 %v7750_v33, %v7749_v20  ;;  %v10795_v46 = vadd.f32 %v10794_v35, %v10793_v45  ;;  %v7488_v8 = vadd.f32 %v10792_v15, %v17155_v14 }
 0x4f1   : > { %v7648_v21 = vpop.f32.mrb[192].mxu1  ;;  %v17213_v10 = vld [vmem:[#allocation2 + $0x18] sm:$0xff] }
 0x4f2   : > { %v7650_v2 = vpop.f32.mrb[193].mxu1  ;;  %v17215_v18 = vld [vmem:[#allocation2 + $0x18] sm:$0xff]  ;;  %7794 = vst.msk [vmem:[#allocation2 + $0x20] sm:$0xff] %vm392_vm1, %v7778_v63  ;;  %v7649_v62 = vadd.f32 %v7648_v21, %v7488_v8  ;;  %8139 = vrot.lane.b32.xlu0 %v17213_v10, %s11376_s15  ;;  %v7491_v61 = vadd.f32 %v10795_v46, %v17155_v14  ;;  %v7866_v3 = vshll.u32 %v17213_v10, 16  ;;  %v7870_v50 = vshrl.u32 %v17213_v10, 16 }
 0x4f3   : > { %v7651_v29 = vpop.f32.mrb[194].mxu1  ;;  %7823 = vst.msk [vmem:[#allocation4 + $0x50] sm:$0xff] %vm392_vm1, %v17215_v18  ;;  %8481 = vst.msk [vmem:[#allocation4 + $0x18] sm:$0xff] %vm392_vm1, %v17215_v18  ;;  %v8055_v44 = vrot.slane %v17215_v18, 1 }
 0x4f4   : > { %v7653_v28 = vpop.f32.mrb[195].mxu1  ;;  %v7652_v40 = vadd.f32 %v7651_v29, %v7491_v61  ;;  %v10796_v31 = vpop.f32.mrb[176].mxu0  ;;  %v7868_v17 = vrot.slane %v7866_v3, 1  ;;  %v7751_v12 = vmax.f32 %v7649_v62, 0.0  ;;  %v11354_v62 = vld [vmem:[%s18122_s9 + $0xb8] sm:$0xff]  }
 0x4f5   : > { %v10797_v38 = vpop.f32.mrb[177].mxu0  ;;  %v8056_v41 = vsel %vm1183_vm10, %v8053_v9, %v8055_v44  ;;  %v11353_v9 = vld [vmem:[%s18122_s9 + $0xf8] sm:$0xff]  }
 0x4f6   : > { %v7752_v4 = vmax.f32 %v7652_v40, 0.0  ;;  %v10798_v23 = vadd.f32 %v10797_v38, %v10796_v31  ;;  %v10799_v49 = vpop.f32.mrb[178].mxu0  ;;  %v7869_v37 = vsel %vm979_vm12, %v7864_v34, %v7868_v17  ;;  %8096 = vst.msk [vmem:[#allocation4 + $0x30] sm:$0xff] %vm392_vm1, %v8056_v41  ;;  %v7872_v30 = vor.u32 %v7870_v50, %v7868_v17  ;;  %10976 = vmatprep.subr.bf16.mxu1 %v11353_v9 }
 0x4f7   : > { %7968 = vrot.lane.b32.xlu1 %v7869_v37, %s11376_s15  ;;  %v10800_v13 = vpop.f32.mrb[179].mxu0  ;;  %10977 = vmatpush3.bf16.msra.mxu1 %v11354_v62 }
 0x4f8   : > { %v7779_v26 = vpack.c.bf16 %v7752_v4, %v7751_v12  ;;  %v10801_v57 = vadd.f32 %v10800_v13, %v10799_v49  ;;  %v7496_v16 = vadd.f32 %v10798_v23, %v17155_v14  ;;  %11152 = vmatprep.subr.bf16.mxu1 %v11352_v56 }
 0x4f9   : > { %v7656_v42 = vpop.f32.mrb[196].mxu1  ;;  %v17235_v36 = vld [vmem:[#allocation2 + $0x20] sm:$0xff] }
 0x4fa   : > { %v7658_v6 = vpop.f32.mrb[197].mxu1  ;;  %v17237_v7 = vld [vmem:[#allocation2 + $0x20] sm:$0xff]  ;;  %7795 = vst.msk [vmem:[#allocation2 + $0x28] sm:$0xff] %vm392_vm1, %v7779_v26  ;;  %v7657_v27 = vadd.f32 %v7656_v42, %v7496_v16  ;;  %v7499_v54 = vadd.f32 %v10801_v57, %v17155_v14  ;;  %8141 = vrot.lane.b32.xlu0 %v17235_v36, %s11376_s15  ;;  %v7874_v25 = vshll.u32 %v17235_v36, 16  ;;  %v7878_v21 = vshrl.u32 %v17235_v36, 16 }
 0x4fb   : > { %v7659_v53 = vpop.f32.mrb[198].mxu1  ;;  %7824 = vst.msk [vmem:[#allocation4 + $0x78] sm:$0xff] %vm392_vm1, %v17237_v7  ;;  %8482 = vst.msk [vmem:[#allocation4 + $0x40] sm:$0xff] %vm392_vm1, %v17237_v7  ;;  %v17253_v48 = vrot.slane %v17237_v7, 1 }
 0x4fc   : > { %v7661_v60 = vpop.f32.mrb[199].mxu1  ;;  %v7660_v32 = vadd.f32 %v7659_v53, %v7499_v54  ;;  %v10802_v59 = vpop.f32.mrb[180].mxu0  ;;  %v7876_v47 = vrot.slane %v7874_v25, 1  ;;  %v7753_v58 = vmax.f32 %v7657_v27, 0.0  ;;  %v8211_v25 = vshll.u32 %v17197_v1, 16 }
 0x4fd   : > { %v10803_v24 = vpop.f32.mrb[181].mxu0  ;;  %v8058_v5 = vsel %vm1183_vm10, %v8055_v44, %v17253_v48 }
 0x4fe   : > { %v7754_v22 = vmax.f32 %v7660_v32, 0.0  ;;  %v10804_v0 = vadd.f32 %v10803_v24, %v10802_v59  ;;  %v10805_v11 = vpop.f32.mrb[182].mxu0  ;;  %v17261_v19 = vsel %vm979_vm12, %v7872_v30, %v7876_v47  ;;  %8097 = vst.msk [vmem:[#allocation4 + $0x58] sm:$0xff] %vm392_vm1, %v8058_v5  ;;  %v7880_v39 = vor.u32 %v7878_v21, %v7876_v47 }
 0x4ff   : > { %v10806_v43 = vpop.f32.mrb[183].mxu0  ;;  %7970 = vrot.lane.b32.xlu1 %v17261_v19, %s11376_s15  ;;  %v8216_v30 = vshll.u32 %v17215_v18, 16  ;;  %v8209_v5 = vshrl.u32 %v17197_v1, 16  ;;  %v8213_v9 = vrot.slane %v8211_v25, 1 }
 0x500   : > { %v7780_v51 = vpack.c.bf16 %v7754_v22, %v7753_v58  ;;  %v10807_v20 = vadd.f32 %v10806_v43, %v10805_v11  ;;  %v7504_v33 = vadd.f32 %v10804_v0, %v17155_v14 }
 0x501   : > { %v7664_v15 = vpop.f32.mrb[200].mxu1  ;;  %v17267_v52 = vld [vmem:[#allocation2 + $0x28] sm:$0xff] }
 0x502   : > { %v7666_v45 = vpop.f32.mrb[201].mxu1  ;;  %v17269_v35 = vld [vmem:[#allocation2 + $0x28] sm:$0xff]  ;;  %7796 = vst.msk [vmem:[#allocation2 + $0x30] sm:$0xff] %vm392_vm1, %v7780_v51  ;;  %v7665_v63 = vadd.f32 %v7664_v15, %v7504_v33  ;;  %v7507_v46 = vadd.f32 %v10807_v20, %v17155_v14  ;;  %8143 = vrot.lane.b32.xlu0 %v17267_v52, %s11376_s15  ;;  %v7882_v2 = vshll.u32 %v17267_v52, 16  ;;  %v7886_v27 = vshrl.u32 %v17267_v52, 16 }
 0x503   : > { %v7667_v8 = vpop.f32.mrb[202].mxu1  ;;  %7825 = vst.msk [vmem:[#allocation4 + $0xa0] sm:$0xff] %vm392_vm1, %v17269_v35  ;;  %8483 = vst.msk [vmem:[#allocation4 + $0x68] sm:$0xff] %vm392_vm1, %v17269_v35  ;;  %v8059_v29 = vrot.slane %v17269_v35, 1  ;;  %v8214_v20 = vor.u32 %v8213_v9, %v8209_v5  ;;  %v8218_v33 = vrot.slane %v8216_v30, 1 }
 0x504   : > { %v7669_v61 = vpop.f32.mrb[203].mxu1  ;;  %v7668_v55 = vadd.f32 %v7667_v8, %v7507_v46  ;;  %v10808_v3 = vpop.f32.mrb[184].mxu0  ;;  %v7884_v28 = vrot.slane %v7882_v2, 1  ;;  %v7755_v31 = vmax.f32 %v7665_v63, 0.0  ;;  %v8352_v46 = vld [vmem:[#allocation2 + $0x10] sm:$0xfe] }
 0x505   : > { %v10809_v44 = vpop.f32.mrb[185].mxu0  ;;  %v8060_v40 = vsel %vm1183_vm10, %v17253_v48, %v8059_v29  ;;  %v8383_v2 = vrot.slane %v17213_v10, 1  ;;  %v8219_v61 = vsel %vm979_vm12, %v8214_v20, %v8218_v33  ;;  %v8228_v20 = vshrl.u32 %v17237_v7, 16 }
 0x506   : > { %v7756_v34 = vmax.f32 %v7668_v55, 0.0  ;;  %v10810_v17 = vadd.f32 %v10809_v44, %v10808_v3  ;;  %v10811_v38 = vpop.f32.mrb[186].mxu0  ;;  %v17288_v41 = vsel %vm979_vm12, %v7880_v39, %v7884_v28  ;;  %8098 = vst.msk [vmem:[#allocation4 + $0x80] sm:$0xff] %vm392_vm1, %v8060_v40  ;;  %8756 = vst.msk [vmem:[#allocation4 + $0x48] sm:$0xff] %vm392_vm1, %v8060_v40  ;;  %v7888_v32 = vor.u32 %v7886_v27, %v7884_v28 }
 0x507   : > { %v10812_v12 = vpop.f32.mrb[187].mxu0  ;;  %7972 = vrot.lane.b32.xlu1 %v17288_v41, %s11376_s15  ;;  %8338 = vst.msk [vmem:[#allocation4 + $0x10] sm:$0xff] %vm392_vm1, %v8219_v61  ;;  %v8382_v40 = vrot.slane %v8352_v46, 1 }
 0x508   : > { %v7781_v4 = vpack.c.bf16 %v7756_v34, %v7755_v31  ;;  %v10813_v23 = vadd.f32 %v10812_v12, %v10811_v38  ;;  %v7512_v49 = vadd.f32 %v10810_v17, %v17155_v14  ;;  %v8220_v34 = vshrl.u32 %v17215_v18, 16 }
 0x509   : > { %v7672_v37 = vpop.f32.mrb[204].mxu1  ;;  %v17295_v26 = vld [vmem:[#allocation2 + $0x30] sm:$0xff]  ;;  %v8224_v17 = vshll.u32 %v17237_v7, 16 }
 0x50a   : > { %v7674_v13 = vpop.f32.mrb[205].mxu1  ;;  %v17297_v57 = vld [vmem:[#allocation2 + $0x30] sm:$0xff]  ;;  %7797 = vst.msk [vmem:[#allocation2 + $0x38] sm:$0xff] %vm392_vm1, %v7781_v4  ;;  %v7673_v16 = vadd.f32 %v7672_v37, %v7512_v49  ;;  %v7515_v42 = vadd.f32 %v10813_v23, %v17155_v14  ;;  %8145 = vrot.lane.b32.xlu0 %v17295_v26, %s11376_s15  ;;  %v7890_v54 = vshll.u32 %v17295_v26, 16  ;;  %v7894_v39 = vshrl.u32 %v17295_v26, 16 }
 0x50b   : > { %v7675_v6 = vpop.f32.mrb[206].mxu1  ;;  %7826 = vst.msk [vmem:[#allocation4 + $0xc8] sm:$0xff] %vm392_vm1, %v17297_v57  ;;  %8484 = vst.msk [vmem:[#allocation4 + $0x90] sm:$0xff] %vm392_vm1, %v17297_v57  ;;  %v8061_v50 = vrot.slane %v17297_v57, 1  ;;  %v8384_v37 = vsel %vm1183_vm10, %v8382_v40, %v8383_v2 }
 0x50c   : > { %v7677_v53 = vpop.f32.mrb[207].mxu1  ;;  %v7676_v56 = vadd.f32 %v7675_v6, %v7515_v42  ;;  %v10814_v60 = vpop.f32.mrb[188].mxu0  ;;  %v7892_v59 = vrot.slane %v7890_v54, 1  ;;  %v7757_v58 = vmax.f32 %v7673_v16, 0.0  ;;  %v8222_v16 = vor.u32 %v8220_v34, %v8218_v33 }
 0x50d   : > { %v10815_v47 = vpop.f32.mrb[189].mxu0  ;;  %v8062_v24 = vsel %vm1183_vm10, %v8059_v29, %v8061_v50  ;;  %v8232_v33 = vshll.u32 %v17269_v35, 16 }
 0x50e   : > { %v7758_v22 = vmax.f32 %v7676_v56, 0.0  ;;  %v10816_v0 = vadd.f32 %v10815_v47, %v10814_v60  ;;  %v10817_v11 = vpop.f32.mrb[190].mxu0  ;;  %v17315_v43 = vsel %vm979_vm12, %v7888_v32, %v7892_v59  ;;  %8099 = vst.msk [vmem:[#allocation4 + $0xa8] sm:$0xff] %vm392_vm1, %v8062_v24  ;;  %8757 = vst.msk [vmem:[#allocation4 + $0x70] sm:$0xff] %vm392_vm1, %v8062_v24  ;;  %v7896_v4 = vor.u32 %v7894_v39, %v7892_v59 }
 0x50f   : > { %v10818_v51 = vpop.f32.mrb[191].mxu0  ;;  %7974 = vrot.lane.b32.xlu1 %v17315_v43, %s11376_s15  ;;  %v8385_v47 = vrot.slane %v17235_v36, 1 }
 0x510   : > { %v7782_v15 = vpack.c.bf16 %v7758_v22, %v7757_v58  ;;  %v10819_v1 = vadd.f32 %v10818_v51, %v10817_v11  ;;  %v7520_v45 = vadd.f32 %v10816_v0, %v17155_v14 }
 0x511   : > { %v7680_v63 = vpop.f32.mrb[208].mxu1  ;;  %v17322_v21 = vld [vmem:[#allocation2 + $0x38] sm:$0xff] }
 0x512   : > { %v7682_v8 = vpop.f32.mrb[209].mxu1  ;;  %v17325_v62 = vld [vmem:[#allocation2 + $0x38] sm:$0xff]  ;;  %7798 = vst.msk [vmem:[#allocation2 + $0x40] sm:$0xff] %vm392_vm1, %v7782_v15  ;;  %v7681_v29 = vadd.f32 %v7680_v63, %v7520_v45  ;;  %v7523_v55 = vadd.f32 %v10819_v1, %v17155_v14  ;;  %8147 = vrot.lane.b32.xlu0 %v17322_v21, %s11376_s15  ;;  %v7898_v28 = vshll.u32 %v17322_v21, 16  ;;  %v7902_v22 = vshrl.u32 %v17322_v21, 16 }
 0x513   : > { %v7683_v3 = vpop.f32.mrb[210].mxu1  ;;  %7827 = vst.msk [vmem:[#allocation4 + $0xf0] sm:$0xff] %vm392_vm1, %v17325_v62  ;;  %8485 = vst.msk [vmem:[#allocation4 + $0xb8] sm:$0xff] %vm392_vm1, %v17325_v62  ;;  %8626 = vrot.lane.b32.xlu1 %v17261_v19, %s11376_s15  ;;  %v8063_v31 = vrot.slane %v17325_v62, 1  ;;  %v8226_v19 = vrot.slane %v8224_v17, 1  ;;  %v8386_v8 = vsel %vm1183_vm10, %v8383_v2, %v8385_v47 }
 0x514   : > { %v7685_v44 = vpop.f32.mrb[211].mxu1  ;;  %v7684_v38 = vadd.f32 %v7683_v3, %v7523_v55  ;;  %v10820_v12 = vpop.f32.mrb[192].mxu0  ;;  %v7900_v23 = vrot.slane %v7898_v28, 1  ;;  %v7759_v42 = vmax.f32 %v7681_v29, 0.0  ;;  %v8234_v29 = vrot.slane %v8232_v33, 1 }
 0x515   : > { %v10821_v49 = vpop.f32.mrb[193].mxu0  ;;  %v8064_v13 = vsel %vm1183_vm10, %v8061_v50, %v8063_v31  ;;  %v8227_v50 = vsel %vm979_vm12, %v8222_v16, %v8226_v19  ;;  %v8230_v61 = vor.u32 %v8228_v20, %v8226_v19 }
 0x516   : > { %v7760_v6 = vmax.f32 %v7684_v38, 0.0  ;;  %v10822_v27 = vadd.f32 %v10821_v49, %v10820_v12  ;;  %v10823_v54 = vpop.f32.mrb[194].mxu0  ;;  %v17349_v18 = vsel %vm979_vm12, %v7896_v4, %v7900_v23  ;;  %8100 = vst.msk [vmem:[#allocation4 + $0xd0] sm:$0xff] %vm392_vm1, %v8064_v13  ;;  %8758 = vst.msk [vmem:[#allocation4 + $0x98] sm:$0xff] %vm392_vm1, %v8064_v13  ;;  %v7904_v45 = vor.u32 %v7902_v22, %v7900_v23 }
 0x517   : > { %v10824_v53 = vpop.f32.mrb[195].mxu0  ;;  %7976 = vrot.lane.b32.xlu0 %v17349_v18, %s11376_s15  ;;  %8411 = vrot.lane.b32.xlu1 %v8384_v37, %s11376_s15  ;;  %8339 = vst.msk [vmem:[#allocation4 + $0x38] sm:$0xff] %vm392_vm1, %v8227_v50  ;;  %v8235_v10 = vsel %vm979_vm12, %v8230_v61, %v8234_v29  ;;  %v8387_v12 = vrot.slane %v17267_v52, 1 }
 0x518   : > { %v7783_v25 = vpack.c.bf16 %v7760_v6, %v7759_v42  ;;  %v10825_v56 = vadd.f32 %v10824_v53, %v10823_v54  ;;  %v7528_v60 = vadd.f32 %v10822_v27, %v17155_v14  ;;  %8340 = vst.msk [vmem:[#allocation4 + $0x60] sm:$0xff] %vm392_vm1, %v8235_v10  ;;  %v8236_v6 = vshrl.u32 %v17269_v35, 16 }
 0x519   : > { %v7688_v32 = vpop.f32.mrb[212].mxu1  ;;  %v17359_v30 = vld [vmem:[#allocation2 + $0x40] sm:$0xff]  ;;  %v8240_v27 = vshll.u32 %v17297_v57, 16 }
 0x51a   : > { %v7690_v59 = vpop.f32.mrb[213].mxu1  ;;  %v17362_v24 = vld [vmem:[#allocation2 + $0x40] sm:$0xff]  ;;  %7799 = vst.msk [vmem:[#allocation2 + $0x48] sm:$0xff] %vm392_vm1, %v7783_v25  ;;  %v7689_v5 = vadd.f32 %v7688_v32, %v7528_v60  ;;  %v7531_v9 = vadd.f32 %v10825_v56, %v17155_v14  ;;  %v7906_v0 = vshll.u32 %v17359_v30, 16  ;;  %v7910_v13 = vshrl.u32 %v17359_v30, 16 }
 0x51b   : > { %v7691_v58 = vpop.f32.mrb[214].mxu1  ;;  %7828 = vst.msk [vmem:[#allocation4 + $0x118] sm:$0xff] %vm392_vm1, %v17362_v24  ;;  %8486 = vst.msk [vmem:[#allocation4 + $0xe0] sm:$0xff] %vm392_vm1, %v17362_v24  ;;  %8149 = vrot.lane.b32.xlu0 %v17359_v30, %s11376_s15  ;;  %8628 = vrot.lane.b32.xlu1 %v17288_v41, %s11376_s15  ;;  %v17377_v51 = vrot.slane %v17362_v24, 1  ;;  %v8388_v60 = vsel %vm1183_vm10, %v8385_v47, %v8387_v12  ;;  %v8238_v32 = vor.u32 %v8236_v6, %v8234_v29 }
 0x51c   : > { %v7693_v11 = vpop.f32.mrb[215].mxu1  ;;  %v7692_v15 = vadd.f32 %v7691_v58, %v7531_v9  ;;  %v10826_v1 = vpop.f32.mrb[196].mxu0  ;;  %v7908_v63 = vrot.slane %v7906_v0, 1  ;;  %v7761_v55 = vmax.f32 %v7689_v5, 0.0  ;;  %v8242_v59 = vrot.slane %v8240_v27, 1 }
 0x51d   : > { %v10827_v46 = vpop.f32.mrb[197].mxu0  ;;  %v8066_v41 = vsel %vm1183_vm10, %v8063_v31, %v17377_v51 }
 0x51e   : > { %v7762_v7 = vmax.f32 %v7692_v15, 0.0  ;;  %v10828_v3 = vadd.f32 %v10827_v46, %v10826_v1  ;;  %v10829_v39 = vpop.f32.mrb[198].mxu0  ;;  %v17389_v28 = vsel %vm979_vm12, %v7904_v45, %v7908_v63  ;;  %8101 = vst.msk [vmem:[#allocation4 + $0xf8] sm:$0xff] %vm392_vm1, %v8066_v41  ;;  %8759 = vst.msk [vmem:[#allocation4 + $0xc0] sm:$0xff] %vm392_vm1, %v8066_v41  ;;  %v7912_v50 = vor.u32 %v7910_v13, %v7908_v63 }
 0x51f   : > { %v10830_v44 = vpop.f32.mrb[199].mxu0  ;;  %7978 = vrot.lane.b32.xlu0 %v17389_v28, %s11376_s15  ;;  %8413 = vrot.lane.b32.xlu1 %v8386_v8, %s11376_s15  ;;  %v8243_v36 = vsel %vm979_vm12, %v8238_v32, %v8242_v59  ;;  %v8389_v45 = vrot.slane %v17295_v26, 1 }
 0x520   : > { %v7784_v2 = vpack.c.bf16 %v7762_v7, %v7761_v55  ;;  %v10831_v40 = vadd.f32 %v10830_v44, %v10829_v39  ;;  %v7536_v31 = vadd.f32 %v10828_v3, %v17155_v14  ;;  %8341 = vst.msk [vmem:[#allocation4 + $0x88] sm:$0xff] %vm392_vm1, %v8243_v36  ;;  %v8244_v3 = vshrl.u32 %v17297_v57, 16 }
 0x521   : > { %v7696_v34 = vpop.f32.mrb[216].mxu1  ;;  %v8116_v38 = vld [vmem:[#allocation2 + $0x48] sm:$0xff]  ;;  %v8248_v39 = vshll.u32 %v17325_v62, 16 }
 0x522   : > { %v7698_v17 = vpop.f32.mrb[217].mxu1  ;;  %v17400_v4 = vld [vmem:[#allocation2 + $0x48] sm:$0xff]  ;;  %7800 = vst.msk [vmem:[#allocation2 + $0x50] sm:$0xff] %vm392_vm1, %v7784_v2  ;;  %v7697_v23 = vadd.f32 %v7696_v34, %v7536_v31  ;;  %v7539_v49 = vadd.f32 %v10831_v40, %v17155_v14  ;;  %v7914_v16 = vshll.u32 %v8116_v38, 16  ;;  %v17412_v42 = vrot.slane %v8116_v38, 1 }
 0x523   : > { %v7699_v37 = vpop.f32.mrb[218].mxu1  ;;  %7829 = vst.msk [vmem:[#allocation4 + $0x140] sm:$0xff] %vm392_vm1, %v17400_v4  ;;  %8487 = vst.msk [vmem:[#allocation4 + $0x108] sm:$0xff] %vm392_vm1, %v17400_v4  ;;  %8151 = vrot.lane.b32.xlu0 %v8116_v38, %s11376_s15  ;;  %8630 = vrot.lane.b32.xlu1 %v17315_v43, %s11376_s15  ;;  %v7918_v61 = vshrl.u32 %v8116_v38, 16  ;;  %v8390_v34 = vsel %vm1183_vm10, %v8387_v12, %v8389_v45  ;;  %v8246_v17 = vor.u32 %v8244_v3, %v8242_v59 }
 0x524   : > { %v7701_v19 = vpop.f32.mrb[219].mxu1  ;;  %v7700_v54 = vadd.f32 %v7699_v37, %v7539_v49  ;;  %v10832_v53 = vpop.f32.mrb[200].mxu0  ;;  %v7916_v25 = vrot.slane %v7914_v16, 1  ;;  %v8068_v43 = vsel %vm1183_vm10, %v17377_v51, %v17412_v42  ;;  %v7763_v35 = vmax.f32 %v7697_v23, 0.0 }
 0x525   : > { %v10833_v56 = vpop.f32.mrb[201].mxu0  ;;  %8102 = vst.msk [vmem:[#allocation4 + $0x120] sm:$0xff] %vm392_vm1, %v8068_v43  ;;  %v8250_v38 = vrot.slane %v8248_v39, 1 }
 0x526   : > { %v7764_v5 = vmax.f32 %v7700_v54, 0.0  ;;  %v10834_v9 = vadd.f32 %v10833_v56, %v10832_v53  ;;  %v10835_v58 = vpop.f32.mrb[202].mxu0  ;;  %v17425_v22 = vsel %vm979_vm12, %v7912_v50, %v7916_v25  ;;  %v7920_v2 = vor.u32 %v7918_v61, %v7916_v25 }
 0x527   : > { %v10836_v0 = vpop.f32.mrb[203].mxu0  ;;  %7980 = vrot.lane.b32.xlu0 %v17425_v22, %s11376_s15  ;;  %8415 = vrot.lane.b32.xlu1 %v8388_v60, %s11376_s15  ;;  %v8251_v52 = vsel %vm979_vm12, %v8246_v17, %v8250_v38  ;;  %v8391_v50 = vrot.slane %v17322_v21, 1 }
 0x528   : > { %v7785_v47 = vpack.c.bf16 %v7764_v5, %v7763_v35  ;;  %v10837_v11 = vadd.f32 %v10836_v0, %v10835_v58  ;;  %v7544_v20 = vadd.f32 %v10834_v9, %v17155_v14  ;;  %8342 = vst.msk [vmem:[#allocation4 + $0xb0] sm:$0xff] %vm392_vm1, %v8251_v52  ;;  %v8252_v9 = vshrl.u32 %v17325_v62, 16 }
 0x529   : > { %v7704_v33 = vpop.f32.mrb[220].mxu1  ;;  %v17434_v1 = vld [vmem:[#allocation2 + $0x50] sm:$0xff]  ;;  %v8256_v58 = vshll.u32 %v17362_v24, 16 }
 0x52a   : > { %v7706_v15 = vpop.f32.mrb[221].mxu1  ;;  %v17437_v63 = vld [vmem:[#allocation2 + $0x50] sm:$0xff]  ;;  %7801 = vst.msk [vmem:[#allocation2 + $0x58] sm:$0xff] %vm392_vm1, %v7785_v47  ;;  %v7705_v46 = vadd.f32 %v7704_v33, %v7544_v20  ;;  %v7547_v8 = vadd.f32 %v10837_v11, %v17155_v14  ;;  %v7922_v29 = vshll.u32 %v17434_v1, 16  ;;  %v8397_v7 = vrot.slane %v17434_v1, 1 }
 0x52b   : > { %v7707_v41 = vpop.f32.mrb[222].mxu1  ;;  %7830 = vst.msk [vmem:[#allocation4 + $0x168] sm:$0xff] %vm392_vm1, %v17437_v63  ;;  %8488 = vst.msk [vmem:[#allocation4 + $0x130] sm:$0xff] %vm392_vm1, %v17437_v63  ;;  %8153 = vrot.lane.b32.xlu0 %v17434_v1, %s11376_s15  ;;  %8632 = vrot.lane.b32.xlu1 %v17349_v18, %s11376_s15  ;;  %v7926_v32 = vshrl.u32 %v17434_v1, 16  ;;  %v8392_v33 = vsel %vm1183_vm10, %v8389_v45, %v8391_v50  ;;  %v8258_v1 = vrot.slane %v8256_v58, 1 }
 0x52c   : > { %v7709_v55 = vpop.f32.mrb[223].mxu1  ;;  %v7708_v44 = vadd.f32 %v7707_v41, %v7547_v8  ;;  %v10838_v10 = vpop.f32.mrb[204].mxu0  ;;  %v7924_v40 = vrot.slane %v7922_v29, 1  ;;  %v17460_v18 = vsel %vm1183_vm10, %v17412_v42, %v8397_v7  ;;  %v7765_v57 = vmax.f32 %v7705_v46, 0.0 }
 0x52d   : > { %v10839_v31 = vpop.f32.mrb[205].mxu0  ;;  %8103 = vst.msk [vmem:[#allocation4 + $0x148] sm:$0xff] %vm392_vm1, %v17460_v18 }
 0x52e   : > { %v7766_v23 = vmax.f32 %v7708_v44, 0.0  ;;  %v10840_v49 = vadd.f32 %v10839_v31, %v10838_v10  ;;  %v10841_v37 = vpop.f32.mrb[206].mxu0  ;;  %v17463_v13 = vsel %vm979_vm12, %v7920_v2, %v7924_v40  ;;  %v7928_v47 = vor.u32 %v7926_v32, %v7924_v40 }
 0x52f   : > { %v10842_v16 = vpop.f32.mrb[207].mxu0  ;;  %7982 = vrot.lane.b32.xlu0 %v17463_v13, %s11376_s15  ;;  %8417 = vrot.lane.b32.xlu1 %v8390_v34, %s11376_s15  ;;  %v8393_v10 = vrot.slane %v17359_v30, 1  ;;  %v8260_v30 = vshrl.u32 %v17362_v24, 16 }
 0x530   : > { %v7786_v12 = vpack.c.bf16 %v7766_v23, %v7765_v57  ;;  %v10843_v19 = vadd.f32 %v10842_v16, %v10841_v37  ;;  %v7552_v6 = vadd.f32 %v10840_v49, %v17155_v14  ;;  %v8264_v23 = vshll.u32 %v17400_v4, 16 }
 0x531   : > { %v7712_v27 = vpop.f32.mrb[224].mxu1  ;;  %v17473_v53 = vld [vmem:[#allocation2 + $0x58] sm:$0xff] }
 0x532   : > { %v7714_v54 = vpop.f32.mrb[225].mxu1  ;;  %v17476_v25 = vld [vmem:[#allocation2 + $0x58] sm:$0xff]  ;;  %7802 = vst.msk [vmem:[#allocation2 + $0x60] sm:$0xff] %vm392_vm1, %v7786_v12  ;;  %v7713_v56 = vadd.f32 %v7712_v27, %v7552_v6  ;;  %v7555_v60 = vadd.f32 %v10843_v19, %v17155_v14  ;;  %v7930_v59 = vshll.u32 %v17473_v53, 16  ;;  %v8399_v5 = vrot.slane %v17473_v53, 1 }
 0x533   : > { %v7715_v43 = vpop.f32.mrb[226].mxu1  ;;  %7831 = vst.msk [vmem:[#allocation4 + $0x190] sm:$0xff] %vm392_vm1, %v17476_v25  ;;  %8489 = vst.msk [vmem:[#allocation4 + $0x158] sm:$0xff] %vm392_vm1, %v17476_v25  ;;  %8155 = vrot.lane.b32.xlu0 %v17473_v53, %s11376_s15  ;;  %8634 = vrot.lane.b32.xlu1 %v17389_v28, %s11376_s15  ;;  %v8254_v28 = vor.u32 %v8252_v9, %v8250_v38  ;;  %v7934_v17 = vshrl.u32 %v17473_v53, 16  ;;  %v8394_v19 = vsel %vm1183_vm10, %v8391_v50, %v8393_v10 }
 0x534   : > { %v7717_v35 = vpop.f32.mrb[227].mxu1  ;;  %v7716_v0 = vadd.f32 %v7715_v43, %v7555_v60  ;;  %v10844_v36 = vpop.f32.mrb[208].mxu0  ;;  %v7932_v11 = vrot.slane %v7930_v59, 1  ;;  %v17499_v15 = vsel %vm1183_vm10, %v8397_v7, %v8399_v5  ;;  %v7767_v46 = vmax.f32 %v7713_v56, 0.0  ;;  %v11365_v59 = vld [vmem:[%s18121_s8] ss:$0 sm:$0xff] }
 0x535   : > { %v10845_v20 = vpop.f32.mrb[209].mxu0  ;;  %8104 = vst.msk [vmem:[#allocation4 + $0x170] sm:$0xff] %vm392_vm1, %v17499_v15  ;;  %v8259_v26 = vsel %vm979_vm12, %v8254_v28, %v8258_v1  ;;  %v8262_v27 = vor.u32 %v8260_v30, %v8258_v1  ;;  %v8268_v1 = vshrl.u32 %v17400_v4, 16 }
 0x536   : > { %v7768_v62 = vmax.f32 %v7716_v0, 0.0  ;;  %v10846_v8 = vadd.f32 %v10845_v20, %v10844_v36  ;;  %v10847_v41 = vpop.f32.mrb[210].mxu0  ;;  %v17502_v61 = vsel %vm979_vm12, %v7928_v47, %v7932_v11  ;;  %8343 = vst.msk [vmem:[#allocation4 + $0xd8] sm:$0xff] %vm392_vm1, %v8259_v26  ;;  %v7936_v16 = vor.u32 %v7934_v17, %v7932_v11 }
 0x537   : > { %v10848_v29 = vpop.f32.mrb[211].mxu0  ;;  %7984 = vrot.lane.b32.xlu0 %v17502_v61, %s11376_s15  ;;  %8419 = vrot.lane.b32.xlu1 %v8392_v33, %s11376_s15 }
 0x538   : > { %v7787_v45 = vpack.c.bf16 %v7768_v62, %v7767_v46  ;;  %v10849_v55 = vadd.f32 %v10848_v29, %v10847_v41  ;;  %v7560_v7 = vadd.f32 %v10846_v8, %v17155_v14  ;;  %v8272_v46 = vshll.u32 %v17437_v63, 16 }
 0x539   : > { %v7720_v3 = vpop.f32.mrb[228].mxu1  ;;  %v17512_v44 = vld [vmem:[#allocation2 + $0x60] sm:$0xff] }
 0x53a   : > { %v7722_v39 = vpop.f32.mrb[229].mxu1  ;;  %v17515_v2 = vld [vmem:[#allocation2 + $0x60] sm:$0xff]  ;;  %7803 = vst.msk [vmem:[#allocation2 + $0x68] sm:$0xff] %vm392_vm1, %v7787_v45  ;;  %v7721_v40 = vadd.f32 %v7720_v3, %v7560_v7  ;;  %v7563_v31 = vadd.f32 %v10849_v55, %v17155_v14  ;;  %v7938_v38 = vshll.u32 %v17512_v44, 16  ;;  %v8401_v14 = vrot.slane %v17512_v44, 1 }
 0x53b   : > { %v7723_v34 = vpop.f32.mrb[230].mxu1  ;;  %7832 = vst.msk [vmem:[#allocation4 + $0x1b8] sm:$0xff] %vm392_vm1, %v17515_v2  ;;  %8490 = vst.msk [vmem:[#allocation4 + $0x180] sm:$0xff] %vm392_vm1, %v17515_v2  ;;  %8157 = vrot.lane.b32.xlu0 %v17512_v44, %s11376_s15  ;;  %8636 = vrot.lane.b32.xlu1 %v17425_v22, %s11376_s15  ;;  %v8266_v22 = vrot.slane %v8264_v23, 1  ;;  %v7942_v11 = vshrl.u32 %v17512_v44, 16  ;;  %v8396_v45 = vsel %vm1183_vm10, %v8393_v10, %v17412_v42  ;;  %v8274_v3 = vrot.slane %v8272_v46, 1 }
 0x53c   : > { %v7725_v57 = vpop.f32.mrb[231].mxu1  ;;  %v7724_v49 = vadd.f32 %v7723_v34, %v7563_v31  ;;  %v10850_v37 = vpop.f32.mrb[212].mxu0  ;;  %v7940_v52 = vrot.slane %v7938_v38, 1  ;;  %v17536_v6 = vsel %vm1183_vm10, %v8399_v5, %v8401_v14  ;;  %v7769_v54 = vmax.f32 %v7721_v40, 0.0 }
 0x53d   : > { %v10851_v12 = vpop.f32.mrb[213].mxu0  ;;  %8105 = vst.msk [vmem:[#allocation4 + $0x198] sm:$0xff] %vm392_vm1, %v17536_v6  ;;  %v8267_v21 = vsel %vm979_vm12, %v8262_v27, %v8266_v22  ;;  %v8270_v7 = vor.u32 %v8268_v1, %v8266_v22  ;;  %v8276_v27 = vshrl.u32 %v17437_v63, 16  ;;  %v8280_v22 = vshll.u32 %v17476_v25, 16 }
 0x53e   : > { %v7770_v53 = vmax.f32 %v7724_v49, 0.0  ;;  %v10852_v56 = vadd.f32 %v10851_v12, %v10850_v37  ;;  %v10853_v24 = vpop.f32.mrb[214].mxu0  ;;  %v17539_v60 = vsel %vm979_vm12, %v7936_v16, %v7940_v52  ;;  %8344 = vst.msk [vmem:[#allocation4 + $0x100] sm:$0xff] %vm392_vm1, %v8267_v21  ;;  %v7944_v41 = vor.u32 %v7942_v11, %v7940_v52 }
 0x53f   : > { %v10854_v43 = vpop.f32.mrb[215].mxu0  ;;  %7986 = vrot.lane.b32.xlu0 %v17539_v60, %s11376_s15  ;;  %8421 = vrot.lane.b32.xlu1 %v8394_v19, %s11376_s15  ;;  %v8275_v42 = vsel %vm979_vm12, %v8270_v7, %v8274_v3  ;;  %v8282_v21 = vrot.slane %v8280_v22, 1 }
 0x540   : > { %v7788_v50 = vpack.c.bf16 %v7770_v53, %v7769_v54  ;;  %v10855_v32 = vadd.f32 %v10854_v43, %v10853_v24  ;;  %v7568_v35 = vadd.f32 %v11365_v59, %v10852_v56  ;;  %8345 = vst.msk [vmem:[#allocation4 + $0x128] sm:$0xff] %vm392_vm1, %v8275_v42  ;;  %v8278_v43 = vor.u32 %v8276_v27, %v8274_v3 }
 0x541   : > { %v7728_v5 = vpop.f32.mrb[232].mxu1  ;;  %v8120_v58 = vld [vmem:[#allocation2 + $0x68] sm:$0xff] }
 0x542   : > { %v7730_v9 = vpop.f32.mrb[233].mxu1  ;;  %7804 = vst.msk [vmem:[#allocation2 + $0x70] sm:$0xff] %vm392_vm1, %v7788_v50  ;;  %v7729_v0 = vadd.f32 %v7728_v5, %v7568_v35  ;;  %v7571_v36 = vadd.f32 %v11365_v59, %v10855_v32  ;;  %v7946_v20 = vshll.u32 %v8120_v58, 16  ;;  %7833 = vst.msk [vmem:[#allocation4 + $0x1e0] sm:$0xff] %vm392_vm1, %v8120_v58  ;;  %v8403_v28 = vrot.slane %v8120_v58, 1 }
 0x543   : > { %v7731_v47 = vpop.f32.mrb[234].mxu1  ;;  %8159 = vrot.lane.b32.xlu0 %v8120_v58, %s11376_s15  ;;  %8638 = vrot.lane.b32.xlu1 %v17463_v13, %s11376_s15  ;;  %v7950_v16 = vshrl.u32 %v8120_v58, 16  ;;  %v8283_v35 = vsel %vm979_vm12, %v8278_v43, %v8282_v21  ;;  %v8284_v5 = vshrl.u32 %v17476_v25, 16  ;;  %v8288_v9 = vshll.u32 %v17515_v2, 16 }
 0x544   : > { %v7733_v33 = vpop.f32.mrb[235].mxu1  ;;  %v7732_v62 = vadd.f32 %v7731_v47, %v7571_v36  ;;  %v10856_v8 = vpop.f32.mrb[216].mxu0  ;;  %v7948_v29 = vrot.slane %v7946_v20, 1  ;;  %v17562_v55 = vsel %vm1183_vm10, %v8401_v14, %v8403_v28  ;;  %v7771_v13 = vmax.f32 %v7729_v0, 0.0  ;;  %8346 = vst.msk [vmem:[#allocation4 + $0x150] sm:$0xff] %vm392_vm1, %v8283_v35 }
 0x545   : > { %v10857_v26 = vpop.f32.mrb[217].mxu0  ;;  %8106 = vst.msk [vmem:[#allocation4 + $0x1c0] sm:$0xff] %vm392_vm1, %v17562_v55  ;;  %v8286_v11 = vor.u32 %v8284_v5, %v8282_v21  ;;  %v8290_v20 = vrot.slane %v8288_v9, 1  ;;  %v8723_v35 = vrot.slane %v17400_v4, 1 }
 0x546   : > { %v7772_v39 = vmax.f32 %v7732_v62, 0.0  ;;  %v10858_v44 = vadd.f32 %v10857_v26, %v10856_v8  ;;  %v10859_v40 = vpop.f32.mrb[218].mxu0  ;;  %v17565_v31 = vsel %vm979_vm12, %v7944_v41, %v7948_v29  ;;  %v7952_v53 = vor.u32 %v7950_v16, %v7948_v29 }
 0x547   : > { %v10860_v34 = vpop.f32.mrb[219].mxu0  ;;  %7988 = vrot.lane.b32.xlu0 %v17565_v31, %s11376_s15  ;;  %8423 = vrot.lane.b32.xlu1 %v8396_v45, %s11376_s15  ;;  %v8291_v46 = vsel %vm979_vm12, %v8286_v11, %v8290_v20  ;;  %v8292_v62 = vshrl.u32 %v17515_v2, 16 }
 0x548   : > { %v7789_v10 = vpack.c.bf16 %v7772_v39, %v7771_v13  ;;  %v10861_v17 = vadd.f32 %v10860_v34, %v10859_v40  ;;  %v7576_v38 = vadd.f32 %v11365_v59, %v10858_v44  ;;  %8347 = vst.msk [vmem:[#allocation4 + $0x178] sm:$0xff] %vm392_vm1, %v8291_v46  ;;  %v8727_v46 = vrot.slane %v17476_v25, 1 }
 0x549   : > { %v7736_v57 = vpop.f32.mrb[236].mxu1  ;;  %v8121_v30 = vld [vmem:[#allocation2 + $0x70] sm:$0xff]  ;;  %v8294_v7 = vor.u32 %v8292_v62, %v8290_v20 }
 0x54a   : > { %v7738_v14 = vpop.f32.mrb[237].mxu1  ;;  %7805 = vst.msk [vmem:[#allocation2 + $0x78] sm:$0xff] %vm392_vm1, %v7789_v10  ;;  %v7737_v23 = vadd.f32 %v7736_v57, %v7576_v38  ;;  %v7579_v49 = vadd.f32 %v11365_v59, %v10861_v17  ;;  %v7954_v52 = vshll.u32 %v8121_v30, 16  ;;  %7834 = vst.msk [vmem:[#allocation4 + $0x208] sm:$0xff] %vm392_vm1, %v8121_v30  ;;  %v17579_v19 = vrot.slane %v8121_v30, 1  ;;  %v17592_v59 = vld [vmem:[#allocation2 + $0x68] sm:$0xff] }
 0x54b   : > { %v7739_v37 = vpop.f32.mrb[238].mxu1  ;;  %8161 = vrot.lane.b32.xlu0 %v8121_v30, %s11376_s15  ;;  %8640 = vrot.lane.b32.xlu1 %v17502_v61, %s11376_s15  ;;  %8491 = vst.msk [vmem:[#allocation4 + $0x1a8] sm:$0xff] %vm392_vm1, %v17592_v59  ;;  %v8296_v8 = vshll.u32 %v17592_v59, 16  ;;  %v17614_v41 = vld [vmem:[#allocation2 + $0x70] sm:$0xff]  ;;  %v8300_v34 = vshrl.u32 %v17592_v59, 16 }
 0x54c   : > { %v7741_v12 = vpop.f32.mrb[239].mxu1  ;;  %v7740_v54 = vadd.f32 %v7739_v37, %v7579_v49  ;;  %v7956_v56 = vrot.slane %v7954_v52, 1  ;;  %v17585_v24 = vsel %vm1183_vm10, %v8403_v28, %v17579_v19  ;;  %v7773_v50 = vmax.f32 %v7737_v23, 0.0  ;;  %v8682_v28 = vld [vmem:[#allocation2 + $0x18] sm:$0xfe]  ;;  %8492 = vst.msk [vmem:[#allocation4 + $0x1d0] sm:$0xff] %vm392_vm1, %v17614_v41 }
 0x54d   : > { %8107 = vst.msk [vmem:[#allocation4 + $0x1e8] sm:$0xff] %vm392_vm1, %v17585_v24  ;;  %v8712_v45 = vrot.slane %v8682_v28, 1  ;;  %v8298_v3 = vrot.slane %v8296_v8, 1  ;;  %v8304_v42 = vshll.u32 %v17614_v41, 16  ;;  %v8308_v57 = vshrl.u32 %v17614_v41, 16  ;;  %v17677_v28 = vld [vmem:[%s18122_s9 + $0x108] sm:$0xff]  }
 0x54e   : > { %v7774_v32 = vmax.f32 %v7740_v54, 0.0  ;;  %v17588_v61 = vsel %vm979_vm12, %v7952_v53, %v7956_v56  ;;  %v8509_v52 = vld [vmem:[#allocation2 + $0x88] sm:$0x1] }
 0x54f   : > { %7990 = vrot.lane.b32.xlu0 %v17588_v61, %s11376_s15  ;;  %8425 = vrot.lane.b32.xlu1 %v17460_v18, %s11376_s15  ;;  %v7958_v18 = vshrl.u32 %v8121_v30, 16  ;;  %v8714_v39 = vsel %vm1183_vm10, %v8712_v45, %v17253_v48  ;;  %v8299_v40 = vsel %vm979_vm12, %v8294_v7, %v8298_v3  ;;  %v8302_v10 = vor.u32 %v8300_v34, %v8298_v3  ;;  %v17708_v7 = vld [vmem:[%s18122_s9 + $0x118] sm:$0xff]  }
 0x550   : > { %v7790_v58 = vpack.c.bf16 %v7774_v32, %v7773_v50  ;;  %8755 = vst.msk [vmem:[#allocation4 + $0x20] sm:$0xff] %vm392_vm1, %v8714_v39  ;;  %8348 = vst.msk [vmem:[#allocation4 + $0x1a0] sm:$0xff] %vm392_vm1, %v8299_v40  ;;  %v8306_v17 = vrot.slane %v8304_v42, 1  ;;  %v8622_v54 = vshll.u32 %v8509_v52, 16  ;;  %v8729_v3 = vrot.slane %v17515_v2, 1 }
 0x551   : > { %v17604_v0 = vld [vmem:[#allocation2 + $0x78] sm:$0xff]  ;;  %v7960_v29 = vor.u32 %v7958_v18, %v7956_v56 }
 0x552   : > { %v7849_v36 = vld [vmem:[#allocation2 + $0x78] sm:$0x1]  ;;  %7806 = vst.msk [vmem:[#allocation2 + $0x80] sm:$0xff] %vm392_vm1, %v7790_v58  ;;  %v8606_v38 = vshll.u32 %v17604_v0, 16  ;;  %v8310_v23 = vor.u32 %v8308_v57, %v8306_v17  ;;  %v8610_v21 = vshrl.u32 %v17604_v0, 16  ;;  %v8730_v34 = vsel %vm1183_vm10, %v8727_v46, %v8729_v3 }
 0x553   : > { %v8036_v47 = vld [vmem:[#allocation2 + $0x78] sm:$0x1]  ;;  %v7962_v33 = vshll.u32 %v7849_v36, 16  ;;  %8163 = vrot.lane.b32.xlu0 %v17604_v0, %s11376_s15  ;;  %8642 = vrot.lane.b32.xlu1 %v17539_v60, %s11376_s15  ;;  %8763 = vst.msk [vmem:[#allocation4 + $0x160] sm:$0xff] %vm392_vm1, %v8730_v34 }
 0x554   : > { %v8079_v1 = vrot.slane %v8036_v47, 1  ;;  %v17625_v44 = vld [vmem:[#allocation2 + $0x78] sm:$0xff]  ;;  %v8608_v37 = vrot.slane %v8606_v38, 1  ;;  %v8724_v47 = vsel %vm1183_vm10, %v17377_v51, %v8723_v35 }
 0x555   : > { %v7964_v26 = vrot.slane %v7962_v33, 1  ;;  %8493 = vst.msk [vmem:[#allocation4 + $0x1f8] sm:$0xff] %vm392_vm1, %v17625_v44  ;;  %v8312_v14 = vshll.u32 %v17625_v44, 16  ;;  %v8316_v12 = vshrl.u32 %v17625_v44, 16  ;;  %8760 = vst.msk [vmem:[#allocation4 + $0xe8] sm:$0xff] %vm392_vm1, %v8724_v47  ;;  %v8735_v38 = vrot.slane %v17625_v44, 1 }
 0x556   : > { %v8080_v60 = vsel %vm1183_vm10, %v17579_v19, %v8079_v1  ;;  %v8609_v43 = vsel %vm979_vm12, %v7960_v29, %v8608_v37  ;;  %v8612_v58 = vor.u32 %v8610_v21, %v8608_v37  ;;  %v8725_v1 = vrot.slane %v17437_v63, 1  ;;  %v17697_v63 = vld [vmem:[%s18122_s9 + $0x110] sm:$0xff]  }
 0x557   : > { %v7965_v13 = vsel %vm979_vm12, %v7960_v29, %v7964_v26  ;;  %8108 = vst.msk [vmem:[#allocation4 + $0x210] sm:$0xff] %vm392_vm1, %v8080_v60  ;;  %8427 = vrot.lane.b32.xlu1 %v17499_v15, %s11376_s15  ;;  %v8307_v15 = vsel %vm979_vm12, %v8302_v10, %v8306_v17  ;;  %v8314_v49 = vrot.slane %v8312_v14, 1  ;;  %v17689_v29 = vld [vmem:[%s18122_s9 + $0x100] sm:$0xff]   ;;  %v8696_v17 = vld [vmem:[#allocation2 + $0x88] sm:$0x1] }
 0x558   : > { %7992 = vrot.lane.b32.xlu0 %v7965_v13, %s11376_s15  ;;  %8349 = vst.msk [vmem:[#allocation4 + $0x1c8] sm:$0xff] %vm392_vm1, %v8307_v15  ;;  %v8726_v25 = vsel %vm1183_vm10, %v8723_v35, %v8725_v1  ;;  %v8728_v26 = vsel %vm1183_vm10, %v8725_v1, %v8727_v46  ;;  %v8731_v13 = vrot.slane %v17592_v59, 1 }
 0x559   : > { %v8508_v48 = vld [vmem:[#allocation2 + $0x80] sm:$0xff]  ;;  %v8318_v53 = vor.u32 %v8316_v12, %v8314_v49  ;;  %8761 = vst.msk [vmem:[#allocation4 + $0x110] sm:$0xff] %vm392_vm1, %v8726_v25  ;;  %8762 = vst.msk [vmem:[#allocation4 + $0x138] sm:$0xff] %vm392_vm1, %v8728_v26 }
 0x55a   : > { %8494 = vst.msk [vmem:[#allocation4 + $0x220] sm:$0xff] %vm392_vm1, %v8508_v48  ;;  %v8614_v16 = vshll.u32 %v8508_v48, 16  ;;  %v8366_v32 = vld [vmem:[#allocation2 + $0x80] sm:$0x1]  ;;  %v8618_v36 = vshrl.u32 %v8508_v48, 16  ;;  %v8732_v42 = vsel %vm1183_vm10, %v8729_v3, %v8731_v13  ;;  %v8733_v48 = vrot.slane %v17614_v41, 1 }
 0x55b   : > { %8429 = vrot.lane.b32.xlu1 %v17536_v6, %s11376_s15  ;;  %v8315_v6 = vsel %vm979_vm12, %v8310_v23, %v8314_v49  ;;  %v8409_v4 = vrot.slane %v8366_v32, 1  ;;  %8764 = vst.msk [vmem:[#allocation4 + $0x188] sm:$0xff] %vm392_vm1, %v8732_v42  ;;  %v8695_v10 = vld [vmem:[#allocation2 + $0x80] sm:$0xff]  ;;  %v8739_v23 = vrot.slane %v8696_v17, 1 }
 0x55c   : > { %8644 = vrot.lane.b32.xlu0 %v17565_v31, %s11376_s15  ;;  %v8138_v30 = vpop.permute.xlu0 %8137  ;;  %v8207_v31 = vld [vmem:[#allocation2 + $0x80] sm:$0x1]  ;;  %8350 = vst.msk [vmem:[#allocation4 + $0x1f0] sm:$0xff] %vm392_vm1, %v8315_v6  ;;  %v8616_v50 = vrot.slane %v8614_v16, 1  ;;  %v8734_v14 = vsel %vm1183_vm10, %v8731_v13, %v8733_v48  ;;  %v8736_v49 = vsel %vm1183_vm10, %v8733_v48, %v8735_v38 }
 0x55d   : > { %8179 = vst.msk [vmem:[#allocation4 + $0x8] sm:$0xff] %vm1138_vm2, %v8138_v30  ;;  %v8320_v27 = vshll.u32 %v8207_v31, 16  ;;  %v8737_v30 = vrot.slane %v8695_v10, 1 }
 0x55e   : > { %v8620_v20 = vor.u32 %v8618_v36, %v8616_v50  ;;  %8765 = vst.msk [vmem:[#allocation4 + $0x1b0] sm:$0xff] %vm392_vm1, %v8734_v14  ;;  %8766 = vst.msk [vmem:[#allocation4 + $0x1d8] sm:$0xff] %vm392_vm1, %v8736_v49 }
 0x55f   : > { %8431 = vrot.lane.b32.xlu1 %v17562_v55, %s11376_s15  ;;  %v8322_v56 = vrot.slane %v8320_v27, 1  ;;  %v8407_v55 = vrot.slane %v17604_v0, 1  ;;  %v8624_v0 = vrot.slane %v8622_v54, 1  ;;  %v8738_v37 = vsel %vm1183_vm10, %v8735_v38, %v8737_v30 }
 0x560   : > { %8646 = vrot.lane.b32.xlu0 %v17588_v61, %s11376_s15  ;;  %v8740_v41 = vsel %vm1183_vm10, %v8737_v30, %v8739_v23  ;;  %8767 = vst.msk [vmem:[#allocation4 + $0x200] sm:$0xff] %vm392_vm1, %v8738_v37 }
 0x561   : > { %v7967_v22 = vpop.permute.xlu1 %7966  ;;  %v8323_v61 = vsel %vm979_vm12, %v8318_v53, %v8322_v56  ;;  %v8408_v11 = vsel %vm1183_vm10, %v17579_v19, %v8407_v55  ;;  %v8625_v51 = vsel %vm979_vm12, %v8620_v20, %v8624_v0  ;;  %v8410_v19 = vsel %vm1183_vm10, %v8407_v55, %v8409_v4  ;;  %8768 = vst.msk [vmem:[#allocation4 + $0x228] sm:$0xff] %vm392_vm1, %v8740_v41 }
 0x562   : > { %8008 = vst.msk [vmem:[#allocation4] sm:$0xff] %vm1138_vm2, %v7967_v22  ;;  %vm9807_vm10 = vcmask 785408  }
 0x563   : > { %8433 = vrot.lane.b32.xlu1 %v17585_v24, %s11376_s15  ;;  %8351 = vst.msk [vmem:[#allocation4 + $0x218] sm:$0xff] %vm392_vm1, %v8323_v61  ;;  %v8617_v24 = vsel %vm979_vm12, %v8612_v58, %v8616_v50  ;;  %vm9865_vm12 = vcmask 523268  }
 0x564   : > { %8648 = vrot.lane.b32.xlu0 %v8609_v43, %s11376_s15  ;;  %v8140_v5 = vpop.permute.xlu0 %8139  ;;  %v8770_v9 = vld [vmem:[#allocation4 + $0x8] sm:$0xff] }
 0x565   : > { %8180 = vst.msk [vmem:[#allocation4 + $0x30] sm:$0xff] %vm1138_vm2, %v8140_v5  ;;  %9208 = vmatprep.mubr.bf16.mxu0 %v8770_v9 }
 0x567   : > { %8435 = vrot.lane.b32.xlu1 %v8408_v11, %s11376_s15 }
 0x568   : > { %8650 = vrot.lane.b32.xlu0 %v8617_v24, %s11376_s15 }
 0x569   : > { %v7969_v18 = vpop.permute.xlu1 %7968  ;;  %v8769_v33 = vld [vmem:[#allocation4] sm:$0xff] }
 0x56a   : > { %8009 = vst.msk [vmem:[#allocation4 + $0x28] sm:$0xff] %vm1138_vm2, %v7969_v18  ;;  %9209 = vmatmul.mubr.bf16.vlgmr.msra.gmra.mrb[220].mxu0 %v8769_v33 }
 0x56b   : > { %8437 = vrot.lane.b32.xlu1 %v8410_v19, %s11376_s15  ;;  %11117 = vmatpush3.bf16.msra.mxu0 %v17689_v29 }
 0x56c   : > { %8652 = vrot.lane.b32.xlu0 %v8625_v51, %s11376_s15  ;;  %v8142_v62 = vpop.permute.xlu0 %8141  ;;  %v8775_v8 = vld [vmem:[#allocation4 + $0x30] sm:$0xff]  ;;  %11118 = vmatprep.subr.bf16.mxu0 %v17677_v28 }
 0x56d   : > { %8181 = vst.msk [vmem:[#allocation4 + $0x58] sm:$0xff] %vm1138_vm2, %v8142_v62  ;;  %9216 = vmatprep.mubr.bf16.mxu0 %v8775_v8 }
 0x56f   : > { %11119 = vmatpush3.bf16.msra.mxu0 %v17677_v28 }
 0x570   : > { %11120 = vmatprep.subr.bf16.mxu0 %v17697_v63 }
 0x571   : > { %v7971_v45 = vpop.permute.xlu1 %7970  ;;  %v8774_v60 = vld [vmem:[#allocation4 + $0x28] sm:$0xff] }
 0x572   : > { %8010 = vst.msk [vmem:[#allocation4 + $0x50] sm:$0xff] %vm1138_vm2, %v7971_v45  ;;  %9217 = vmatmul.mubr.bf16.gmra.mrb[224].mxu0 %v8774_v60 }
 0x573   : > { %11121 = vmatpush3.bf16.msra.mxu0 %v17697_v63 }
 0x574   : > { %v8144_v39 = vpop.permute.xlu0 %8143  ;;  %v8780_v40 = vld [vmem:[#allocation4 + $0x58] sm:$0xff]  ;;  %11122 = vmatprep.subr.bf16.mxu0 %v17708_v7 }
 0x575   : > { %8182 = vst.msk [vmem:[#allocation4 + $0x80] sm:$0xff] %vm1138_vm2, %v8144_v39  ;;  %9224 = vmatprep.mubr.bf16.mxu0 %v8780_v40 }
 0x577   : > { %11123 = vmatpush3.bf16.msra.mxu0 %v17708_v7 }
 0x579   : > { %v7973_v2 = vpop.permute.xlu1 %7972  ;;  %v8779_v59 = vld [vmem:[#allocation4 + $0x50] sm:$0xff] }
 0x57a   : > { %8011 = vst.msk [vmem:[#allocation4 + $0x78] sm:$0xff] %vm1138_vm2, %v7973_v2  ;;  %9225 = vmatmul.mubr.bf16.gmra.mrb[228].mxu0 %v8779_v59 }
 0x57c   : > { %v8146_v15 = vpop.permute.xlu0 %8145  ;;  %v8785_v57 = vld [vmem:[#allocation4 + $0x80] sm:$0xff] }
 0x57d   : > { %8183 = vst.msk [vmem:[#allocation4 + $0xa8] sm:$0xff] %vm1138_vm2, %v8146_v15  ;;  %9232 = vmatprep.mubr.bf16.mxu0 %v8785_v57 }
 0x581   : > { %v7975_v44 = vpop.permute.xlu1 %7974  ;;  %v8784_v16 = vld [vmem:[#allocation4 + $0x78] sm:$0xff] }
 0x582   : > { %8012 = vst.msk [vmem:[#allocation4 + $0xa0] sm:$0xff] %vm1138_vm2, %v7975_v44  ;;  %9233 = vmatmul.mubr.bf16.gmra.mrb[232].mxu0 %v8784_v16 }
 0x584   : > { %v8148_v52 = vpop.permute.xlu0 %8147  ;;  %v8790_v31 = vld [vmem:[#allocation4 + $0xa8] sm:$0xff] }
 0x585   : > { %8184 = vst.msk [vmem:[#allocation4 + $0xd0] sm:$0xff] %vm1138_vm2, %v8148_v52  ;;  %v8627_v6 = vpop.permute.xlu1 %8626  ;;  %9240 = vmatprep.mubr.bf16.mxu0 %v8790_v31 }
 0x586   : > { %8668 = vst.msk [vmem:[#allocation4 + $0x18] sm:$0xff] %vm1138_vm2, %v8627_v6 }
 0x589   : > { %v7977_v12 = vpop.permute.xlu0 %7976  ;;  %v8412_v27 = vpop.permute.xlu1 %8411  ;;  %v8789_v22 = vld [vmem:[#allocation4 + $0xa0] sm:$0xff] }
 0x58a   : > { %8013 = vst.msk [vmem:[#allocation4 + $0xc8] sm:$0xff] %vm1138_vm2, %v7977_v12  ;;  %8453 = vst.msk [vmem:[#allocation4 + $0x10] sm:$0xff] %vm1138_vm2, %v8412_v27  ;;  %9241 = vmatmul.mubr.bf16.gmra.mrb[236].mxu0 %v8789_v22 }
 0x58c   : > { %v8795_v54 = vld [vmem:[#allocation4 + $0xd0] sm:$0xff] }
 0x58d   : > { %v8150_v53 = vpop.permute.xlu0 %8149  ;;  %v8629_v56 = vpop.permute.xlu1 %8628  ;;  %9248 = vmatprep.mubr.bf16.mxu0 %v8795_v54  ;;  %v8772_v43 = vld [vmem:[#allocation4 + $0x18] sm:$0xff] }
 0x58e   : > { %8185 = vst.msk [vmem:[#allocation4 + $0xf8] sm:$0xff] %vm1138_vm2, %v8150_v53  ;;  %8669 = vst.msk [vmem:[#allocation4 + $0x40] sm:$0xff] %vm1138_vm2, %v8629_v56  ;;  %9353 = vmatprep.mubr.bf16.mxu1 %v8772_v43 }
 0x591   : > { %v7979_v21 = vpop.permute.xlu0 %7978  ;;  %v8414_v50 = vpop.permute.xlu1 %8413  ;;  %v8794_v55 = vld [vmem:[#allocation4 + $0xc8] sm:$0xff]  ;;  %v8771_v32 = vld [vmem:[#allocation4 + $0x10] sm:$0xff] }
 0x592   : > { %8014 = vst.msk [vmem:[#allocation4 + $0xf0] sm:$0xff] %vm1138_vm2, %v7979_v21  ;;  %8454 = vst.msk [vmem:[#allocation4 + $0x38] sm:$0xff] %vm1138_vm2, %v8414_v50  ;;  %9249 = vmatmul.mubr.bf16.gmra.mrb[240].mxu0 %v8794_v55  ;;  %9354 = vmatmul.mubr.bf16.vlgmr.msra.gmra.mrb[240].mxu1 %v8771_v32 }
 0x593   : > { %11156 = vmatpush3.bf16.msra.mxu1 %v17689_v29 }
 0x594   : > { %11153 = vmatprep.subr.bf16.mxu1 %v17677_v28 }
 0x595   : > { %v8152_v61 = vpop.permute.xlu0 %8151  ;;  %v8631_v35 = vpop.permute.xlu1 %8630  ;;  %v8800_v5 = vld [vmem:[#allocation4 + $0xf8] sm:$0xff]  ;;  %v8777_v9 = vld [vmem:[#allocation4 + $0x40] sm:$0xff] }
 0x596   : > { %8186 = vst.msk [vmem:[#allocation4 + $0x120] sm:$0xff] %vm1138_vm2, %v8152_v61  ;;  %8670 = vst.msk [vmem:[#allocation4 + $0x68] sm:$0xff] %vm1138_vm2, %v8631_v35  ;;  %9256 = vmatprep.mubr.bf16.mxu0 %v8800_v5  ;;  %9361 = vmatprep.mubr.bf16.mxu1 %v8777_v9  ;;  %v8773_v61 = vld [vmem:[#allocation4 + $0x20] sm:$0xff] }
 0x597   : > { %11157 = vmatpush3.bf16.msra.mxu1 %v17677_v28 }
 0x598   : > { %11154 = vmatprep.subr.bf16.mxu1 %v17697_v63 }
 0x599   : > { %v7981_v58 = vpop.permute.xlu0 %7980  ;;  %v8416_v36 = vpop.permute.xlu1 %8415  ;;  %v8799_v0 = vld [vmem:[#allocation4 + $0xf0] sm:$0xff]  ;;  %v8776_v47 = vld [vmem:[#allocation4 + $0x38] sm:$0xff] }
 0x59a   : > { %8015 = vst.msk [vmem:[#allocation4 + $0x118] sm:$0xff] %vm1138_vm2, %v7981_v58  ;;  %8455 = vst.msk [vmem:[#allocation4 + $0x60] sm:$0xff] %vm1138_vm2, %v8416_v36  ;;  %9257 = vmatmul.mubr.bf16.gmra.mrb[244].mxu0 %v8799_v0  ;;  %9362 = vmatmul.mubr.bf16.gmra.mrb[244].mxu1 %v8776_v47  ;;  %v8778_v47 = vld [vmem:[#allocation4 + $0x48] sm:$0xff] }
 0x59b   : > { %11158 = vmatpush3.bf16.msra.mxu1 %v17697_v63 }
 0x59c   : > { %11155 = vmatprep.subr.bf16.mxu1 %v17708_v7 }
 0x59d   : > { %v8154_v24 = vpop.permute.xlu0 %8153  ;;  %v8633_v11 = vpop.permute.xlu1 %8632  ;;  %v8805_v20 = vld [vmem:[#allocation4 + $0x120] sm:$0xff]  ;;  %v8782_v4 = vld [vmem:[#allocation4 + $0x68] sm:$0xff] }
 0x59e   : > { %8187 = vst.msk [vmem:[#allocation4 + $0x148] sm:$0xff] %vm1138_vm2, %v8154_v24  ;;  %8671 = vst.msk [vmem:[#allocation4 + $0x90] sm:$0xff] %vm1138_vm2, %v8633_v11  ;;  %9264 = vmatprep.mubr.bf16.mxu0 %v8805_v20  ;;  %9369 = vmatprep.mubr.bf16.mxu1 %v8782_v4  ;;  %v8783_v11 = vld [vmem:[#allocation4 + $0x70] sm:$0xff] }
 0x59f   : > { %11159 = vmatpush3.bf16.msra.mxu1 %v17708_v7 }
 0x5a1   : > { %v7983_v18 = vpop.permute.xlu0 %7982  ;;  %v8418_v33 = vpop.permute.xlu1 %8417  ;;  %v8804_v28 = vld [vmem:[#allocation4 + $0x118] sm:$0xff]  ;;  %v8781_v51 = vld [vmem:[#allocation4 + $0x60] sm:$0xff] }
 0x5a2   : > { %8016 = vst.msk [vmem:[#allocation4 + $0x140] sm:$0xff] %vm1138_vm2, %v7983_v18  ;;  %8456 = vst.msk [vmem:[#allocation4 + $0x88] sm:$0xff] %vm1138_vm2, %v8418_v33  ;;  %9265 = vmatmul.mubr.bf16.gmra.mrb[248].mxu0 %v8804_v28  ;;  %9370 = vmatmul.mubr.bf16.gmra.mrb[248].mxu1 %v8781_v51  ;;  %v8788_v33 = vld [vmem:[#allocation4 + $0x98] sm:$0xff]  ;;  %v8793_v51 = vld [vmem:[#allocation4 + $0xc0] sm:$0xff] }
 0x5a5   : > { %v8156_v19 = vpop.permute.xlu0 %8155  ;;  %v8635_v1 = vpop.permute.xlu1 %8634  ;;  %v8810_v46 = vld [vmem:[#allocation4 + $0x148] sm:$0xff]  ;;  %v8787_v62 = vld [vmem:[#allocation4 + $0x90] sm:$0xff] }
 0x5a6   : > { %8188 = vst.msk [vmem:[#allocation4 + $0x170] sm:$0xff] %vm1138_vm2, %v8156_v19  ;;  %8672 = vst.msk [vmem:[#allocation4 + $0xb8] sm:$0xff] %vm1138_vm2, %v8635_v1  ;;  %9272 = vmatprep.mubr.bf16.mxu0 %v8810_v46  ;;  %9377 = vmatprep.mubr.bf16.mxu1 %v8787_v62  ;;  %v8798_v1 = vld [vmem:[#allocation4 + $0xe8] sm:$0xff]  ;;  %v8803_v62 = vld [vmem:[#allocation4 + $0x110] sm:$0xff] }
 0x5a9   : > { %v7985_v8 = vpop.permute.xlu0 %7984  ;;  %v8420_v29 = vpop.permute.xlu1 %8419  ;;  %v8809_v63 = vld [vmem:[#allocation4 + $0x140] sm:$0xff]  ;;  %v8786_v25 = vld [vmem:[#allocation4 + $0x88] sm:$0xff] }
 0x5aa   : > { %8017 = vst.msk [vmem:[#allocation4 + $0x168] sm:$0xff] %vm1138_vm2, %v7985_v8  ;;  %8457 = vst.msk [vmem:[#allocation4 + $0xb0] sm:$0xff] %vm1138_vm2, %v8420_v29  ;;  %9273 = vmatmul.mubr.bf16.gmra.mrb[252].mxu0 %v8809_v63  ;;  %9378 = vmatmul.mubr.bf16.gmra.mrb[252].mxu1 %v8786_v25  ;;  %v8808_v29 = vld [vmem:[#allocation4 + $0x138] sm:$0xff]  ;;  %v8813_v25 = vld [vmem:[#allocation4 + $0x160] sm:$0xff] }
 0x5ad   : > { %v8158_v26 = vpop.permute.xlu0 %8157  ;;  %v8637_v45 = vpop.permute.xlu1 %8636  ;;  %v8815_v60 = vld [vmem:[#allocation4 + $0x170] sm:$0xff]  ;;  %v8792_v7 = vld [vmem:[#allocation4 + $0xb8] sm:$0xff] }
 0x5ae   : > { %8189 = vst.msk [vmem:[#allocation4 + $0x198] sm:$0xff] %vm1138_vm2, %v8158_v26  ;;  %8673 = vst.msk [vmem:[#allocation4 + $0xe0] sm:$0xff] %vm1138_vm2, %v8637_v45  ;;  %9280 = vmatprep.mubr.bf16.mxu0 %v8815_v60  ;;  %9385 = vmatprep.mubr.bf16.mxu1 %v8792_v7  ;;  %v8818_v45 = vld [vmem:[#allocation4 + $0x188] sm:$0xff]  ;;  %v8823_v60 = vld [vmem:[#allocation4 + $0x1b0] sm:$0xff] }
 0x5af   : > { %v8833_v7 = vld [vmem:[#allocation4 + $0x200] sm:$0xff] }
 0x5b1   : > { %v7987_v3 = vpop.permute.xlu0 %7986  ;;  %v8422_v13 = vpop.permute.xlu1 %8421  ;;  %v8814_v39 = vld [vmem:[#allocation4 + $0x168] sm:$0xff]  ;;  %v8791_v40 = vld [vmem:[#allocation4 + $0xb0] sm:$0xff] }
 0x5b2   : > { %8018 = vst.msk [vmem:[#allocation4 + $0x190] sm:$0xff] %vm1138_vm2, %v7987_v3  ;;  %8458 = vst.msk [vmem:[#allocation4 + $0xd8] sm:$0xff] %vm1138_vm2, %v8422_v13  ;;  %9281 = vmatmul.mubr.bf16.gmra.mrb[0].mxu0 %v8814_v39  ;;  %9386 = vmatmul.mubr.bf16.gmra.mrb[0].mxu1 %v8791_v40  ;;  %v8828_v3 = vld [vmem:[#allocation4 + $0x1d8] sm:$0xff]  ;;  %v8838_v13 = vld [vmem:[#allocation4 + $0x228] sm:$0xff] }
 0x5b5   : > { %v8160_v34 = vpop.permute.xlu0 %8159  ;;  %v8639_v42 = vpop.permute.xlu1 %8638  ;;  %v8820_v2 = vld [vmem:[#allocation4 + $0x198] sm:$0xff]  ;;  %v8797_v59 = vld [vmem:[#allocation4 + $0xe0] sm:$0xff] }
 0x5b6   : > { %8190 = vst.msk [vmem:[#allocation4 + $0x1c0] sm:$0xff] %vm1138_vm2, %v8160_v34  ;;  %8674 = vst.msk [vmem:[#allocation4 + $0x108] sm:$0xff] %vm1138_vm2, %v8639_v42  ;;  %9288 = vmatprep.mubr.bf16.mxu0 %v8820_v2  ;;  %9393 = vmatprep.mubr.bf16.mxu1 %v8797_v59 }
 0x5b9   : > { %v7989_v48 = vpop.permute.xlu0 %7988  ;;  %v8424_v10 = vpop.permute.xlu1 %8423  ;;  %v8819_v17 = vld [vmem:[#allocation4 + $0x190] sm:$0xff]  ;;  %v8796_v38 = vld [vmem:[#allocation4 + $0xd8] sm:$0xff] }
 0x5ba   : > { %8019 = vst.msk [vmem:[#allocation4 + $0x1b8] sm:$0xff] %vm1138_vm2, %v7989_v48  ;;  %8459 = vst.msk [vmem:[#allocation4 + $0x100] sm:$0xff] %vm1138_vm2, %v8424_v10  ;;  %9289 = vmatmul.mubr.bf16.gmra.mrb[4].mxu0 %v8819_v17  ;;  %9394 = vmatmul.mubr.bf16.gmra.mrb[4].mxu1 %v8796_v38 }
 0x5bd   : > { %v8162_v15 = vpop.permute.xlu0 %8161  ;;  %v8641_v57 = vpop.permute.xlu1 %8640  ;;  %v8825_v14 = vld [vmem:[#allocation4 + $0x1c0] sm:$0xff]  ;;  %v8802_v30 = vld [vmem:[#allocation4 + $0x108] sm:$0xff] }
 0x5be   : > { %8191 = vst.msk [vmem:[#allocation4 + $0x1e8] sm:$0xff] %vm1138_vm2, %v8162_v15  ;;  %8675 = vst.msk [vmem:[#allocation4 + $0x130] sm:$0xff] %vm1138_vm2, %v8641_v57  ;;  %9296 = vmatprep.mubr.bf16.mxu0 %v8825_v14  ;;  %9401 = vmatprep.mubr.bf16.mxu1 %v8802_v30 }
 0x5c1   : > { %v7991_v23 = vpop.permute.xlu0 %7990  ;;  %v8426_v49 = vpop.permute.xlu1 %8425  ;;  %v8824_v37 = vld [vmem:[#allocation4 + $0x1b8] sm:$0xff]  ;;  %v8801_v41 = vld [vmem:[#allocation4 + $0x100] sm:$0xff] }
 0x5c2   : > { %8020 = vst.msk [vmem:[#allocation4 + $0x1e0] sm:$0xff] %vm1138_vm2, %v7991_v23  ;;  %8460 = vst.msk [vmem:[#allocation4 + $0x128] sm:$0xff] %vm1138_vm2, %v8426_v49  ;;  %9297 = vmatmul.mubr.bf16.gmra.mrb[8].mxu0 %v8824_v37  ;;  %9402 = vmatmul.mubr.bf16.gmra.mrb[8].mxu1 %v8801_v41 }
 0x5c5   : > { %v8164_v44 = vpop.permute.xlu0 %8163  ;;  %v8643_v16 = vpop.permute.xlu1 %8642  ;;  %v8830_v52 = vld [vmem:[#allocation4 + $0x1e8] sm:$0xff]  ;;  %v8807_v31 = vld [vmem:[#allocation4 + $0x130] sm:$0xff] }
 0x5c6   : > { %8192 = vst.msk [vmem:[#allocation4 + $0x210] sm:$0xff] %vm1138_vm2, %v8164_v44  ;;  %8676 = vst.msk [vmem:[#allocation4 + $0x158] sm:$0xff] %vm1138_vm2, %v8643_v16  ;;  %9304 = vmatprep.mubr.bf16.mxu0 %v8830_v52  ;;  %9409 = vmatprep.mubr.bf16.mxu1 %v8807_v31 }
 0x5c9   : > { %v8428_v12 = vpop.permute.xlu1 %8427  ;;  %v8829_v27 = vld [vmem:[#allocation4 + $0x1e0] sm:$0xff]  ;;  %v8806_v22 = vld [vmem:[#allocation4 + $0x128] sm:$0xff] }
 0x5ca   : > { %v7993_v6 = vpop.permute.xlu0 %7992  ;;  %8461 = vst.msk [vmem:[#allocation4 + $0x150] sm:$0xff] %vm1138_vm2, %v8428_v12  ;;  %9305 = vmatmul.mubr.bf16.gmra.mrb[12].mxu0 %v8829_v27  ;;  %9410 = vmatmul.mubr.bf16.gmra.mrb[12].mxu1 %v8806_v22 }
 0x5cb   : > { %8021 = vst.msk [vmem:[#allocation4 + $0x208] sm:$0xff] %vm1138_vm2, %v7993_v6 }
 0x5cd   : > { %v8430_v53 = vpop.permute.xlu1 %8429  ;;  %v8835_v56 = vld [vmem:[#allocation4 + $0x210] sm:$0xff]  ;;  %v8812_v43 = vld [vmem:[#allocation4 + $0x158] sm:$0xff] }
 0x5ce   : > { %v8645_v54 = vpop.permute.xlu0 %8644  ;;  %8462 = vst.msk [vmem:[#allocation4 + $0x178] sm:$0xff] %vm1138_vm2, %v8430_v53  ;;  %9312 = vmatprep.mubr.bf16.mxu0 %v8835_v56  ;;  %9417 = vmatprep.mubr.bf16.mxu1 %v8812_v43 }
 0x5cf   : > { %8677 = vst.msk [vmem:[#allocation4 + $0x180] sm:$0xff] %vm1138_vm2, %v8645_v54 }
 0x5d1   : > { %v8432_v50 = vpop.permute.xlu1 %8431  ;;  %v8811_v32 = vld [vmem:[#allocation4 + $0x150] sm:$0xff] }
 0x5d2   : > { %v8647_v21 = vpop.permute.xlu0 %8646  ;;  %v8834_v55 = vld [vmem:[#allocation4 + $0x208] sm:$0xff]  ;;  %8463 = vst.msk [vmem:[#allocation4 + $0x1a0] sm:$0xff] %vm1138_vm2, %v8432_v50  ;;  %9418 = vmatmul.mubr.bf16.gmra.mrb[16].mxu1 %v8811_v32 }
 0x5d3   : > { %8678 = vst.msk [vmem:[#allocation4 + $0x1a8] sm:$0xff] %vm1138_vm2, %v8647_v21  ;;  %9313 = vmatmul.mubr.bf16.gmra.mrb[16].mxu0 %v8834_v55  ;;  %v17812_v21 = vld [vmem:[%s18123_s10] ss:$0 sm:$0xff] }
 0x5d4   : > { %11124 = vmatprep.mubr.msk.bf16.mxu0 %vm392_vm1, %v8773_v61 }
 0x5d5   : > { %v8434_v5 = vpop.permute.xlu1 %8433  ;;  %v8816_v0 = vld [vmem:[#allocation4 + $0x178] sm:$0xff] }
 0x5d6   : > { %v8649_v35 = vpop.permute.xlu0 %8648  ;;  %v8817_v9 = vld [vmem:[#allocation4 + $0x180] sm:$0xff]  ;;  %8464 = vst.msk [vmem:[#allocation4 + $0x1c8] sm:$0xff] %vm1138_vm2, %v8434_v5 }
 0x5d7   : > { %8679 = vst.msk [vmem:[#allocation4 + $0x1d0] sm:$0xff] %vm1138_vm2, %v8649_v35  ;;  %9425 = vmatprep.mubr.bf16.mxu1 %v8817_v9 }
 0x5d9   : > { %v8436_v36 = vpop.permute.xlu1 %8435  ;;  %v8821_v18 = vld [vmem:[#allocation4 + $0x1a0] sm:$0xff] }
 0x5da   : > { %v8651_v58 = vpop.permute.xlu0 %8650  ;;  %v8822_v24 = vld [vmem:[#allocation4 + $0x1a8] sm:$0xff]  ;;  %8465 = vst.msk [vmem:[#allocation4 + $0x1f0] sm:$0xff] %vm1138_vm2, %v8436_v36  ;;  %9426 = vmatmul.mubr.bf16.gmra.mrb[20].mxu1 %v8816_v0 }
 0x5db   : > { %8680 = vst.msk [vmem:[#allocation4 + $0x1f8] sm:$0xff] %vm1138_vm2, %v8651_v58  ;;  %11125 = vmatmul.mubr.msk.bf16.vlgmr.msra.gmra.mrb[20].mxu0 %vm392_vm1, %v8778_v47  ;;  %9433 = vmatprep.mubr.bf16.mxu1 %v8822_v24 }
 0x5dc   : > { %11128 = vmatprep.mubr.msk.bf16.mxu0 %vm392_vm1, %v8783_v11 }
 0x5dd   : > { %v8438_v4 = vpop.permute.xlu1 %8437  ;;  %v8826_v19 = vld [vmem:[#allocation4 + $0x1c8] sm:$0xff] }
 0x5de   : > { %v8653_v20 = vpop.permute.xlu0 %8652  ;;  %8466 = vst.msk [vmem:[#allocation4 + $0x218] sm:$0xff] %vm1138_vm2, %v8438_v4  ;;  %v8827_v28 = vld [vmem:[#allocation4 + $0x1d0] sm:$0xff] }
 0x5df   : > { %8681 = vst.msk [vmem:[#allocation4 + $0x220] sm:$0xff] %vm1138_vm2, %v8653_v20 }
 0x5e1   : > { %v8831_v8 = vld [vmem:[#allocation4 + $0x1f0] sm:$0xff] }
 0x5e2   : > { %9434 = vmatmul.mubr.bf16.gmra.mrb[24].mxu1 %v8821_v18  ;;  %v8832_v46 = vld [vmem:[#allocation4 + $0x1f8] sm:$0xff] }
 0x5e3   : > { %11129 = vmatmul.mubr.msk.bf16.gmra.mrb[24].mxu0 %vm392_vm1, %v8788_v33  ;;  %9441 = vmatprep.mubr.bf16.mxu1 %v8827_v28 }
 0x5e4   : > { %11132 = vmatprep.mubr.msk.bf16.mxu0 %vm392_vm1, %v8793_v51 }
 0x5e5   : > { %v8836_v26 = vld [vmem:[#allocation4 + $0x218] sm:$0xff] }
 0x5e6   : > { %v8837_v63 = vld [vmem:[#allocation4 + $0x220] sm:$0xff] }
 0x5ea   : > { %9442 = vmatmul.mubr.bf16.gmra.mrb[28].mxu1 %v8826_v19 }
 0x5eb   : > { %11133 = vmatmul.mubr.msk.bf16.gmra.mrb[28].mxu0 %vm392_vm1, %v8798_v1  ;;  %9449 = vmatprep.mubr.bf16.mxu1 %v8832_v46 }
 0x5ec   : > { %11136 = vmatprep.mubr.msk.bf16.mxu0 %vm392_vm1, %v8803_v62 }
 0x5f2   : > { %9450 = vmatmul.mubr.bf16.gmra.mrb[32].mxu1 %v8831_v8 }
 0x5f3   : > { %11137 = vmatmul.mubr.msk.bf16.gmra.mrb[32].mxu0 %vm392_vm1, %v8808_v29  ;;  %9457 = vmatprep.mubr.bf16.mxu1 %v8837_v63 }
 0x5f4   : > { %11140 = vmatprep.mubr.msk.bf16.mxu0 %vm392_vm1, %v8813_v25 }
 0x5fa   : > { %9458 = vmatmul.mubr.bf16.gmra.mrb[36].mxu1 %v8836_v26 }
 0x5fb   : > { %11141 = vmatmul.mubr.msk.bf16.gmra.mrb[36].mxu0 %vm392_vm1, %v8818_v45  ;;  %11148 = vmatprep.mubr.msk.bf16.mxu1 %vm392_vm1, %v8833_v7 }
 0x5fc   : > { %11144 = vmatprep.mubr.msk.bf16.mxu0 %vm392_vm1, %v8823_v60 }
 0x602   : > { %11149 = vmatmul.mubr.msk.bf16.vlgmr.msra.gmra.mrb[40].mxu1 %vm392_vm1, %v8838_v13 }
 0x603   : > { %11145 = vmatmul.mubr.msk.bf16.gmra.mrb[40].mxu0 %vm392_vm1, %v8828_v3  ;;  %vm9864_vm1 = vcmask 1044224  }
 0x604   : > { %vm17994_vm2 = vmor %vm9865_vm12, %vm9864_vm1 }
 0x63d   : > { %v10878_v39 = vpop.f32.mrb[220].mxu0 }
 0x63e   : > { %v10879_v40 = vpop.f32.mrb[221].mxu0 }
 0x63f   : > { %v10880_v34 = vadd.f32 %v10879_v40, %v10878_v39  ;;  %v10881_v42 = vpop.f32.mrb[222].mxu0 }
 0x640   : > { %v10882_v2 = vpop.f32.mrb[223].mxu0 }
 0x641   : > { %v10883_v59 = vadd.f32 %v10882_v2, %v10881_v42  ;;  %v9211_v35 = vadd.f32 %v10880_v34, %v17812_v21 }
 0x643   : > { %v9214_v24 = vadd.f32 %v10883_v59, %v17812_v21 }
 0x645   : > { %v10884_v48 = vpop.f32.mrb[224].mxu0 }
 0x646   : > { %v10885_v10 = vpop.f32.mrb[225].mxu0 }
 0x647   : > { %v10886_v17 = vadd.f32 %v10885_v10, %v10884_v48  ;;  %v10887_v38 = vpop.f32.mrb[226].mxu0 }
 0x648   : > { %v10888_v15 = vpop.f32.mrb[227].mxu0 }
 0x649   : > { %v10889_v57 = vadd.f32 %v10888_v15, %v10887_v38  ;;  %v9219_v1 = vadd.f32 %v10886_v17, %v17812_v21 }
 0x64b   : > { %v9222_v26 = vadd.f32 %v10889_v57, %v17812_v21 }
 0x64d   : > { %v10890_v14 = vpop.f32.mrb[228].mxu0 }
 0x64e   : > { %v10891_v30 = vpop.f32.mrb[229].mxu0 }
 0x64f   : > { %v10892_v23 = vadd.f32 %v10891_v30, %v10890_v14  ;;  %v10893_v49 = vpop.f32.mrb[230].mxu0 }
 0x650   : > { %v10894_v37 = vpop.f32.mrb[231].mxu0 }
 0x651   : > { %v10895_v41 = vadd.f32 %v10894_v37, %v10893_v49  ;;  %v9227_v42 = vadd.f32 %v10892_v23, %v17812_v21 }
 0x653   : > { %v9230_v15 = vadd.f32 %v10895_v41, %v17812_v21 }
 0x655   : > { %v10896_v44 = vpop.f32.mrb[232].mxu0 }
 0x656   : > { %v10897_v16 = vpop.f32.mrb[233].mxu0 }
 0x657   : > { %v17801_v52 = vadd.f32 %v10897_v16, %v10896_v44  ;;  %v10899_v31 = vpop.f32.mrb[234].mxu0 }
 0x658   : > { %v10900_v6 = vpop.f32.mrb[235].mxu0 }
 0x659   : > { %v17803_v12 = vadd.f32 %v10900_v6, %v10899_v31  ;;  %v9235_v31 = vadd.f32 %v17801_v52, %v17812_v21 }
 0x65d   : > { %v10902_v27 = vpop.f32.mrb[236].mxu0 }
 0x65e   : > { %v10903_v22 = vpop.f32.mrb[237].mxu0 }
 0x65f   : > { %v17805_v54 = vadd.f32 %v10903_v22, %v10902_v27  ;;  %v10905_v53 = vpop.f32.mrb[238].mxu0 }
 0x660   : > { %v10906_v56 = vpop.f32.mrb[239].mxu0 }
 0x661   : > { %v17807_v43 = vadd.f32 %v10906_v56, %v10905_v53 }
 0x665   : > { %v10908_v50 = vpop.f32.mrb[240].mxu0  ;;  %v10978_v55 = vpop.f32.mrb[240].mxu1 }
 0x666   : > { %v10909_v32 = vpop.f32.mrb[241].mxu0  ;;  %v10979_v61 = vpop.f32.mrb[241].mxu1 }
 0x667   : > { %v17815_v5 = vadd.f32 %v10909_v32, %v10908_v50  ;;  %v10980_v9 = vadd.f32 %v10979_v61, %v10978_v55  ;;  %v10911_v58 = vpop.f32.mrb[242].mxu0  ;;  %v10981_v36 = vpop.f32.mrb[242].mxu1  ;;  %v9238_v50 = vadd.f32 %v17803_v12, %v17812_v21 }
 0x668   : > { %v10912_v0 = vpop.f32.mrb[243].mxu0  ;;  %v10982_v47 = vpop.f32.mrb[243].mxu1 }
 0x669   : > { %v17818_v11 = vadd.f32 %v10912_v0, %v10911_v58  ;;  %v10983_v20 = vadd.f32 %v10982_v47, %v10981_v36  ;;  %v17820_v4 = vadd.f32 %v10980_v9, %v9211_v35  ;;  %v9243_v0 = vadd.f32 %v17805_v54, %v17812_v21 }
 0x66b   : > { %v17822_v18 = vadd.f32 %v10983_v20, %v9214_v24 }
 0x66d   : > { %v10914_v33 = vpop.f32.mrb[244].mxu0  ;;  %v10984_v28 = vpop.f32.mrb[244].mxu1 }
 0x66e   : > { %v10915_v51 = vpop.f32.mrb[245].mxu0  ;;  %v10985_v19 = vpop.f32.mrb[245].mxu1 }
 0x66f   : > { %v17825_v46 = vadd.f32 %v10915_v51, %v10914_v33  ;;  %v10986_v62 = vadd.f32 %v10985_v19, %v10984_v28  ;;  %v10917_v8 = vpop.f32.mrb[246].mxu0  ;;  %v10987_v29 = vpop.f32.mrb[246].mxu1  ;;  %v9246_v51 = vadd.f32 %v17807_v43, %v17812_v21 }
 0x670   : > { %v10918_v63 = vpop.f32.mrb[247].mxu0  ;;  %v10988_v25 = vpop.f32.mrb[247].mxu1 }
 0x671   : > { %v17828_v45 = vadd.f32 %v10918_v63, %v10917_v8  ;;  %v10989_v60 = vadd.f32 %v10988_v25, %v10987_v29  ;;  %v17830_v7 = vadd.f32 %v10986_v62, %v9219_v1 }
 0x673   : > { %v17832_v3 = vadd.f32 %v10989_v60, %v9222_v26  ;;  %v9251_v26 = vadd.f32 %v17815_v5, %v17812_v21 }
 0x675   : > { %v10920_v13 = vpop.f32.mrb[248].mxu0  ;;  %v10990_v39 = vpop.f32.mrb[248].mxu1 }
 0x676   : > { %v10921_v40 = vpop.f32.mrb[249].mxu0  ;;  %v10991_v34 = vpop.f32.mrb[249].mxu1 }
 0x677   : > { %v17835_v2 = vadd.f32 %v10921_v40, %v10920_v13  ;;  %v10992_v59 = vadd.f32 %v10991_v34, %v10990_v39  ;;  %v10923_v48 = vpop.f32.mrb[250].mxu0  ;;  %v10993_v10 = vpop.f32.mrb[250].mxu1 }
 0x678   : > { %v10924_v17 = vpop.f32.mrb[251].mxu0  ;;  %v10994_v38 = vpop.f32.mrb[251].mxu1 }
 0x679   : > { %v17838_v57 = vadd.f32 %v10924_v17, %v10923_v48  ;;  %v10995_v14 = vadd.f32 %v10994_v38, %v10993_v10  ;;  %v17840_v30 = vadd.f32 %v10992_v59, %v9227_v42  ;;  %v9254_v42 = vadd.f32 %v17818_v11, %v17812_v21 }
 0x67b   : > { %v17842_v49 = vadd.f32 %v10995_v14, %v9230_v15 }
 0x67d   : > { %v10926_v37 = vpop.f32.mrb[252].mxu0  ;;  %v10996_v44 = vpop.f32.mrb[252].mxu1 }
 0x67e   : > { %v10927_v16 = vpop.f32.mrb[253].mxu0  ;;  %v10997_v23 = vpop.f32.mrb[253].mxu1 }
 0x67f   : > { %v17846_v6 = vadd.f32 %v10927_v16, %v10926_v37  ;;  %v10998_v27 = vadd.f32 %v10997_v23, %v10996_v44  ;;  %v10929_v22 = vpop.f32.mrb[254].mxu0  ;;  %v10999_v53 = vpop.f32.mrb[254].mxu1  ;;  %v9259_v37 = vadd.f32 %v17825_v46, %v17812_v21 }
 0x680   : > { %v10930_v41 = vpop.f32.mrb[255].mxu0  ;;  %v11000_v56 = vpop.f32.mrb[255].mxu1 }
 0x681   : > { %v17850_v55 = vadd.f32 %v10930_v41, %v10929_v22  ;;  %v11001_v32 = vadd.f32 %v11000_v56, %v10999_v53  ;;  %v17852_v61 = vadd.f32 %v10998_v27, %v9235_v31  ;;  %v9262_v22 = vadd.f32 %v17828_v45, %v17812_v21 }
 0x683   : > { %v17854_v35 = vadd.f32 %v11001_v32, %v9238_v50 }
 0x685   : > { %v10932_v9 = vpop.f32.mrb[0].mxu0  ;;  %v11002_v58 = vpop.f32.mrb[0].mxu1 }
 0x686   : > { %v10933_v52 = vpop.f32.mrb[1].mxu0  ;;  %v11003_v36 = vpop.f32.mrb[1].mxu1 }
 0x687   : > { %v17858_v47 = vadd.f32 %v10933_v52, %v10932_v9  ;;  %v11004_v24 = vadd.f32 %v11003_v36, %v11002_v58  ;;  %v10935_v20 = vpop.f32.mrb[2].mxu0  ;;  %v11005_v33 = vpop.f32.mrb[2].mxu1  ;;  %v9267_v52 = vadd.f32 %v17835_v2, %v17812_v21 }
 0x688   : > { %v10936_v12 = vpop.f32.mrb[3].mxu0  ;;  %v11006_v28 = vpop.f32.mrb[3].mxu1 }
 0x689   : > { %v17862_v19 = vadd.f32 %v10936_v12, %v10935_v20  ;;  %v11007_v1 = vadd.f32 %v11006_v28, %v11005_v33  ;;  %v17864_v62 = vadd.f32 %v11004_v24, %v9243_v0  ;;  %v9270_v12 = vadd.f32 %v17838_v57, %v17812_v21 }
 0x68b   : > { %v17866_v8 = vadd.f32 %v11007_v1, %v9246_v51 }
 0x68d   : > { %v10938_v29 = vpop.f32.mrb[4].mxu0  ;;  %v11008_v63 = vpop.f32.mrb[4].mxu1 }
 0x68e   : > { %v10939_v54 = vpop.f32.mrb[5].mxu0  ;;  %v11009_v25 = vpop.f32.mrb[5].mxu1 }
 0x68f   : > { %v17870_v60 = vadd.f32 %v10939_v54, %v10938_v29  ;;  %v11010_v13 = vadd.f32 %v11009_v25, %v11008_v63  ;;  %v10941_v39 = vpop.f32.mrb[6].mxu0  ;;  %v11011_v40 = vpop.f32.mrb[6].mxu1 }
 0x690   : > { %v10942_v43 = vpop.f32.mrb[7].mxu0  ;;  %v11012_v34 = vpop.f32.mrb[7].mxu1 }
 0x691   : > { %v17874_v59 = vadd.f32 %v10942_v43, %v10941_v39  ;;  %v11013_v48 = vadd.f32 %v11012_v34, %v11011_v40  ;;  %v17876_v10 = vadd.f32 %v11010_v13, %v9251_v26  ;;  %v9275_v26 = vadd.f32 %v17846_v6, %v17812_v21 }
 0x693   : > { %v17878_v17 = vadd.f32 %v11013_v48, %v9254_v42  ;;  %v9278_v42 = vadd.f32 %v17850_v55, %v17812_v21 }
 0x695   : > { %v10944_v38 = vpop.f32.mrb[8].mxu0  ;;  %v11014_v15 = vpop.f32.mrb[8].mxu1 }
 0x696   : > { %v10945_v5 = vpop.f32.mrb[9].mxu0  ;;  %v11015_v14 = vpop.f32.mrb[9].mxu1 }
 0x697   : > { %v17882_v44 = vadd.f32 %v10945_v5, %v10944_v38  ;;  %v11016_v16 = vadd.f32 %v11015_v14, %v11014_v15  ;;  %v10947_v23 = vpop.f32.mrb[10].mxu0  ;;  %v11017_v31 = vpop.f32.mrb[10].mxu1 }
 0x698   : > { %v10948_v11 = vpop.f32.mrb[11].mxu0  ;;  %v11018_v27 = vpop.f32.mrb[11].mxu1 }
 0x699   : > { %v17886_v53 = vadd.f32 %v10948_v11, %v10947_v23  ;;  %v11019_v41 = vadd.f32 %v11018_v27, %v11017_v31  ;;  %v17888_v56 = vadd.f32 %v11016_v16, %v9259_v37  ;;  %v9283_v31 = vadd.f32 %v17858_v47, %v17812_v21 }
 0x69b   : > { %v17890_v50 = vadd.f32 %v11019_v41, %v9262_v22 }
 0x69d   : > { %v10950_v32 = vpop.f32.mrb[12].mxu0  ;;  %v11020_v9 = vpop.f32.mrb[12].mxu1 }
 0x69e   : > { %v10951_v46 = vpop.f32.mrb[13].mxu0  ;;  %v11021_v58 = vpop.f32.mrb[13].mxu1 }
 0x69f   : > { %v17894_v36 = vadd.f32 %v10951_v46, %v10950_v32  ;;  %v11022_v0 = vadd.f32 %v11021_v58, %v11020_v9  ;;  %v10953_v24 = vpop.f32.mrb[14].mxu0  ;;  %v11023_v20 = vpop.f32.mrb[14].mxu1  ;;  %v9286_v58 = vadd.f32 %v17862_v19, %v17812_v21 }
 0x6a0   : > { %v10954_v45 = vpop.f32.mrb[15].mxu0  ;;  %v11024_v33 = vpop.f32.mrb[15].mxu1 }
 0x6a1   : > { %v17898_v28 = vadd.f32 %v10954_v45, %v10953_v24  ;;  %v11025_v51 = vadd.f32 %v11024_v33, %v11023_v20  ;;  %v17900_v1 = vadd.f32 %v11022_v0, %v9267_v52 }
 0x6a3   : > { %v17902_v29 = vadd.f32 %v11025_v51, %v9270_v12 }
 0x6a5   : > { %v11026_v54 = vpop.f32.mrb[16].mxu1 }
 0x6a6   : > { %v10956_v63 = vpop.f32.mrb[16].mxu0  ;;  %v11027_v25 = vpop.f32.mrb[17].mxu1 }
 0x6a7   : > { %v10957_v2 = vpop.f32.mrb[17].mxu0  ;;  %v11028_v39 = vadd.f32 %v11027_v25, %v11026_v54  ;;  %v11029_v43 = vpop.f32.mrb[18].mxu1  ;;  %v9291_v54 = vadd.f32 %v17870_v60, %v17812_v21 }
 0x6a8   : > { %v17906_v13 = vadd.f32 %v10957_v2, %v10956_v63  ;;  %v10959_v40 = vpop.f32.mrb[18].mxu0  ;;  %v11030_v34 = vpop.f32.mrb[19].mxu1 }
 0x6a9   : > { %v10960_v57 = vpop.f32.mrb[19].mxu0  ;;  %v11031_v38 = vadd.f32 %v11030_v34, %v11029_v43  ;;  %v17912_v15 = vadd.f32 %v11028_v39, %v9275_v26 }
 0x6aa   : > { %v17910_v48 = vadd.f32 %v10960_v57, %v10959_v40 }
 0x6ab   : > { %v17914_v5 = vadd.f32 %v11031_v38, %v9278_v42 }
 0x6ad   : > { %v11032_v14 = vpop.f32.mrb[20].mxu1 }
 0x6ae   : > { %v11126_v37 = vpop.f32.mrb[20].mxu0  ;;  %v11033_v16 = vpop.f32.mrb[21].mxu1 }
 0x6af   : > { %v9509_v6 = vadd.f32 %v11126_v37, %v17830_v7  ;;  %v9500_v23 = vpop.f32.mrb[21].mxu0  ;;  %v11034_v11 = vadd.f32 %v11033_v16, %v11032_v14  ;;  %v11035_v55 = vpop.f32.mrb[22].mxu1 }
 0x6b0   : > { %v9501_v27 = vadd.f32 %v9500_v23, %v17820_v4  ;;  %v11127_v22 = vpop.f32.mrb[22].mxu0  ;;  %v11036_v9 = vpop.f32.mrb[23].mxu1 }
 0x6b1   : > { %v9613_v41 = vmax.f32 %v9509_v6, 0.0  ;;  %v9512_v32 = vadd.f32 %v11127_v22, %v17832_v3  ;;  %v9503_v46 = vpop.f32.mrb[23].mxu0  ;;  %v11037_v52 = vadd.f32 %v11036_v9, %v11035_v55  ;;  %v17924_v0 = vadd.f32 %v11034_v11, %v9283_v31 }
 0x6b2   : > { %v9504_v7 = vadd.f32 %v9503_v46, %v17822_v18  ;;  %v9611_v47 = vmax.f32 %v9501_v27, 0.0  ;;  %v9299_v22 = vadd.f32 %v17882_v44, %v17812_v21 }
 0x6b3   : > { %v10394_v24 = vpack.c.bf16 %v9613_v41, %v9613_v41  ;;  %v9614_v20 = vmax.f32 %v9512_v32, 0.0  ;;  %v17926_v45 = vadd.f32 %v11037_v52, %v9286_v58 }
 0x6b4   : > { %v9612_v33 = vmax.f32 %v9504_v7, 0.0  ;;  %v10392_v51 = vpack.c.bf16 %v9611_v47, %v9611_v47 }
 0x6b5   : > { %v10395_v4 = vpack.c.bf16 %v9614_v20, %v9614_v20  ;;  %9727 = vrot.lane.b32.xlu0 %v10394_v24, %s11377_s25  ;;  %v11038_v3 = vpop.f32.mrb[24].mxu1 }
 0x6b6   : > { %v11130_v12 = vpop.f32.mrb[24].mxu0  ;;  %v11039_v63 = vpop.f32.mrb[25].mxu1  ;;  %v10393_v40 = vpack.c.bf16 %v9612_v33, %v9612_v33 }
 0x6b7   : > { %v9525_v19 = vadd.f32 %v11130_v12, %v17852_v61  ;;  %9729 = vrot.lane.b32.xlu1 %v10395_v4, %s11377_s25  ;;  %v9516_v18 = vpop.f32.mrb[25].mxu0  ;;  %v11040_v2 = vadd.f32 %v11039_v63, %v11038_v3  ;;  %v11041_v26 = vpop.f32.mrb[26].mxu1  ;;  %v9294_v61 = vadd.f32 %v17874_v59, %v17812_v21 }
 0x6b8   : > { %v9517_v25 = vadd.f32 %v9516_v18, %v17840_v30  ;;  %v11131_v39 = vpop.f32.mrb[26].mxu0  ;;  %v11042_v34 = vpop.f32.mrb[27].mxu1 }
 0x6b9   : > { %v9617_v43 = vmax.f32 %v9525_v19, 0.0  ;;  %v9528_v57 = vadd.f32 %v11131_v39, %v17854_v35  ;;  %v9519_v42 = vpop.f32.mrb[27].mxu0  ;;  %9723 = vrot.lane.b32.xlu0 %v10392_v51, %s11377_s25  ;;  %v11043_v38 = vadd.f32 %v11042_v34, %v11041_v26  ;;  %v17939_v60 = vadd.f32 %v11040_v2, %v9291_v54 }
 0x6ba   : > { %v9520_v14 = vadd.f32 %v9519_v42, %v17842_v49  ;;  %v9615_v30 = vmax.f32 %v9517_v25, 0.0 }
 0x6bb   : > { %v10398_v37 = vpack.c.bf16 %v9617_v43, %v9617_v43  ;;  %v9618_v6 = vmax.f32 %v9528_v57, 0.0  ;;  %9725 = vrot.lane.b32.xlu1 %v10393_v40, %s11377_s25  ;;  %v17942_v16 = vadd.f32 %v11043_v38, %v9294_v61 }
 0x6bc   : > { %v9616_v23 = vmax.f32 %v9520_v14, 0.0  ;;  %v10396_v27 = vpack.c.bf16 %v9615_v30, %v9615_v30 }
 0x6bd   : > { %v10399_v35 = vpack.c.bf16 %v9618_v6, %v9618_v6  ;;  %9735 = vrot.lane.b32.xlu0 %v10398_v37, %s11377_s25  ;;  %v11044_v31 = vpop.f32.mrb[28].mxu1 }
 0x6be   : > { %v11134_v11 = vpop.f32.mrb[28].mxu0  ;;  %v11045_v55 = vpop.f32.mrb[29].mxu1  ;;  %v10397_v58 = vpack.c.bf16 %v9616_v23, %v9616_v23 }
 0x6bf   : > { %v9541_v59 = vadd.f32 %v11134_v11, %v17876_v10  ;;  %v9532_v49 = vpop.f32.mrb[29].mxu0  ;;  %9737 = vrot.lane.b32.xlu1 %v10399_v35, %s11377_s25  ;;  %v11046_v41 = vadd.f32 %v11045_v55, %v11044_v31  ;;  %v11047_v9 = vpop.f32.mrb[30].mxu1  ;;  %v9302_v10 = vadd.f32 %v17886_v53, %v17812_v21  ;;  %v9315_v35 = vadd.f32 %v17906_v13, %v17812_v21 }
 0x6c0   : > { %v9533_v32 = vadd.f32 %v9532_v49, %v17864_v62  ;;  %v11135_v46 = vpop.f32.mrb[30].mxu0  ;;  %v11048_v24 = vpop.f32.mrb[31].mxu1  ;;  %v9318_v55 = vadd.f32 %v17910_v48, %v17812_v21 }
 0x6c1   : > { %v9621_v52 = vmax.f32 %v9541_v59, 0.0  ;;  %v9544_v7 = vadd.f32 %v11135_v46, %v17878_v17  ;;  %v9535_v47 = vpop.f32.mrb[31].mxu0  ;;  %9731 = vrot.lane.b32.xlu0 %v10396_v27, %s11377_s25  ;;  %v11049_v20 = vadd.f32 %v11048_v24, %v11047_v9  ;;  %v9444_v44 = vadd.f32 %v11046_v41, %v9299_v22 }
 0x6c2   : > { %v9536_v4 = vadd.f32 %v9535_v47, %v17866_v8  ;;  %v9619_v3 = vmax.f32 %v9533_v32, 0.0  ;;  %v9307_v8 = vadd.f32 %v17894_v36, %v17812_v21 }
 0x6c3   : > { %v10402_v33 = vpack.c.bf16 %v9621_v52, %v9621_v52  ;;  %v9622_v62 = vmax.f32 %v9544_v7, 0.0  ;;  %9733 = vrot.lane.b32.xlu1 %v10397_v58, %s11377_s25  ;;  %v9447_v12 = vadd.f32 %v11049_v20, %v9302_v10 }
 0x6c4   : > { %v9620_v19 = vmax.f32 %v9536_v4, 0.0  ;;  %v10400_v18 = vpack.c.bf16 %v9619_v3, %v9619_v3 }
 0x6c5   : > { %v10403_v51 = vpack.c.bf16 %v9622_v62, %v9622_v62  ;;  %9743 = vrot.lane.b32.xlu0 %v10402_v33, %s11377_s25  ;;  %v11050_v17 = vpop.f32.mrb[32].mxu1 }
 0x6c6   : > { %v11138_v63 = vpop.f32.mrb[32].mxu0  ;;  %v11051_v53 = vpop.f32.mrb[33].mxu1  ;;  %v10401_v43 = vpack.c.bf16 %v9620_v19, %v9620_v19 }
 0x6c7   : > { %v9557_v54 = vadd.f32 %v11138_v63, %v17900_v1  ;;  %v9548_v2 = vpop.f32.mrb[33].mxu0  ;;  %9745 = vrot.lane.b32.xlu1 %v10403_v51, %s11377_s25  ;;  %v11052_v25 = vadd.f32 %v11051_v53, %v11050_v17  ;;  %v11053_v39 = vpop.f32.mrb[34].mxu1  ;;  %v9310_v1 = vadd.f32 %v17898_v28, %v17812_v21 }
 0x6c8   : > { %v9549_v26 = vadd.f32 %v9548_v2, %v17888_v56  ;;  %v11139_v40 = vpop.f32.mrb[34].mxu0  ;;  %v11054_v34 = vpop.f32.mrb[35].mxu1 }
 0x6c9   : > { %v9560_v57 = vadd.f32 %v11139_v40, %v17902_v29  ;;  %v9551_v42 = vpop.f32.mrb[35].mxu0  ;;  %9739 = vrot.lane.b32.xlu0 %v10400_v18, %s11377_s25  ;;  %v11055_v61 = vadd.f32 %v11054_v34, %v11053_v39  ;;  %v9452_v14 = vadd.f32 %v11052_v25, %v9307_v8  ;;  %v9625_v33 = vmax.f32 %v9557_v54, 0.0 }
 0x6ca   : > { %v9552_v38 = vadd.f32 %v9551_v42, %v17890_v50 }
 0x6cb   : > { %9741 = vrot.lane.b32.xlu1 %v10401_v43, %s11377_s25  ;;  %v9455_v36 = vadd.f32 %v11055_v61, %v9310_v1  ;;  %v10406_v19 = vpack.c.bf16 %v9625_v33, %v9625_v33 }
 0x6cd   : > { %v11056_v56 = vpop.f32.mrb[36].mxu1 }
 0x6ce   : > { %v11142_v37 = vpop.f32.mrb[36].mxu0  ;;  %v11057_v6 = vpop.f32.mrb[37].mxu1 }
 0x6cf   : > { %v9573_v30 = vadd.f32 %v11142_v37, %v17924_v0  ;;  %v9564_v29 = vpop.f32.mrb[37].mxu0  ;;  %v11058_v23 = vadd.f32 %v11057_v6, %v11056_v56  ;;  %v11059_v28 = vpop.f32.mrb[38].mxu1 }
 0x6d0   : > { %v9565_v31 = vadd.f32 %v9564_v29, %v17912_v15  ;;  %v11143_v11 = vpop.f32.mrb[38].mxu0  ;;  %v11060_v27 = vpop.f32.mrb[39].mxu1 }
 0x6d1   : > { %v9576_v50 = vadd.f32 %v11143_v11, %v17926_v45  ;;  %v9567_v59 = vpop.f32.mrb[39].mxu0  ;;  %v11061_v49 = vadd.f32 %v11060_v27, %v11059_v28  ;;  %v9460_v22 = vadd.f32 %v11058_v23, %v9315_v35  ;;  %v9629_v18 = vmax.f32 %v9573_v30, 0.0 }
 0x6d2   : > { %v9568_v0 = vadd.f32 %v9567_v59, %v17914_v5  ;;  %v9627_v2 = vmax.f32 %v9565_v31, 0.0 }
 0x6d3   : > { %v9463_v41 = vadd.f32 %v11061_v49, %v9318_v55  ;;  %v9630_v54 = vmax.f32 %v9576_v50, 0.0  ;;  %v10410_v53 = vpack.c.bf16 %v9629_v18, %v9629_v18 }
 0x6d4   : > { %v9628_v25 = vmax.f32 %v9568_v0, 0.0 }
 0x6d5   : > { %v11150_v9 = vpop.f32.mrb[40].mxu1  ;;  %v10411_v8 = vpack.c.bf16 %v9630_v54, %v9630_v54 }
 0x6d6   : > { %v11146_v32 = vpop.f32.mrb[40].mxu0  ;;  %v9605_v46 = vadd.f32 %v11150_v9, %v9460_v22  ;;  %v9596_v15 = vpop.f32.mrb[41].mxu1  ;;  %v10409_v40 = vpack.c.bf16 %v9628_v25, %v9628_v25 }
 0x6d7   : > { %v9589_v13 = vadd.f32 %v11146_v32, %v9444_v44  ;;  %v9580_v58 = vpop.f32.mrb[41].mxu0  ;;  %v9597_v7 = vadd.f32 %v9596_v15, %v9452_v14  ;;  %v11151_v24 = vpop.f32.mrb[42].mxu1  ;;  %v9626_v44 = vmax.f32 %v9560_v57, 0.0 }
 0x6d8   : > { %v9581_v52 = vadd.f32 %v9580_v58, %v17939_v60  ;;  %v11147_v45 = vpop.f32.mrb[42].mxu0  ;;  %v9608_v10 = vadd.f32 %v11151_v24, %v9463_v41  ;;  %v9599_v21 = vpop.f32.mrb[43].mxu1  ;;  %v9623_v60 = vmax.f32 %v9549_v26, 0.0  ;;  %v10408_v26 = vpack.c.bf16 %v9627_v2, %v9627_v2 }
 0x6d9   : > { %v9592_v47 = vadd.f32 %v11147_v45, %v9447_v12  ;;  %v9583_v20 = vpop.f32.mrb[43].mxu0  ;;  %v9635_v48 = vmax.f32 %v9597_v7, 0.0  ;;  %v9600_v4 = vadd.f32 %v9599_v21, %v9455_v36  ;;  %v10407_v17 = vpack.c.bf16 %v9626_v44, %v9626_v44 }
 0x6da   : > { %v9584_v5 = vadd.f32 %v9583_v20, %v17942_v16  ;;  %v9624_v12 = vmax.f32 %v9552_v38, 0.0  ;;  %v10404_v63 = vpack.c.bf16 %v9623_v60, %v9623_v60  ;;  %v9633_v39 = vmax.f32 %v9589_v13, 0.0 }
 0x6db   : > { %v10416_v3 = vpack.c.bf16 %v9635_v48, %v9635_v48  ;;  %v9636_v62 = vmax.f32 %v9600_v4, 0.0  ;;  %v9634_v43 = vmax.f32 %v9592_v47, 0.0  ;;  %v9631_v34 = vmax.f32 %v9581_v52, 0.0 }
 0x6dc   : > { %v10405_v16 = vpack.c.bf16 %v9624_v12, %v9624_v12  ;;  %v10414_v57 = vpack.c.bf16 %v9633_v39, %v9633_v39  ;;  %v9632_v1 = vmax.f32 %v9584_v5, 0.0  ;;  %v9637_v61 = vmax.f32 %v9605_v46, 0.0 }
 0x6dd   : > { %v10417_v51 = vpack.c.bf16 %v9636_v62, %v9636_v62  ;;  %9771 = vrot.lane.b32.xlu0 %v10416_v3, %s11377_s25  ;;  %v10415_v42 = vpack.c.bf16 %v9634_v43, %v9634_v43  ;;  %v10412_v38 = vpack.c.bf16 %v9631_v34, %v9631_v34  ;;  %v9638_v14 = vmax.f32 %v9608_v10, 0.0 }
 0x6de   : > { %v10413_v36 = vpack.c.bf16 %v9632_v1, %v9632_v1  ;;  %v10418_v56 = vpack.c.bf16 %v9637_v61, %v9637_v61 }
 0x6df   : > { %9773 = vrot.lane.b32.xlu1 %v10417_v51, %s11377_s25  ;;  %v10419_v37 = vpack.c.bf16 %v9638_v14, %v9638_v14 }
 0x6e1   : > { %9751 = vrot.lane.b32.xlu0 %v10406_v19, %s11377_s25 }
 0x6e3   : > { %9753 = vrot.lane.b32.xlu1 %v10407_v17, %s11377_s25 }
 0x6e5   : > { %9747 = vrot.lane.b32.xlu0 %v10404_v63, %s11377_s25 }
 0x6e7   : > { %9749 = vrot.lane.b32.xlu1 %v10405_v16, %s11377_s25 }
 0x6e9   : > { %9759 = vrot.lane.b32.xlu0 %v10410_v53, %s11377_s25 }
 0x6eb   : > { %9761 = vrot.lane.b32.xlu1 %v10411_v8, %s11377_s25 }
 0x6ed   : > { %9755 = vrot.lane.b32.xlu0 %v10408_v26, %s11377_s25 }
 0x6ef   : > { %9757 = vrot.lane.b32.xlu1 %v10409_v40, %s11377_s25 }
 0x6f1   : > { %9767 = vrot.lane.b32.xlu0 %v10414_v57, %s11377_s25 }
 0x6f3   : > { %9769 = vrot.lane.b32.xlu1 %v10415_v42, %s11377_s25 }
 0x6f5   : > { %9763 = vrot.lane.b32.xlu0 %v10412_v38, %s11377_s25 }
 0x6f7   : > { %9765 = vrot.lane.b32.xlu1 %v10413_v36, %s11377_s25 }
 0x6f9   : > { %9775 = vrot.lane.b32.xlu0 %v10418_v56, %s11377_s25 }
 0x6fb   : > { %9777 = vrot.lane.b32.xlu1 %v10419_v37, %s11377_s25 }
 0x727   : > { %v9728_v30 = vpop.permute.xlu0 %9727 }
 0x728   : > { %v9781_v29 = vrot.slane %v9728_v30, 4 }
 0x729   : > { %v9730_v35 = vpop.permute.xlu1 %9729 }
 0x72a   : > { %v9810_v23 = vsel %vm9807_vm10, %v9781_v29, %v9728_v30  ;;  %v9782_v31 = vrot.slane %v9730_v35, 4 }
 0x72b   : > { %9869 = vst.msk [vmem:[%s16790_s26 + $0x10] sm:$0xff] %vm17994_vm2, %v9810_v23  ;;  %v9724_v28 = vpop.permute.xlu0 %9723 }
 0x72c   : > { %v9811_v11 = vsel %vm9807_vm10, %v9782_v31, %v9730_v35  ;;  %v9779_v50 = vrot.slane %v9724_v28, 4 }
 0x72d   : > { %9870 = vst.msk [vmem:[%s16790_s26 + $0x18] sm:$0xff] %vm17994_vm2, %v9811_v11  ;;  %v9726_v27 = vpop.permute.xlu1 %9725 }
 0x72e   : > { %v9808_v59 = vsel %vm9807_vm10, %v9779_v50, %v9724_v28  ;;  %v9780_v55 = vrot.slane %v9726_v27, 4 }
 0x72f   : > { %9867 = vst.msk [vmem:[%s16790_s26] sm:$0xff] %vm17994_vm2, %v9808_v59  ;;  %v9736_v49 = vpop.permute.xlu0 %9735 }
 0x730   : > { %v9809_v0 = vsel %vm9807_vm10, %v9780_v55, %v9726_v27  ;;  %v9785_v22 = vrot.slane %v9736_v49, 4 }
 0x731   : > { %9868 = vst.msk [vmem:[%s16790_s26 + $0x8] sm:$0xff] %vm17994_vm2, %v9809_v0  ;;  %v9738_v41 = vpop.permute.xlu1 %9737 }
 0x732   : > { %v9814_v32 = vsel %vm9807_vm10, %v9785_v22, %v9736_v49  ;;  %v9786_v9 = vrot.slane %v9738_v41, 4 }
 0x733   : > { %9873 = vst.msk [vmem:[%s16790_s26 + $0x30] sm:$0xff] %vm17994_vm2, %v9814_v32  ;;  %v9732_v13 = vpop.permute.xlu0 %9731 }
 0x734   : > { %v9815_v46 = vsel %vm9807_vm10, %v9786_v9, %v9738_v41  ;;  %v9783_v58 = vrot.slane %v9732_v13, 4 }
 0x735   : > { %9874 = vst.msk [vmem:[%s16790_s26 + $0x38] sm:$0xff] %vm17994_vm2, %v9815_v46  ;;  %v9734_v15 = vpop.permute.xlu1 %9733 }
 0x736   : > { %v9812_v52 = vsel %vm9807_vm10, %v9783_v58, %v9732_v13  ;;  %v9784_v7 = vrot.slane %v9734_v15, 4 }
 0x737   : > { %9871 = vst.msk [vmem:[%s16790_s26 + $0x20] sm:$0xff] %vm17994_vm2, %v9812_v52  ;;  %v9744_v45 = vpop.permute.xlu0 %9743 }
 0x738   : > { %v9813_v24 = vsel %vm9807_vm10, %v9784_v7, %v9734_v15  ;;  %v9789_v47 = vrot.slane %v9744_v45, 4 }
 0x739   : > { %9872 = vst.msk [vmem:[%s16790_s26 + $0x28] sm:$0xff] %vm17994_vm2, %v9813_v24  ;;  %v9746_v10 = vpop.permute.xlu1 %9745 }
 0x73a   : > { %v9818_v20 = vsel %vm9807_vm10, %v9789_v47, %v9744_v45  ;;  %v9790_v21 = vrot.slane %v9746_v10, 4 }
 0x73b   : > { %9877 = vst.msk [vmem:[%s16790_s26 + $0x50] sm:$0xff] %vm17994_vm2, %v9818_v20  ;;  %v9740_v48 = vpop.permute.xlu0 %9739 }
 0x73c   : > { %v9819_v5 = vsel %vm9807_vm10, %v9790_v21, %v9746_v10  ;;  %v9787_v4 = vrot.slane %v9740_v48, 4 }
 0x73d   : > { %9878 = vst.msk [vmem:[%s16790_s26 + $0x58] sm:$0xff] %vm17994_vm2, %v9819_v5  ;;  %v9742_v33 = vpop.permute.xlu1 %9741 }
 0x73e   : > { %v9816_v3 = vsel %vm9807_vm10, %v9787_v4, %v9740_v48  ;;  %v9788_v62 = vrot.slane %v9742_v33, 4 }
 0x73f   : > { %9875 = vst.msk [vmem:[%s16790_s26 + $0x40] sm:$0xff] %vm17994_vm2, %v9816_v3 }
 0x740   : > { %v9817_v44 = vsel %vm9807_vm10, %v9788_v62, %v9742_v33 }
 0x741   : > { %9876 = vst.msk [vmem:[%s16790_s26 + $0x48] sm:$0xff] %vm17994_vm2, %v9817_v44 }
 0x74f   : > { %v9772_v51 = vpop.permute.xlu0 %9771 }
 0x750   : > { %v9803_v19 = vrot.slane %v9772_v51, 4 }
 0x751   : > { %v9774_v60 = vpop.permute.xlu1 %9773 }
 0x752   : > { %v9832_v17 = vsel %vm9807_vm10, %v9803_v19, %v9772_v51  ;;  %v9804_v12 = vrot.slane %v9774_v60, 4 }
 0x753   : > { %9891 = vst.msk [vmem:[%s16790_s26 + $0xc0] sm:$0xff] %vm17994_vm2, %v9832_v17  ;;  %v9752_v63 = vpop.permute.xlu0 %9751 }
 0x754   : > { %v9833_v18 = vsel %vm9807_vm10, %v9804_v12, %v9774_v60  ;;  %v9793_v16 = vrot.slane %v9752_v63, 4 }
 0x755   : > { %9892 = vst.msk [vmem:[%s16790_s26 + $0xc8] sm:$0xff] %vm17994_vm2, %v9833_v18  ;;  %v9754_v54 = vpop.permute.xlu1 %9753 }
 0x756   : > { %v9822_v53 = vsel %vm9807_vm10, %v9793_v16, %v9752_v63  ;;  %v9794_v2 = vrot.slane %v9754_v54, 4 }
 0x757   : > { %9881 = vst.msk [vmem:[%s16790_s26 + $0x70] sm:$0xff] %vm17994_vm2, %v9822_v53  ;;  %v9748_v8 = vpop.permute.xlu0 %9747 }
 0x758   : > { %v9823_v25 = vsel %vm9807_vm10, %v9794_v2, %v9754_v54  ;;  %v9791_v26 = vrot.slane %v9748_v8, 4 }
 0x759   : > { %9882 = vst.msk [vmem:[%s16790_s26 + $0x78] sm:$0xff] %vm17994_vm2, %v9823_v25  ;;  %v9750_v39 = vpop.permute.xlu1 %9749 }
 0x75a   : > { %v9820_v40 = vsel %vm9807_vm10, %v9791_v26, %v9748_v8  ;;  %v9792_v43 = vrot.slane %v9750_v39, 4 }
 0x75b   : > { %9879 = vst.msk [vmem:[%s16790_s26 + $0x60] sm:$0xff] %vm17994_vm2, %v9820_v40  ;;  %v9760_v57 = vpop.permute.xlu0 %9759 }
 0x75c   : > { %v9821_v34 = vsel %vm9807_vm10, %v9792_v43, %v9750_v39  ;;  %v9797_v42 = vrot.slane %v9760_v57, 4 }
 0x75d   : > { %9880 = vst.msk [vmem:[%s16790_s26 + $0x68] sm:$0xff] %vm17994_vm2, %v9821_v34  ;;  %v9762_v1 = vpop.permute.xlu1 %9761 }
 0x75e   : > { %v9826_v61 = vsel %vm9807_vm10, %v9797_v42, %v9760_v57  ;;  %v9798_v38 = vrot.slane %v9762_v1, 4 }
 0x75f   : > { %9885 = vst.msk [vmem:[%s16790_s26 + $0x90] sm:$0xff] %vm17994_vm2, %v9826_v61  ;;  %v9756_v14 = vpop.permute.xlu0 %9755 }
 0x760   : > { %v9827_v36 = vsel %vm9807_vm10, %v9798_v38, %v9762_v1  ;;  %v9795_v56 = vrot.slane %v9756_v14, 4 }
 0x761   : > { %9886 = vst.msk [vmem:[%s16790_s26 + $0x98] sm:$0xff] %vm17994_vm2, %v9827_v36  ;;  %v9758_v37 = vpop.permute.xlu1 %9757 }
 0x762   : > { %v9824_v30 = vsel %vm9807_vm10, %v9795_v56, %v9756_v14  ;;  %v9796_v29 = vrot.slane %v9758_v37, 4 }
 0x763   : > { %9883 = vst.msk [vmem:[%s16790_s26 + $0x80] sm:$0xff] %vm17994_vm2, %v9824_v30  ;;  %v9768_v35 = vpop.permute.xlu0 %9767 }
 0x764   : > { %v9825_v23 = vsel %vm9807_vm10, %v9796_v29, %v9758_v37  ;;  %v9801_v31 = vrot.slane %v9768_v35, 4 }
 0x765   : > { %9884 = vst.msk [vmem:[%s16790_s26 + $0x88] sm:$0xff] %vm17994_vm2, %v9825_v23  ;;  %v9770_v28 = vpop.permute.xlu1 %9769 }
 0x766   : > { %v9830_v11 = vsel %vm9807_vm10, %v9801_v31, %v9768_v35  ;;  %v9802_v50 = vrot.slane %v9770_v28, 4 }
 0x767   : > { %9889 = vst.msk [vmem:[%s16790_s26 + $0xb0] sm:$0xff] %vm17994_vm2, %v9830_v11  ;;  %v9764_v27 = vpop.permute.xlu0 %9763 }
 0x768   : > { %v9831_v59 = vsel %vm9807_vm10, %v9802_v50, %v9770_v28  ;;  %v9799_v55 = vrot.slane %v9764_v27, 4 }
 0x769   : > { %9890 = vst.msk [vmem:[%s16790_s26 + $0xb8] sm:$0xff] %vm17994_vm2, %v9831_v59  ;;  %v9766_v49 = vpop.permute.xlu1 %9765 }
 0x76a   : > { %v9828_v0 = vsel %vm9807_vm10, %v9799_v55, %v9764_v27  ;;  %v9800_v22 = vrot.slane %v9766_v49, 4 }
 0x76b   : > { %9887 = vst.msk [vmem:[%s16790_s26 + $0xa0] sm:$0xff] %vm17994_vm2, %v9828_v0  ;;  %v9776_v41 = vpop.permute.xlu0 %9775 }
 0x76c   : > { %v9829_v32 = vsel %vm9807_vm10, %v9800_v22, %v9766_v49  ;;  %v9805_v9 = vrot.slane %v9776_v41, 4 }
 0x76d   : > { %9888 = vst.msk [vmem:[%s16790_s26 + $0xa8] sm:$0xff] %vm17994_vm2, %v9829_v32  ;;  %v9778_v13 = vpop.permute.xlu1 %9777 }
 0x76e   : > { %v9834_v46 = vsel %vm9807_vm10, %v9805_v9, %v9776_v41  ;;  %v9806_v58 = vrot.slane %v9778_v13, 4 }
 0x76f   : > { %9893 = vst.msk [vmem:[%s16790_s26 + $0xd0] sm:$0xff] %vm17994_vm2, %v9834_v46 }
 0x770   : > { %v9835_v15 = vsel %vm9807_vm10, %v9806_v58, %v9778_v13 }
 0x771   : > { %9894 = vst.msk [vmem:[%s16790_s26 + $0xd8] sm:$0xff] %vm17994_vm2, %v9835_v15 }
 0x772 PF: > { %s21_s17 = sadd.s32 1, %s11373_s17  }
 0x773   : > { %p18_p4 = scmp.ge.s32.totalorder %s21_s17, 4  }
 0x775   :  { %20 = sbr.rel (!%p18_p4) target bundleno = 1 (0x1), region = 94 }

</bundles_post_ra>
